<compile_context>
chip_gen: v7x
topology: tpu7x:2x2x1
jax: 0.10.0
libtpu: 0.0.40
codegen_flags: <defaults>
</compile_context>

<pallas_src>
import jax
import jax.numpy as jnp
from jax.experimental import pallas as pl
from jax.experimental.pallas import tpu as pltpu

D_DRUG = 512        # drug branch channels
D_PROT = 1280       # protein branch channels
N_LAYERS = 4        # 2 ResNetBlocks x 2 convs, per branch
N_BLOCKS = N_LAYERS // 2
KAN_HID = 256


# ----------------------------------------------------------------------------
# Fused kernel.  Grid axis = protein ResNetBlock index (sequential).
#   step 0 prologue : full drug branch (4 layers, unrolled) -> d_scr,
#                     protein activation init -> p_scr.
#   every step      : one protein ResNetBlock (layers 2g and 2g+1).
#   last step       : reduce_protein_dim + KAN head -> o_ref.
# ----------------------------------------------------------------------------
def _fused_kernel(xd_ref, xp_ref,
                  wd_ref, bd_ref,        # drug stack   (4,512,512) bf16 / (4,1,512) f32
                  wp_ref, bp_ref,        # protein pair (2,1280,1280) bf16 / (4,1,1280) f32
                  wred_ref, bred_ref,    # reduce_protein_dim (1280,512) bf16 / (1,512) f32
                  lamd_ref, lamp_ref,    # KAN lambdas.T split: (512,256)/(512,256) bf16
                  wout_ref, bout_ref,    # KAN output Linear (1,256)/(1,1) f32
                  o_ref,                 # (B,1) prediction
                  d_scr, p_scr):         # VMEM scratch: drug / protein activations (f32)
    g = pl.program_id(0)
    last = pl.num_programs(0) - 1

    # ---- prologue: drug branch + protein activation init ----
    # NOTE: must stay *before* the protein block below — it initializes p_scr
    # which the unconditional code reads in this same grid step.
    @pl.when(g == 0)
    def _():
        d = xd_ref[...]
        h = None
        for l in range(N_LAYERS):                      # unrolled at trace time
            w = wd_ref[l]                              # (512, 512) bf16, BN-folded
            b = bd_ref[l]                              # (1, 512) f32
            y_in = d if l % 2 == 0 else h
            y = jnp.dot(y_in.astype(jnp.bfloat16), w,
                        preferred_element_type=jnp.float32) + b
            if l % 2 == 0:
                h = jnp.maximum(y, 0.0)                # conv1 + bn1 + relu
            else:
                d = jnp.maximum(d + y, 0.0)            # conv2 + bn2 + residual + relu
        d_scr[...] = d
        p_scr[...] = xp_ref[...]

    # ---- one protein ResNetBlock per grid step: layers 2g and 2g+1 ----
    p = p_scr[...]
    h = jnp.dot(p.astype(jnp.bfloat16), wp_ref[0],
                preferred_element_type=jnp.float32) + bp_ref[2 * g]
    h = jnp.maximum(h, 0.0)
    y = jnp.dot(h.astype(jnp.bfloat16), wp_ref[1],
                preferred_element_type=jnp.float32) + bp_ref[2 * g + 1]
    p = jnp.maximum(p + y, 0.0)
    p_scr[...] = p

    # ---- epilogue: reduce_protein_dim + concat + KAN (lambdas + 256->1) ----
    @pl.when(g == last)
    def _():
        pr = jnp.dot(p.astype(jnp.bfloat16), wred_ref[...],
                     preferred_element_type=jnp.float32) + bred_ref[...]
        hk = jnp.dot(d_scr[...].astype(jnp.bfloat16), lamd_ref[...],
                     preferred_element_type=jnp.float32)
        hk = hk + jnp.dot(pr.astype(jnp.bfloat16), lamp_ref[...],
                          preferred_element_type=jnp.float32)
        hk = jnp.maximum(hk, 0.0)
        # 256 -> 1 output Linear folded into a VPU multiply + row-sum epilogue.
        o_ref[...] = (jnp.sum(hk * wout_ref[...], axis=-1, keepdims=True)
                      + bout_ref[...])


def _const_spec(shape):
    zeros = (0,) * len(shape)
    return pl.BlockSpec(shape, lambda g: zeros)     # fetched once (prologue)


@jax.jit
def affinity_forward(drug, protein, prm):
    B = drug.shape[0]
    in_specs = [
        _const_spec((B, D_DRUG)),                              # drug feature
        _const_spec((B, D_PROT)),                              # protein feature
        _const_spec((N_LAYERS, D_DRUG, D_DRUG)),               # Wd: all drug layers
        _const_spec((N_LAYERS, 1, D_DRUG)),                    # Bd: all drug biases
        pl.BlockSpec((2, D_PROT, D_PROT), lambda g: (g, 0, 0)),  # Wp: 2 layers / step
        _const_spec((N_LAYERS, 1, D_PROT)),                    # Bp: all biases, once
        _const_spec((D_PROT, D_DRUG)),                         # w_red
        _const_spec((1, D_DRUG)),                              # b_red
        _const_spec((D_DRUG, KAN_HID)),                        # lam_d (drug half of lambdas.T)
        _const_spec((D_DRUG, KAN_HID)),                        # lam_p (protein half)
        _const_spec((1, KAN_HID)),                             # w_out
        _const_spec((1, 1)),                                   # b_out
    ]
    return pl.pallas_call(
        _fused_kernel,
        out_shape=jax.ShapeDtypeStruct((B, 1), jnp.float32),
        grid=(N_BLOCKS,),
        in_specs=in_specs,
        out_specs=pl.BlockSpec((B, 1), lambda g: (0, 0)),      # resident, written last step
        scratch_shapes=[pltpu.VMEM((B, D_DRUG), jnp.float32),
                        pltpu.VMEM((B, D_PROT), jnp.float32)],
        compiler_params=pltpu.CompilerParams(
            dimension_semantics=("arbitrary",),    # sequential layer dependence
            vmem_limit_bytes=40 << 20),            # ~21.5 MB resident; > v5e 16 MiB default
    )(drug, protein, prm["Wd"], prm["Bd"], prm["Wp"], prm["Bp"],
      prm["w_red"], prm["b_red"], prm["lam_d"], prm["lam_p"],
      prm["w_out"], prm["b_out"])


# ----------------------------------------------------------------------------
# Deterministic synthetic parameters (BN folded, weights cast to bf16 once).
# ----------------------------------------------------------------------------
def _bn_fold(kg, kb, km, kv, C, eps=1e-5):
    gamma = 1.0 + 0.05 * jax.random.normal(kg, (C,), jnp.float32)
    beta = 0.05 * jax.random.normal(kb, (C,), jnp.float32)
    mean = 0.05 * jax.random.normal(km, (C,), jnp.float32)
    var = 0.5 + jnp.abs(jax.random.normal(kv, (C,), jnp.float32))
    s = gamma / jnp.sqrt(var + eps)
    t = beta - mean * s
    return s, t


def _make_branch(key, C, n_blocks=2):
    Ws, Bs = [], []
    for bk in jax.random.split(key, n_blocks):
        ks = jax.random.split(bk, 12)
        for (w_i, b_i, off) in ((0, 1, 2), (6, 7, 8)):
            # center-tap Conv1d weight, stored already transposed: (in, out)
            w = 0.02 * jax.random.normal(ks[w_i], (C, C), jnp.float32)
            b = 0.02 * jax.random.normal(ks[b_i], (C,), jnp.float32)
            s, t = _bn_fold(ks[off], ks[off + 1], ks[off + 2], ks[off + 3], C)
            Ws.append(w * s[None, :])          # fold BN scale into columns
            Bs.append(b * s + t)               # fold BN shift into bias
    W = jnp.stack(Ws).astype(jnp.bfloat16)     # (2*n_blocks, C, C)
    Bv = jnp.stack(Bs)[:, None, :]             # (2*n_blocks, 1, C) f32
    return W, Bv


def make_params(key):
    keys = jax.random.split(key, 6)
    Wd, Bd = _make_branch(keys[0], D_DRUG)
    Wp, Bp = _make_branch(keys[1], D_PROT)
    w_red = (0.02 * jax.random.normal(keys[2], (D_PROT, D_DRUG), jnp.float32)
             ).astype(jnp.bfloat16)
    b_red = (0.02 * jax.random.normal(keys[3], (D_DRUG,), jnp.float32)
             ).reshape(1, D_DRUG)
    lamT = 0.05 * jax.random.normal(keys[4], (2 * D_DRUG, KAN_HID), jnp.float32)
    lam_d = lamT[:D_DRUG].astype(jnp.bfloat16)     # drug half of lambdas.T
    lam_p = lamT[D_DRUG:].astype(jnp.bfloat16)     # protein half of lambdas.T
    kw, kb = jax.random.split(keys[5])
    w_out = 0.05 * jax.random.normal(kw, (1, KAN_HID), jnp.float32)
    b_out = 0.05 * jax.random.normal(kb, (1, 1), jnp.float32)
    return dict(Wd=Wd, Bd=Bd, Wp=Wp, Bp=Bp, w_red=w_red, b_red=b_red,
                lam_d=lam_d, lam_p=lam_p, w_out=w_out, b_out=b_out)


# ----------------------------------------------------------------------------
# Pure-JAX reference (same folded / bf16-rounded weights, f32 activations).
# ----------------------------------------------------------------------------
def ref_forward(drug, protein, prm):
    def branch(x, W, Bv):
        h = None
        for l in range(W.shape[0]):
            w = W[l].astype(jnp.float32)
            b = Bv[l]
            if l % 2 == 0:
                h = jnp.maximum(x @ w + b, 0.0)
            else:
                x = jnp.maximum(x + h @ w + b, 0.0)
        return x

    d = branch(drug, prm["Wd"], prm["Bd"])
    p = branch(protein, prm["Wp"], prm["Bp"])
    pr = p @ prm["w_red"].astype(jnp.float32) + prm["b_red"]
    comb = jnp.concatenate([d, pr], axis=1)
    lam = jnp.concatenate([prm["lam_d"], prm["lam_p"]], axis=0).astype(jnp.float32)
    h = jnp.maximum(comb @ lam, 0.0)
    return jnp.sum(h * prm["w_out"], axis=-1, keepdims=True) + prm["b_out"]


if __name__ == "__main__":
    key = jax.random.PRNGKey(0)
    kp, kd, kpr = jax.random.split(key, 3)
    prm = make_params(kp)

    B = 2
    drug = jax.random.normal(kd, (B, D_DRUG), jnp.float32)       # drug_feature
    protein = jax.random.normal(kpr, (B, D_PROT), jnp.float32)   # protein_feature

    out = jax.block_until_ready(affinity_forward(drug, protein, prm))
    assert out.shape == (B, 1), out.shape

    ref = jax.block_until_ready(ref_forward(drug, protein, prm))
    # bf16 activation rounding before each MXU dot accumulates small drift vs.
    # the f32-activation reference; covered by the tolerance below.
    assert jnp.allclose(out, ref, atol=2e-2, rtol=2e-2), (out, ref)

    print("KERNEL_OK")
</pallas_src>

<mosaic_0001>
module attributes {stable_mosaic.version = 11 : i64} {
  func.func @_fused_kernel(%arg0: i32, %arg1: memref<2x512xf32, #tpu.memory_space<vmem>>, %arg2: memref<2x1280xf32, #tpu.memory_space<vmem>>, %arg3: memref<4x512x512xbf16, #tpu.memory_space<vmem>>, %arg4: memref<4x1x512xf32, #tpu.memory_space<vmem>>, %arg5: memref<2x1280x1280xbf16, #tpu.memory_space<vmem>>, %arg6: memref<4x1x1280xf32, #tpu.memory_space<vmem>>, %arg7: memref<1280x512xbf16, #tpu.memory_space<vmem>>, %arg8: memref<1x512xf32, #tpu.memory_space<vmem>>, %arg9: memref<512x256xbf16, #tpu.memory_space<vmem>>, %arg10: memref<512x256xbf16, #tpu.memory_space<vmem>>, %arg11: memref<1x256xf32, #tpu.memory_space<vmem>>, %arg12: memref<1x1xf32, #tpu.memory_space<vmem>>, %arg13: memref<2x1xf32, #tpu.memory_space<vmem>>, %arg14: memref<2x512xf32, #tpu.memory_space<vmem>>, %arg15: memref<2x1280xf32, #tpu.memory_space<vmem>>) attributes {dimension_semantics = [#tpu.dimension_semantics<arbitrary>], iteration_bounds = array<i64: 2>, scalar_prefetch = 0 : i64, scratch_operands = 2 : i64, tpu.core_type = #tpu.core_type<tc>, window_params = [{pipeline_mode = #tpu.pipeline_mode<synchronous>, transform_indices = @transform_0, window_bounds = array<i64: 2, 512>}, {pipeline_mode = #tpu.pipeline_mode<synchronous>, transform_indices = @transform_1, window_bounds = array<i64: 2, 1280>}, {pipeline_mode = #tpu.pipeline_mode<synchronous>, transform_indices = @transform_2, window_bounds = array<i64: 4, 512, 512>}, {pipeline_mode = #tpu.pipeline_mode<synchronous>, transform_indices = @transform_3, window_bounds = array<i64: 4, 1, 512>}, {transform_indices = @transform_4, window_bounds = array<i64: 2, 1280, 1280>}, {pipeline_mode = #tpu.pipeline_mode<synchronous>, transform_indices = @transform_5, window_bounds = array<i64: 4, 1, 1280>}, {pipeline_mode = #tpu.pipeline_mode<synchronous>, transform_indices = @transform_6, window_bounds = array<i64: 1280, 512>}, {pipeline_mode = #tpu.pipeline_mode<synchronous>, transform_indices = @transform_7, window_bounds = array<i64: 1, 512>}, {pipeline_mode = #tpu.pipeline_mode<synchronous>, transform_indices = @transform_8, window_bounds = array<i64: 512, 256>}, {pipeline_mode = #tpu.pipeline_mode<synchronous>, transform_indices = @transform_9, window_bounds = array<i64: 512, 256>}, {pipeline_mode = #tpu.pipeline_mode<synchronous>, transform_indices = @transform_10, window_bounds = array<i64: 1, 256>}, {pipeline_mode = #tpu.pipeline_mode<synchronous>, transform_indices = @transform_11, window_bounds = array<i64: 1, 1>}, {pipeline_mode = #tpu.pipeline_mode<synchronous>, transform_indices = @transform_12, window_bounds = array<i64: 2, 1>}]} {
    %c0_i32 = arith.constant 0 : i32
    %0 = arith.cmpi eq, %arg0, %c0_i32 : i32
    %1 = arith.extui %0 : i1 to i32
    %c0_i32_0 = arith.constant 0 : i32
    %2 = arith.cmpi ne, %1, %c0_i32_0 : i32
    scf.if %2 {
      %c0_19 = arith.constant 0 : index
      %c0_20 = arith.constant 0 : index
      %34 = vector.load %arg1[%c0_19, %c0_20] : memref<2x512xf32, #tpu.memory_space<vmem>>, vector<2x512xf32>
      %c0_21 = arith.constant 0 : index
      %c0_22 = arith.constant 0 : index
      %c0_23 = arith.constant 0 : index
      %35 = vector.load %arg3[%c0_21, %c0_22, %c0_23] : memref<4x512x512xbf16, #tpu.memory_space<vmem>>, vector<1x512x512xbf16>
      %36 = vector.shape_cast %35 : vector<1x512x512xbf16> to vector<512x512xbf16>
      %c0_24 = arith.constant 0 : index
      %c0_25 = arith.constant 0 : index
      %c0_26 = arith.constant 0 : index
      %37 = vector.load %arg4[%c0_24, %c0_25, %c0_26] : memref<4x1x512xf32, #tpu.memory_space<vmem>>, vector<1x1x512xf32>
      %38 = vector.shape_cast %37 : vector<1x1x512xf32> to vector<1x512xf32>
      %39 = arith.truncf %34 : vector<2x512xf32> to vector<2x512xbf16>
      %cst_27 = arith.constant dense<0.000000e+00> : vector<2x512xf32>
      %40 = tpu.matmul %39, %36, %cst_27 {dimension_numbers = #tpu.dot_dimension_numbers<[1], [0], [0], [1], [0, 0, 1, 1], [], []>} : vector<2x512xbf16>, vector<512x512xbf16>, vector<2x512xf32> -> vector<2x512xf32>
      %41 = vector.broadcast %38 : vector<1x512xf32> to vector<2x512xf32>
      %42 = arith.addf %40, %41 : vector<2x512xf32>
      %cst_28 = arith.constant 0.000000e+00 : f32
      %43 = vector.broadcast %cst_28 : f32 to vector<2x512xf32>
      %44 = arith.maximumf %42, %43 : vector<2x512xf32>
      %c1_29 = arith.constant 1 : index
      %c0_30 = arith.constant 0 : index
      %c0_31 = arith.constant 0 : index
      %45 = vector.load %arg3[%c1_29, %c0_30, %c0_31] : memref<4x512x512xbf16, #tpu.memory_space<vmem>>, vector<1x512x512xbf16>
      %46 = vector.shape_cast %45 : vector<1x512x512xbf16> to vector<512x512xbf16>
      %c1_32 = arith.constant 1 : index
      %c0_33 = arith.constant 0 : index
      %c0_34 = arith.constant 0 : index
      %47 = vector.load %arg4[%c1_32, %c0_33, %c0_34] : memref<4x1x512xf32, #tpu.memory_space<vmem>>, vector<1x1x512xf32>
      %48 = vector.shape_cast %47 : vector<1x1x512xf32> to vector<1x512xf32>
      %49 = arith.truncf %44 : vector<2x512xf32> to vector<2x512xbf16>
      %cst_35 = arith.constant dense<0.000000e+00> : vector<2x512xf32>
      %50 = tpu.matmul %49, %46, %cst_35 {dimension_numbers = #tpu.dot_dimension_numbers<[1], [0], [0], [1], [0, 0, 1, 1], [], []>} : vector<2x512xbf16>, vector<512x512xbf16>, vector<2x512xf32> -> vector<2x512xf32>
      %51 = vector.broadcast %48 : vector<1x512xf32> to vector<2x512xf32>
      %52 = arith.addf %50, %51 : vector<2x512xf32>
      %53 = arith.addf %34, %52 : vector<2x512xf32>
      %cst_36 = arith.constant 0.000000e+00 : f32
      %54 = vector.broadcast %cst_36 : f32 to vector<2x512xf32>
      %55 = arith.maximumf %53, %54 : vector<2x512xf32>
      %c2 = arith.constant 2 : index
      %c0_37 = arith.constant 0 : index
      %c0_38 = arith.constant 0 : index
      %56 = vector.load %arg3[%c2, %c0_37, %c0_38] : memref<4x512x512xbf16, #tpu.memory_space<vmem>>, vector<1x512x512xbf16>
      %57 = vector.shape_cast %56 : vector<1x512x512xbf16> to vector<512x512xbf16>
      %c2_39 = arith.constant 2 : index
      %c0_40 = arith.constant 0 : index
      %c0_41 = arith.constant 0 : index
      %58 = vector.load %arg4[%c2_39, %c0_40, %c0_41] : memref<4x1x512xf32, #tpu.memory_space<vmem>>, vector<1x1x512xf32>
      %59 = vector.shape_cast %58 : vector<1x1x512xf32> to vector<1x512xf32>
      %60 = arith.truncf %55 : vector<2x512xf32> to vector<2x512xbf16>
      %cst_42 = arith.constant dense<0.000000e+00> : vector<2x512xf32>
      %61 = tpu.matmul %60, %57, %cst_42 {dimension_numbers = #tpu.dot_dimension_numbers<[1], [0], [0], [1], [0, 0, 1, 1], [], []>} : vector<2x512xbf16>, vector<512x512xbf16>, vector<2x512xf32> -> vector<2x512xf32>
      %62 = vector.broadcast %59 : vector<1x512xf32> to vector<2x512xf32>
      %63 = arith.addf %61, %62 : vector<2x512xf32>
      %cst_43 = arith.constant 0.000000e+00 : f32
      %64 = vector.broadcast %cst_43 : f32 to vector<2x512xf32>
      %65 = arith.maximumf %63, %64 : vector<2x512xf32>
      %c3 = arith.constant 3 : index
      %c0_44 = arith.constant 0 : index
      %c0_45 = arith.constant 0 : index
      %66 = vector.load %arg3[%c3, %c0_44, %c0_45] : memref<4x512x512xbf16, #tpu.memory_space<vmem>>, vector<1x512x512xbf16>
      %67 = vector.shape_cast %66 : vector<1x512x512xbf16> to vector<512x512xbf16>
      %c3_46 = arith.constant 3 : index
      %c0_47 = arith.constant 0 : index
      %c0_48 = arith.constant 0 : index
      %68 = vector.load %arg4[%c3_46, %c0_47, %c0_48] : memref<4x1x512xf32, #tpu.memory_space<vmem>>, vector<1x1x512xf32>
      %69 = vector.shape_cast %68 : vector<1x1x512xf32> to vector<1x512xf32>
      %70 = arith.truncf %65 : vector<2x512xf32> to vector<2x512xbf16>
      %cst_49 = arith.constant dense<0.000000e+00> : vector<2x512xf32>
      %71 = tpu.matmul %70, %67, %cst_49 {dimension_numbers = #tpu.dot_dimension_numbers<[1], [0], [0], [1], [0, 0, 1, 1], [], []>} : vector<2x512xbf16>, vector<512x512xbf16>, vector<2x512xf32> -> vector<2x512xf32>
      %72 = vector.broadcast %69 : vector<1x512xf32> to vector<2x512xf32>
      %73 = arith.addf %71, %72 : vector<2x512xf32>
      %74 = arith.addf %55, %73 : vector<2x512xf32>
      %cst_50 = arith.constant 0.000000e+00 : f32
      %75 = vector.broadcast %cst_50 : f32 to vector<2x512xf32>
      %76 = arith.maximumf %74, %75 : vector<2x512xf32>
      %c0_51 = arith.constant 0 : index
      %c0_52 = arith.constant 0 : index
      %77 = vector.load %arg14[%c0_51, %c0_52] : memref<2x512xf32, #tpu.memory_space<vmem>>, vector<2x512xf32>
      tpu.vector_store %arg14[%c0_51, %c0_52], %76 {strides = array<i32>} : memref<2x512xf32, #tpu.memory_space<vmem>>, vector<2x512xf32>,
      %c0_53 = arith.constant 0 : index
      %c0_54 = arith.constant 0 : index
      %78 = vector.load %arg2[%c0_53, %c0_54] : memref<2x1280xf32, #tpu.memory_space<vmem>>, vector<2x1280xf32>
      %c0_55 = arith.constant 0 : index
      %c0_56 = arith.constant 0 : index
      %79 = vector.load %arg15[%c0_55, %c0_56] : memref<2x1280xf32, #tpu.memory_space<vmem>>, vector<2x1280xf32>
      tpu.vector_store %arg15[%c0_55, %c0_56], %78 {strides = array<i32>} : memref<2x1280xf32, #tpu.memory_space<vmem>>, vector<2x1280xf32>,
    } else {
    }
    %c0 = arith.constant 0 : index
    %c0_1 = arith.constant 0 : index
    %3 = vector.load %arg15[%c0, %c0_1] : memref<2x1280xf32, #tpu.memory_space<vmem>>, vector<2x1280xf32>
    %4 = arith.truncf %3 : vector<2x1280xf32> to vector<2x1280xbf16>
    %c0_2 = arith.constant 0 : index
    %c0_3 = arith.constant 0 : index
    %c0_4 = arith.constant 0 : index
    %5 = vector.load %arg5[%c0_2, %c0_3, %c0_4] : memref<2x1280x1280xbf16, #tpu.memory_space<vmem>>, vector<1x1280x1280xbf16>
    %6 = vector.shape_cast %5 : vector<1x1280x1280xbf16> to vector<1280x1280xbf16>
    %cst = arith.constant dense<0.000000e+00> : vector<2x1280xf32>
    %7 = tpu.matmul %4, %6, %cst {dimension_numbers = #tpu.dot_dimension_numbers<[1], [0], [0], [1], [0, 0, 1, 1], [], []>} : vector<2x1280xbf16>, vector<1280x1280xbf16>, vector<2x1280xf32> -> vector<2x1280xf32>
    %c2_i32 = arith.constant 2 : i32
    %8 = arith.muli %c2_i32, %arg0 : i32
    %9 = arith.index_cast %8 : i32 to index
    %c0_5 = arith.constant 0 : index
    %c0_6 = arith.constant 0 : index
    %10 = vector.load %arg6[%9, %c0_5, %c0_6] : memref<4x1x1280xf32, #tpu.memory_space<vmem>>, vector<1x1x1280xf32>
    %11 = vector.shape_cast %10 : vector<1x1x1280xf32> to vector<1x1280xf32>
    %12 = vector.broadcast %11 : vector<1x1280xf32> to vector<2x1280xf32>
    %13 = arith.addf %7, %12 : vector<2x1280xf32>
    %cst_7 = arith.constant 0.000000e+00 : f32
    %14 = vector.broadcast %cst_7 : f32 to vector<2x1280xf32>
    %15 = arith.maximumf %13, %14 : vector<2x1280xf32>
    %16 = arith.truncf %15 : vector<2x1280xf32> to vector<2x1280xbf16>
    %c1 = arith.constant 1 : index
    %c0_8 = arith.constant 0 : index
    %c0_9 = arith.constant 0 : index
    %17 = vector.load %arg5[%c1, %c0_8, %c0_9] : memref<2x1280x1280xbf16, #tpu.memory_space<vmem>>, vector<1x1280x1280xbf16>
    %18 = vector.shape_cast %17 : vector<1x1280x1280xbf16> to vector<1280x1280xbf16>
    %cst_10 = arith.constant dense<0.000000e+00> : vector<2x1280xf32>
    %19 = tpu.matmul %16, %18, %cst_10 {dimension_numbers = #tpu.dot_dimension_numbers<[1], [0], [0], [1], [0, 0, 1, 1], [], []>} : vector<2x1280xbf16>, vector<1280x1280xbf16>, vector<2x1280xf32> -> vector<2x1280xf32>
    %c2_i32_11 = arith.constant 2 : i32
    %20 = arith.muli %c2_i32_11, %arg0 : i32
    %c1_i32 = arith.constant 1 : i32
    %21 = arith.addi %20, %c1_i32 : i32
    %22 = arith.index_cast %21 : i32 to index
    %c0_12 = arith.constant 0 : index
    %c0_13 = arith.constant 0 : index
    %23 = vector.load %arg6[%22, %c0_12, %c0_13] : memref<4x1x1280xf32, #tpu.memory_space<vmem>>, vector<1x1x1280xf32>
    %24 = vector.shape_cast %23 : vector<1x1x1280xf32> to vector<1x1280xf32>
    %25 = vector.broadcast %24 : vector<1x1280xf32> to vector<2x1280xf32>
    %26 = arith.addf %19, %25 : vector<2x1280xf32>
    %27 = arith.addf %3, %26 : vector<2x1280xf32>
    %cst_14 = arith.constant 0.000000e+00 : f32
    %28 = vector.broadcast %cst_14 : f32 to vector<2x1280xf32>
    %29 = arith.maximumf %27, %28 : vector<2x1280xf32>
    %c0_15 = arith.constant 0 : index
    %c0_16 = arith.constant 0 : index
    %30 = vector.load %arg15[%c0_15, %c0_16] : memref<2x1280xf32, #tpu.memory_space<vmem>>, vector<2x1280xf32>
    tpu.vector_store %arg15[%c0_15, %c0_16], %29 {strides = array<i32>} : memref<2x1280xf32, #tpu.memory_space<vmem>>, vector<2x1280xf32>,
    %c1_i32_17 = arith.constant 1 : i32
    %31 = arith.cmpi eq, %arg0, %c1_i32_17 : i32
    %32 = arith.extui %31 : i1 to i32
    %c0_i32_18 = arith.constant 0 : i32
    %33 = arith.cmpi ne, %32, %c0_i32_18 : i32
    scf.if %33 {
      %34 = arith.truncf %29 : vector<2x1280xf32> to vector<2x1280xbf16>
      %c0_19 = arith.constant 0 : index
      %c0_20 = arith.constant 0 : index
      %35 = vector.load %arg7[%c0_19, %c0_20] : memref<1280x512xbf16, #tpu.memory_space<vmem>>, vector<1280x512xbf16>
      %cst_21 = arith.constant dense<0.000000e+00> : vector<2x512xf32>
      %36 = tpu.matmul %34, %35, %cst_21 {dimension_numbers = #tpu.dot_dimension_numbers<[1], [0], [0], [1], [0, 0, 1, 1], [], []>} : vector<2x1280xbf16>, vector<1280x512xbf16>, vector<2x512xf32> -> vector<2x512xf32>
      %c0_22 = arith.constant 0 : index
      %c0_23 = arith.constant 0 : index
      %37 = vector.load %arg8[%c0_22, %c0_23] : memref<1x512xf32, #tpu.memory_space<vmem>>, vector<1x512xf32>
      %38 = vector.broadcast %37 : vector<1x512xf32> to vector<2x512xf32>
      %39 = arith.addf %36, %38 : vector<2x512xf32>
      %c0_24 = arith.constant 0 : index
      %c0_25 = arith.constant 0 : index
      %40 = vector.load %arg14[%c0_24, %c0_25] : memref<2x512xf32, #tpu.memory_space<vmem>>, vector<2x512xf32>
      %41 = arith.truncf %40 : vector<2x512xf32> to vector<2x512xbf16>
      %c0_26 = arith.constant 0 : index
      %c0_27 = arith.constant 0 : index
      %42 = vector.load %arg9[%c0_26, %c0_27] : memref<512x256xbf16, #tpu.memory_space<vmem>>, vector<512x256xbf16>
      %cst_28 = arith.constant dense<0.000000e+00> : vector<2x256xf32>
      %43 = tpu.matmul %41, %42, %cst_28 {dimension_numbers = #tpu.dot_dimension_numbers<[1], [0], [0], [1], [0, 0, 1, 1], [], []>} : vector<2x512xbf16>, vector<512x256xbf16>, vector<2x256xf32> -> vector<2x256xf32>
      %44 = arith.truncf %39 : vector<2x512xf32> to vector<2x512xbf16>
      %c0_29 = arith.constant 0 : index
      %c0_30 = arith.constant 0 : index
      %45 = vector.load %arg10[%c0_29, %c0_30] : memref<512x256xbf16, #tpu.memory_space<vmem>>, vector<512x256xbf16>
      %cst_31 = arith.constant dense<0.000000e+00> : vector<2x256xf32>
      %46 = tpu.matmul %44, %45, %cst_31 {dimension_numbers = #tpu.dot_dimension_numbers<[1], [0], [0], [1], [0, 0, 1, 1], [], []>} : vector<2x512xbf16>, vector<512x256xbf16>, vector<2x256xf32> -> vector<2x256xf32>
      %47 = arith.addf %43, %46 : vector<2x256xf32>
      %cst_32 = arith.constant 0.000000e+00 : f32
      %48 = vector.broadcast %cst_32 : f32 to vector<2x256xf32>
      %49 = arith.maximumf %47, %48 : vector<2x256xf32>
      %c0_33 = arith.constant 0 : index
      %c0_34 = arith.constant 0 : index
      %50 = vector.load %arg11[%c0_33, %c0_34] : memref<1x256xf32, #tpu.memory_space<vmem>>, vector<1x256xf32>
      %51 = vector.broadcast %50 : vector<1x256xf32> to vector<2x256xf32>
      %52 = arith.mulf %49, %51 : vector<2x256xf32>
      %cst_35 = arith.constant dense<0.000000e+00> : vector<2xf32>
      %53 = vector.multi_reduction <add>, %52, %cst_35 [1] : vector<2x256xf32> to vector<2xf32>
      %54 = vector.shape_cast %53 : vector<2xf32> to vector<2x1xf32>
      %c0_36 = arith.constant 0 : index
      %c0_37 = arith.constant 0 : index
      %55 = vector.load %arg12[%c0_36, %c0_37] : memref<1x1xf32, #tpu.memory_space<vmem>>, vector<1x1xf32>
      %56 = vector.broadcast %55 : vector<1x1xf32> to vector<2x1xf32>
      %57 = arith.addf %54, %56 : vector<2x1xf32>
      %c0_38 = arith.constant 0 : index
      %c0_39 = arith.constant 0 : index
      %58 = vector.load %arg13[%c0_38, %c0_39] : memref<2x1xf32, #tpu.memory_space<vmem>>, vector<2x1xf32>
      tpu.vector_store %arg13[%c0_38, %c0_39], %57 {strides = array<i32>} : memref<2x1xf32, #tpu.memory_space<vmem>>, vector<2x1xf32>,
    } else {
    }
    return
  }
  func.func @transform_0(%arg0: i32) -> (i32, i32) {
    %c0_i32 = arith.constant 0 : i32
    %c0_i32_0 = arith.constant 0 : i32
    %c0_i32_1 = arith.constant 0 : i32
    return %c0_i32, %c0_i32_0 : i32, i32
  }
  func.func @transform_1(%arg0: i32) -> (i32, i32) {
    %c0_i32 = arith.constant 0 : i32
    %c0_i32_0 = arith.constant 0 : i32
    %c0_i32_1 = arith.constant 0 : i32
    return %c0_i32, %c0_i32_0 : i32, i32
  }
  func.func @transform_2(%arg0: i32) -> (i32, i32, i32) {
    %c0_i32 = arith.constant 0 : i32
    %c0_i32_0 = arith.constant 0 : i32
    %c0_i32_1 = arith.constant 0 : i32
    %c0_i32_2 = arith.constant 0 : i32
    return %c0_i32, %c0_i32_0, %c0_i32_1 : i32, i32, i32
  }
  func.func @transform_3(%arg0: i32) -> (i32, i32, i32) {
    %c0_i32 = arith.constant 0 : i32
    %c0_i32_0 = arith.constant 0 : i32
    %c0_i32_1 = arith.constant 0 : i32
    %c0_i32_2 = arith.constant 0 : i32
    return %c0_i32, %c0_i32_0, %c0_i32_1 : i32, i32, i32
  }
  func.func @transform_4(%arg0: i32) -> (i32, i32, i32) {
    %c0_i32 = arith.constant 0 : i32
    %c0_i32_0 = arith.constant 0 : i32
    %c0_i32_1 = arith.constant 0 : i32
    return %arg0, %c0_i32, %c0_i32_0 : i32, i32, i32
  }
  func.func @transform_5(%arg0: i32) -> (i32, i32, i32) {
    %c0_i32 = arith.constant 0 : i32
    %c0_i32_0 = arith.constant 0 : i32
    %c0_i32_1 = arith.constant 0 : i32
    %c0_i32_2 = arith.constant 0 : i32
    return %c0_i32, %c0_i32_0, %c0_i32_1 : i32, i32, i32
  }
  func.func @transform_6(%arg0: i32) -> (i32, i32) {
    %c0_i32 = arith.constant 0 : i32
    %c0_i32_0 = arith.constant 0 : i32
    %c0_i32_1 = arith.constant 0 : i32
    return %c0_i32, %c0_i32_0 : i32, i32
  }
  func.func @transform_7(%arg0: i32) -> (i32, i32) {
    %c0_i32 = arith.constant 0 : i32
    %c0_i32_0 = arith.constant 0 : i32
    %c0_i32_1 = arith.constant 0 : i32
    return %c0_i32, %c0_i32_0 : i32, i32
  }
  func.func @transform_8(%arg0: i32) -> (i32, i32) {
    %c0_i32 = arith.constant 0 : i32
    %c0_i32_0 = arith.constant 0 : i32
    %c0_i32_1 = arith.constant 0 : i32
    return %c0_i32, %c0_i32_0 : i32, i32
  }
  func.func @transform_9(%arg0: i32) -> (i32, i32) {
    %c0_i32 = arith.constant 0 : i32
    %c0_i32_0 = arith.constant 0 : i32
    %c0_i32_1 = arith.constant 0 : i32
    return %c0_i32, %c0_i32_0 : i32, i32
  }
  func.func @transform_10(%arg0: i32) -> (i32, i32) {
    %c0_i32 = arith.constant 0 : i32
    %c0_i32_0 = arith.constant 0 : i32
    %c0_i32_1 = arith.constant 0 : i32
    return %c0_i32, %c0_i32_0 : i32, i32
  }
  func.func @transform_11(%arg0: i32) -> (i32, i32) {
    %c0_i32 = arith.constant 0 : i32
    %c0_i32_0 = arith.constant 0 : i32
    %c0_i32_1 = arith.constant 0 : i32
    return %c0_i32, %c0_i32_0 : i32, i32
  }
  func.func @transform_12(%arg0: i32) -> (i32, i32) {
    %c0_i32 = arith.constant 0 : i32
    %c0_i32_0 = arith.constant 0 : i32
    %c0_i32_1 = arith.constant 0 : i32
    return %c0_i32, %c0_i32_0 : i32, i32
  }
}

</mosaic_0001>

<bundles_post_ra>
// kernel: affinity_forward.1
= control target key start
LH: loop header
LB: loop body
LE: loop exit
PB: predicated region body
PF: predicated region fallthrough
CT: control target
= control target key end

     0   :  { %s30595_s0 = inlined_call_operand.hbm [shape: f32[2,512], index: 0, kind: input, shape index: {}]   ;;  %s30596_s1 = inlined_call_operand.hbm [shape: f32[2,1280], index: 1, kind: input, shape index: {}]   ;;  %s30597_s2 = inlined_call_operand.hbm [shape: bf16[4,512,512], index: 2, kind: input, shape index: {}]   ;;  %s30598_s3 = inlined_call_operand.hbm [shape: f32[4,1,512], index: 3, kind: input, shape index: {}]   ;;  %s30599_s4 = inlined_call_operand.hbm [shape: bf16[4,1280,1280], index: 4, kind: input, shape index: {}]   ;;  %s30600_s5 = inlined_call_operand.hbm [shape: f32[4,1,1280], index: 5, kind: input, shape index: {}]   ;;  %s30601_s6 = inlined_call_operand.hbm [shape: bf16[1280,512], index: 6, kind: input, shape index: {}]   ;;  %s30602_s7 = inlined_call_operand.hbm [shape: f32[1,512], index: 7, kind: input, shape index: {}]   ;;  %s30603_s8 = inlined_call_operand.hbm [shape: bf16[512,256], index: 8, kind: input, shape index: {}]   ;;  %s30604_s9 = inlined_call_operand.hbm [shape: bf16[512,256], index: 9, kind: input, shape index: {}]   ;;  %s30605_s10 = inlined_call_operand.hbm [shape: f32[1,256], index: 10, kind: input, shape index: {}]   ;;  %s30606_s11 = inlined_call_operand.<no memory space> [shape: f32[1,1], index: 11, kind: input, shape index: {}]   ;;  %s30607_s12 = inlined_call_operand.vmem [shape: f32[2,1], index: 12, kind: output, shape index: {}]  }
   0x1   :  { %30614 = sst [smem:[#allocation29_spill]] %s30595_s0  ;;  %v17_v0 = vstv %s30606_s11 }
   0x2   :  { %30615 = sst [smem:[#allocation30_spill]] %s30596_s1  ;;  %18 = vst [vmem:[#allocation4] sm:$0x1] %v17_v0 }
   0x3   :  { %30616 = sst [smem:[#allocation31_spill]] %s30597_s2 }
   0x4   :  { %30617 = sst [smem:[#allocation32_spill]] %s30598_s3 }
   0x5   :  { %30618 = sst [smem:[#allocation33_spill]] %s30607_s12 }
   0x6   :  { %19 = vsyncpa [#allocation6], 0 }
   0x7   :  { %20 = vsyncpa [#allocation8], 0 }
   0x8   :  { %21 = vsyncpa [#allocation11], 0 }
   0x9   :  { %22 = vsyncpa [#allocation16], 0 }
   0xa   :  { %23 = vsyncpa [#allocation19], 0  ;;  %s28123_s23 = smov 0   ;;  %s28125_s24 = smov 0  }
   0xb   :  { %s28127_s25 = smov 0   ;;  %s28129_s26 = smov 0  }
   0xc LB: > { %s28032_s11 = smov [#allocation7]   ;;  %s28144_s28 = sadd.s32 4294967295, %s28030_s26   ;;  %s28030_s26 = sphi %s28129_s26, %s30653_s26   ;;  %s28026_s25 = sphi %s28127_s25, %s30652_s25   ;;  %s28022_s24 = sphi %s28125_s24, %s30651_s24   ;;  %s28018_s23 = sphi %s28123_s23, %s30650_s23  }
   0xd   : > { %s336_s27 = sshll.u32 %s28032_s11, 4  ;;  %p19980_p0 = scmp.ge.s32.totalorder %s28030_s26, 1  ;;  %s337_s27 = int_to_ptr.vmem [resolvable:$true] %s336_s27 }
   0xe   : > { %p30608_p1 = scmp.eq.s32.totalorder %s28144_s28, 0  ;;  %p312_p2 = scmp.lt.s32.totalorder %s28030_s26, 3 }
   0xf   : > { %s28033_s30 = smov [#allocation5]   ;;  %s28034_s14 = smov [#allocation9]  }
  0x10   : > { %p28150_p4 = pnand %p19980_p0, %p312_p2  ;;  %s325_s13 = sshll.u32 %s28033_s30, 4  ;;  %s28156_s13 = int_to_ptr.vmem [resolvable:$true] %s325_s13 }
  0x11   : > { %s346_s15 = sshll.u32 %s28034_s14, 4  ;;  %s30621_s1 = sld [smem:[#allocation30_spill]]  ;;  %s28164_s15 = int_to_ptr.vmem [resolvable:$true] %s346_s15 }
  0x12   : > { %s30619_s29 = scalar_select %p28150_p4, 1, 0 }
  0x13   : > { %p23696_p5 = pneg %p28150_p4 }
  0x15   : > { %p28160_p6 = pnand %p23696_p5, %p30608_p1 }
  0x17   : > { %s27658_s19 = scalar_lea.hbm %s30621_s1, 320  ;;  %p28174_p8 = pneg %p28160_p6 }
  0x18   : > { %p27659_p7 = scmp.ne.s32.totalorder %s30621_s1, %s27658_s19  ;;  %p27665_p11 = scmp.lt.u32.totalorder %s27658_s19, %s30621_s1 }
  0x1a   : > { %p27661_p9 = pnand %p28174_p8, %p27659_p7 }
  0x1c   : > { %p27662_p10 = pneg %p27661_p9 }
  0x1e   : > { %p27667_p12 = pnand %p27665_p11, %p27662_p10 }
  0x20   : > { %27670 = shalt.err (!%p27667_p12)
}
  0x21   : > { %s27671_s14 = scalar_lea.vmem %s337_s27, 320  ;;  %p27679_p5 = scmp.lt.s32.totalorder %s337_s27, %s337_s27 }
  0x22   : > { %p27672_p13 = scmp.ne.s32.totalorder %s337_s27, %s27671_s14  ;;  %p27680_p3 = scmp.lt.s32.totalorder %s27671_s14, %s27671_s14 }
  0x24   : > { %p27674_p0 = pnand %p27672_p13, %p28174_p8  ;;  %p27681_p1 = por %p27680_p3, %p27679_p5 }
  0x26   : > { %p27675_p2 = pneg %p27674_p0 }
  0x28   : > { %p27682_p4 = pnand %p27681_p1, %p27675_p2 }
  0x2a   : > { %27685 = shalt.err (!%p27682_p4)
}
  0x2b   : > { %23702 = dma.hbm_to_vmem [thread:$0]  (!%p28160_p6), %s30621_s1, 320, %s337_s27, [#allocation8]  }
  0x2c   : > { %s30623_s0 = sld [smem:[#allocation29_spill]] }
  0x32   : > { %s27686_s21 = scalar_lea.hbm %s30623_s0, 128 }
  0x33   : > { %p27687_p7 = scmp.ne.s32.totalorder %s30623_s0, %s27686_s21  ;;  %p27693_p1 = scmp.lt.u32.totalorder %s27686_s21, %s30623_s0 }
  0x35   : > { %p27689_p9 = pnand %p27687_p7, %p28174_p8 }
  0x37   : > { %p27690_p3 = pneg %p27689_p9 }
  0x39   : > { %p27695_p4 = pnand %p27693_p1, %p27690_p3 }
  0x3b   : > { %27698 = shalt.err (!%p27695_p4)
}
  0x3c   : > { %s27699_s27 = scalar_lea.vmem %s28156_s13, 128  ;;  %p27707_p13 = scmp.lt.s32.totalorder %s28156_s13, %s28156_s13 }
  0x3d   : > { %p27700_p10 = scmp.ne.s32.totalorder %s28156_s13, %s27699_s27  ;;  %p27708_p0 = scmp.lt.s32.totalorder %s27699_s27, %s27699_s27 }
  0x3f   : > { %p27702_p11 = pnand %p27700_p10, %p28174_p8  ;;  %p27709_p2 = por %p27708_p0, %p27707_p13 }
  0x41   : > { %p27703_p12 = pneg %p27702_p11 }
  0x43   : > { %p27710_p5 = pnand %p27709_p2, %p27703_p12 }
  0x45   : > { %27713 = shalt.err (!%p27710_p5)
}
  0x46   : > { %23699 = dma.hbm_to_vmem [thread:$0]  (!%p28160_p6), %s30623_s0, 128, %s28156_s13, [#allocation6]  }
  0x47   : > { %s30624_s2 = sld [smem:[#allocation31_spill]] }
  0x4d   : > { %s27714_s20 = scalar_lea.hbm %s30624_s2, 65536 }
  0x4e   : > { %p27715_p7 = scmp.ne.s32.totalorder %s30624_s2, %s27714_s20  ;;  %p27721_p1 = scmp.lt.u32.totalorder %s27714_s20, %s30624_s2 }
  0x50   : > { %p27717_p9 = pnand %p27715_p7, %p28174_p8 }
  0x52   : > { %p27718_p3 = pneg %p27717_p9 }
  0x54   : > { %p27723_p4 = pnand %p27721_p1, %p27718_p3 }
  0x56   : > { %27726 = shalt.err (!%p27723_p4)
}
  0x57   : > { %s27727_s13 = scalar_lea.vmem %s28164_s15, 65536  ;;  %p27735_p13 = scmp.lt.s32.totalorder %s28164_s15, %s28164_s15 }
  0x58   : > { %p27728_p10 = scmp.ne.s32.totalorder %s28164_s15, %s27727_s13  ;;  %p27736_p0 = scmp.lt.s32.totalorder %s27727_s13, %s27727_s13 }
  0x5a   : > { %p27730_p11 = pnand %p27728_p10, %p28174_p8  ;;  %p27737_p2 = por %p27736_p0, %p27735_p13 }
  0x5c   : > { %p27731_p12 = pneg %p27730_p11 }
  0x5e   : > { %p27738_p5 = pnand %p27737_p2, %p27731_p12 }
  0x60   : > { %27741 = shalt.err (!%p27738_p5)
}
  0x61   : > { %s30610_s27 = smov 256   ;;  %s30611_s12 = smov 16  }
  0x62   : > { %23705 = dma.hbm_to_vmem [thread:$0]  (!%p28160_p6), %s30624_s2, 65536, %s28164_s15, [#allocation8], %s30610_s27, %s30610_s27, %s30611_s12  }
  0x63   : > { %s28037_s19 = smov [#allocation10]   ;;  %s30625_s3 = sld [smem:[#allocation32_spill]] }
  0x64   : > { %s359_s20 = sshll.u32 %s28037_s19, 4  ;;  %s360_s20 = int_to_ptr.vmem [resolvable:$true] %s359_s20 }
  0x69   : > { %s27742_s30 = scalar_lea.hbm %s30625_s3, 256 }
  0x6a   : > { %p27743_p7 = scmp.ne.s32.totalorder %s30625_s3, %s27742_s30  ;;  %p27749_p1 = scmp.lt.u32.totalorder %s27742_s30, %s30625_s3 }
  0x6c   : > { %p27745_p9 = pnand %p27743_p7, %p28174_p8 }
  0x6e   : > { %p27746_p3 = pneg %p27745_p9 }
  0x70   : > { %p27751_p4 = pnand %p27749_p1, %p27746_p3 }
  0x72   : > { %27754 = shalt.err (!%p27751_p4)
}
  0x73   : > { %s27755_s15 = scalar_lea.vmem %s360_s20, 256  ;;  %p27763_p13 = scmp.lt.s32.totalorder %s360_s20, %s360_s20 }
  0x74   : > { %p27756_p10 = scmp.ne.s32.totalorder %s360_s20, %s27755_s15  ;;  %p27764_p0 = scmp.lt.s32.totalorder %s27755_s15, %s27755_s15 }
  0x76   : > { %p27758_p11 = pnand %p27756_p10, %p28174_p8  ;;  %p27765_p2 = por %p27764_p0, %p27763_p13 }
  0x78   : > { %p27759_p12 = pneg %p27758_p11 }
  0x7a   : > { %p27766_p5 = pnand %p27765_p2, %p27759_p12 }
  0x7c   : > { %27769 = shalt.err (!%p27766_p5)
}
  0x7d   : > { %s28038_s17 = smov 64   ;;  %s28039_s18 = smov 4  }
  0x7e   : > { %23708 = dma.hbm_to_vmem [thread:$0]  (!%p28160_p6), %s30625_s3, 256, %s360_s20, [#allocation11], %s28038_s17, %s28038_s17, %s28039_s18  }
  0x7f   : > { %s28040_s19 = smov [#allocation15]   ;;  %s27770_s14 = scalar_lea.hbm %s30602_s7, 64 }
  0x80   : > { %s399_s21 = sshll.u32 %s28040_s19, 4  ;;  %p27771_p7 = scmp.ne.s32.totalorder %s30602_s7, %s27770_s14  ;;  %s400_s21 = int_to_ptr.vmem [resolvable:$true] %s399_s21 }
  0x81   : > { %p27777_p1 = scmp.lt.u32.totalorder %s27770_s14, %s30602_s7 }
  0x82   : > { %p27773_p9 = pnand %p27771_p7, %p28174_p8 }
  0x84   : > { %p27774_p3 = pneg %p27773_p9 }
  0x86   : > { %p27779_p4 = pnand %p27777_p1, %p27774_p3 }
  0x88   : > { %27782 = shalt.err (!%p27779_p4)
}
  0x89   : > { %s27783_s20 = scalar_lea.vmem %s400_s21, 64  ;;  %p27791_p13 = scmp.lt.s32.totalorder %s400_s21, %s400_s21 }
  0x8a   : > { %p27784_p10 = scmp.ne.s32.totalorder %s400_s21, %s27783_s20  ;;  %p27792_p0 = scmp.lt.s32.totalorder %s27783_s20, %s27783_s20 }
  0x8c   : > { %p27786_p11 = pnand %p27784_p10, %p28174_p8  ;;  %p27793_p2 = por %p27792_p0, %p27791_p13 }
  0x8e   : > { %p27787_p12 = pneg %p27786_p11 }
  0x90   : > { %p27794_p5 = pnand %p27793_p2, %p27787_p12 }
  0x92   : > { %27797 = shalt.err (!%p27794_p5)
}
  0x93   : > { %23717 = dma.hbm_to_vmem [thread:$0]  (!%p28160_p6), %s30602_s7, 64, %s400_s21, [#allocation16]  }
  0x94   : > { %s28041_s27 = smov [#allocation18]   ;;  %s28042_s0 = smov [#allocation13]  }
  0x95   : > { %s422_s12 = sshll.u32 %s28041_s27, 4  ;;  %s372_s1 = sshll.u32 %s28042_s0, 4  ;;  %s423_s12 = int_to_ptr.vmem [resolvable:$true] %s422_s12  ;;  %s373_s1 = int_to_ptr.vmem [resolvable:$true] %s372_s1 }
  0x96   : > { %s27798_s30 = scalar_lea.hbm %s30604_s9, 8192 }
  0x97   : > { %p27799_p7 = scmp.ne.s32.totalorder %s30604_s9, %s27798_s30  ;;  %p27805_p1 = scmp.lt.u32.totalorder %s27798_s30, %s30604_s9 }
  0x99   : > { %p27801_p9 = pnand %p27799_p7, %p28174_p8 }
  0x9b   : > { %p27802_p3 = pneg %p27801_p9 }
  0x9d   : > { %p27807_p4 = pnand %p27805_p1, %p27802_p3 }
  0x9f   : > { %27810 = shalt.err (!%p27807_p4)
}
  0xa0   : > { %s27811_s21 = scalar_lea.vmem %s423_s12, 8192  ;;  %p27819_p13 = scmp.lt.s32.totalorder %s423_s12, %s423_s12 }
  0xa1   : > { %p27812_p10 = scmp.ne.s32.totalorder %s423_s12, %s27811_s21  ;;  %p27820_p0 = scmp.lt.s32.totalorder %s27811_s21, %s27811_s21 }
  0xa3   : > { %p27814_p11 = pnand %p27812_p10, %p28174_p8  ;;  %p27821_p2 = por %p27820_p0, %p27819_p13 }
  0xa5   : > { %p27815_p12 = pneg %p27814_p11 }
  0xa7   : > { %p27822_p5 = pnand %p27821_p2, %p27815_p12 }
  0xa9   : > { %27825 = shalt.err (!%p27822_p5)
}
  0xaa   : > { %s30612_s17 = smov 128   ;;  %s30613_s18 = smov 8  }
  0xab   : > { %23723 = dma.hbm_to_vmem [thread:$0]  (!%p28160_p6), %s30604_s9, 8192, %s423_s12, [#allocation19], %s30612_s17, %s30612_s17, %s30613_s18  }
  0xac   : > { %s27826_s30 = scalar_lea.hbm %s30600_s5, 640 }
  0xad   : > { %p27827_p7 = scmp.ne.s32.totalorder %s30600_s5, %s27826_s30  ;;  %p27833_p1 = scmp.lt.u32.totalorder %s27826_s30, %s30600_s5 }
  0xaf   : > { %p27829_p9 = pnand %p27827_p7, %p28174_p8 }
  0xb1   : > { %p27830_p3 = pneg %p27829_p9 }
  0xb3   : > { %p27835_p4 = pnand %p27833_p1, %p27830_p3 }
  0xb5   : > { %27838 = shalt.err (!%p27835_p4)
}
  0xb6   : > { %s27839_s21 = scalar_lea.vmem %s373_s1, 640  ;;  %p27847_p13 = scmp.lt.s32.totalorder %s373_s1, %s373_s1 }
  0xb7   : > { %p27840_p10 = scmp.ne.s32.totalorder %s373_s1, %s27839_s21  ;;  %p27848_p0 = scmp.lt.s32.totalorder %s27839_s21, %s27839_s21 }
  0xb9   : > { %p27842_p11 = pnand %p27840_p10, %p28174_p8  ;;  %p27849_p2 = por %p27848_p0, %p27847_p13 }
  0xbb   : > { %p27843_p12 = pneg %p27842_p11 }
  0xbd   : > { %p27850_p5 = pnand %p27849_p2, %p27843_p12 }
  0xbf   : > { %27853 = shalt.err (!%p27850_p5)
}
  0xc0   : > { %s28045_s12 = smov 160   ;;  %s28046_s27 = smov 10  }
  0xc1   : > { %23711 = dma.hbm_to_vmem [thread:$0]  (!%p28160_p6), %s30600_s5, 640, %s373_s1, [#allocation8], %s28045_s12, %s28045_s12, %s28046_s27  }
  0xc2   : > { %s28047_s11 = smov [#allocation14]   ;;  %s28048_s14 = smov [#allocation17]  }
  0xc3   : > { %s385_s30 = sshll.u32 %s28047_s11, 4  ;;  %s409_s13 = sshll.u32 %s28048_s14, 4  ;;  %s386_s30 = int_to_ptr.vmem [resolvable:$true] %s385_s30  ;;  %s410_s13 = int_to_ptr.vmem [resolvable:$true] %s409_s13 }
  0xc4   : > { %s27854_s21 = scalar_lea.hbm %s30601_s6, 40960 }
  0xc5   : > { %p27855_p7 = scmp.ne.s32.totalorder %s30601_s6, %s27854_s21  ;;  %p27861_p1 = scmp.lt.u32.totalorder %s27854_s21, %s30601_s6 }
  0xc7   : > { %p27857_p9 = pnand %p27855_p7, %p28174_p8 }
  0xc9   : > { %p27858_p3 = pneg %p27857_p9 }
  0xcb   : > { %p27863_p4 = pnand %p27861_p1, %p27858_p3 }
  0xcd   : > { %27866 = shalt.err (!%p27863_p4)
}
  0xce   : > { %s27867_s1 = scalar_lea.vmem %s386_s30, 40960  ;;  %p27875_p13 = scmp.lt.s32.totalorder %s386_s30, %s386_s30 }
  0xcf   : > { %p27868_p10 = scmp.ne.s32.totalorder %s386_s30, %s27867_s1  ;;  %p27876_p0 = scmp.lt.s32.totalorder %s27867_s1, %s27867_s1 }
  0xd1   : > { %p27870_p11 = pnand %p27868_p10, %p28174_p8  ;;  %p27877_p2 = por %p27876_p0, %p27875_p13 }
  0xd3   : > { %p27871_p12 = pneg %p27870_p11 }
  0xd5   : > { %p27878_p5 = pnand %p27877_p2, %p27871_p12 }
  0xd7   : > { %27881 = shalt.err (!%p27878_p5)
}
  0xd8   : > { %s30626_s17 = smov 16   ;;  %s30627_s18 = smov 256  }
  0xd9   : > { %23714 = dma.hbm_to_vmem [thread:$0]  (!%p28160_p6), %s30601_s6, 40960, %s386_s30, [#allocation11], %s30627_s18, %s30627_s18, %s30626_s17  }
  0xda   : > { %s27882_s0 = scalar_lea.hbm %s30603_s8, 8192 }
  0xdb   : > { %p27883_p7 = scmp.ne.s32.totalorder %s30603_s8, %s27882_s0  ;;  %p27889_p1 = scmp.lt.u32.totalorder %s27882_s0, %s30603_s8 }
  0xdd   : > { %p27885_p9 = pnand %p27883_p7, %p28174_p8 }
  0xdf   : > { %p27886_p3 = pneg %p27885_p9 }
  0xe1   : > { %p27891_p4 = pnand %p27889_p1, %p27886_p3 }
  0xe3   : > { %27894 = shalt.err (!%p27891_p4)
}
  0xe4   : > { %s27895_s20 = scalar_lea.vmem %s410_s13, 8192  ;;  %p27903_p13 = scmp.lt.s32.totalorder %s410_s13, %s410_s13 }
  0xe5   : > { %p27896_p10 = scmp.ne.s32.totalorder %s410_s13, %s27895_s20  ;;  %p27904_p0 = scmp.lt.s32.totalorder %s27895_s20, %s27895_s20 }
  0xe7   : > { %p27898_p11 = pnand %p27896_p10, %p28174_p8  ;;  %p27905_p2 = por %p27904_p0, %p27903_p13 }
  0xe9   : > { %p27899_p12 = pneg %p27898_p11 }
  0xeb   : > { %p27906_p5 = pnand %p27905_p2, %p27899_p12 }
  0xed   : > { %27909 = shalt.err (!%p27906_p5)
}
  0xee   : > { %s30628_s30 = smov 8   ;;  %s30629_s21 = smov 128  }
  0xef   : > { %23720 = dma.hbm_to_vmem [thread:$0]  (!%p28160_p6), %s30603_s8, 8192, %s410_s13, [#allocation16], %s30629_s21, %s30629_s21, %s30628_s30  }
  0xf0   : > { %s28049_s18 = smov [#allocation20]   ;;  %s27910_s27 = scalar_lea.hbm %s30605_s10, 32 }
  0xf1   : > { %s436_s2 = sshll.u32 %s28049_s18, 4  ;;  %p27911_p7 = scmp.ne.s32.totalorder %s30605_s10, %s27910_s27  ;;  %s437_s2 = int_to_ptr.vmem [resolvable:$true] %s436_s2 }
  0xf2   : > { %p27917_p1 = scmp.lt.u32.totalorder %s27910_s27, %s30605_s10 }
  0xf3   : > { %p27913_p9 = pnand %p27911_p7, %p28174_p8 }
  0xf5   : > { %p27914_p3 = pneg %p27913_p9 }
  0xf7   : > { %p27919_p4 = pnand %p27917_p1, %p27914_p3 }
  0xf9   : > { %27922 = shalt.err (!%p27919_p4)
}
  0xfa   : > { %s27923_s13 = scalar_lea.vmem %s437_s2, 32  ;;  %p27931_p13 = scmp.lt.s32.totalorder %s437_s2, %s437_s2 }
  0xfb   : > { %p27924_p10 = scmp.ne.s32.totalorder %s437_s2, %s27923_s13  ;;  %p27932_p0 = scmp.lt.s32.totalorder %s27923_s13, %s27923_s13 }
  0xfd   : > { %p27926_p11 = pnand %p27924_p10, %p28174_p8  ;;  %p27933_p2 = por %p27932_p0, %p27931_p13 }
  0xff   : > { %p27927_p12 = pneg %p27926_p11 }
 0x101   : > { %p27934_p5 = pnand %p27933_p2, %p27927_p12 }
 0x103   : > { %27937 = shalt.err (!%p27934_p5)
}
 0x104   : > { %23726 = dma.hbm_to_vmem [thread:$0]  (!%p28160_p6), %s30605_s10, 32, %s437_s2, [#allocation19]  }
 0x105   : > { %s28375_s22 = sadd.s32 1, %s28030_s26   ;;  %s120_s16 = sadd.s32 1, %s28026_s25 }
 0x106   : > { %s117_s30 = ssub.s32 %s28030_s26, %s28375_s22  ;;  %p127_p8 = scmp.ne.s32.totalorder %s28026_s25, %s28022_s24 }
 0x107   : > { %p118_p7 = scmp.eq.s32.totalorder %s117_s30, 0  ;;  %p128_p9 = scmp.eq.s32.totalorder %s28030_s26, 0 }
 0x108   : > { %p133_p3 = scmp.ne.s32.totalorder %s28022_s24, %s28018_s23  ;;  %p23741_p1 = scmp.lt.s32.totalorder %s28030_s26, 2 }
 0x109   : > { %s28387_s21 = scalar_select %p118_p7, %s28026_s25, %s120_s16  }
 0x10a   : > { %p129_p4 = por %p128_p9, %p127_p8  ;;  %p30630_p10 = scmp.eq.s32.totalorder %s28144_s28, 0 }
 0x10b   : > { %s450_s17 = sand.u32 1, %s28030_s26   ;;  %s452_s18 = sand.u32 1, %s28026_s25  }
 0x10c   : > { %p28391_p11 = por %p30630_p10, %p133_p3  ;;  %s23651_s2 = smul.u32 12800, %s452_s18 }
 0x10d   : > { %s23652_s3 = smul.u32 204800, %s28030_s26  ;;  %p28398_p6 = pnand %p23741_p1, %p129_p4 }
 0x10e   : > { %s454_s19 = scalar_lea.vmem [#allocation12], %s23651_s2  ;;  %s28409_s26 = scalar_lea.sflag [#allocation6], %s450_s17 }
 0x10f   : > { %s28405_s23 = scalar_lea.hbm %s30599_s4, %s23652_s3  ;;  %s462_s11 = sshll.u32 %s454_s19, 4  ;;  %s28407_s11 = int_to_ptr.vmem [resolvable:$true] %s462_s11 }
 0x110   : > { %s27938_s14 = scalar_lea.hbm %s28405_s23, 204800  ;;  %p27940_p13 = pneg %p28398_p6 }
 0x111   : > { %p27939_p12 = scmp.ne.s32.totalorder %s28405_s23, %s27938_s14  ;;  %s27943_s20 = scalar_lea.hbm %s30599_s4, 409600 }
 0x112   : > { %p27944_p5 = scmp.lt.u32.totalorder %s28405_s23, %s30599_s4  ;;  %p27945_p8 = scmp.lt.u32.totalorder %s27943_s20, %s27938_s14 }
 0x113   : > { %p27941_p0 = pnand %p27940_p13, %p27939_p12  ;;  %p27947_p9 = scmp.lt.u32.totalorder %s27938_s14, %s28405_s23 }
 0x114   : > { %p27946_p7 = por %p27945_p8, %p27944_p5 }
 0x115   : > { %p27942_p2 = pneg %p27941_p0 }
 0x116   : > { %p27948_p3 = por %p27947_p9, %p27946_p7 }
 0x118   : > { %p27949_p1 = pnand %p27948_p3, %p27942_p2 }
 0x11a   : > { %27952 = shalt.err (!%p27949_p1)
}
 0x11b   : > { %s27953_s17 = scalar_lea.vmem %s28407_s11, 204800  ;;  %s28050_s18 = smov [#allocation12]  }
 0x11c   : > { %p27954_p4 = scmp.ne.s32.totalorder %s28407_s11, %s27953_s17  ;;  %s27958_s2 = sshll.u32 %s28050_s18, 4  ;;  %s27959_s2 = int_to_ptr.vmem [resolvable:$false] %s27958_s2 }
 0x11d   : > { %s27960_s3 = scalar_lea.vmem %s27959_s2, 409600  ;;  %p27961_p0 = scmp.lt.s32.totalorder %s28407_s11, %s27959_s2 }
 0x11e   : > { %p27956_p10 = pnand %p27954_p4, %p27940_p13  ;;  %p27962_p5 = scmp.lt.s32.totalorder %s27960_s3, %s27953_s17 }
 0x120   : > { %p27957_p12 = pneg %p27956_p10  ;;  %p27963_p8 = por %p27962_p5, %p27961_p0 }
 0x122   : > { %p27964_p7 = pnand %p27963_p8, %p27957_p12 }
 0x124   : > { %27967 = shalt.err (!%p27964_p7)
}
 0x125   : > { %s28051_s27 = smov 640   ;;  %s28052_s0 = smov 40  }
 0x126   : > { %23730 = dma.hbm_to_vmem [thread:$0]  (!%p28398_p6), %s28405_s23, 204800, %s28407_s11, %s28409_s26, %s28051_s27, %s28051_s27, %s28052_s0  }
 0x127   : > { %p30633_p13 = scmp.ne.s32.totalorder %s30619_s29, 0 }
 0x128   : > { %p30634_p2 = scmp.eq.s32.totalorder (!%p30633_p13), %s28144_s28, 0 }
 0x129   : > { %474 = sbr.rel (%p30633_p13) target bundleno = 4705 (0x1261), region = 68 }
 0x130   : > { %27985 = dma.done.wait (%p30634_p2), [#allocation6], 128   ;;  %p30635_p9 = pmov %p30634_p2 }
 0x131   : > { %p30636_p3 = pmov %p30634_p2 }
 0x132   : > { %27987 = vsyncadd (%p30635_p9), [#allocation6], 4294967168 }
 0x133   : > { %27989 = dma.done.wait (%p30636_p3), [#allocation8], 65856   ;;  %p30637_p1 = pmov %p30634_p2 }
 0x135   : > { %27991 = vsyncadd (%p30637_p1), [#allocation8], 4294901440  ;;  %p30638_p4 = pmov %p30637_p1 }
 0x136   : > { %p30639_p6 = pmov %p30637_p1 }
 0x137   : > { %27993 = dma.done.wait (%p30638_p4), [#allocation11], 256  }
 0x138   : > { %27995 = vsyncadd (%p30639_p6), [#allocation11], 4294967040  ;;  %s492_s29 = sand.u32 1, %s28144_s28   ;;  %s494_s12 = sand.u32 1, %s28022_s24  }
 0x139   : > { %s23653_s23 = smul.u32 12800, %s494_s12  ;;  %s493_s19 = scalar_lea.sflag [#allocation6], %s492_s29 }
 0x13b   : > { %s28453_s11 = scalar_lea.vmem [#allocation12], %s23653_s23 }
 0x13c   : > { %27997 = dma.done.wait (%p28391_p11), %s493_s19, 204800  }
 0x13d   : > { %27999 = vsyncadd (%p28391_p11), %s493_s19, 4294762496  ;;  %p30640_p10 = pmov %p30637_p1 }
 0x13e   : > { %p30641_p12 = pmov %p30637_p1 }
 0x13f   : > { %28001 = dma.done.wait (%p30640_p10), [#allocation8], 640  }
 0x140   : > { %28003 = vsyncadd (%p30641_p12), [#allocation8], 4294966656  ;;  %p30642_p0 = pmov %p30637_p1 }
 0x142   : > { %28005 = dma.done.wait (%p30642_p0), [#allocation11], 40960   ;;  %p30643_p5 = pmov %p30642_p0 }
 0x143   : > { %p30644_p8 = pmov %p30642_p0 }
 0x144   : > { %28007 = vsyncadd (%p30643_p5), [#allocation11], 4294926336 }
 0x145   : > { %28009 = dma.done.wait (%p30644_p8), [#allocation16], 8256   ;;  %p30645_p7 = pmov %p30642_p0 }
 0x146   : > { %p30646_p11 = pmov %p30642_p0 }
 0x147   : > { %28011 = vsyncadd (%p30645_p7), [#allocation16], 4294959040 }
 0x148   : > { %28013 = dma.done.wait (%p30646_p11), [#allocation19], 8224   ;;  %p30647_p13 = pmov %p30642_p0 }
 0x149   : > { %p30648_p2 = scmp.ne.s32.totalorder %s28144_s28, 0 }
 0x14a   : > { %28015 = vsyncadd (%p30647_p13), [#allocation19], 4294959072  ;;  %v23806_v1 = vld [vmem:[#allocation9 + $0x4] ss:$16 sps:$4 sm:$0xff] (!%p30648_p2)   ;;  %v23808_v2 = vld [vmem:[#allocation9 + $0xc] ss:$16 sps:$4 sm:$0xff] (!%p30648_p2)   ;;  %v696_v39 = vlaneseq (!%p30648_p2) }
 0x14b   : > { %560 = sbr.rel (%p30648_p2) target bundleno = 1549 (0x60d), region = 116  ;;  %1378 = vmatprep.subr.bf16.mxu0 (!%p30648_p2), %v23806_v1  ;;  %v23810_v3 = vld [vmem:[#allocation9] ss:$16 sps:$4 sm:$0xff] (!%p30648_p2)   ;;  %v23811_v4 = vld [vmem:[#allocation9 + $0x8] ss:$16 sps:$4 sm:$0xff] (!%p30648_p2)   ;;  %1460 = vmatprep.subr.bf16.mxu1 (!%p30648_p2), %v23808_v2 }
 0x14c   : > { %v23812_v5 = vld [vmem:[#allocation9 + $0x24] ss:$16 sps:$4 sm:$0xff] (!%p30648_p2)   ;;  %1379 = vmatpush1.bf16.msra.mxu0 (!%p30648_p2), %v23810_v3  ;;  %1461 = vmatpush1.bf16.msra.mxu1 (!%p30648_p2), %v23811_v4  ;;  %v23814_v6 = vld [vmem:[#allocation9 + $0x2c] ss:$16 sps:$4 sm:$0xff] (!%p30648_p2)   ;;  %v23816_v7 = vld [vmem:[#allocation9 + $0x20] ss:$16 sps:$4 sm:$0xff] (!%p30648_p2)  }
 0x14d   : > { %1380 = vmatprep.subr.bf16.mxu0 (!%p30648_p2), %v23812_v5  ;;  %v23817_v8 = vld [vmem:[#allocation9 + $0x28] ss:$16 sps:$4 sm:$0xff] (!%p30648_p2)   ;;  %1462 = vmatprep.subr.bf16.mxu1 (!%p30648_p2), %v23814_v6  ;;  %v23818_v9 = vld [vmem:[#allocation9 + $0x44] ss:$16 sps:$4 sm:$0xff] (!%p30648_p2)   ;;  %v23820_v10 = vld [vmem:[#allocation9 + $0x4c] ss:$16 sps:$4 sm:$0xff] (!%p30648_p2)  }
 0x14e   : > { %v23822_v11 = vld [vmem:[#allocation9 + $0x40] ss:$16 sps:$4 sm:$0xff] (!%p30648_p2)   ;;  %v23823_v12 = vld [vmem:[#allocation9 + $0x48] ss:$16 sps:$4 sm:$0xff] (!%p30648_p2)   ;;  %v23824_v13 = vld [vmem:[#allocation9 + $0x64] ss:$16 sps:$4 sm:$0xff] (!%p30648_p2)  }
 0x14f   : > { %v23826_v14 = vld [vmem:[#allocation9 + $0x6c] ss:$16 sps:$4 sm:$0xff] (!%p30648_p2)   ;;  %v23828_v15 = vld [vmem:[#allocation9 + $0x60] ss:$16 sps:$4 sm:$0xff] (!%p30648_p2)   ;;  %v23829_v16 = vld [vmem:[#allocation9 + $0x68] ss:$16 sps:$4 sm:$0xff] (!%p30648_p2)  }
 0x150   : > { %1381 = vmatpush1.bf16.msra.mxu0 (!%p30648_p2), %v23816_v7  ;;  %1463 = vmatpush1.bf16.msra.mxu1 (!%p30648_p2), %v23817_v8  ;;  %v23830_v17 = vld [vmem:[#allocation9 + $0x84] ss:$16 sps:$4 sm:$0xff] (!%p30648_p2)   ;;  %v23832_v18 = vld [vmem:[#allocation9 + $0x8c] ss:$16 sps:$4 sm:$0xff] (!%p30648_p2)   ;;  %v23834_v19 = vld [vmem:[#allocation9 + $0x80] ss:$16 sps:$4 sm:$0xff] (!%p30648_p2)  }
 0x151   : > { %1382 = vmatprep.subr.bf16.mxu0 (!%p30648_p2), %v23818_v9  ;;  %1464 = vmatprep.subr.bf16.mxu1 (!%p30648_p2), %v23820_v10  ;;  %v23835_v20 = vld [vmem:[#allocation9 + $0x88] ss:$16 sps:$4 sm:$0xff] (!%p30648_p2)   ;;  %v23836_v21 = vld [vmem:[#allocation9 + $0xa4] ss:$16 sps:$4 sm:$0xff] (!%p30648_p2)   ;;  %v23838_v22 = vld [vmem:[#allocation9 + $0xac] ss:$16 sps:$4 sm:$0xff] (!%p30648_p2)  }
 0x152   : > { %v23840_v23 = vld [vmem:[#allocation9 + $0xa0] ss:$16 sps:$4 sm:$0xff]   ;;  %v23841_v24 = vld [vmem:[#allocation9 + $0xa8] ss:$16 sps:$4 sm:$0xff]   ;;  %v23842_v25 = vld [vmem:[#allocation9 + $0xc4] ss:$16 sps:$4 sm:$0xff]  }
 0x153   : > { %v23844_v26 = vld [vmem:[#allocation9 + $0xcc] ss:$16 sps:$4 sm:$0xff]   ;;  %v23846_v27 = vld [vmem:[#allocation9 + $0xc0] ss:$16 sps:$4 sm:$0xff]   ;;  %v23847_v28 = vld [vmem:[#allocation9 + $0xc8] ss:$16 sps:$4 sm:$0xff]  }
 0x154   : > { %1383 = vmatpush1.bf16.msra.mxu0 %v23822_v11  ;;  %1465 = vmatpush1.bf16.msra.mxu1 %v23823_v12  ;;  %v23848_v29 = vld [vmem:[#allocation9 + $0xe4] ss:$16 sps:$4 sm:$0xff]   ;;  %v23850_v30 = vld [vmem:[#allocation9 + $0xec] ss:$16 sps:$4 sm:$0xff]   ;;  %v23852_v31 = vld [vmem:[#allocation9 + $0xe0] ss:$16 sps:$4 sm:$0xff]  }
 0x155   : > { %1384 = vmatprep.subr.bf16.mxu0 %v23824_v13  ;;  %1466 = vmatprep.subr.bf16.mxu1 %v23826_v14  ;;  %v23853_v32 = vld [vmem:[#allocation9 + $0xe8] ss:$16 sps:$4 sm:$0xff]   ;;  %v23854_v33 = vld [vmem:[#allocation9 + $0x104] ss:$16 sps:$4 sm:$0xff]   ;;  %v23856_v34 = vld [vmem:[#allocation9 + $0x10c] ss:$16 sps:$4 sm:$0xff]  }
 0x156   : > { %v23858_v35 = vld [vmem:[#allocation9 + $0x100] ss:$16 sps:$4 sm:$0xff]   ;;  %v23859_v36 = vld [vmem:[#allocation9 + $0x108] ss:$16 sps:$4 sm:$0xff]   ;;  %v28053_v37 = vmov 1983009808  }
 0x157   : > { %v694_v38 = vunpack.c.l.s4 %v28053_v37  ;;  %v23860_v40 = vld [vmem:[#allocation9 + $0x124] ss:$16 sps:$4 sm:$0xff]   ;;  %v23862_v41 = vld [vmem:[#allocation9 + $0x12c] ss:$16 sps:$4 sm:$0xff]   ;;  %v23864_v42 = vld [vmem:[#allocation9 + $0x120] ss:$16 sps:$4 sm:$0xff]  }
 0x158   : > { %1385 = vmatpush1.bf16.msra.mxu0 %v23828_v15  ;;  %1467 = vmatpush1.bf16.msra.mxu1 %v23829_v16  ;;  %v28477_v44 = vshrl.u32 %v696_v39, 7  ;;  %v23865_v45 = vld [vmem:[#allocation9 + $0x128] ss:$16 sps:$4 sm:$0xff]   ;;  %v23866_v46 = vld [vmem:[#allocation9 + $0x144] ss:$16 sps:$4 sm:$0xff]  }
 0x159   : > { %1386 = vmatprep.subr.bf16.mxu0 %v23830_v17  ;;  %1468 = vmatprep.subr.bf16.mxu1 %v23832_v18  ;;  %v695_v43 = vunpack.c.0.s8 %v694_v38  ;;  %v23868_v47 = vld [vmem:[#allocation9 + $0x14c] ss:$16 sps:$4 sm:$0xff]   ;;  %v23870_v48 = vld [vmem:[#allocation9 + $0x140] ss:$16 sps:$4 sm:$0xff]   ;;  %v23871_v49 = vld [vmem:[#allocation9 + $0x148] ss:$16 sps:$4 sm:$0xff]  }
 0x15a   : > { %v23872_v51 = vld [vmem:[#allocation9 + $0x164] ss:$16 sps:$4 sm:$0xff]   ;;  %v23874_v52 = vld [vmem:[#allocation9 + $0x16c] ss:$16 sps:$4 sm:$0xff]   ;;  %v23876_v54 = vld [vmem:[#allocation9 + $0x160] ss:$16 sps:$4 sm:$0xff]  }
 0x15b   : > { %v28480_v50 = vsub.s32 %v695_v43, %v28477_v44  ;;  %v561_v53 = vld [vmem:[#allocation5] sm:$0xff]  ;;  %v23880_v58 = vld [vmem:[#allocation9 + $0x18c] ss:$16 sps:$4 sm:$0xff]   ;;  %v23882_v60 = vld [vmem:[#allocation9 + $0x180] ss:$16 sps:$4 sm:$0xff]  }
 0x15c   : > { %1387 = vmatpush1.bf16.msra.mxu0 %v23834_v19  ;;  %1469 = vmatpush1.bf16.msra.mxu1 %v23835_v20  ;;  %v23877_v56 = vld [vmem:[#allocation9 + $0x168] ss:$16 sps:$4 sm:$0xff]   ;;  %v23878_v57 = vld [vmem:[#allocation9 + $0x184] ss:$16 sps:$4 sm:$0xff]   ;;  %v23886_v0 = vld [vmem:[#allocation9 + $0x1ac] ss:$16 sps:$4 sm:$0xff]   ;;  %v692_v5 = vcombine.high %v561_v53, %v561_v53 }
 0x15d   : > { %1388 = vmatprep.subr.bf16.mxu0 %v23836_v21  ;;  %1470 = vmatprep.subr.bf16.mxu1 %v23838_v22  ;;  %v699_v55 = vrot.slane %v561_v53, %v28480_v50  ;;  %v23883_v62 = vld [vmem:[#allocation9 + $0x188] ss:$16 sps:$4 sm:$0xff]   ;;  %v23884_v63 = vld [vmem:[#allocation9 + $0x1a4] ss:$16 sps:$4 sm:$0xff]   ;;  %v23888_v1 = vld [vmem:[#allocation9 + $0x1a0] ss:$16 sps:$4 sm:$0xff]  }
 0x15e   : > { %v23889_v2 = vld [vmem:[#allocation9 + $0x1a8] ss:$16 sps:$4 sm:$0xff]   ;;  %v23890_v3 = vld [vmem:[#allocation9 + $0x1c4] ss:$16 sps:$4 sm:$0xff]   ;;  %v23892_v4 = vld [vmem:[#allocation9 + $0x1cc] ss:$16 sps:$4 sm:$0xff]   ;;  %v28484_v10 = vrot.slane %v692_v5, %v28480_v50 }
 0x15f   : > { %v707_v59 = vcombine.high %v699_v55, %v699_v55  ;;  %v23894_v6 = vld [vmem:[#allocation9 + $0x1c0] ss:$16 sps:$4 sm:$0xff]   ;;  %v23895_v7 = vld [vmem:[#allocation9 + $0x1c8] ss:$16 sps:$4 sm:$0xff]   ;;  %v23896_v8 = vld [vmem:[#allocation9 + $0x1e4] ss:$16 sps:$4 sm:$0xff]   ;;  %v713_v17 = vpack.c.bf16 %v699_v55, %v699_v55 }
 0x160   : > { %1389 = vmatpush1.bf16.msra.mxu0 %v23840_v23  ;;  %1471 = vmatpush1.bf16.msra.mxu1 %v23841_v24  ;;  %v23898_v9 = vld [vmem:[#allocation9 + $0x1ec] ss:$16 sps:$4 sm:$0xff]   ;;  %v23900_v11 = vld [vmem:[#allocation9 + $0x1e0] ss:$16 sps:$4 sm:$0xff]   ;;  %v23901_v12 = vld [vmem:[#allocation9 + $0x1e8] ss:$16 sps:$4 sm:$0xff]   ;;  %v708_v15 = vcombine.high %v28484_v10, %v28484_v10 }
 0x161   : > { %1390 = vmatprep.subr.bf16.mxu0 %v23842_v25  ;;  %1472 = vmatprep.subr.bf16.mxu1 %v23844_v26  ;;  %v714_v61 = vpack.c.bf16 %v707_v59, %v707_v59  ;;  %v23904_v13 = vld [vmem:[#allocation9 + $0x204] ss:$16 sps:$4 sm:$0xff]   ;;  %v23907_v14 = vld [vmem:[#allocation9 + $0x20c] ss:$16 sps:$4 sm:$0xff]   ;;  %v23902_v16 = vld [vmem:[#allocation9 + $0x200] ss:$16 sps:$4 sm:$0xff]  }
 0x162   : > { %v23905_v18 = vld [vmem:[#allocation9 + $0x208] ss:$16 sps:$4 sm:$0xff]   ;;  %v23910_v19 = vld [vmem:[#allocation9 + $0x224] ss:$16 sps:$4 sm:$0xff]   ;;  %v23913_v20 = vld [vmem:[#allocation9 + $0x22c] ss:$16 sps:$4 sm:$0xff]   ;;  %v716_v21 = vpack.c.bf16 %v708_v15, %v708_v15 }
 0x163   : > { %1410 = vmatprep.mubr.bf16.mxu0 %v714_v61  ;;  %1492 = vmatprep.mubr.bf16.mxu1 %v714_v61  ;;  %v23908_v22 = vld [vmem:[#allocation9 + $0x220] ss:$16 sps:$4 sm:$0xff]   ;;  %v23911_v23 = vld [vmem:[#allocation9 + $0x228] ss:$16 sps:$4 sm:$0xff]   ;;  %v23916_v24 = vld [vmem:[#allocation9 + $0x244] ss:$16 sps:$4 sm:$0xff]  }
 0x164   : > { %1391 = vmatpush1.bf16.msra.mxu0 %v23846_v27  ;;  %1473 = vmatpush1.bf16.msra.mxu1 %v23847_v28  ;;  %v23919_v25 = vld [vmem:[#allocation9 + $0x24c] ss:$16 sps:$4 sm:$0xff]   ;;  %v23914_v26 = vld [vmem:[#allocation9 + $0x240] ss:$16 sps:$4 sm:$0xff]   ;;  %v23917_v27 = vld [vmem:[#allocation9 + $0x248] ss:$16 sps:$4 sm:$0xff]  }
 0x165   : > { %1392 = vmatprep.subr.bf16.mxu0 %v23848_v29  ;;  %1474 = vmatprep.subr.bf16.mxu1 %v23850_v30  ;;  %v23922_v28 = vld [vmem:[#allocation9 + $0x264] ss:$16 sps:$4 sm:$0xff]   ;;  %v23925_v29 = vld [vmem:[#allocation9 + $0x26c] ss:$16 sps:$4 sm:$0xff]   ;;  %v23920_v30 = vld [vmem:[#allocation9 + $0x260] ss:$16 sps:$4 sm:$0xff]  }
 0x166   : > { %v23937_v37 = vld [vmem:[#allocation9 + $0x2ac] ss:$16 sps:$4 sm:$0xff]   ;;  %v23932_v38 = vld [vmem:[#allocation9 + $0x2a0] ss:$16 sps:$4 sm:$0xff]   ;;  %v23935_v39 = vld [vmem:[#allocation9 + $0x2a8] ss:$16 sps:$4 sm:$0xff]  }
 0x167   : > { %v23941_v43 = vld [vmem:[#allocation9 + $0x2c8] ss:$16 sps:$4 sm:$0xff]   ;;  %v23961_v55 = vld [vmem:[#allocation9 + $0x32c] ss:$16 sps:$4 sm:$0xff]   ;;  %v23994_v15 = vld [vmem:[#allocation9 + $0x3e4] ss:$16 sps:$4 sm:$0xff]  }
 0x168   : > { %1393 = vmatpush1.bf16.msra.mxu0 %v23852_v31  ;;  %1475 = vmatpush1.bf16.msra.mxu1 %v23853_v32  ;;  %v23923_v31 = vld [vmem:[#allocation9 + $0x268] ss:$16 sps:$4 sm:$0xff]   ;;  %v23928_v32 = vld [vmem:[#allocation9 + $0x284] ss:$16 sps:$4 sm:$0xff]   ;;  %v23967_v59 = vld [vmem:[#allocation9 + $0x34c] ss:$16 sps:$4 sm:$0xff]  }
 0x169   : > { %1394 = vmatprep.subr.bf16.mxu0 %v23854_v33  ;;  %1476 = vmatprep.subr.bf16.mxu1 %v23856_v34  ;;  %v23931_v33 = vld [vmem:[#allocation9 + $0x28c] ss:$16 sps:$4 sm:$0xff]   ;;  %v23926_v34 = vld [vmem:[#allocation9 + $0x280] ss:$16 sps:$4 sm:$0xff]   ;;  %v23953_v53 = vld [vmem:[#allocation9 + $0x308] ss:$16 sps:$4 sm:$0xff]  }
 0x16a   : > { %v23965_v61 = vld [vmem:[#allocation9 + $0x348] ss:$16 sps:$4 sm:$0xff]  }
 0x16b   : > { %v23977_v5 = vld [vmem:[#allocation9 + $0x388] ss:$16 sps:$4 sm:$0xff]  }
 0x16c   : > { %1395 = vmatpush1.bf16.msra.mxu0 %v23858_v35  ;;  %1477 = vmatpush1.bf16.msra.mxu1 %v23859_v36  ;;  %v23929_v35 = vld [vmem:[#allocation9 + $0x288] ss:$16 sps:$4 sm:$0xff]   ;;  %v23934_v36 = vld [vmem:[#allocation9 + $0x2a4] ss:$16 sps:$4 sm:$0xff]  }
 0x16d   : > { %1396 = vmatprep.subr.bf16.mxu0 %v23860_v40  ;;  %1478 = vmatprep.subr.bf16.mxu1 %v23862_v41  ;;  %v23940_v40 = vld [vmem:[#allocation9 + $0x2c4] ss:$16 sps:$4 sm:$0xff]   ;;  %v23943_v41 = vld [vmem:[#allocation9 + $0x2cc] ss:$16 sps:$4 sm:$0xff]  }
 0x170   : > { %1397 = vmatpush1.bf16.msra.mxu0 %v23864_v42  ;;  %1479 = vmatpush1.bf16.msra.mxu1 %v23865_v45  ;;  %v23938_v42 = vld [vmem:[#allocation9 + $0x2c0] ss:$16 sps:$4 sm:$0xff]   ;;  %v23946_v45 = vld [vmem:[#allocation9 + $0x2e4] ss:$16 sps:$4 sm:$0xff]  }
 0x171   : > { %1398 = vmatprep.subr.bf16.mxu0 %v23866_v46  ;;  %1480 = vmatprep.subr.bf16.mxu1 %v23868_v47  ;;  %v23949_v46 = vld [vmem:[#allocation9 + $0x2ec] ss:$16 sps:$4 sm:$0xff]   ;;  %v23944_v47 = vld [vmem:[#allocation9 + $0x2e0] ss:$16 sps:$4 sm:$0xff]  }
 0x174   : > { %1399 = vmatpush1.bf16.msra.mxu0 %v23870_v48  ;;  %1481 = vmatpush1.bf16.msra.mxu1 %v23871_v49  ;;  %v23947_v48 = vld [vmem:[#allocation9 + $0x2e8] ss:$16 sps:$4 sm:$0xff]   ;;  %v23952_v49 = vld [vmem:[#allocation9 + $0x304] ss:$16 sps:$4 sm:$0xff]  }
 0x175   : > { %1400 = vmatprep.subr.bf16.mxu0 %v23872_v51  ;;  %1482 = vmatprep.subr.bf16.mxu1 %v23874_v52  ;;  %v23955_v51 = vld [vmem:[#allocation9 + $0x30c] ss:$16 sps:$4 sm:$0xff]   ;;  %v23950_v52 = vld [vmem:[#allocation9 + $0x300] ss:$16 sps:$4 sm:$0xff]  }
 0x178   : > { %1401 = vmatpush1.bf16.msra.mxu0 %v23876_v54  ;;  %1483 = vmatpush1.bf16.msra.mxu1 %v23877_v56  ;;  %v23958_v54 = vld [vmem:[#allocation9 + $0x324] ss:$16 sps:$4 sm:$0xff]   ;;  %v23956_v56 = vld [vmem:[#allocation9 + $0x320] ss:$16 sps:$4 sm:$0xff]  }
 0x179   : > { %1402 = vmatprep.subr.bf16.mxu0 %v23878_v57  ;;  %1484 = vmatprep.subr.bf16.mxu1 %v23880_v58  ;;  %v23959_v57 = vld [vmem:[#allocation9 + $0x328] ss:$16 sps:$4 sm:$0xff]   ;;  %v23964_v58 = vld [vmem:[#allocation9 + $0x344] ss:$16 sps:$4 sm:$0xff]  }
 0x17c   : > { %1403 = vmatpush1.bf16.msra.mxu0 %v23882_v60  ;;  %1485 = vmatpush1.bf16.msra.mxu1 %v23883_v62  ;;  %v23962_v60 = vld [vmem:[#allocation9 + $0x340] ss:$16 sps:$4 sm:$0xff]   ;;  %v23970_v62 = vld [vmem:[#allocation9 + $0x364] ss:$16 sps:$4 sm:$0xff]  }
 0x17d   : > { %1404 = vmatprep.subr.bf16.mxu0 %v23884_v63  ;;  %1486 = vmatprep.subr.bf16.mxu1 %v23886_v0  ;;  %v23973_v63 = vld [vmem:[#allocation9 + $0x36c] ss:$16 sps:$4 sm:$0xff]   ;;  %v23968_v0 = vld [vmem:[#allocation9 + $0x360] ss:$16 sps:$4 sm:$0xff]  }
 0x180   : > { %1405 = vmatpush1.bf16.msra.mxu0 %v23888_v1  ;;  %1487 = vmatpush1.bf16.msra.mxu1 %v23889_v2  ;;  %v23971_v1 = vld [vmem:[#allocation9 + $0x368] ss:$16 sps:$4 sm:$0xff]   ;;  %v23976_v2 = vld [vmem:[#allocation9 + $0x384] ss:$16 sps:$4 sm:$0xff]  }
 0x181   : > { %1406 = vmatprep.subr.bf16.mxu0 %v23890_v3  ;;  %1488 = vmatprep.subr.bf16.mxu1 %v23892_v4  ;;  %v23979_v3 = vld [vmem:[#allocation9 + $0x38c] ss:$16 sps:$4 sm:$0xff]   ;;  %v23974_v4 = vld [vmem:[#allocation9 + $0x380] ss:$16 sps:$4 sm:$0xff]  }
 0x184   : > { %1407 = vmatpush1.bf16.msra.mxu0 %v23894_v6  ;;  %1489 = vmatpush1.bf16.msra.mxu1 %v23895_v7  ;;  %v23982_v6 = vld [vmem:[#allocation9 + $0x3a4] ss:$16 sps:$4 sm:$0xff]   ;;  %v23985_v7 = vld [vmem:[#allocation9 + $0x3ac] ss:$16 sps:$4 sm:$0xff]  }
 0x185   : > { %1408 = vmatprep.subr.bf16.mxu0 %v23896_v8  ;;  %1490 = vmatprep.subr.bf16.mxu1 %v23898_v9  ;;  %v23980_v8 = vld [vmem:[#allocation9 + $0x3a0] ss:$16 sps:$4 sm:$0xff]   ;;  %v23983_v9 = vld [vmem:[#allocation9 + $0x3a8] ss:$16 sps:$4 sm:$0xff]  }
 0x188   : > { %1409 = vmatpush1.bf16.msra.mxu0 %v23900_v11  ;;  %1491 = vmatpush1.bf16.msra.mxu1 %v23901_v12  ;;  %v23988_v11 = vld [vmem:[#allocation9 + $0x3c4] ss:$16 sps:$4 sm:$0xff]   ;;  %v23991_v12 = vld [vmem:[#allocation9 + $0x3cc] ss:$16 sps:$4 sm:$0xff]  }
 0x189   : > { %1419 = vmatprep.subr.bf16.mxu0 %v23904_v13  ;;  %1501 = vmatprep.subr.bf16.mxu1 %v23907_v14  ;;  %v23986_v13 = vld [vmem:[#allocation9 + $0x3c0] ss:$16 sps:$4 sm:$0xff]   ;;  %v23989_v14 = vld [vmem:[#allocation9 + $0x3c8] ss:$16 sps:$4 sm:$0xff]  }
 0x18b   : > { %1411 = vmatmul.mubr.bf16.vlgmr.msra.gmra.mrb[0].mxu0 %v713_v17  ;;  %1493 = vmatmul.mubr.bf16.vlgmr.msra.gmra.mrb[0].mxu1 %v713_v17  ;;  %v23992_v17 = vld [vmem:[#allocation9 + $0x3e0] ss:$16 sps:$4 sm:$0xff]  }
 0x18c   : > { %1420 = vmatpush1.bf16.msra.mxu0 %v23902_v16  ;;  %1502 = vmatpush1.bf16.msra.mxu1 %v23905_v18  ;;  %v23997_v16 = vld [vmem:[#allocation9 + $0x3ec] ss:$16 sps:$4 sm:$0xff]   ;;  %v23995_v18 = vld [vmem:[#allocation9 + $0x3e8] ss:$16 sps:$4 sm:$0xff]  }
 0x18d   : > { %1421 = vmatprep.subr.bf16.mxu0 %v23910_v19  ;;  %1503 = vmatprep.subr.bf16.mxu1 %v23913_v20  ;;  %v24001_v19 = vld [vmem:[#allocation9 + $0x404] ss:$16 sps:$4 sm:$0xff]   ;;  %v24004_v20 = vld [vmem:[#allocation9 + $0x40c] ss:$16 sps:$4 sm:$0xff]  }
 0x18e   : > { %1451 = vmatprep.mubr.bf16.mxu0 %v716_v21  ;;  %1533 = vmatprep.mubr.bf16.mxu1 %v716_v21  ;;  %v23999_v21 = vld [vmem:[#allocation9 + $0x400] ss:$16 sps:$4 sm:$0xff]  }
 0x190   : > { %1422 = vmatpush1.bf16.msra.mxu0 %v23908_v22  ;;  %1504 = vmatpush1.bf16.msra.mxu1 %v23911_v23  ;;  %v24002_v22 = vld [vmem:[#allocation9 + $0x408] ss:$16 sps:$4 sm:$0xff]   ;;  %v715_v23 = vpack.c.bf16 %v28484_v10, %v28484_v10  ;;  %v24022_v10 = vld [vmem:[#allocation9 + $0x46c] ss:$16 sps:$4 sm:$0xff]  }
 0x191   : > { %1423 = vmatprep.subr.bf16.mxu0 %v23916_v24  ;;  %1505 = vmatprep.subr.bf16.mxu1 %v23919_v25  ;;  %v24007_v24 = vld [vmem:[#allocation9 + $0x424] ss:$16 sps:$4 sm:$0xff]   ;;  %v24010_v25 = vld [vmem:[#allocation9 + $0x42c] ss:$16 sps:$4 sm:$0xff]  }
 0x194   : > { %1424 = vmatpush1.bf16.msra.mxu0 %v23914_v26  ;;  %1506 = vmatpush1.bf16.msra.mxu1 %v23917_v27  ;;  %v24005_v26 = vld [vmem:[#allocation9 + $0x420] ss:$16 sps:$4 sm:$0xff]   ;;  %v24008_v27 = vld [vmem:[#allocation9 + $0x428] ss:$16 sps:$4 sm:$0xff]  }
 0x195   : > { %1425 = vmatprep.subr.bf16.mxu0 %v23922_v28  ;;  %1507 = vmatprep.subr.bf16.mxu1 %v23925_v29  ;;  %v24013_v28 = vld [vmem:[#allocation9 + $0x444] ss:$16 sps:$4 sm:$0xff]   ;;  %v24016_v29 = vld [vmem:[#allocation9 + $0x44c] ss:$16 sps:$4 sm:$0xff]  }
 0x198   : > { %1426 = vmatpush1.bf16.msra.mxu0 %v23920_v30  ;;  %1508 = vmatpush1.bf16.msra.mxu1 %v23923_v31  ;;  %v24011_v30 = vld [vmem:[#allocation9 + $0x440] ss:$16 sps:$4 sm:$0xff]   ;;  %v24014_v31 = vld [vmem:[#allocation9 + $0x448] ss:$16 sps:$4 sm:$0xff]  }
 0x199   : > { %1427 = vmatprep.subr.bf16.mxu0 %v23928_v32  ;;  %1509 = vmatprep.subr.bf16.mxu1 %v23931_v33  ;;  %v24019_v32 = vld [vmem:[#allocation9 + $0x464] ss:$16 sps:$4 sm:$0xff]   ;;  %v24017_v33 = vld [vmem:[#allocation9 + $0x460] ss:$16 sps:$4 sm:$0xff]  }
 0x19c   : > { %1428 = vmatpush1.bf16.msra.mxu0 %v23926_v34  ;;  %1510 = vmatpush1.bf16.msra.mxu1 %v23929_v35  ;;  %v24020_v34 = vld [vmem:[#allocation9 + $0x468] ss:$16 sps:$4 sm:$0xff]   ;;  %v24025_v35 = vld [vmem:[#allocation9 + $0x484] ss:$16 sps:$4 sm:$0xff]  }
 0x19d   : > { %1429 = vmatprep.subr.bf16.mxu0 %v23934_v36  ;;  %1511 = vmatprep.subr.bf16.mxu1 %v23937_v37  ;;  %v24028_v36 = vld [vmem:[#allocation9 + $0x48c] ss:$16 sps:$4 sm:$0xff]   ;;  %v24023_v37 = vld [vmem:[#allocation9 + $0x480] ss:$16 sps:$4 sm:$0xff]  }
 0x1a0   : > { %1430 = vmatpush1.bf16.msra.mxu0 %v23932_v38  ;;  %1512 = vmatpush1.bf16.msra.mxu1 %v23935_v39  ;;  %v24026_v38 = vld [vmem:[#allocation9 + $0x488] ss:$16 sps:$4 sm:$0xff]   ;;  %v24031_v39 = vld [vmem:[#allocation9 + $0x4a4] ss:$16 sps:$4 sm:$0xff]  }
 0x1a1   : > { %1431 = vmatprep.subr.bf16.mxu0 %v23940_v40  ;;  %1513 = vmatprep.subr.bf16.mxu1 %v23943_v41  ;;  %v24034_v40 = vld [vmem:[#allocation9 + $0x4ac] ss:$16 sps:$4 sm:$0xff]   ;;  %v24029_v41 = vld [vmem:[#allocation9 + $0x4a0] ss:$16 sps:$4 sm:$0xff]  }
 0x1a4   : > { %1432 = vmatpush1.bf16.msra.mxu0 %v23938_v42  ;;  %1514 = vmatpush1.bf16.msra.mxu1 %v23941_v43  ;;  %v24032_v42 = vld [vmem:[#allocation9 + $0x4a8] ss:$16 sps:$4 sm:$0xff]   ;;  %v24037_v43 = vld [vmem:[#allocation9 + $0x4c4] ss:$16 sps:$4 sm:$0xff]  }
 0x1a5   : > { %1433 = vmatprep.subr.bf16.mxu0 %v23946_v45  ;;  %1515 = vmatprep.subr.bf16.mxu1 %v23949_v46  ;;  %v24040_v45 = vld [vmem:[#allocation9 + $0x4cc] ss:$16 sps:$4 sm:$0xff]   ;;  %v24035_v46 = vld [vmem:[#allocation9 + $0x4c0] ss:$16 sps:$4 sm:$0xff]  }
 0x1a8   : > { %1434 = vmatpush1.bf16.msra.mxu0 %v23944_v47  ;;  %1516 = vmatpush1.bf16.msra.mxu1 %v23947_v48  ;;  %v24038_v47 = vld [vmem:[#allocation9 + $0x4c8] ss:$16 sps:$4 sm:$0xff]   ;;  %v24043_v48 = vld [vmem:[#allocation9 + $0x4e4] ss:$16 sps:$4 sm:$0xff]  }
 0x1a9   : > { %1435 = vmatprep.subr.bf16.mxu0 %v23952_v49  ;;  %1517 = vmatprep.subr.bf16.mxu1 %v23955_v51  ;;  %v24046_v49 = vld [vmem:[#allocation9 + $0x4ec] ss:$16 sps:$4 sm:$0xff]   ;;  %v24041_v51 = vld [vmem:[#allocation9 + $0x4e0] ss:$16 sps:$4 sm:$0xff]  }
 0x1ac   : > { %1436 = vmatpush1.bf16.msra.mxu0 %v23950_v52  ;;  %1518 = vmatpush1.bf16.msra.mxu1 %v23953_v53  ;;  %v24044_v52 = vld [vmem:[#allocation9 + $0x4e8] ss:$16 sps:$4 sm:$0xff]   ;;  %v24049_v53 = vld [vmem:[#allocation9 + $0x504] ss:$16 sps:$4 sm:$0xff]  }
 0x1ad   : > { %1437 = vmatprep.subr.bf16.mxu0 %v23958_v54  ;;  %1519 = vmatprep.subr.bf16.mxu1 %v23961_v55  ;;  %v24052_v54 = vld [vmem:[#allocation9 + $0x50c] ss:$16 sps:$4 sm:$0xff]   ;;  %v24047_v55 = vld [vmem:[#allocation9 + $0x500] ss:$16 sps:$4 sm:$0xff]  }
 0x1b0   : > { %1438 = vmatpush1.bf16.msra.mxu0 %v23956_v56  ;;  %1520 = vmatpush1.bf16.msra.mxu1 %v23959_v57  ;;  %v24050_v56 = vld [vmem:[#allocation9 + $0x508] ss:$16 sps:$4 sm:$0xff]   ;;  %v24055_v57 = vld [vmem:[#allocation9 + $0x524] ss:$16 sps:$4 sm:$0xff]  }
 0x1b1   : > { %1439 = vmatprep.subr.bf16.mxu0 %v23964_v58  ;;  %1521 = vmatprep.subr.bf16.mxu1 %v23967_v59  ;;  %v24058_v58 = vld [vmem:[#allocation9 + $0x52c] ss:$16 sps:$4 sm:$0xff]   ;;  %v24053_v59 = vld [vmem:[#allocation9 + $0x520] ss:$16 sps:$4 sm:$0xff]  }
 0x1b4   : > { %1440 = vmatpush1.bf16.msra.mxu0 %v23962_v60  ;;  %1522 = vmatpush1.bf16.msra.mxu1 %v23965_v61  ;;  %v24056_v60 = vld [vmem:[#allocation9 + $0x528] ss:$16 sps:$4 sm:$0xff]   ;;  %v24061_v61 = vld [vmem:[#allocation9 + $0x544] ss:$16 sps:$4 sm:$0xff]  }
 0x1b5   : > { %1441 = vmatprep.subr.bf16.mxu0 %v23970_v62  ;;  %1523 = vmatprep.subr.bf16.mxu1 %v23973_v63  ;;  %v24064_v62 = vld [vmem:[#allocation9 + $0x54c] ss:$16 sps:$4 sm:$0xff]   ;;  %v24059_v63 = vld [vmem:[#allocation9 + $0x540] ss:$16 sps:$4 sm:$0xff]  }
 0x1b8   : > { %1442 = vmatpush1.bf16.msra.mxu0 %v23968_v0  ;;  %1524 = vmatpush1.bf16.msra.mxu1 %v23971_v1  ;;  %v24062_v0 = vld [vmem:[#allocation9 + $0x548] ss:$16 sps:$4 sm:$0xff]   ;;  %v24067_v1 = vld [vmem:[#allocation9 + $0x564] ss:$16 sps:$4 sm:$0xff]  }
 0x1b9   : > { %1443 = vmatprep.subr.bf16.mxu0 %v23976_v2  ;;  %1525 = vmatprep.subr.bf16.mxu1 %v23979_v3  ;;  %v24070_v2 = vld [vmem:[#allocation9 + $0x56c] ss:$16 sps:$4 sm:$0xff]   ;;  %v24065_v3 = vld [vmem:[#allocation9 + $0x560] ss:$16 sps:$4 sm:$0xff]  }
 0x1bc   : > { %1444 = vmatpush1.bf16.msra.mxu0 %v23974_v4  ;;  %1526 = vmatpush1.bf16.msra.mxu1 %v23977_v5  ;;  %v24068_v4 = vld [vmem:[#allocation9 + $0x568] ss:$16 sps:$4 sm:$0xff]   ;;  %v24073_v5 = vld [vmem:[#allocation9 + $0x584] ss:$16 sps:$4 sm:$0xff]  }
 0x1bd   : > { %1445 = vmatprep.subr.bf16.mxu0 %v23982_v6  ;;  %1527 = vmatprep.subr.bf16.mxu1 %v23985_v7  ;;  %v24076_v6 = vld [vmem:[#allocation9 + $0x58c] ss:$16 sps:$4 sm:$0xff]   ;;  %v24071_v7 = vld [vmem:[#allocation9 + $0x580] ss:$16 sps:$4 sm:$0xff]  }
 0x1c0   : > { %1446 = vmatpush1.bf16.msra.mxu0 %v23980_v8  ;;  %1528 = vmatpush1.bf16.msra.mxu1 %v23983_v9  ;;  %v24074_v8 = vld [vmem:[#allocation9 + $0x588] ss:$16 sps:$4 sm:$0xff]   ;;  %v24079_v9 = vld [vmem:[#allocation9 + $0x5a4] ss:$16 sps:$4 sm:$0xff]  }
 0x1c1   : > { %1447 = vmatprep.subr.bf16.mxu0 %v23988_v11  ;;  %1529 = vmatprep.subr.bf16.mxu1 %v23991_v12  ;;  %v24082_v11 = vld [vmem:[#allocation9 + $0x5ac] ss:$16 sps:$4 sm:$0xff]   ;;  %v24077_v12 = vld [vmem:[#allocation9 + $0x5a0] ss:$16 sps:$4 sm:$0xff]  }
 0x1c4   : > { %1448 = vmatpush1.bf16.msra.mxu0 %v23986_v13  ;;  %1530 = vmatpush1.bf16.msra.mxu1 %v23989_v14  ;;  %v24080_v13 = vld [vmem:[#allocation9 + $0x5a8] ss:$16 sps:$4 sm:$0xff]   ;;  %v24085_v14 = vld [vmem:[#allocation9 + $0x5c4] ss:$16 sps:$4 sm:$0xff]  }
 0x1c5   : > { %1449 = vmatprep.subr.bf16.mxu0 %v23994_v15  ;;  %1531 = vmatprep.subr.bf16.mxu1 %v23997_v16  ;;  %v24088_v15 = vld [vmem:[#allocation9 + $0x5cc] ss:$16 sps:$4 sm:$0xff]   ;;  %v24083_v16 = vld [vmem:[#allocation9 + $0x5c0] ss:$16 sps:$4 sm:$0xff]  }
 0x1c8   : > { %1450 = vmatpush1.bf16.msra.mxu0 %v23992_v17  ;;  %1532 = vmatpush1.bf16.msra.mxu1 %v23995_v18  ;;  %v24086_v17 = vld [vmem:[#allocation9 + $0x5c8] ss:$16 sps:$4 sm:$0xff]   ;;  %v24091_v18 = vld [vmem:[#allocation9 + $0x5e4] ss:$16 sps:$4 sm:$0xff]  }
 0x1c9   : > { %2342 = vmatprep.subr.bf16.mxu0 %v24001_v19  ;;  %2424 = vmatprep.subr.bf16.mxu1 %v24004_v20  ;;  %v24094_v19 = vld [vmem:[#allocation9 + $0x5ec] ss:$16 sps:$4 sm:$0xff]   ;;  %v24089_v20 = vld [vmem:[#allocation9 + $0x5e0] ss:$16 sps:$4 sm:$0xff]  }
 0x1cb   : > { %1452 = vmatmul.mubr.bf16.vlgmr.msra.gmra.mrb[0].mxu0 %v715_v23  ;;  %1534 = vmatmul.mubr.bf16.vlgmr.msra.gmra.mrb[0].mxu1 %v715_v23  ;;  %v24100_v23 = vld [vmem:[#allocation9 + $0x60c] ss:$16 sps:$4 sm:$0xff]  }
 0x1cc   : > { %2343 = vmatpush1.bf16.msra.mxu0 %v23999_v21  ;;  %2425 = vmatpush1.bf16.msra.mxu1 %v24002_v22  ;;  %v24092_v21 = vld [vmem:[#allocation9 + $0x5e8] ss:$16 sps:$4 sm:$0xff]   ;;  %v24097_v22 = vld [vmem:[#allocation9 + $0x604] ss:$16 sps:$4 sm:$0xff]  }
 0x1cd   : > { %2344 = vmatprep.subr.bf16.mxu0 %v24007_v24  ;;  %2426 = vmatprep.subr.bf16.mxu1 %v24010_v25  ;;  %v28491_v24 = vsub.s32 0, %v28477_v44  ;;  %v28493_v25 = vld [vmem:[#allocation10] sm:$0xf] }
 0x1d0   : > { %2345 = vmatpush1.bf16.msra.mxu0 %v24005_v26  ;;  %2427 = vmatpush1.bf16.msra.mxu1 %v24008_v27  ;;  %v28496_v26 = vsub.s32 1, %v28477_v44  ;;  %v28499_v27 = vsub.s32 3, %v28477_v44 }
 0x1d1   : > { %2346 = vmatprep.subr.bf16.mxu0 %v24013_v28  ;;  %2428 = vmatprep.subr.bf16.mxu1 %v24016_v29  ;;  %v721_v28 = vrot.slane %v28493_v25, %v28491_v24 }
 0x1d2   : > { %v725_v29 = vrot.slane %v28493_v25, %v28496_v26 }
 0x1d4   : > { %2347 = vmatpush1.bf16.msra.mxu0 %v24011_v30  ;;  %2429 = vmatpush1.bf16.msra.mxu1 %v24014_v31  ;;  %v733_v30 = vrot.slane %v28493_v25, %v28499_v27 }
 0x1d5   : > { %2348 = vmatprep.subr.bf16.mxu0 %v24019_v32  ;;  %2430 = vmatprep.subr.bf16.mxu1 %v24022_v10 }
 0x1d8   : > { %2349 = vmatpush1.bf16.msra.mxu0 %v24017_v33  ;;  %2431 = vmatpush1.bf16.msra.mxu1 %v24020_v34 }
 0x1d9   : > { %2350 = vmatprep.subr.bf16.mxu0 %v24025_v35  ;;  %2432 = vmatprep.subr.bf16.mxu1 %v24028_v36 }
 0x1dc   : > { %2351 = vmatpush1.bf16.msra.mxu0 %v24023_v37  ;;  %2433 = vmatpush1.bf16.msra.mxu1 %v24026_v38 }
 0x1dd   : > { %2352 = vmatprep.subr.bf16.mxu0 %v24031_v39  ;;  %2434 = vmatprep.subr.bf16.mxu1 %v24034_v40 }
 0x1e0   : > { %2353 = vmatpush1.bf16.msra.mxu0 %v24029_v41  ;;  %2435 = vmatpush1.bf16.msra.mxu1 %v24032_v42 }
 0x1e1   : > { %2354 = vmatprep.subr.bf16.mxu0 %v24037_v43  ;;  %2436 = vmatprep.subr.bf16.mxu1 %v24040_v45 }
 0x1e4   : > { %2355 = vmatpush1.bf16.msra.mxu0 %v24035_v46  ;;  %2437 = vmatpush1.bf16.msra.mxu1 %v24038_v47  ;;  %v24095_v46 = vld [vmem:[#allocation9 + $0x600] ss:$16 sps:$4 sm:$0xff]   ;;  %v24098_v47 = vld [vmem:[#allocation9 + $0x608] ss:$16 sps:$4 sm:$0xff]  }
 0x1e5   : > { %2356 = vmatprep.subr.bf16.mxu0 %v24043_v48  ;;  %2438 = vmatprep.subr.bf16.mxu1 %v24046_v49  ;;  %v24103_v49 = vld [vmem:[#allocation9 + $0x624] ss:$16 sps:$4 sm:$0xff]  }
 0x1e8   : > { %2357 = vmatpush1.bf16.msra.mxu0 %v24041_v51  ;;  %2439 = vmatpush1.bf16.msra.mxu1 %v24044_v52  ;;  %v24106_v51 = vld [vmem:[#allocation9 + $0x62c] ss:$16 sps:$4 sm:$0xff]  }
 0x1e9   : > { %2358 = vmatprep.subr.bf16.mxu0 %v24049_v53  ;;  %2440 = vmatprep.subr.bf16.mxu1 %v24052_v54  ;;  %v24101_v53 = vld [vmem:[#allocation9 + $0x620] ss:$16 sps:$4 sm:$0xff]   ;;  %v24104_v54 = vld [vmem:[#allocation9 + $0x628] ss:$16 sps:$4 sm:$0xff]  }
 0x1ec   : > { %2359 = vmatpush1.bf16.msra.mxu0 %v24047_v55  ;;  %2441 = vmatpush1.bf16.msra.mxu1 %v24050_v56  ;;  %v24109_v55 = vld [vmem:[#allocation9 + $0x644] ss:$16 sps:$4 sm:$0xff]   ;;  %v24112_v56 = vld [vmem:[#allocation9 + $0x64c] ss:$16 sps:$4 sm:$0xff]  }
 0x1ed   : > { %2360 = vmatprep.subr.bf16.mxu0 %v24055_v57  ;;  %2442 = vmatprep.subr.bf16.mxu1 %v24058_v58  ;;  %v24107_v57 = vld [vmem:[#allocation9 + $0x640] ss:$16 sps:$4 sm:$0xff]   ;;  %v24110_v58 = vld [vmem:[#allocation9 + $0x648] ss:$16 sps:$4 sm:$0xff]  }
 0x1f0   : > { %2361 = vmatpush1.bf16.msra.mxu0 %v24053_v59  ;;  %2443 = vmatpush1.bf16.msra.mxu1 %v24056_v60  ;;  %v24115_v59 = vld [vmem:[#allocation9 + $0x664] ss:$16 sps:$4 sm:$0xff]   ;;  %v24118_v60 = vld [vmem:[#allocation9 + $0x66c] ss:$16 sps:$4 sm:$0xff]  }
 0x1f1   : > { %2362 = vmatprep.subr.bf16.mxu0 %v24061_v61  ;;  %2444 = vmatprep.subr.bf16.mxu1 %v24064_v62  ;;  %v24113_v61 = vld [vmem:[#allocation9 + $0x660] ss:$16 sps:$4 sm:$0xff]   ;;  %v24116_v62 = vld [vmem:[#allocation9 + $0x668] ss:$16 sps:$4 sm:$0xff]  }
 0x1f4   : > { %2363 = vmatpush1.bf16.msra.mxu0 %v24059_v63  ;;  %2445 = vmatpush1.bf16.msra.mxu1 %v24062_v0  ;;  %v24121_v63 = vld [vmem:[#allocation9 + $0x684] ss:$16 sps:$4 sm:$0xff]   ;;  %v24124_v0 = vld [vmem:[#allocation9 + $0x68c] ss:$16 sps:$4 sm:$0xff]  }
 0x1f5   : > { %2364 = vmatprep.subr.bf16.mxu0 %v24067_v1  ;;  %2446 = vmatprep.subr.bf16.mxu1 %v24070_v2  ;;  %v24119_v1 = vld [vmem:[#allocation9 + $0x680] ss:$16 sps:$4 sm:$0xff]   ;;  %v24122_v2 = vld [vmem:[#allocation9 + $0x688] ss:$16 sps:$4 sm:$0xff]  }
 0x1f8   : > { %2365 = vmatpush1.bf16.msra.mxu0 %v24065_v3  ;;  %2447 = vmatpush1.bf16.msra.mxu1 %v24068_v4  ;;  %v24127_v3 = vld [vmem:[#allocation9 + $0x6a4] ss:$16 sps:$4 sm:$0xff]   ;;  %v24130_v4 = vld [vmem:[#allocation9 + $0x6ac] ss:$16 sps:$4 sm:$0xff]  }
 0x1f9   : > { %2366 = vmatprep.subr.bf16.mxu0 %v24073_v5  ;;  %2448 = vmatprep.subr.bf16.mxu1 %v24076_v6  ;;  %v24125_v5 = vld [vmem:[#allocation9 + $0x6a0] ss:$16 sps:$4 sm:$0xff]   ;;  %v24128_v6 = vld [vmem:[#allocation9 + $0x6a8] ss:$16 sps:$4 sm:$0xff]  }
 0x1fc   : > { %2367 = vmatpush1.bf16.msra.mxu0 %v24071_v7  ;;  %2449 = vmatpush1.bf16.msra.mxu1 %v24074_v8  ;;  %v24133_v7 = vld [vmem:[#allocation9 + $0x6c4] ss:$16 sps:$4 sm:$0xff]   ;;  %v24136_v8 = vld [vmem:[#allocation9 + $0x6cc] ss:$16 sps:$4 sm:$0xff]  }
 0x1fd   : > { %2368 = vmatprep.subr.bf16.mxu0 %v24079_v9  ;;  %2450 = vmatprep.subr.bf16.mxu1 %v24082_v11  ;;  %v24131_v9 = vld [vmem:[#allocation9 + $0x6c0] ss:$16 sps:$4 sm:$0xff]   ;;  %v24134_v11 = vld [vmem:[#allocation9 + $0x6c8] ss:$16 sps:$4 sm:$0xff]  }
 0x200   : > { %2369 = vmatpush1.bf16.msra.mxu0 %v24077_v12  ;;  %2451 = vmatpush1.bf16.msra.mxu1 %v24080_v13  ;;  %v24139_v12 = vld [vmem:[#allocation9 + $0x6e4] ss:$16 sps:$4 sm:$0xff]   ;;  %v24142_v13 = vld [vmem:[#allocation9 + $0x6ec] ss:$16 sps:$4 sm:$0xff]  }
 0x201   : > { %2370 = vmatprep.subr.bf16.mxu0 %v24085_v14  ;;  %2452 = vmatprep.subr.bf16.mxu1 %v24088_v15  ;;  %v24137_v14 = vld [vmem:[#allocation9 + $0x6e0] ss:$16 sps:$4 sm:$0xff]   ;;  %v24140_v15 = vld [vmem:[#allocation9 + $0x6e8] ss:$16 sps:$4 sm:$0xff]  }
 0x204   : > { %2371 = vmatpush1.bf16.msra.mxu0 %v24083_v16  ;;  %2453 = vmatpush1.bf16.msra.mxu1 %v24086_v17  ;;  %v24145_v16 = vld [vmem:[#allocation9 + $0x704] ss:$16 sps:$4 sm:$0xff]   ;;  %v24148_v17 = vld [vmem:[#allocation9 + $0x70c] ss:$16 sps:$4 sm:$0xff]  }
 0x205   : > { %2372 = vmatprep.subr.bf16.mxu0 %v24091_v18  ;;  %2454 = vmatprep.subr.bf16.mxu1 %v24094_v19  ;;  %v24143_v18 = vld [vmem:[#allocation9 + $0x700] ss:$16 sps:$4 sm:$0xff]   ;;  %v24146_v19 = vld [vmem:[#allocation9 + $0x708] ss:$16 sps:$4 sm:$0xff]  }
 0x208   : > { %2373 = vmatpush1.bf16.msra.mxu0 %v24089_v20  ;;  %2455 = vmatpush1.bf16.msra.mxu1 %v24092_v21  ;;  %v24151_v20 = vld [vmem:[#allocation9 + $0x724] ss:$16 sps:$4 sm:$0xff]   ;;  %v24154_v21 = vld [vmem:[#allocation9 + $0x72c] ss:$16 sps:$4 sm:$0xff]  }
 0x209   : > { %2383 = vmatprep.subr.bf16.mxu0 %v24097_v22  ;;  %2465 = vmatprep.subr.bf16.mxu1 %v24100_v23  ;;  %v24149_v22 = vld [vmem:[#allocation9 + $0x720] ss:$16 sps:$4 sm:$0xff]   ;;  %v24152_v23 = vld [vmem:[#allocation9 + $0x728] ss:$16 sps:$4 sm:$0xff]  }
 0x29e   : > { %v1453_v31 = vpop.f32.mrb[0].mxu0  ;;  %v28507_v32 = vpop.f32.mrb[0].mxu1 }
 0x29f   : > { %v23377_v10 = vadd.f32 %v1453_v31, %v721_v28  ;;  %v1455_v33 = vpop.f32.mrb[1].mxu0  ;;  %v1537_v34 = vpop.f32.mrb[1].mxu1  ;;  %v24157_v28 = vld [vmem:[#allocation9 + $0x744] ss:$16 sps:$4 sm:$0xff]   ;;  %v24158_v31 = vld [vmem:[#allocation9 + $0x748] ss:$16 sps:$4 sm:$0xff]  }
 0x2a0   : > { %v23378_v35 = vadd.f32 %v1455_v33, %v725_v29  ;;  %v23380_v36 = vadd.f32 %v1537_v34, %v733_v30  ;;  %v1457_v37 = vpop.f32.mrb[2].mxu0  ;;  %v1539_v38 = vpop.f32.mrb[2].mxu1  ;;  %v24160_v29 = vld [vmem:[#allocation9 + $0x74c] ss:$16 sps:$4 sm:$0xff]   ;;  %v24155_v30 = vld [vmem:[#allocation9 + $0x740] ss:$16 sps:$4 sm:$0xff]  }
 0x2a1   : > { %v1542_v39 = vmax.f32 %v23377_v10, 0.0  ;;  %v1458_v40 = vpop.f32.mrb[3].mxu0  ;;  %v1540_v41 = vpop.f32.mrb[3].mxu1  ;;  %v24163_v10 = vld [vmem:[#allocation9 + $0x764] ss:$16 sps:$4 sm:$0xff]  }
 0x2a2   : > { %v1543_v42 = vmax.f32 %v23378_v35, 0.0  ;;  %v1545_v43 = vmax.f32 %v23380_v36, 0.0  ;;  %v24166_v33 = vld [vmem:[#allocation9 + $0x76c] ss:$16 sps:$4 sm:$0xff]   ;;  %v24161_v34 = vld [vmem:[#allocation9 + $0x760] ss:$16 sps:$4 sm:$0xff]  }
 0x2a3   : > { %v1677_v48 = vpack.c.bf16 %v1542_v39, %v1542_v39  ;;  %v24164_v35 = vld [vmem:[#allocation9 + $0x768] ss:$16 sps:$4 sm:$0xff]   ;;  %v24169_v36 = vld [vmem:[#allocation9 + $0x784] ss:$16 sps:$4 sm:$0xff]   ;;  %v24172_v37 = vld [vmem:[#allocation9 + $0x78c] ss:$16 sps:$4 sm:$0xff]  }
 0x2a4   : > { %v1678_v45 = vpack.c.bf16 %v1543_v42, %v1543_v42  ;;  %v1680_v52 = vpack.c.bf16 %v1545_v43, %v1545_v43  ;;  %v24167_v38 = vld [vmem:[#allocation9 + $0x780] ss:$16 sps:$4 sm:$0xff]   ;;  %v24170_v39 = vld [vmem:[#allocation9 + $0x788] ss:$16 sps:$4 sm:$0xff]   ;;  %v28510_v40 = vsub.s32 2, %v28477_v44 }
 0x2a5   : > { %v24175_v41 = vld [vmem:[#allocation9 + $0x7a4] ss:$16 sps:$4 sm:$0xff]   ;;  %v24178_v42 = vld [vmem:[#allocation9 + $0x7ac] ss:$16 sps:$4 sm:$0xff]   ;;  %v24173_v43 = vld [vmem:[#allocation9 + $0x7a0] ss:$16 sps:$4 sm:$0xff]  }
 0x2a6   : > { %2374 = vmatprep.mubr.bf16.mxu0 %v1678_v45  ;;  %2456 = vmatprep.mubr.bf16.mxu1 %v1678_v45  ;;  %v24176_v45 = vld [vmem:[#allocation9 + $0x7a8] ss:$16 sps:$4 sm:$0xff]  }
 0x2a7   : > { %2375 = vmatmul.mubr.bf16.vlgmr.msra.gmra.mrb[4].mxu0 %v1677_v48  ;;  %2457 = vmatmul.mubr.bf16.vlgmr.msra.gmra.mrb[4].mxu1 %v1677_v48  ;;  %v24184_v48 = vld [vmem:[#allocation9 + $0x7cc] ss:$16 sps:$4 sm:$0xff]   ;;  %v24182_v44 = vld [vmem:[#allocation9 + $0x7c8] ss:$16 sps:$4 sm:$0xff]  }
 0x2a8   : > { %2384 = vmatpush1.bf16.msra.mxu0 %v24095_v46  ;;  %2466 = vmatpush1.bf16.msra.mxu1 %v24098_v47  ;;  %v729_v46 = vrot.slane %v28493_v25, %v28510_v40  ;;  %v24181_v47 = vld [vmem:[#allocation9 + $0x7c4] ss:$16 sps:$4 sm:$0xff]  }
 0x2a9   : > { %2415 = vmatprep.mubr.bf16.mxu0 %v1680_v52  ;;  %2497 = vmatprep.mubr.bf16.mxu1 %v1680_v52  ;;  %v24187_v52 = vld [vmem:[#allocation9 + $0x7e4] ss:$16 sps:$4 sm:$0xff]  }
 0x2aa   : > { %2385 = vmatprep.subr.bf16.mxu0 %v24103_v49  ;;  %2467 = vmatprep.subr.bf16.mxu1 %v24106_v51  ;;  %v24179_v49 = vld [vmem:[#allocation9 + $0x7c0] ss:$16 sps:$4 sm:$0xff]   ;;  %v23379_v51 = vadd.f32 %v28507_v32, %v729_v46  ;;  %v24193_v25 = vld [vmem:[#allocation9 + $0x804] ss:$16 sps:$4 sm:$0xff]   ;;  %v24260_v46 = vld [vmem:[#allocation9 + $0x968] ss:$16 sps:$4 sm:$0xff]  }
 0x2ab   : > { %v24199_v32 = vld [vmem:[#allocation9 + $0x824] ss:$16 sps:$4 sm:$0xff]  }
 0x2ac   : > { %2386 = vmatpush1.bf16.msra.mxu0 %v24101_v53  ;;  %2468 = vmatpush1.bf16.msra.mxu1 %v24104_v54  ;;  %v24190_v53 = vld [vmem:[#allocation9 + $0x7ec] ss:$16 sps:$4 sm:$0xff]   ;;  %v24185_v54 = vld [vmem:[#allocation9 + $0x7e0] ss:$16 sps:$4 sm:$0xff]  }
 0x2ad   : > { %2387 = vmatprep.subr.bf16.mxu0 %v24109_v55  ;;  %2469 = vmatprep.subr.bf16.mxu1 %v24112_v56  ;;  %v24188_v55 = vld [vmem:[#allocation9 + $0x7e8] ss:$16 sps:$4 sm:$0xff]   ;;  %v1544_v56 = vmax.f32 %v23379_v51, 0.0  ;;  %v24271_v51 = vld [vmem:[#allocation9 + $0x9a4] ss:$16 sps:$4 sm:$0xff]  }
 0x2b0   : > { %2388 = vmatpush1.bf16.msra.mxu0 %v24107_v57  ;;  %2470 = vmatpush1.bf16.msra.mxu1 %v24110_v58  ;;  %v24196_v57 = vld [vmem:[#allocation9 + $0x80c] ss:$16 sps:$4 sm:$0xff]   ;;  %v24191_v58 = vld [vmem:[#allocation9 + $0x800] ss:$16 sps:$4 sm:$0xff]  }
 0x2b1   : > { %2389 = vmatprep.subr.bf16.mxu0 %v24115_v59  ;;  %2471 = vmatprep.subr.bf16.mxu1 %v24118_v60  ;;  %v24194_v59 = vld [vmem:[#allocation9 + $0x808] ss:$16 sps:$4 sm:$0xff]   ;;  %v1679_v60 = vpack.c.bf16 %v1544_v56, %v1544_v56  ;;  %v24280_v56 = vld [vmem:[#allocation9 + $0x9cc] ss:$16 sps:$4 sm:$0xff]  }
 0x2b4   : > { %2390 = vmatpush1.bf16.msra.mxu0 %v24113_v61  ;;  %2472 = vmatpush1.bf16.msra.mxu1 %v24116_v62  ;;  %v24202_v61 = vld [vmem:[#allocation9 + $0x82c] ss:$16 sps:$4 sm:$0xff]   ;;  %v24197_v62 = vld [vmem:[#allocation9 + $0x820] ss:$16 sps:$4 sm:$0xff]  }
 0x2b5   : > { %2391 = vmatprep.subr.bf16.mxu0 %v24121_v63  ;;  %2473 = vmatprep.subr.bf16.mxu1 %v24124_v0  ;;  %v24200_v63 = vld [vmem:[#allocation9 + $0x828] ss:$16 sps:$4 sm:$0xff]   ;;  %v24205_v0 = vld [vmem:[#allocation9 + $0x844] ss:$16 sps:$4 sm:$0xff]  }
 0x2b8   : > { %2392 = vmatpush1.bf16.msra.mxu0 %v24119_v1  ;;  %2474 = vmatpush1.bf16.msra.mxu1 %v24122_v2  ;;  %v24208_v1 = vld [vmem:[#allocation9 + $0x84c] ss:$16 sps:$4 sm:$0xff]   ;;  %v24203_v2 = vld [vmem:[#allocation9 + $0x840] ss:$16 sps:$4 sm:$0xff]  }
 0x2b9   : > { %2393 = vmatprep.subr.bf16.mxu0 %v24127_v3  ;;  %2475 = vmatprep.subr.bf16.mxu1 %v24130_v4  ;;  %v24206_v3 = vld [vmem:[#allocation9 + $0x848] ss:$16 sps:$4 sm:$0xff]   ;;  %v24211_v4 = vld [vmem:[#allocation9 + $0x864] ss:$16 sps:$4 sm:$0xff]  }
 0x2bc   : > { %2394 = vmatpush1.bf16.msra.mxu0 %v24125_v5  ;;  %2476 = vmatpush1.bf16.msra.mxu1 %v24128_v6  ;;  %v24214_v5 = vld [vmem:[#allocation9 + $0x86c] ss:$16 sps:$4 sm:$0xff]   ;;  %v24209_v6 = vld [vmem:[#allocation9 + $0x860] ss:$16 sps:$4 sm:$0xff]  }
 0x2bd   : > { %2395 = vmatprep.subr.bf16.mxu0 %v24133_v7  ;;  %2477 = vmatprep.subr.bf16.mxu1 %v24136_v8  ;;  %v24212_v7 = vld [vmem:[#allocation9 + $0x868] ss:$16 sps:$4 sm:$0xff]   ;;  %v24217_v8 = vld [vmem:[#allocation9 + $0x884] ss:$16 sps:$4 sm:$0xff]  }
 0x2c0   : > { %2396 = vmatpush1.bf16.msra.mxu0 %v24131_v9  ;;  %2478 = vmatpush1.bf16.msra.mxu1 %v24134_v11  ;;  %v24220_v9 = vld [vmem:[#allocation9 + $0x88c] ss:$16 sps:$4 sm:$0xff]   ;;  %v24215_v11 = vld [vmem:[#allocation9 + $0x880] ss:$16 sps:$4 sm:$0xff]  }
 0x2c1   : > { %2397 = vmatprep.subr.bf16.mxu0 %v24139_v12  ;;  %2479 = vmatprep.subr.bf16.mxu1 %v24142_v13  ;;  %v24218_v12 = vld [vmem:[#allocation9 + $0x888] ss:$16 sps:$4 sm:$0xff]   ;;  %v24223_v13 = vld [vmem:[#allocation9 + $0x8a4] ss:$16 sps:$4 sm:$0xff]  }
 0x2c4   : > { %2398 = vmatpush1.bf16.msra.mxu0 %v24137_v14  ;;  %2480 = vmatpush1.bf16.msra.mxu1 %v24140_v15  ;;  %v24226_v14 = vld [vmem:[#allocation9 + $0x8ac] ss:$16 sps:$4 sm:$0xff]   ;;  %v24221_v15 = vld [vmem:[#allocation9 + $0x8a0] ss:$16 sps:$4 sm:$0xff]  }
 0x2c5   : > { %2399 = vmatprep.subr.bf16.mxu0 %v24145_v16  ;;  %2481 = vmatprep.subr.bf16.mxu1 %v24148_v17  ;;  %v24224_v16 = vld [vmem:[#allocation9 + $0x8a8] ss:$16 sps:$4 sm:$0xff]   ;;  %v24229_v17 = vld [vmem:[#allocation9 + $0x8c4] ss:$16 sps:$4 sm:$0xff]  }
 0x2c8   : > { %2400 = vmatpush1.bf16.msra.mxu0 %v24143_v18  ;;  %2482 = vmatpush1.bf16.msra.mxu1 %v24146_v19  ;;  %v24232_v18 = vld [vmem:[#allocation9 + $0x8cc] ss:$16 sps:$4 sm:$0xff]   ;;  %v24227_v19 = vld [vmem:[#allocation9 + $0x8c0] ss:$16 sps:$4 sm:$0xff]  }
 0x2c9   : > { %2401 = vmatprep.subr.bf16.mxu0 %v24151_v20  ;;  %2483 = vmatprep.subr.bf16.mxu1 %v24154_v21  ;;  %v24230_v20 = vld [vmem:[#allocation9 + $0x8c8] ss:$16 sps:$4 sm:$0xff]   ;;  %v24235_v21 = vld [vmem:[#allocation9 + $0x8e4] ss:$16 sps:$4 sm:$0xff]  }
 0x2cc   : > { %2402 = vmatpush1.bf16.msra.mxu0 %v24149_v22  ;;  %2484 = vmatpush1.bf16.msra.mxu1 %v24152_v23  ;;  %v24238_v22 = vld [vmem:[#allocation9 + $0x8ec] ss:$16 sps:$4 sm:$0xff]   ;;  %v24233_v23 = vld [vmem:[#allocation9 + $0x8e0] ss:$16 sps:$4 sm:$0xff]  }
 0x2cd   : > { %2403 = vmatprep.subr.bf16.mxu0 %v24157_v28  ;;  %2485 = vmatprep.subr.bf16.mxu1 %v24160_v29  ;;  %v24236_v28 = vld [vmem:[#allocation9 + $0x8e8] ss:$16 sps:$4 sm:$0xff]   ;;  %v24241_v29 = vld [vmem:[#allocation9 + $0x904] ss:$16 sps:$4 sm:$0xff]  }
 0x2d0   : > { %2404 = vmatpush1.bf16.msra.mxu0 %v24155_v30  ;;  %2486 = vmatpush1.bf16.msra.mxu1 %v24158_v31  ;;  %v24244_v30 = vld [vmem:[#allocation9 + $0x90c] ss:$16 sps:$4 sm:$0xff]   ;;  %v24239_v31 = vld [vmem:[#allocation9 + $0x900] ss:$16 sps:$4 sm:$0xff]  }
 0x2d1   : > { %2405 = vmatprep.subr.bf16.mxu0 %v24163_v10  ;;  %2487 = vmatprep.subr.bf16.mxu1 %v24166_v33  ;;  %v24242_v10 = vld [vmem:[#allocation9 + $0x908] ss:$16 sps:$4 sm:$0xff]   ;;  %v24247_v33 = vld [vmem:[#allocation9 + $0x924] ss:$16 sps:$4 sm:$0xff]  }
 0x2d4   : > { %2406 = vmatpush1.bf16.msra.mxu0 %v24161_v34  ;;  %2488 = vmatpush1.bf16.msra.mxu1 %v24164_v35  ;;  %v24250_v34 = vld [vmem:[#allocation9 + $0x92c] ss:$16 sps:$4 sm:$0xff]   ;;  %v24245_v35 = vld [vmem:[#allocation9 + $0x920] ss:$16 sps:$4 sm:$0xff]  }
 0x2d5   : > { %2407 = vmatprep.subr.bf16.mxu0 %v24169_v36  ;;  %2489 = vmatprep.subr.bf16.mxu1 %v24172_v37  ;;  %v24248_v36 = vld [vmem:[#allocation9 + $0x928] ss:$16 sps:$4 sm:$0xff]   ;;  %v24253_v37 = vld [vmem:[#allocation9 + $0x944] ss:$16 sps:$4 sm:$0xff]  }
 0x2d8   : > { %2408 = vmatpush1.bf16.msra.mxu0 %v24167_v38  ;;  %2490 = vmatpush1.bf16.msra.mxu1 %v24170_v39  ;;  %v24256_v38 = vld [vmem:[#allocation9 + $0x94c] ss:$16 sps:$4 sm:$0xff]   ;;  %v24251_v39 = vld [vmem:[#allocation9 + $0x940] ss:$16 sps:$4 sm:$0xff]  }
 0x2d9   : > { %2409 = vmatprep.subr.bf16.mxu0 %v24175_v41  ;;  %2491 = vmatprep.subr.bf16.mxu1 %v24178_v42  ;;  %v24254_v41 = vld [vmem:[#allocation9 + $0x948] ss:$16 sps:$4 sm:$0xff]   ;;  %v24259_v42 = vld [vmem:[#allocation9 + $0x964] ss:$16 sps:$4 sm:$0xff]  }
 0x2dc   : > { %2410 = vmatpush1.bf16.msra.mxu0 %v24173_v43  ;;  %2492 = vmatpush1.bf16.msra.mxu1 %v24176_v45  ;;  %v24262_v43 = vld [vmem:[#allocation9 + $0x96c] ss:$16 sps:$4 sm:$0xff]   ;;  %v24257_v45 = vld [vmem:[#allocation9 + $0x960] ss:$16 sps:$4 sm:$0xff]  }
 0x2dd   : > { %2411 = vmatprep.subr.bf16.mxu0 %v24181_v47  ;;  %2493 = vmatprep.subr.bf16.mxu1 %v24184_v48  ;;  %v24265_v47 = vld [vmem:[#allocation9 + $0x984] ss:$16 sps:$4 sm:$0xff]   ;;  %v24268_v48 = vld [vmem:[#allocation9 + $0x98c] ss:$16 sps:$4 sm:$0xff]  }
 0x2e0   : > { %2412 = vmatpush1.bf16.msra.mxu0 %v24179_v49  ;;  %2494 = vmatpush1.bf16.msra.mxu1 %v24182_v44  ;;  %v24263_v49 = vld [vmem:[#allocation9 + $0x980] ss:$16 sps:$4 sm:$0xff]   ;;  %v24266_v44 = vld [vmem:[#allocation9 + $0x988] ss:$16 sps:$4 sm:$0xff]  }
 0x2e1   : > { %2413 = vmatprep.subr.bf16.mxu0 %v24187_v52  ;;  %2495 = vmatprep.subr.bf16.mxu1 %v24190_v53  ;;  %v24274_v52 = vld [vmem:[#allocation9 + $0x9ac] ss:$16 sps:$4 sm:$0xff]   ;;  %v24269_v53 = vld [vmem:[#allocation9 + $0x9a0] ss:$16 sps:$4 sm:$0xff]  }
 0x2e4   : > { %2414 = vmatpush1.bf16.msra.mxu0 %v24185_v54  ;;  %2496 = vmatpush1.bf16.msra.mxu1 %v24188_v55  ;;  %v24272_v54 = vld [vmem:[#allocation9 + $0x9a8] ss:$16 sps:$4 sm:$0xff]   ;;  %v24277_v55 = vld [vmem:[#allocation9 + $0x9c4] ss:$16 sps:$4 sm:$0xff]  }
 0x2e5   : > { %3348 = vmatprep.subr.bf16.mxu0 %v24193_v25  ;;  %3430 = vmatprep.subr.bf16.mxu1 %v24196_v57  ;;  %v24275_v25 = vld [vmem:[#allocation9 + $0x9c0] ss:$16 sps:$4 sm:$0xff]   ;;  %v24278_v57 = vld [vmem:[#allocation9 + $0x9c8] ss:$16 sps:$4 sm:$0xff]  }
 0x2e7   : > { %2416 = vmatmul.mubr.bf16.vlgmr.msra.gmra.mrb[4].mxu0 %v1679_v60  ;;  %2498 = vmatmul.mubr.bf16.vlgmr.msra.gmra.mrb[4].mxu1 %v1679_v60  ;;  %v24284_v60 = vld [vmem:[#allocation9 + $0x9e8] ss:$16 sps:$4 sm:$0xff]  }
 0x2e8   : > { %3349 = vmatpush1.bf16.msra.mxu0 %v24191_v58  ;;  %3431 = vmatpush1.bf16.msra.mxu1 %v24194_v59  ;;  %v24283_v58 = vld [vmem:[#allocation9 + $0x9e4] ss:$16 sps:$4 sm:$0xff]   ;;  %v24281_v59 = vld [vmem:[#allocation9 + $0x9e0] ss:$16 sps:$4 sm:$0xff]  }
 0x2e9   : > { %3350 = vmatprep.subr.bf16.mxu0 %v24199_v32  ;;  %3432 = vmatprep.subr.bf16.mxu1 %v24202_v61  ;;  %v24286_v32 = vld [vmem:[#allocation9 + $0x9ec] ss:$16 sps:$4 sm:$0xff]   ;;  %v24289_v61 = vld [vmem:[#allocation9 + $0xa04] ss:$16 sps:$4 sm:$0xff]  }
 0x2ec   : > { %3351 = vmatpush1.bf16.msra.mxu0 %v24197_v62  ;;  %3433 = vmatpush1.bf16.msra.mxu1 %v24200_v63  ;;  %v24292_v62 = vld [vmem:[#allocation9 + $0xa0c] ss:$16 sps:$4 sm:$0xff]   ;;  %v1676_v63 = vld [vmem:[#allocation10 + $0x4] sm:$0xf] }
 0x2ed   : > { %3352 = vmatprep.subr.bf16.mxu0 %v24205_v0  ;;  %3434 = vmatprep.subr.bf16.mxu1 %v24208_v1  ;;  %v1685_v0 = vrot.slane %v1676_v63, %v28491_v24  ;;  %v1693_v1 = vrot.slane %v1676_v63, %v28510_v40 }
 0x2f0   : > { %3353 = vmatpush1.bf16.msra.mxu0 %v24203_v2  ;;  %3435 = vmatpush1.bf16.msra.mxu1 %v24206_v3  ;;  %v1689_v2 = vrot.slane %v1676_v63, %v28496_v26  ;;  %v1697_v3 = vrot.slane %v1676_v63, %v28499_v27  ;;  %v24331_v63 = vld [vmem:[#allocation9 + $0xae4] ss:$16 sps:$4 sm:$0xff]  }
 0x2f1   : > { %3354 = vmatprep.subr.bf16.mxu0 %v24211_v4  ;;  %3436 = vmatprep.subr.bf16.mxu1 %v24214_v5 }
 0x2f4   : > { %3355 = vmatpush1.bf16.msra.mxu0 %v24209_v6  ;;  %3437 = vmatpush1.bf16.msra.mxu1 %v24212_v7 }
 0x2f5   : > { %3356 = vmatprep.subr.bf16.mxu0 %v24217_v8  ;;  %3438 = vmatprep.subr.bf16.mxu1 %v24220_v9 }
 0x2f8   : > { %3357 = vmatpush1.bf16.msra.mxu0 %v24215_v11  ;;  %3439 = vmatpush1.bf16.msra.mxu1 %v24218_v12 }
 0x2f9   : > { %3358 = vmatprep.subr.bf16.mxu0 %v24223_v13  ;;  %3440 = vmatprep.subr.bf16.mxu1 %v24226_v14 }
 0x2fc   : > { %3359 = vmatpush1.bf16.msra.mxu0 %v24221_v15  ;;  %3441 = vmatpush1.bf16.msra.mxu1 %v24224_v16 }
 0x2fd   : > { %3360 = vmatprep.subr.bf16.mxu0 %v24229_v17  ;;  %3442 = vmatprep.subr.bf16.mxu1 %v24232_v18 }
 0x300   : > { %3361 = vmatpush1.bf16.msra.mxu0 %v24227_v19  ;;  %3443 = vmatpush1.bf16.msra.mxu1 %v24230_v20 }
 0x301   : > { %3362 = vmatprep.subr.bf16.mxu0 %v24235_v21  ;;  %3444 = vmatprep.subr.bf16.mxu1 %v24238_v22  ;;  %v24575_v22 = vld [vmem:[#allocation5] sm:$0xff] }
 0x304   : > { %3363 = vmatpush1.bf16.msra.mxu0 %v24233_v23  ;;  %3445 = vmatpush1.bf16.msra.mxu1 %v24236_v28 }
 0x305   : > { %3364 = vmatprep.subr.bf16.mxu0 %v24241_v29  ;;  %3446 = vmatprep.subr.bf16.mxu1 %v24244_v30 }
 0x308   : > { %3365 = vmatpush1.bf16.msra.mxu0 %v24239_v31  ;;  %3447 = vmatpush1.bf16.msra.mxu1 %v24242_v10 }
 0x309   : > { %3366 = vmatprep.subr.bf16.mxu0 %v24247_v33  ;;  %3448 = vmatprep.subr.bf16.mxu1 %v24250_v34  ;;  %v24287_v34 = vld [vmem:[#allocation9 + $0xa00] ss:$16 sps:$4 sm:$0xff]  }
 0x30c   : > { %3367 = vmatpush1.bf16.msra.mxu0 %v24245_v35  ;;  %3449 = vmatpush1.bf16.msra.mxu1 %v24248_v36  ;;  %v24290_v35 = vld [vmem:[#allocation9 + $0xa08] ss:$16 sps:$4 sm:$0xff]  }
 0x30d   : > { %3368 = vmatprep.subr.bf16.mxu0 %v24253_v37  ;;  %3450 = vmatprep.subr.bf16.mxu1 %v24256_v38 }
 0x310   : > { %3369 = vmatpush1.bf16.msra.mxu0 %v24251_v39  ;;  %3451 = vmatpush1.bf16.msra.mxu1 %v24254_v41  ;;  %v24295_v39 = vld [vmem:[#allocation9 + $0xa24] ss:$16 sps:$4 sm:$0xff]   ;;  %v24298_v41 = vld [vmem:[#allocation9 + $0xa2c] ss:$16 sps:$4 sm:$0xff]  }
 0x311   : > { %3370 = vmatprep.subr.bf16.mxu0 %v24259_v42  ;;  %3452 = vmatprep.subr.bf16.mxu1 %v24262_v43  ;;  %v24293_v42 = vld [vmem:[#allocation9 + $0xa20] ss:$16 sps:$4 sm:$0xff]   ;;  %v24296_v43 = vld [vmem:[#allocation9 + $0xa28] ss:$16 sps:$4 sm:$0xff]  }
 0x314   : > { %3371 = vmatpush1.bf16.msra.mxu0 %v24257_v45  ;;  %3453 = vmatpush1.bf16.msra.mxu1 %v24260_v46  ;;  %v24301_v45 = vld [vmem:[#allocation9 + $0xa44] ss:$16 sps:$4 sm:$0xff]   ;;  %v24304_v46 = vld [vmem:[#allocation9 + $0xa4c] ss:$16 sps:$4 sm:$0xff]  }
 0x315   : > { %3372 = vmatprep.subr.bf16.mxu0 %v24265_v47  ;;  %3454 = vmatprep.subr.bf16.mxu1 %v24268_v48  ;;  %v24299_v47 = vld [vmem:[#allocation9 + $0xa40] ss:$16 sps:$4 sm:$0xff]   ;;  %v24302_v48 = vld [vmem:[#allocation9 + $0xa48] ss:$16 sps:$4 sm:$0xff]  }
 0x318   : > { %3373 = vmatpush1.bf16.msra.mxu0 %v24263_v49  ;;  %3455 = vmatpush1.bf16.msra.mxu1 %v24266_v44  ;;  %v24307_v49 = vld [vmem:[#allocation9 + $0xa64] ss:$16 sps:$4 sm:$0xff]   ;;  %v24310_v44 = vld [vmem:[#allocation9 + $0xa6c] ss:$16 sps:$4 sm:$0xff]  }
 0x319   : > { %3374 = vmatprep.subr.bf16.mxu0 %v24271_v51  ;;  %3456 = vmatprep.subr.bf16.mxu1 %v24274_v52  ;;  %v24305_v51 = vld [vmem:[#allocation9 + $0xa60] ss:$16 sps:$4 sm:$0xff]   ;;  %v24308_v52 = vld [vmem:[#allocation9 + $0xa68] ss:$16 sps:$4 sm:$0xff]  }
 0x31c   : > { %3375 = vmatpush1.bf16.msra.mxu0 %v24269_v53  ;;  %3457 = vmatpush1.bf16.msra.mxu1 %v24272_v54  ;;  %v24313_v53 = vld [vmem:[#allocation9 + $0xa84] ss:$16 sps:$4 sm:$0xff]   ;;  %v24316_v54 = vld [vmem:[#allocation9 + $0xa8c] ss:$16 sps:$4 sm:$0xff]  }
 0x31d   : > { %3376 = vmatprep.subr.bf16.mxu0 %v24277_v55  ;;  %3458 = vmatprep.subr.bf16.mxu1 %v24280_v56  ;;  %v24311_v55 = vld [vmem:[#allocation9 + $0xa80] ss:$16 sps:$4 sm:$0xff]   ;;  %v24314_v56 = vld [vmem:[#allocation9 + $0xa88] ss:$16 sps:$4 sm:$0xff]  }
 0x320   : > { %3377 = vmatpush1.bf16.msra.mxu0 %v24275_v25  ;;  %3459 = vmatpush1.bf16.msra.mxu1 %v24278_v57  ;;  %v24319_v25 = vld [vmem:[#allocation9 + $0xaa4] ss:$16 sps:$4 sm:$0xff]   ;;  %v24322_v57 = vld [vmem:[#allocation9 + $0xaac] ss:$16 sps:$4 sm:$0xff]  }
 0x321   : > { %3378 = vmatprep.subr.bf16.mxu0 %v24283_v58  ;;  %3460 = vmatprep.subr.bf16.mxu1 %v24286_v32  ;;  %v24317_v58 = vld [vmem:[#allocation9 + $0xaa0] ss:$16 sps:$4 sm:$0xff]   ;;  %v24328_v32 = vld [vmem:[#allocation9 + $0xacc] ss:$16 sps:$4 sm:$0xff]  }
 0x324   : > { %3379 = vmatpush1.bf16.msra.mxu0 %v24281_v59  ;;  %3461 = vmatpush1.bf16.msra.mxu1 %v24284_v60  ;;  %v24320_v59 = vld [vmem:[#allocation9 + $0xaa8] ss:$16 sps:$4 sm:$0xff]   ;;  %v24325_v60 = vld [vmem:[#allocation9 + $0xac4] ss:$16 sps:$4 sm:$0xff]  }
 0x325   : > { %3389 = vmatprep.subr.bf16.mxu0 %v24289_v61  ;;  %3471 = vmatprep.subr.bf16.mxu1 %v24292_v62  ;;  %v24323_v61 = vld [vmem:[#allocation9 + $0xac0] ss:$16 sps:$4 sm:$0xff]   ;;  %v24326_v62 = vld [vmem:[#allocation9 + $0xac8] ss:$16 sps:$4 sm:$0xff]  }
 0x3ba   : > { %v2417_v4 = vpop.f32.mrb[4].mxu0  ;;  %v2499_v5 = vpop.f32.mrb[4].mxu1 }
 0x3bb   : > { %v23381_v6 = vadd.f32 %v2417_v4, %v1685_v0  ;;  %v23383_v7 = vadd.f32 %v2499_v5, %v1693_v1  ;;  %v2419_v8 = vpop.f32.mrb[5].mxu0  ;;  %v2501_v9 = vpop.f32.mrb[5].mxu1  ;;  %v24334_v0 = vld [vmem:[#allocation9 + $0xaec] ss:$16 sps:$4 sm:$0xff]   ;;  %v24329_v1 = vld [vmem:[#allocation9 + $0xae0] ss:$16 sps:$4 sm:$0xff]  }
 0x3bc   : > { %v23382_v11 = vadd.f32 %v2419_v8, %v1689_v2  ;;  %v23384_v12 = vadd.f32 %v2501_v9, %v1697_v3  ;;  %v2421_v13 = vpop.f32.mrb[6].mxu0  ;;  %v2503_v14 = vpop.f32.mrb[6].mxu1  ;;  %v24332_v2 = vld [vmem:[#allocation9 + $0xae8] ss:$16 sps:$4 sm:$0xff]   ;;  %v24337_v3 = vld [vmem:[#allocation9 + $0xb04] ss:$16 sps:$4 sm:$0xff]  }
 0x3bd   : > { %v2422_v15 = vpop.f32.mrb[7].mxu0  ;;  %v2504_v16 = vpop.f32.mrb[7].mxu1  ;;  %v24340_v4 = vld [vmem:[#allocation9 + $0xb0c] ss:$16 sps:$4 sm:$0xff]   ;;  %v24335_v5 = vld [vmem:[#allocation9 + $0xb00] ss:$16 sps:$4 sm:$0xff]  }
 0x3be   : > { %v2510_v17 = vcombine.low %v23381_v6, %v23382_v11  ;;  %v2511_v18 = vcombine.low %v23383_v7, %v23384_v12  ;;  %v24338_v6 = vld [vmem:[#allocation9 + $0xb08] ss:$16 sps:$4 sm:$0xff]   ;;  %v24343_v7 = vld [vmem:[#allocation9 + $0xb24] ss:$16 sps:$4 sm:$0xff]   ;;  %v24346_v8 = vld [vmem:[#allocation9 + $0xb2c] ss:$16 sps:$4 sm:$0xff]  }
 0x3bf   : > { %v24341_v9 = vld [vmem:[#allocation9 + $0xb20] ss:$16 sps:$4 sm:$0xff]   ;;  %v24344_v11 = vld [vmem:[#allocation9 + $0xb28] ss:$16 sps:$4 sm:$0xff]   ;;  %v24349_v12 = vld [vmem:[#allocation9 + $0xb44] ss:$16 sps:$4 sm:$0xff]  }
 0x3c0   : > { %v2518_v19 = vrot.slane %v2510_v17, %v28480_v50  ;;  %v2525_v20 = vrot.slane %v2511_v18, %v28480_v50  ;;  %v24352_v13 = vld [vmem:[#allocation9 + $0xb4c] ss:$16 sps:$4 sm:$0xff]   ;;  %v24347_v14 = vld [vmem:[#allocation9 + $0xb40] ss:$16 sps:$4 sm:$0xff]   ;;  %v24350_v15 = vld [vmem:[#allocation9 + $0xb48] ss:$16 sps:$4 sm:$0xff]  }
 0x3c1   : > { %v24355_v16 = vld [vmem:[#allocation9 + $0xb64] ss:$16 sps:$4 sm:$0xff]   ;;  %v24358_v17 = vld [vmem:[#allocation9 + $0xb6c] ss:$16 sps:$4 sm:$0xff]   ;;  %v24353_v18 = vld [vmem:[#allocation9 + $0xb60] ss:$16 sps:$4 sm:$0xff]  }
 0x3c2   : > { %v2526_v21 = vcombine.low %v2518_v19, %v2525_v20  ;;  %v24356_v19 = vld [vmem:[#allocation9 + $0xb68] ss:$16 sps:$4 sm:$0xff]   ;;  %v24361_v20 = vld [vmem:[#allocation9 + $0xb84] ss:$16 sps:$4 sm:$0xff]  }
 0x3c4   : > { %v2528_v23 = vadd.f32 %v24575_v22, %v2526_v21  ;;  %v24364_v21 = vld [vmem:[#allocation9 + $0xb8c] ss:$16 sps:$4 sm:$0xff]   ;;  %v24359_v22 = vld [vmem:[#allocation9 + $0xb80] ss:$16 sps:$4 sm:$0xff]  }
 0x3c6   : > { %v28521_v28 = vmax.f32 %v2528_v23, 0.0  ;;  %v24362_v23 = vld [vmem:[#allocation9 + $0xb88] ss:$16 sps:$4 sm:$0xff]  }
 0x3c8   : > { %v2669_v29 = vrot.slane %v28521_v28, %v28480_v50  ;;  %v2662_v30 = vcombine.high %v28521_v28, %v28521_v28 }
 0x3ca   : > { %v2677_v31 = vcombine.high %v2669_v29, %v2669_v29  ;;  %v28528_v10 = vrot.slane %v2662_v30, %v28480_v50  ;;  %v2683_v37 = vpack.c.bf16 %v2669_v29, %v2669_v29  ;;  %v24367_v29 = vld [vmem:[#allocation9 + $0xba4] ss:$16 sps:$4 sm:$0xff]   ;;  %v24370_v30 = vld [vmem:[#allocation9 + $0xbac] ss:$16 sps:$4 sm:$0xff]  }
 0x3cc   : > { %v2684_v33 = vpack.c.bf16 %v2677_v31, %v2677_v31  ;;  %v2678_v36 = vcombine.high %v28528_v10, %v28528_v10  ;;  %v24365_v31 = vld [vmem:[#allocation9 + $0xba0] ss:$16 sps:$4 sm:$0xff]  }
 0x3ce   : > { %3380 = vmatprep.mubr.bf16.mxu0 %v2684_v33  ;;  %3462 = vmatprep.mubr.bf16.mxu1 %v2684_v33  ;;  %v2686_v38 = vpack.c.bf16 %v2678_v36, %v2678_v36  ;;  %v24368_v33 = vld [vmem:[#allocation9 + $0xba8] ss:$16 sps:$4 sm:$0xff]   ;;  %v24371_v36 = vld [vmem:[#allocation9 + $0xbc0] ss:$16 sps:$4 sm:$0xff]  }
 0x3cf   : > { %3381 = vmatmul.mubr.bf16.vlgmr.msra.gmra.mrb[8].mxu0 %v2683_v37  ;;  %3463 = vmatmul.mubr.bf16.vlgmr.msra.gmra.mrb[8].mxu1 %v2683_v37  ;;  %v24374_v37 = vld [vmem:[#allocation9 + $0xbc8] ss:$16 sps:$4 sm:$0xff]  }
 0x3d0   : > { %3390 = vmatpush1.bf16.msra.mxu0 %v24287_v34  ;;  %3472 = vmatpush1.bf16.msra.mxu1 %v24290_v35  ;;  %v24373_v34 = vld [vmem:[#allocation9 + $0xbc4] ss:$16 sps:$4 sm:$0xff]   ;;  %v24376_v35 = vld [vmem:[#allocation9 + $0xbcc] ss:$16 sps:$4 sm:$0xff]  }
 0x3d1   : > { %3421 = vmatprep.mubr.bf16.mxu0 %v2686_v38  ;;  %3503 = vmatprep.mubr.bf16.mxu1 %v2686_v38  ;;  %v24379_v38 = vld [vmem:[#allocation9 + $0xbe4] ss:$16 sps:$4 sm:$0xff]  }
 0x3d2   : > { %3391 = vmatprep.subr.bf16.mxu0 %v24295_v39  ;;  %3473 = vmatprep.subr.bf16.mxu1 %v24298_v41  ;;  %v24382_v39 = vld [vmem:[#allocation9 + $0xbec] ss:$16 sps:$4 sm:$0xff]   ;;  %v24377_v41 = vld [vmem:[#allocation9 + $0xbe0] ss:$16 sps:$4 sm:$0xff]  }
 0x3d4   : > { %3392 = vmatpush1.bf16.msra.mxu0 %v24293_v42  ;;  %3474 = vmatpush1.bf16.msra.mxu1 %v24296_v43  ;;  %v24380_v42 = vld [vmem:[#allocation9 + $0xbe8] ss:$16 sps:$4 sm:$0xff]   ;;  %v24385_v43 = vld [vmem:[#allocation9 + $0xc04] ss:$16 sps:$4 sm:$0xff]  }
 0x3d5   : > { %3393 = vmatprep.subr.bf16.mxu0 %v24301_v45  ;;  %3475 = vmatprep.subr.bf16.mxu1 %v24304_v46  ;;  %v24388_v45 = vld [vmem:[#allocation9 + $0xc0c] ss:$16 sps:$4 sm:$0xff]   ;;  %v24383_v46 = vld [vmem:[#allocation9 + $0xc00] ss:$16 sps:$4 sm:$0xff]  }
 0x3d8   : > { %3394 = vmatpush1.bf16.msra.mxu0 %v24299_v47  ;;  %3476 = vmatpush1.bf16.msra.mxu1 %v24302_v48  ;;  %v24386_v47 = vld [vmem:[#allocation9 + $0xc08] ss:$16 sps:$4 sm:$0xff]   ;;  %v2685_v48 = vpack.c.bf16 %v28528_v10, %v28528_v10  ;;  %v24403_v10 = vld [vmem:[#allocation9 + $0xc64] ss:$16 sps:$4 sm:$0xff]  }
 0x3d9   : > { %3395 = vmatprep.subr.bf16.mxu0 %v24307_v49  ;;  %3477 = vmatprep.subr.bf16.mxu1 %v24310_v44  ;;  %v24391_v49 = vld [vmem:[#allocation9 + $0xc24] ss:$16 sps:$4 sm:$0xff]   ;;  %v24394_v44 = vld [vmem:[#allocation9 + $0xc2c] ss:$16 sps:$4 sm:$0xff]  }
 0x3dc   : > { %3396 = vmatpush1.bf16.msra.mxu0 %v24305_v51  ;;  %3478 = vmatpush1.bf16.msra.mxu1 %v24308_v52  ;;  %v24389_v51 = vld [vmem:[#allocation9 + $0xc20] ss:$16 sps:$4 sm:$0xff]   ;;  %v24392_v52 = vld [vmem:[#allocation9 + $0xc28] ss:$16 sps:$4 sm:$0xff]  }
 0x3dd   : > { %3397 = vmatprep.subr.bf16.mxu0 %v24313_v53  ;;  %3479 = vmatprep.subr.bf16.mxu1 %v24316_v54  ;;  %v24397_v53 = vld [vmem:[#allocation9 + $0xc44] ss:$16 sps:$4 sm:$0xff]   ;;  %v24400_v54 = vld [vmem:[#allocation9 + $0xc4c] ss:$16 sps:$4 sm:$0xff]  }
 0x3e0   : > { %3398 = vmatpush1.bf16.msra.mxu0 %v24311_v55  ;;  %3480 = vmatpush1.bf16.msra.mxu1 %v24314_v56  ;;  %v24395_v55 = vld [vmem:[#allocation9 + $0xc40] ss:$16 sps:$4 sm:$0xff]   ;;  %v24398_v56 = vld [vmem:[#allocation9 + $0xc48] ss:$16 sps:$4 sm:$0xff]  }
 0x3e1   : > { %3399 = vmatprep.subr.bf16.mxu0 %v24319_v25  ;;  %3481 = vmatprep.subr.bf16.mxu1 %v24322_v57  ;;  %v24406_v25 = vld [vmem:[#allocation9 + $0xc6c] ss:$16 sps:$4 sm:$0xff]   ;;  %v24401_v57 = vld [vmem:[#allocation9 + $0xc60] ss:$16 sps:$4 sm:$0xff]  }
 0x3e4   : > { %3400 = vmatpush1.bf16.msra.mxu0 %v24317_v58  ;;  %3482 = vmatpush1.bf16.msra.mxu1 %v24320_v59  ;;  %v24404_v58 = vld [vmem:[#allocation9 + $0xc68] ss:$16 sps:$4 sm:$0xff]   ;;  %v24409_v59 = vld [vmem:[#allocation9 + $0xc84] ss:$16 sps:$4 sm:$0xff]  }
 0x3e5   : > { %3401 = vmatprep.subr.bf16.mxu0 %v24325_v60  ;;  %3483 = vmatprep.subr.bf16.mxu1 %v24328_v32  ;;  %v24412_v60 = vld [vmem:[#allocation9 + $0xc8c] ss:$16 sps:$4 sm:$0xff]   ;;  %v24407_v32 = vld [vmem:[#allocation9 + $0xc80] ss:$16 sps:$4 sm:$0xff]  }
 0x3e8   : > { %3402 = vmatpush1.bf16.msra.mxu0 %v24323_v61  ;;  %3484 = vmatpush1.bf16.msra.mxu1 %v24326_v62  ;;  %v24410_v61 = vld [vmem:[#allocation9 + $0xc88] ss:$16 sps:$4 sm:$0xff]   ;;  %v24415_v62 = vld [vmem:[#allocation9 + $0xca4] ss:$16 sps:$4 sm:$0xff]  }
 0x3e9   : > { %3403 = vmatprep.subr.bf16.mxu0 %v24331_v63  ;;  %3485 = vmatprep.subr.bf16.mxu1 %v24334_v0  ;;  %v24418_v63 = vld [vmem:[#allocation9 + $0xcac] ss:$16 sps:$4 sm:$0xff]   ;;  %v24413_v0 = vld [vmem:[#allocation9 + $0xca0] ss:$16 sps:$4 sm:$0xff]  }
 0x3ec   : > { %3404 = vmatpush1.bf16.msra.mxu0 %v24329_v1  ;;  %3486 = vmatpush1.bf16.msra.mxu1 %v24332_v2  ;;  %v24416_v1 = vld [vmem:[#allocation9 + $0xca8] ss:$16 sps:$4 sm:$0xff]   ;;  %v24421_v2 = vld [vmem:[#allocation9 + $0xcc4] ss:$16 sps:$4 sm:$0xff]  }
 0x3ed   : > { %3405 = vmatprep.subr.bf16.mxu0 %v24337_v3  ;;  %3487 = vmatprep.subr.bf16.mxu1 %v24340_v4  ;;  %v24424_v3 = vld [vmem:[#allocation9 + $0xccc] ss:$16 sps:$4 sm:$0xff]   ;;  %v24419_v4 = vld [vmem:[#allocation9 + $0xcc0] ss:$16 sps:$4 sm:$0xff]  }
 0x3f0   : > { %3406 = vmatpush1.bf16.msra.mxu0 %v24335_v5  ;;  %3488 = vmatpush1.bf16.msra.mxu1 %v24338_v6  ;;  %v24422_v5 = vld [vmem:[#allocation9 + $0xcc8] ss:$16 sps:$4 sm:$0xff]   ;;  %v24427_v6 = vld [vmem:[#allocation9 + $0xce4] ss:$16 sps:$4 sm:$0xff]  }
 0x3f1   : > { %3407 = vmatprep.subr.bf16.mxu0 %v24343_v7  ;;  %3489 = vmatprep.subr.bf16.mxu1 %v24346_v8  ;;  %v24430_v7 = vld [vmem:[#allocation9 + $0xcec] ss:$16 sps:$4 sm:$0xff]   ;;  %v24425_v8 = vld [vmem:[#allocation9 + $0xce0] ss:$16 sps:$4 sm:$0xff]  }
 0x3f4   : > { %3408 = vmatpush1.bf16.msra.mxu0 %v24341_v9  ;;  %3490 = vmatpush1.bf16.msra.mxu1 %v24344_v11  ;;  %v24428_v9 = vld [vmem:[#allocation9 + $0xce8] ss:$16 sps:$4 sm:$0xff]   ;;  %v24433_v11 = vld [vmem:[#allocation9 + $0xd04] ss:$16 sps:$4 sm:$0xff]  }
 0x3f5   : > { %3409 = vmatprep.subr.bf16.mxu0 %v24349_v12  ;;  %3491 = vmatprep.subr.bf16.mxu1 %v24352_v13  ;;  %v24436_v12 = vld [vmem:[#allocation9 + $0xd0c] ss:$16 sps:$4 sm:$0xff]   ;;  %v24431_v13 = vld [vmem:[#allocation9 + $0xd00] ss:$16 sps:$4 sm:$0xff]  }
 0x3f8   : > { %3410 = vmatpush1.bf16.msra.mxu0 %v24347_v14  ;;  %3492 = vmatpush1.bf16.msra.mxu1 %v24350_v15  ;;  %v24434_v14 = vld [vmem:[#allocation9 + $0xd08] ss:$16 sps:$4 sm:$0xff]   ;;  %v24439_v15 = vld [vmem:[#allocation9 + $0xd24] ss:$16 sps:$4 sm:$0xff]  }
 0x3f9   : > { %3411 = vmatprep.subr.bf16.mxu0 %v24355_v16  ;;  %3493 = vmatprep.subr.bf16.mxu1 %v24358_v17  ;;  %v24442_v16 = vld [vmem:[#allocation9 + $0xd2c] ss:$16 sps:$4 sm:$0xff]   ;;  %v24437_v17 = vld [vmem:[#allocation9 + $0xd20] ss:$16 sps:$4 sm:$0xff]  }
 0x3fc   : > { %3412 = vmatpush1.bf16.msra.mxu0 %v24353_v18  ;;  %3494 = vmatpush1.bf16.msra.mxu1 %v24356_v19  ;;  %v24440_v18 = vld [vmem:[#allocation9 + $0xd28] ss:$16 sps:$4 sm:$0xff]   ;;  %v24445_v19 = vld [vmem:[#allocation9 + $0xd44] ss:$16 sps:$4 sm:$0xff]  }
 0x3fd   : > { %3413 = vmatprep.subr.bf16.mxu0 %v24361_v20  ;;  %3495 = vmatprep.subr.bf16.mxu1 %v24364_v21  ;;  %v24448_v20 = vld [vmem:[#allocation9 + $0xd4c] ss:$16 sps:$4 sm:$0xff]   ;;  %v24443_v21 = vld [vmem:[#allocation9 + $0xd40] ss:$16 sps:$4 sm:$0xff]  }
 0x400   : > { %3414 = vmatpush1.bf16.msra.mxu0 %v24359_v22  ;;  %3496 = vmatpush1.bf16.msra.mxu1 %v24362_v23  ;;  %v24446_v22 = vld [vmem:[#allocation9 + $0xd48] ss:$16 sps:$4 sm:$0xff]   ;;  %v24451_v23 = vld [vmem:[#allocation9 + $0xd64] ss:$16 sps:$4 sm:$0xff]  }
 0x401   : > { %3415 = vmatprep.subr.bf16.mxu0 %v24367_v29  ;;  %3497 = vmatprep.subr.bf16.mxu1 %v24370_v30  ;;  %v24454_v29 = vld [vmem:[#allocation9 + $0xd6c] ss:$16 sps:$4 sm:$0xff]   ;;  %v24449_v30 = vld [vmem:[#allocation9 + $0xd60] ss:$16 sps:$4 sm:$0xff]  }
 0x404   : > { %3416 = vmatpush1.bf16.msra.mxu0 %v24365_v31  ;;  %3498 = vmatpush1.bf16.msra.mxu1 %v24368_v33  ;;  %v24452_v31 = vld [vmem:[#allocation9 + $0xd68] ss:$16 sps:$4 sm:$0xff]   ;;  %v24457_v33 = vld [vmem:[#allocation9 + $0xd84] ss:$16 sps:$4 sm:$0xff]  }
 0x405   : > { %3417 = vmatprep.subr.bf16.mxu0 %v24373_v34  ;;  %3499 = vmatprep.subr.bf16.mxu1 %v24376_v35  ;;  %v24460_v34 = vld [vmem:[#allocation9 + $0xd8c] ss:$16 sps:$4 sm:$0xff]   ;;  %v24455_v35 = vld [vmem:[#allocation9 + $0xd80] ss:$16 sps:$4 sm:$0xff]  }
 0x408   : > { %3418 = vmatpush1.bf16.msra.mxu0 %v24371_v36  ;;  %3500 = vmatpush1.bf16.msra.mxu1 %v24374_v37  ;;  %v24458_v36 = vld [vmem:[#allocation9 + $0xd88] ss:$16 sps:$4 sm:$0xff]   ;;  %v24463_v37 = vld [vmem:[#allocation9 + $0xda4] ss:$16 sps:$4 sm:$0xff]  }
 0x409   : > { %3419 = vmatprep.subr.bf16.mxu0 %v24379_v38  ;;  %3501 = vmatprep.subr.bf16.mxu1 %v24382_v39  ;;  %v24466_v38 = vld [vmem:[#allocation9 + $0xdac] ss:$16 sps:$4 sm:$0xff]   ;;  %v24461_v39 = vld [vmem:[#allocation9 + $0xda0] ss:$16 sps:$4 sm:$0xff]  }
 0x40c   : > { %3420 = vmatpush1.bf16.msra.mxu0 %v24377_v41  ;;  %3502 = vmatpush1.bf16.msra.mxu1 %v24380_v42  ;;  %v24464_v41 = vld [vmem:[#allocation9 + $0xda8] ss:$16 sps:$4 sm:$0xff]   ;;  %v24469_v42 = vld [vmem:[#allocation9 + $0xdc4] ss:$16 sps:$4 sm:$0xff]  }
 0x40d   : > { %4312 = vmatprep.subr.bf16.mxu0 %v24385_v43  ;;  %4394 = vmatprep.subr.bf16.mxu1 %v24388_v45  ;;  %v24472_v43 = vld [vmem:[#allocation9 + $0xdcc] ss:$16 sps:$4 sm:$0xff]   ;;  %v24467_v45 = vld [vmem:[#allocation9 + $0xdc0] ss:$16 sps:$4 sm:$0xff]  }
 0x40f   : > { %3422 = vmatmul.mubr.bf16.vlgmr.msra.gmra.mrb[8].mxu0 %v2685_v48  ;;  %3504 = vmatmul.mubr.bf16.vlgmr.msra.gmra.mrb[8].mxu1 %v2685_v48  ;;  %v24478_v48 = vld [vmem:[#allocation9 + $0xdec] ss:$16 sps:$4 sm:$0xff]  }
 0x410   : > { %4313 = vmatpush1.bf16.msra.mxu0 %v24383_v46  ;;  %4395 = vmatpush1.bf16.msra.mxu1 %v24386_v47  ;;  %v24470_v46 = vld [vmem:[#allocation9 + $0xdc8] ss:$16 sps:$4 sm:$0xff]   ;;  %v24475_v47 = vld [vmem:[#allocation9 + $0xde4] ss:$16 sps:$4 sm:$0xff]  }
 0x411   : > { %4314 = vmatprep.subr.bf16.mxu0 %v24391_v49  ;;  %4396 = vmatprep.subr.bf16.mxu1 %v24394_v44  ;;  %v24473_v49 = vld [vmem:[#allocation9 + $0xde0] ss:$16 sps:$4 sm:$0xff]   ;;  %v24476_v44 = vld [vmem:[#allocation9 + $0xde8] ss:$16 sps:$4 sm:$0xff]  }
 0x414   : > { %4315 = vmatpush1.bf16.msra.mxu0 %v24389_v51  ;;  %4397 = vmatpush1.bf16.msra.mxu1 %v24392_v52  ;;  %v24481_v51 = vld [vmem:[#allocation9 + $0xe04] ss:$16 sps:$4 sm:$0xff]   ;;  %v24484_v52 = vld [vmem:[#allocation9 + $0xe0c] ss:$16 sps:$4 sm:$0xff]  }
 0x415   : > { %4316 = vmatprep.subr.bf16.mxu0 %v24397_v53  ;;  %4398 = vmatprep.subr.bf16.mxu1 %v24400_v54  ;;  %v28534_v53 = vld [vmem:[#allocation10 + $0x8] sm:$0xf] }
 0x416   : > { %v2691_v54 = vrot.slane %v28534_v53, %v28491_v24 }
 0x418   : > { %4317 = vmatpush1.bf16.msra.mxu0 %v24395_v55  ;;  %4399 = vmatpush1.bf16.msra.mxu1 %v24398_v56  ;;  %v2695_v55 = vrot.slane %v28534_v53, %v28496_v26  ;;  %v2703_v56 = vrot.slane %v28534_v53, %v28499_v27 }
 0x419   : > { %4318 = vmatprep.subr.bf16.mxu0 %v24403_v10  ;;  %4400 = vmatprep.subr.bf16.mxu1 %v24406_v25 }
 0x41c   : > { %4319 = vmatpush1.bf16.msra.mxu0 %v24401_v57  ;;  %4401 = vmatpush1.bf16.msra.mxu1 %v24404_v58 }
 0x41d   : > { %4320 = vmatprep.subr.bf16.mxu0 %v24409_v59  ;;  %4402 = vmatprep.subr.bf16.mxu1 %v24412_v60 }
 0x420   : > { %4321 = vmatpush1.bf16.msra.mxu0 %v24407_v32  ;;  %4403 = vmatpush1.bf16.msra.mxu1 %v24410_v61 }
 0x421   : > { %4322 = vmatprep.subr.bf16.mxu0 %v24415_v62  ;;  %4404 = vmatprep.subr.bf16.mxu1 %v24418_v63 }
 0x424   : > { %4323 = vmatpush1.bf16.msra.mxu0 %v24413_v0  ;;  %4405 = vmatpush1.bf16.msra.mxu1 %v24416_v1 }
 0x425   : > { %4324 = vmatprep.subr.bf16.mxu0 %v24421_v2  ;;  %4406 = vmatprep.subr.bf16.mxu1 %v24424_v3 }
 0x428   : > { %4325 = vmatpush1.bf16.msra.mxu0 %v24419_v4  ;;  %4407 = vmatpush1.bf16.msra.mxu1 %v24422_v5  ;;  %v24479_v5 = vld [vmem:[#allocation9 + $0xe00] ss:$16 sps:$4 sm:$0xff]  }
 0x429   : > { %4326 = vmatprep.subr.bf16.mxu0 %v24427_v6  ;;  %4408 = vmatprep.subr.bf16.mxu1 %v24430_v7  ;;  %v24482_v6 = vld [vmem:[#allocation9 + $0xe08] ss:$16 sps:$4 sm:$0xff]  }
 0x42c   : > { %4327 = vmatpush1.bf16.msra.mxu0 %v24425_v8  ;;  %4409 = vmatpush1.bf16.msra.mxu1 %v24428_v9  ;;  %v24487_v8 = vld [vmem:[#allocation9 + $0xe24] ss:$16 sps:$4 sm:$0xff]   ;;  %v24490_v9 = vld [vmem:[#allocation9 + $0xe2c] ss:$16 sps:$4 sm:$0xff]  }
 0x42d   : > { %4328 = vmatprep.subr.bf16.mxu0 %v24433_v11  ;;  %4410 = vmatprep.subr.bf16.mxu1 %v24436_v12  ;;  %v24485_v12 = vld [vmem:[#allocation9 + $0xe20] ss:$16 sps:$4 sm:$0xff]  }
 0x430   : > { %4329 = vmatpush1.bf16.msra.mxu0 %v24431_v13  ;;  %4411 = vmatpush1.bf16.msra.mxu1 %v24434_v14  ;;  %v24488_v13 = vld [vmem:[#allocation9 + $0xe28] ss:$16 sps:$4 sm:$0xff]   ;;  %v24493_v14 = vld [vmem:[#allocation9 + $0xe44] ss:$16 sps:$4 sm:$0xff]  }
 0x431   : > { %4330 = vmatprep.subr.bf16.mxu0 %v24439_v15  ;;  %4412 = vmatprep.subr.bf16.mxu1 %v24442_v16  ;;  %v24496_v15 = vld [vmem:[#allocation9 + $0xe4c] ss:$16 sps:$4 sm:$0xff]   ;;  %v24491_v16 = vld [vmem:[#allocation9 + $0xe40] ss:$16 sps:$4 sm:$0xff]  }
 0x434   : > { %4331 = vmatpush1.bf16.msra.mxu0 %v24437_v17  ;;  %4413 = vmatpush1.bf16.msra.mxu1 %v24440_v18  ;;  %v24494_v17 = vld [vmem:[#allocation9 + $0xe48] ss:$16 sps:$4 sm:$0xff]   ;;  %v24499_v18 = vld [vmem:[#allocation9 + $0xe64] ss:$16 sps:$4 sm:$0xff]  }
 0x435   : > { %4332 = vmatprep.subr.bf16.mxu0 %v24445_v19  ;;  %4414 = vmatprep.subr.bf16.mxu1 %v24448_v20  ;;  %v24502_v19 = vld [vmem:[#allocation9 + $0xe6c] ss:$16 sps:$4 sm:$0xff]   ;;  %v24497_v20 = vld [vmem:[#allocation9 + $0xe60] ss:$16 sps:$4 sm:$0xff]  }
 0x438   : > { %4333 = vmatpush1.bf16.msra.mxu0 %v24443_v21  ;;  %4415 = vmatpush1.bf16.msra.mxu1 %v24446_v22  ;;  %v24500_v21 = vld [vmem:[#allocation9 + $0xe68] ss:$16 sps:$4 sm:$0xff]   ;;  %v24505_v22 = vld [vmem:[#allocation9 + $0xe84] ss:$16 sps:$4 sm:$0xff]  }
 0x439   : > { %4334 = vmatprep.subr.bf16.mxu0 %v24451_v23  ;;  %4416 = vmatprep.subr.bf16.mxu1 %v24454_v29  ;;  %v24508_v23 = vld [vmem:[#allocation9 + $0xe8c] ss:$16 sps:$4 sm:$0xff]   ;;  %v24503_v29 = vld [vmem:[#allocation9 + $0xe80] ss:$16 sps:$4 sm:$0xff]  }
 0x43c   : > { %4335 = vmatpush1.bf16.msra.mxu0 %v24449_v30  ;;  %4417 = vmatpush1.bf16.msra.mxu1 %v24452_v31  ;;  %v24506_v30 = vld [vmem:[#allocation9 + $0xe88] ss:$16 sps:$4 sm:$0xff]   ;;  %v24511_v31 = vld [vmem:[#allocation9 + $0xea4] ss:$16 sps:$4 sm:$0xff]  }
 0x43d   : > { %4336 = vmatprep.subr.bf16.mxu0 %v24457_v33  ;;  %4418 = vmatprep.subr.bf16.mxu1 %v24460_v34  ;;  %v24514_v33 = vld [vmem:[#allocation9 + $0xeac] ss:$16 sps:$4 sm:$0xff]   ;;  %v24509_v34 = vld [vmem:[#allocation9 + $0xea0] ss:$16 sps:$4 sm:$0xff]  }
 0x440   : > { %4337 = vmatpush1.bf16.msra.mxu0 %v24455_v35  ;;  %4419 = vmatpush1.bf16.msra.mxu1 %v24458_v36  ;;  %v24512_v35 = vld [vmem:[#allocation9 + $0xea8] ss:$16 sps:$4 sm:$0xff]   ;;  %v24517_v36 = vld [vmem:[#allocation9 + $0xec4] ss:$16 sps:$4 sm:$0xff]  }
 0x441   : > { %4338 = vmatprep.subr.bf16.mxu0 %v24463_v37  ;;  %4420 = vmatprep.subr.bf16.mxu1 %v24466_v38  ;;  %v24520_v37 = vld [vmem:[#allocation9 + $0xecc] ss:$16 sps:$4 sm:$0xff]   ;;  %v24515_v38 = vld [vmem:[#allocation9 + $0xec0] ss:$16 sps:$4 sm:$0xff]  }
 0x444   : > { %4339 = vmatpush1.bf16.msra.mxu0 %v24461_v39  ;;  %4421 = vmatpush1.bf16.msra.mxu1 %v24464_v41  ;;  %v24518_v39 = vld [vmem:[#allocation9 + $0xec8] ss:$16 sps:$4 sm:$0xff]   ;;  %v24523_v41 = vld [vmem:[#allocation9 + $0xee4] ss:$16 sps:$4 sm:$0xff]  }
 0x445   : > { %4340 = vmatprep.subr.bf16.mxu0 %v24469_v42  ;;  %4422 = vmatprep.subr.bf16.mxu1 %v24472_v43  ;;  %v24526_v42 = vld [vmem:[#allocation9 + $0xeec] ss:$16 sps:$4 sm:$0xff]   ;;  %v24521_v43 = vld [vmem:[#allocation9 + $0xee0] ss:$16 sps:$4 sm:$0xff]  }
 0x448   : > { %4341 = vmatpush1.bf16.msra.mxu0 %v24467_v45  ;;  %4423 = vmatpush1.bf16.msra.mxu1 %v24470_v46  ;;  %v24524_v45 = vld [vmem:[#allocation9 + $0xee8] ss:$16 sps:$4 sm:$0xff]   ;;  %v24529_v46 = vld [vmem:[#allocation9 + $0xf04] ss:$16 sps:$4 sm:$0xff]  }
 0x449   : > { %4342 = vmatprep.subr.bf16.mxu0 %v24475_v47  ;;  %4424 = vmatprep.subr.bf16.mxu1 %v24478_v48  ;;  %v24532_v47 = vld [vmem:[#allocation9 + $0xf0c] ss:$16 sps:$4 sm:$0xff]   ;;  %v24527_v48 = vld [vmem:[#allocation9 + $0xf00] ss:$16 sps:$4 sm:$0xff]  }
 0x44c   : > { %4343 = vmatpush1.bf16.msra.mxu0 %v24473_v49  ;;  %4425 = vmatpush1.bf16.msra.mxu1 %v24476_v44  ;;  %v24530_v49 = vld [vmem:[#allocation9 + $0xf08] ss:$16 sps:$4 sm:$0xff]   ;;  %v24535_v44 = vld [vmem:[#allocation9 + $0xf24] ss:$16 sps:$4 sm:$0xff]  }
 0x44d   : > { %4353 = vmatprep.subr.bf16.mxu0 %v24481_v51  ;;  %4435 = vmatprep.subr.bf16.mxu1 %v24484_v52  ;;  %v24538_v51 = vld [vmem:[#allocation9 + $0xf2c] ss:$16 sps:$4 sm:$0xff]   ;;  %v24533_v52 = vld [vmem:[#allocation9 + $0xf20] ss:$16 sps:$4 sm:$0xff]  }
 0x4e2   : > { %v3423_v10 = vpop.f32.mrb[8].mxu0  ;;  %v28542_v25 = vpop.f32.mrb[8].mxu1 }
 0x4e3   : > { %v23385_v57 = vadd.f32 %v3423_v10, %v2691_v54  ;;  %v3425_v58 = vpop.f32.mrb[9].mxu0  ;;  %v3507_v59 = vpop.f32.mrb[9].mxu1  ;;  %v24536_v54 = vld [vmem:[#allocation9 + $0xf28] ss:$16 sps:$4 sm:$0xff]   ;;  %v24539_v10 = vld [vmem:[#allocation9 + $0xf40] ss:$16 sps:$4 sm:$0xff]  }
 0x4e4   : > { %v23386_v60 = vadd.f32 %v3425_v58, %v2695_v55  ;;  %v23388_v32 = vadd.f32 %v3507_v59, %v2703_v56  ;;  %v3427_v61 = vpop.f32.mrb[10].mxu0  ;;  %v3509_v62 = vpop.f32.mrb[10].mxu1  ;;  %v24541_v55 = vld [vmem:[#allocation9 + $0xf44] ss:$16 sps:$4 sm:$0xff]   ;;  %v24544_v56 = vld [vmem:[#allocation9 + $0xf4c] ss:$16 sps:$4 sm:$0xff]  }
 0x4e5   : > { %v3512_v63 = vmax.f32 %v23385_v57, 0.0  ;;  %v3428_v0 = vpop.f32.mrb[11].mxu0  ;;  %v3510_v1 = vpop.f32.mrb[11].mxu1  ;;  %v24542_v57 = vld [vmem:[#allocation9 + $0xf48] ss:$16 sps:$4 sm:$0xff]  }
 0x4e6   : > { %v3513_v2 = vmax.f32 %v23386_v60, 0.0  ;;  %v3515_v3 = vmax.f32 %v23388_v32, 0.0  ;;  %v24547_v58 = vld [vmem:[#allocation9 + $0xf64] ss:$16 sps:$4 sm:$0xff]   ;;  %v24550_v59 = vld [vmem:[#allocation9 + $0xf6c] ss:$16 sps:$4 sm:$0xff]  }
 0x4e7   : > { %v3647_v7 = vpack.c.bf16 %v3512_v63, %v3512_v63  ;;  %v24545_v60 = vld [vmem:[#allocation9 + $0xf60] ss:$16 sps:$4 sm:$0xff]   ;;  %v24548_v32 = vld [vmem:[#allocation9 + $0xf68] ss:$16 sps:$4 sm:$0xff]   ;;  %v24553_v61 = vld [vmem:[#allocation9 + $0xf84] ss:$16 sps:$4 sm:$0xff]  }
 0x4e8   : > { %v3648_v4 = vpack.c.bf16 %v3513_v2, %v3513_v2  ;;  %v3650_v11 = vpack.c.bf16 %v3515_v3, %v3515_v3  ;;  %v24556_v62 = vld [vmem:[#allocation9 + $0xf8c] ss:$16 sps:$4 sm:$0xff]   ;;  %v24551_v63 = vld [vmem:[#allocation9 + $0xf80] ss:$16 sps:$4 sm:$0xff]   ;;  %v24554_v0 = vld [vmem:[#allocation9 + $0xf88] ss:$16 sps:$4 sm:$0xff]  }
 0x4e9   : > { %v24559_v1 = vld [vmem:[#allocation9 + $0xfa4] ss:$16 sps:$4 sm:$0xff]   ;;  %v24562_v2 = vld [vmem:[#allocation9 + $0xfac] ss:$16 sps:$4 sm:$0xff]   ;;  %v24557_v3 = vld [vmem:[#allocation9 + $0xfa0] ss:$16 sps:$4 sm:$0xff]  }
 0x4ea   : > { %4344 = vmatprep.mubr.bf16.mxu0 %v3648_v4  ;;  %4426 = vmatprep.mubr.bf16.mxu1 %v3648_v4  ;;  %v24560_v4 = vld [vmem:[#allocation9 + $0xfa8] ss:$16 sps:$4 sm:$0xff]  }
 0x4eb   : > { %4345 = vmatmul.mubr.bf16.vlgmr.msra.gmra.mrb[12].mxu0 %v3647_v7  ;;  %4427 = vmatmul.mubr.bf16.vlgmr.msra.gmra.mrb[12].mxu1 %v3647_v7  ;;  %v24568_v7 = vld [vmem:[#allocation9 + $0xfcc] ss:$16 sps:$4 sm:$0xff]  }
 0x4ec   : > { %4354 = vmatpush1.bf16.msra.mxu0 %v24479_v5  ;;  %4436 = vmatpush1.bf16.msra.mxu1 %v24482_v6  ;;  %v2699_v5 = vrot.slane %v28534_v53, %v28510_v40  ;;  %v24565_v6 = vld [vmem:[#allocation9 + $0xfc4] ss:$16 sps:$4 sm:$0xff]  }
 0x4ed   : > { %4385 = vmatprep.mubr.bf16.mxu0 %v3650_v11  ;;  %4467 = vmatprep.mubr.bf16.mxu1 %v3650_v11 }
 0x4ee   : > { %4355 = vmatprep.subr.bf16.mxu0 %v24487_v8  ;;  %4437 = vmatprep.subr.bf16.mxu1 %v24490_v9  ;;  %v24563_v8 = vld [vmem:[#allocation9 + $0xfc0] ss:$16 sps:$4 sm:$0xff]   ;;  %v24566_v9 = vld [vmem:[#allocation9 + $0xfc8] ss:$16 sps:$4 sm:$0xff]   ;;  %v23387_v11 = vadd.f32 %v28542_v25, %v2699_v5  ;;  %v3646_v25 = vld [vmem:[#allocation10 + $0xc] sm:$0xf] }
 0x4f0   : > { %4356 = vmatpush1.bf16.msra.mxu0 %v24485_v12  ;;  %4438 = vmatpush1.bf16.msra.mxu1 %v24488_v13  ;;  %v24571_v12 = vld [vmem:[#allocation9 + $0xfe4] ss:$16 sps:$4 sm:$0xff]   ;;  %v24574_v13 = vld [vmem:[#allocation9 + $0xfec] ss:$16 sps:$4 sm:$0xff]  }
 0x4f1   : > { %4357 = vmatprep.subr.bf16.mxu0 %v24493_v14  ;;  %4439 = vmatprep.subr.bf16.mxu1 %v24496_v15  ;;  %v24569_v14 = vld [vmem:[#allocation9 + $0xfe0] ss:$16 sps:$4 sm:$0xff]   ;;  %v24572_v15 = vld [vmem:[#allocation9 + $0xfe8] ss:$16 sps:$4 sm:$0xff]  }
 0x4f4   : > { %4358 = vmatpush1.bf16.msra.mxu0 %v24491_v16  ;;  %4440 = vmatpush1.bf16.msra.mxu1 %v24494_v17  ;;  %v3514_v16 = vmax.f32 %v23387_v11, 0.0  ;;  %v4501_v17 = vld [vmem:[#allocation7] sm:$0xff] }
 0x4f5   : > { %4359 = vmatprep.subr.bf16.mxu0 %v24499_v18  ;;  %4441 = vmatprep.subr.bf16.mxu1 %v24502_v19  ;;  %v4502_v18 = vld [vmem:[#allocation7 + $0x8] sm:$0xff]  ;;  %v4503_v19 = vld [vmem:[#allocation7 + $0x10] sm:$0xf]  ;;  %4504 = vst [vmem:[#allocation3] sm:$0xff] %v4501_v17 }
 0x4f6   : > { %v3649_v53 = vpack.c.bf16 %v3514_v16, %v3514_v16  ;;  %4505 = vst [vmem:[#allocation3 + $0x8] sm:$0xff] %v4502_v18  ;;  %4506 = vst [vmem:[#allocation3 + $0x10] sm:$0xf] %v4503_v19 }
 0x4f8   : > { %4360 = vmatpush1.bf16.msra.mxu0 %v24497_v20  ;;  %4442 = vmatpush1.bf16.msra.mxu1 %v24500_v21  ;;  %v3655_v20 = vrot.slane %v3646_v25, %v28491_v24  ;;  %v3663_v21 = vrot.slane %v3646_v25, %v28510_v40 }
 0x4f9   : > { %4361 = vmatprep.subr.bf16.mxu0 %v24505_v22  ;;  %4443 = vmatprep.subr.bf16.mxu1 %v24508_v23  ;;  %v3659_v22 = vrot.slane %v3646_v25, %v28496_v26  ;;  %v3667_v23 = vrot.slane %v3646_v25, %v28499_v27 }
 0x4fc   : > { %4362 = vmatpush1.bf16.msra.mxu0 %v24503_v29  ;;  %4444 = vmatpush1.bf16.msra.mxu1 %v24506_v30 }
 0x4fd   : > { %4363 = vmatprep.subr.bf16.mxu0 %v24511_v31  ;;  %4445 = vmatprep.subr.bf16.mxu1 %v24514_v33 }
 0x500   : > { %4364 = vmatpush1.bf16.msra.mxu0 %v24509_v34  ;;  %4446 = vmatpush1.bf16.msra.mxu1 %v24512_v35 }
 0x501   : > { %4365 = vmatprep.subr.bf16.mxu0 %v24517_v36  ;;  %4447 = vmatprep.subr.bf16.mxu1 %v24520_v37 }
 0x504   : > { %4366 = vmatpush1.bf16.msra.mxu0 %v24515_v38  ;;  %4448 = vmatpush1.bf16.msra.mxu1 %v24518_v39 }
 0x505   : > { %4367 = vmatprep.subr.bf16.mxu0 %v24523_v41  ;;  %4449 = vmatprep.subr.bf16.mxu1 %v24526_v42 }
 0x508   : > { %4368 = vmatpush1.bf16.msra.mxu0 %v24521_v43  ;;  %4450 = vmatpush1.bf16.msra.mxu1 %v24524_v45 }
 0x509   : > { %4369 = vmatprep.subr.bf16.mxu0 %v24529_v46  ;;  %4451 = vmatprep.subr.bf16.mxu1 %v24532_v47 }
 0x50c   : > { %4370 = vmatpush1.bf16.msra.mxu0 %v24527_v48  ;;  %4452 = vmatpush1.bf16.msra.mxu1 %v24530_v49 }
 0x50d   : > { %4371 = vmatprep.subr.bf16.mxu0 %v24535_v44  ;;  %4453 = vmatprep.subr.bf16.mxu1 %v24538_v51 }
 0x510   : > { %4372 = vmatpush1.bf16.msra.mxu0 %v24533_v52  ;;  %4454 = vmatpush1.bf16.msra.mxu1 %v24536_v54 }
 0x511   : > { %4373 = vmatprep.subr.bf16.mxu0 %v24541_v55  ;;  %4455 = vmatprep.subr.bf16.mxu1 %v24544_v56 }
 0x514   : > { %4374 = vmatpush1.bf16.msra.mxu0 %v24539_v10  ;;  %4456 = vmatpush1.bf16.msra.mxu1 %v24542_v57 }
 0x515   : > { %4375 = vmatprep.subr.bf16.mxu0 %v24547_v58  ;;  %4457 = vmatprep.subr.bf16.mxu1 %v24550_v59 }
 0x518   : > { %4376 = vmatpush1.bf16.msra.mxu0 %v24545_v60  ;;  %4458 = vmatpush1.bf16.msra.mxu1 %v24548_v32 }
 0x519   : > { %4377 = vmatprep.subr.bf16.mxu0 %v24553_v61  ;;  %4459 = vmatprep.subr.bf16.mxu1 %v24556_v62 }
 0x51c   : > { %4378 = vmatpush1.bf16.msra.mxu0 %v24551_v63  ;;  %4460 = vmatpush1.bf16.msra.mxu1 %v24554_v0 }
 0x51d   : > { %4379 = vmatprep.subr.bf16.mxu0 %v24559_v1  ;;  %4461 = vmatprep.subr.bf16.mxu1 %v24562_v2 }
 0x520   : > { %4380 = vmatpush1.bf16.msra.mxu0 %v24557_v3  ;;  %4462 = vmatpush1.bf16.msra.mxu1 %v24560_v4 }
 0x521   : > { %4381 = vmatprep.subr.bf16.mxu0 %v24565_v6  ;;  %4463 = vmatprep.subr.bf16.mxu1 %v24568_v7 }
 0x524   : > { %4382 = vmatpush1.bf16.msra.mxu0 %v24563_v8  ;;  %4464 = vmatpush1.bf16.msra.mxu1 %v24566_v9 }
 0x525   : > { %4383 = vmatprep.subr.bf16.mxu0 %v24571_v12  ;;  %4465 = vmatprep.subr.bf16.mxu1 %v24574_v13 }
 0x528   : > { %4384 = vmatpush1.bf16.msra.mxu0 %v24569_v14  ;;  %4466 = vmatpush1.bf16.msra.mxu1 %v24572_v15 }
 0x52b   : > { %4386 = vmatmul.mubr.bf16.vlgmr.msra.gmra.mrb[12].mxu0 %v3649_v53  ;;  %4468 = vmatmul.mubr.bf16.vlgmr.msra.gmra.mrb[12].mxu1 %v3649_v53 }
 0x5fe   : > { %v4387_v29 = vpop.f32.mrb[12].mxu0  ;;  %v4469_v30 = vpop.f32.mrb[12].mxu1 }
 0x5ff   : > { %v23389_v31 = vadd.f32 %v4387_v29, %v3655_v20  ;;  %v23391_v33 = vadd.f32 %v4469_v30, %v3663_v21  ;;  %v4389_v34 = vpop.f32.mrb[13].mxu0  ;;  %v4471_v35 = vpop.f32.mrb[13].mxu1 }
 0x600   : > { %v23390_v36 = vadd.f32 %v4389_v34, %v3659_v22  ;;  %v23392_v37 = vadd.f32 %v4471_v35, %v3667_v23  ;;  %v4391_v38 = vpop.f32.mrb[14].mxu0  ;;  %v4473_v39 = vpop.f32.mrb[14].mxu1 }
 0x601   : > { %v4392_v41 = vpop.f32.mrb[15].mxu0  ;;  %v4474_v42 = vpop.f32.mrb[15].mxu1 }
 0x602   : > { %v4480_v43 = vcombine.low %v23389_v31, %v23390_v36  ;;  %v4481_v24 = vcombine.low %v23391_v33, %v23392_v37 }
 0x604   : > { %v4488_v40 = vrot.slane %v4480_v43, %v28480_v50  ;;  %v4495_v26 = vrot.slane %v4481_v24, %v28480_v50 }
 0x606   : > { %v4496_v45 = vcombine.low %v4488_v40, %v4495_v26 }
 0x608   : > { %v4498_v27 = vadd.f32 %v4496_v45, %v28521_v28 }
 0x60a   : > { %v4499_v46 = vmax.f32 %v4498_v27, 0.0 }
 0x60c   : > { %4500 = vst [vmem:[#allocation2] sm:$0xff] %v4499_v46 }
 0x60d PF: > { %v24576_v47 = vld [vmem:[%s28453_s11 + $0x4] ss:$40 sps:$4 sm:$0xff]   ;;  %v24580_v50 = vld [vmem:[%s28453_s11] ss:$40 sps:$4 sm:$0xff]   ;;  %v24582_v49 = vld [vmem:[%s28453_s11 + $0x54] ss:$40 sps:$4 sm:$0xff]   ;;  %v4517_v18 = vlaneseq }
 0x60e   : > { %v24578_v48 = vld [vmem:[%s28453_s11 + $0xc] ss:$40 sps:$4 sm:$0xff]   ;;  %9432 = vmatprep.subr.bf16.mxu0 %v24576_v47  ;;  %v24581_v28 = vld [vmem:[%s28453_s11 + $0x8] ss:$40 sps:$4 sm:$0xff]   ;;  %v24584_v44 = vld [vmem:[%s28453_s11 + $0x5c] ss:$40 sps:$4 sm:$0xff]  }
 0x60f   : > { %9637 = vmatprep.subr.bf16.mxu1 %v24578_v48  ;;  %9433 = vmatpush1.bf16.msra.mxu0 %v24580_v50  ;;  %v24586_v51 = vld [vmem:[%s28453_s11 + $0x50] ss:$40 sps:$4 sm:$0xff]   ;;  %v24588_v54 = vld [vmem:[%s28453_s11 + $0xa4] ss:$40 sps:$4 sm:$0xff]   ;;  %v24592_v56 = vld [vmem:[%s28453_s11 + $0xa0] ss:$40 sps:$4 sm:$0xff]  }
 0x610   : > { %9638 = vmatpush1.bf16.msra.mxu1 %v24581_v28  ;;  %9434 = vmatprep.subr.bf16.mxu0 %v24582_v49  ;;  %v24587_v52 = vld [vmem:[%s28453_s11 + $0x58] ss:$40 sps:$4 sm:$0xff]   ;;  %v24590_v55 = vld [vmem:[%s28453_s11 + $0xac] ss:$40 sps:$4 sm:$0xff]   ;;  %v24593_v10 = vld [vmem:[%s28453_s11 + $0xa8] ss:$40 sps:$4 sm:$0xff]  }
 0x611   : > { %9639 = vmatprep.subr.bf16.mxu1 %v24584_v44  ;;  %v24594_v57 = vld [vmem:[%s28453_s11 + $0xf4] ss:$40 sps:$4 sm:$0xff]   ;;  %v24598_v59 = vld [vmem:[%s28453_s11 + $0xf0] ss:$40 sps:$4 sm:$0xff]   ;;  %v24600_v32 = vld [vmem:[%s28453_s11 + $0x144] ss:$40 sps:$4 sm:$0xff]  }
 0x612   : > { %v24596_v58 = vld [vmem:[%s28453_s11 + $0xfc] ss:$40 sps:$4 sm:$0xff]   ;;  %v24599_v60 = vld [vmem:[%s28453_s11 + $0xf8] ss:$40 sps:$4 sm:$0xff]   ;;  %v24602_v61 = vld [vmem:[%s28453_s11 + $0x14c] ss:$40 sps:$4 sm:$0xff]  }
 0x613   : > { %9435 = vmatpush1.bf16.msra.mxu0 %v24586_v51  ;;  %v24604_v62 = vld [vmem:[%s28453_s11 + $0x140] ss:$40 sps:$4 sm:$0xff]   ;;  %v24606_v0 = vld [vmem:[%s28453_s11 + $0x194] ss:$40 sps:$4 sm:$0xff]   ;;  %v24610_v2 = vld [vmem:[%s28453_s11 + $0x190] ss:$40 sps:$4 sm:$0xff]  }
 0x614   : > { %9640 = vmatpush1.bf16.msra.mxu1 %v24587_v52  ;;  %9436 = vmatprep.subr.bf16.mxu0 %v24588_v54  ;;  %v24605_v63 = vld [vmem:[%s28453_s11 + $0x148] ss:$40 sps:$4 sm:$0xff]   ;;  %v24608_v1 = vld [vmem:[%s28453_s11 + $0x19c] ss:$40 sps:$4 sm:$0xff]   ;;  %v24611_v3 = vld [vmem:[%s28453_s11 + $0x198] ss:$40 sps:$4 sm:$0xff]  }
 0x615   : > { %9641 = vmatprep.subr.bf16.mxu1 %v24590_v55  ;;  %v24612_v4 = vld [vmem:[%s28453_s11 + $0x1e4] ss:$40 sps:$4 sm:$0xff]   ;;  %v24616_v6 = vld [vmem:[%s28453_s11 + $0x1e0] ss:$40 sps:$4 sm:$0xff]   ;;  %v24618_v8 = vld [vmem:[%s28453_s11 + $0x234] ss:$40 sps:$4 sm:$0xff]  }
 0x616   : > { %v24614_v5 = vld [vmem:[%s28453_s11 + $0x1ec] ss:$40 sps:$4 sm:$0xff]   ;;  %v24617_v7 = vld [vmem:[%s28453_s11 + $0x1e8] ss:$40 sps:$4 sm:$0xff]   ;;  %v24620_v9 = vld [vmem:[%s28453_s11 + $0x23c] ss:$40 sps:$4 sm:$0xff]  }
 0x617   : > { %9437 = vmatpush1.bf16.msra.mxu0 %v24592_v56  ;;  %v24622_v11 = vld [vmem:[%s28453_s11 + $0x230] ss:$40 sps:$4 sm:$0xff]   ;;  %v24624_v13 = vld [vmem:[%s28453_s11 + $0x284] ss:$40 sps:$4 sm:$0xff]   ;;  %v24628_v15 = vld [vmem:[%s28453_s11 + $0x280] ss:$40 sps:$4 sm:$0xff]  }
 0x618   : > { %9642 = vmatpush1.bf16.msra.mxu1 %v24593_v10  ;;  %9438 = vmatprep.subr.bf16.mxu0 %v24594_v57  ;;  %v24623_v12 = vld [vmem:[%s28453_s11 + $0x238] ss:$40 sps:$4 sm:$0xff]   ;;  %v24626_v14 = vld [vmem:[%s28453_s11 + $0x28c] ss:$40 sps:$4 sm:$0xff]   ;;  %v24629_v16 = vld [vmem:[%s28453_s11 + $0x288] ss:$40 sps:$4 sm:$0xff]  }
 0x619   : > { %9643 = vmatprep.subr.bf16.mxu1 %v24596_v58  ;;  %v28054_v53 = vmov 1983009808   ;;  %v24630_v19 = vld [vmem:[%s28453_s11 + $0x2d4] ss:$40 sps:$4 sm:$0xff]   ;;  %v24634_v20 = vld [vmem:[%s28453_s11 + $0x2d0] ss:$40 sps:$4 sm:$0xff]  }
 0x61a   : > { %v4515_v17 = vunpack.c.l.s4 %v28054_v53  ;;  %v24632_v25 = vld [vmem:[%s28453_s11 + $0x2dc] ss:$40 sps:$4 sm:$0xff]   ;;  %v28593_v22 = vshrl.u32 %v4517_v18, 7  ;;  %v24635_v23 = vld [vmem:[%s28453_s11 + $0x2d8] ss:$40 sps:$4 sm:$0xff]   ;;  %s20520_s1 = smul.u32 20, %s28144_s28 }
 0x61b   : > { %9439 = vmatpush1.bf16.msra.mxu0 %v24598_v59  ;;  %v24636_v29 = vld [vmem:[%s28453_s11 + $0x324] ss:$40 sps:$4 sm:$0xff]   ;;  %v24640_v31 = vld [vmem:[%s28453_s11 + $0x320] ss:$40 sps:$4 sm:$0xff]   ;;  %v24642_v35 = vld [vmem:[%s28453_s11 + $0x374] ss:$40 sps:$4 sm:$0xff]  }
 0x61c   : > { %9644 = vmatpush1.bf16.msra.mxu1 %v24599_v60  ;;  %9440 = vmatprep.subr.bf16.mxu0 %v24600_v32  ;;  %v4516_v21 = vunpack.c.0.s8 %v4515_v17  ;;  %v24638_v30 = vld [vmem:[%s28453_s11 + $0x32c] ss:$40 sps:$4 sm:$0xff]   ;;  %v24641_v33 = vld [vmem:[%s28453_s11 + $0x328] ss:$40 sps:$4 sm:$0xff]   ;;  %v24644_v36 = vld [vmem:[%s28453_s11 + $0x37c] ss:$40 sps:$4 sm:$0xff]  }
 0x61d   : > { %9645 = vmatprep.subr.bf16.mxu1 %v24602_v61  ;;  %v4507_v37 = vld [vmem:[#allocation3] sm:$0xff]  ;;  %v24646_v38 = vld [vmem:[%s28453_s11 + $0x370] ss:$40 sps:$4 sm:$0xff]   ;;  %v24650_v43 = vld [vmem:[%s28453_s11 + $0x3cc] ss:$40 sps:$4 sm:$0xff]   ;;  %s29289_s26 = scalar_lea.vmem [#allocation13], %s20520_s1 }
 0x61e   : > { %v28601_v34 = vsub.s32 %v4516_v21, %v28593_v22  ;;  %v24647_v41 = vld [vmem:[%s28453_s11 + $0x378] ss:$40 sps:$4 sm:$0xff]   ;;  %v24648_v42 = vld [vmem:[%s28453_s11 + $0x3c4] ss:$40 sps:$4 sm:$0xff]   ;;  %v24653_v45 = vld [vmem:[%s28453_s11 + $0x3c8] ss:$40 sps:$4 sm:$0xff]   ;;  %v4513_v49 = vcombine.high %v4507_v37, %v4507_v37 }
 0x61f   : > { %9441 = vmatpush1.bf16.msra.mxu0 %v24604_v62  ;;  %v24652_v40 = vld [vmem:[%s28453_s11 + $0x3c0] ss:$40 sps:$4 sm:$0xff]   ;;  %v24654_v27 = vld [vmem:[%s28453_s11 + $0x414] ss:$40 sps:$4 sm:$0xff]   ;;  %v24658_v47 = vld [vmem:[%s28453_s11 + $0x410] ss:$40 sps:$4 sm:$0xff]  }
 0x620   : > { %9646 = vmatpush1.bf16.msra.mxu1 %v24605_v63  ;;  %9442 = vmatprep.subr.bf16.mxu0 %v24606_v0  ;;  %v4520_v39 = vrot.slane %v4507_v37, %v28601_v34  ;;  %v24656_v46 = vld [vmem:[%s28453_s11 + $0x41c] ss:$40 sps:$4 sm:$0xff]   ;;  %v24659_v48 = vld [vmem:[%s28453_s11 + $0x418] ss:$40 sps:$4 sm:$0xff]   ;;  %v24662_v28 = vld [vmem:[%s28453_s11 + $0x46c] ss:$40 sps:$4 sm:$0xff]   ;;  %v28627_v55 = vrot.slane %v4513_v49, %v28601_v34 }
 0x621   : > { %9647 = vmatprep.subr.bf16.mxu1 %v24608_v1  ;;  %v24660_v50 = vld [vmem:[%s28453_s11 + $0x464] ss:$40 sps:$4 sm:$0xff]   ;;  %v24664_v44 = vld [vmem:[%s28453_s11 + $0x460] ss:$40 sps:$4 sm:$0xff]   ;;  %v24666_v52 = vld [vmem:[%s28453_s11 + $0x4b4] ss:$40 sps:$4 sm:$0xff]  }
 0x622   : > { %v4528_v24 = vcombine.high %v4520_v39, %v4520_v39  ;;  %v24665_v51 = vld [vmem:[%s28453_s11 + $0x468] ss:$40 sps:$4 sm:$0xff]   ;;  %v24668_v54 = vld [vmem:[%s28453_s11 + $0x4bc] ss:$40 sps:$4 sm:$0xff]   ;;  %v24671_v10 = vld [vmem:[%s28453_s11 + $0x4b8] ss:$40 sps:$4 sm:$0xff]   ;;  %v4529_v59 = vcombine.high %v28627_v55, %v28627_v55  ;;  %v28636_v32 = vpack.c.bf16 %v4520_v39, %v4520_v39 }
 0x623   : > { %9443 = vmatpush1.bf16.msra.mxu0 %v24610_v2  ;;  %v24670_v56 = vld [vmem:[%s28453_s11 + $0x4b0] ss:$40 sps:$4 sm:$0xff]   ;;  %v24674_v57 = vld [vmem:[%s28453_s11 + $0x504] ss:$40 sps:$4 sm:$0xff]   ;;  %v24672_v60 = vld [vmem:[%s28453_s11 + $0x500] ss:$40 sps:$4 sm:$0xff]  }
 0x624   : > { %9648 = vmatpush1.bf16.msra.mxu1 %v24611_v3  ;;  %9444 = vmatprep.subr.bf16.mxu0 %v24612_v4  ;;  %v28611_v26 = vpack.c.bf16 %v4528_v24, %v4528_v24  ;;  %v24677_v58 = vld [vmem:[%s28453_s11 + $0x50c] ss:$40 sps:$4 sm:$0xff]   ;;  %v24675_v61 = vld [vmem:[%s28453_s11 + $0x508] ss:$40 sps:$4 sm:$0xff]   ;;  %v24683_v63 = vld [vmem:[%s28453_s11 + $0x55c] ss:$40 sps:$4 sm:$0xff]   ;;  %v28641_v0 = vpack.c.bf16 %v4529_v59, %v4529_v59 }
 0x625   : > { %9649 = vmatprep.subr.bf16.mxu1 %v24614_v5  ;;  %v24680_v62 = vld [vmem:[%s28453_s11 + $0x554] ss:$40 sps:$4 sm:$0xff]   ;;  %v24678_v1 = vld [vmem:[%s28453_s11 + $0x550] ss:$40 sps:$4 sm:$0xff]   ;;  %v24686_v3 = vld [vmem:[%s28453_s11 + $0x5a4] ss:$40 sps:$4 sm:$0xff]  }
 0x626   : > { %9464 = vmatprep.mubr.bf16.mxu0 %v28611_v26  ;;  %9669 = vmatprep.mubr.bf16.mxu1 %v28611_v26  ;;  %v24681_v2 = vld [vmem:[%s28453_s11 + $0x558] ss:$40 sps:$4 sm:$0xff]   ;;  %v24689_v4 = vld [vmem:[%s28453_s11 + $0x5ac] ss:$40 sps:$4 sm:$0xff]   ;;  %v24707_v53 = vld [vmem:[%s28453_s11 + $0x69c] ss:$40 sps:$4 sm:$0xff]  }
 0x627   : > { %9445 = vmatpush1.bf16.msra.mxu0 %v24616_v6  ;;  %v24684_v5 = vld [vmem:[%s28453_s11 + $0x5a0] ss:$40 sps:$4 sm:$0xff]   ;;  %v24702_v17 = vld [vmem:[%s28453_s11 + $0x690] ss:$40 sps:$4 sm:$0xff]   ;;  %v24731_v39 = vld [vmem:[%s28453_s11 + $0x7dc] ss:$40 sps:$4 sm:$0xff]  }
 0x628   : > { %9650 = vmatpush1.bf16.msra.mxu1 %v24617_v7  ;;  %9446 = vmatprep.subr.bf16.mxu0 %v24618_v8  ;;  %v24687_v6 = vld [vmem:[%s28453_s11 + $0x5a8] ss:$40 sps:$4 sm:$0xff]   ;;  %v24692_v7 = vld [vmem:[%s28453_s11 + $0x5f4] ss:$40 sps:$4 sm:$0xff]   ;;  %v24705_v18 = vld [vmem:[%s28453_s11 + $0x698] ss:$40 sps:$4 sm:$0xff]  }
 0x629   : > { %9651 = vmatprep.subr.bf16.mxu1 %v24620_v9  ;;  %v24695_v8 = vld [vmem:[%s28453_s11 + $0x5fc] ss:$40 sps:$4 sm:$0xff]   ;;  %v24690_v9 = vld [vmem:[%s28453_s11 + $0x5f0] ss:$40 sps:$4 sm:$0xff]   ;;  %v24737_v24 = vld [vmem:[%s28453_s11 + $0x82c] ss:$40 sps:$4 sm:$0xff]  }
 0x62a   : > { %v24711_v21 = vld [vmem:[%s28453_s11 + $0x6e8] ss:$40 sps:$4 sm:$0xff]   ;;  %p22925_p9 = scmp.ne.s32.totalorder %s28144_s28, 1 }
 0x62b   : > { %9447 = vmatpush1.bf16.msra.mxu0 %v24622_v11  ;;  %v24693_v11 = vld [vmem:[%s28453_s11 + $0x5f8] ss:$40 sps:$4 sm:$0xff]   ;;  %v24723_v37 = vld [vmem:[%s28453_s11 + $0x788] ss:$40 sps:$4 sm:$0xff]   ;;  %vm19824_vm0 = vcmask (!%p22925_p9), 1041408   ;;  %vm19838_vm1 = vcmask (!%p22925_p9), 1024  }
 0x62c   : > { %9652 = vmatpush1.bf16.msra.mxu1 %v24623_v12  ;;  %9448 = vmatprep.subr.bf16.mxu0 %v24624_v13  ;;  %v24698_v12 = vld [vmem:[%s28453_s11 + $0x644] ss:$40 sps:$4 sm:$0xff]   ;;  %v24744_v49 = vld [vmem:[%s28453_s11 + $0x8c0] ss:$40 sps:$4 sm:$0xff]   ;;  %s30649_s13 = sld [smem:[#allocation33_spill]] (!%p22925_p9) }
 0x62d   : > { %9653 = vmatprep.subr.bf16.mxu1 %v24626_v14  ;;  %v24701_v13 = vld [vmem:[%s28453_s11 + $0x64c] ss:$40 sps:$4 sm:$0xff]   ;;  %v24696_v14 = vld [vmem:[%s28453_s11 + $0x640] ss:$40 sps:$4 sm:$0xff]  }
 0x62e   : > { %v24759_v59 = vld [vmem:[%s28453_s11 + $0x968] ss:$40 sps:$4 sm:$0xff]  }
 0x62f   : > { %9449 = vmatpush1.bf16.msra.mxu0 %v24628_v15  ;;  %v24699_v15 = vld [vmem:[%s28453_s11 + $0x648] ss:$40 sps:$4 sm:$0xff]  }
 0x630   : > { %9654 = vmatpush1.bf16.msra.mxu1 %v24629_v16  ;;  %9450 = vmatprep.subr.bf16.mxu0 %v24630_v19  ;;  %v24704_v16 = vld [vmem:[%s28453_s11 + $0x694] ss:$40 sps:$4 sm:$0xff]   ;;  %v24710_v19 = vld [vmem:[%s28453_s11 + $0x6e4] ss:$40 sps:$4 sm:$0xff]  }
 0x631   : > { %9655 = vmatprep.subr.bf16.mxu1 %v24632_v25  ;;  %v24713_v25 = vld [vmem:[%s28453_s11 + $0x6ec] ss:$40 sps:$4 sm:$0xff]  }
 0x633   : > { %9451 = vmatpush1.bf16.msra.mxu0 %v24634_v20  ;;  %v24708_v20 = vld [vmem:[%s28453_s11 + $0x6e0] ss:$40 sps:$4 sm:$0xff]  }
 0x634   : > { %9656 = vmatpush1.bf16.msra.mxu1 %v24635_v23  ;;  %9452 = vmatprep.subr.bf16.mxu0 %v24636_v29  ;;  %v24716_v23 = vld [vmem:[%s28453_s11 + $0x734] ss:$40 sps:$4 sm:$0xff]  }
 0x635   : > { %9657 = vmatprep.subr.bf16.mxu1 %v24638_v30  ;;  %v24719_v29 = vld [vmem:[%s28453_s11 + $0x73c] ss:$40 sps:$4 sm:$0xff]   ;;  %v24714_v30 = vld [vmem:[%s28453_s11 + $0x730] ss:$40 sps:$4 sm:$0xff]  }
 0x637   : > { %9453 = vmatpush1.bf16.msra.mxu0 %v24640_v31  ;;  %v24717_v31 = vld [vmem:[%s28453_s11 + $0x738] ss:$40 sps:$4 sm:$0xff]  }
 0x638   : > { %9658 = vmatpush1.bf16.msra.mxu1 %v24641_v33  ;;  %9454 = vmatprep.subr.bf16.mxu0 %v24642_v35  ;;  %v24722_v33 = vld [vmem:[%s28453_s11 + $0x784] ss:$40 sps:$4 sm:$0xff]  }
 0x639   : > { %9659 = vmatprep.subr.bf16.mxu1 %v24644_v36  ;;  %v24725_v35 = vld [vmem:[%s28453_s11 + $0x78c] ss:$40 sps:$4 sm:$0xff]   ;;  %v24720_v36 = vld [vmem:[%s28453_s11 + $0x780] ss:$40 sps:$4 sm:$0xff]  }
 0x63b   : > { %9455 = vmatpush1.bf16.msra.mxu0 %v24646_v38  ;;  %v24728_v38 = vld [vmem:[%s28453_s11 + $0x7d4] ss:$40 sps:$4 sm:$0xff]  }
 0x63c   : > { %9660 = vmatpush1.bf16.msra.mxu1 %v24647_v41  ;;  %9456 = vmatprep.subr.bf16.mxu0 %v24648_v42  ;;  %v24726_v41 = vld [vmem:[%s28453_s11 + $0x7d0] ss:$40 sps:$4 sm:$0xff]  }
 0x63d   : > { %9661 = vmatprep.subr.bf16.mxu1 %v24650_v43  ;;  %v24729_v42 = vld [vmem:[%s28453_s11 + $0x7d8] ss:$40 sps:$4 sm:$0xff]   ;;  %v24734_v43 = vld [vmem:[%s28453_s11 + $0x824] ss:$40 sps:$4 sm:$0xff]  }
 0x63f   : > { %9457 = vmatpush1.bf16.msra.mxu0 %v24652_v40  ;;  %v24732_v40 = vld [vmem:[%s28453_s11 + $0x820] ss:$40 sps:$4 sm:$0xff]  }
 0x640   : > { %9662 = vmatpush1.bf16.msra.mxu1 %v24653_v45  ;;  %9458 = vmatprep.subr.bf16.mxu0 %v24654_v27  ;;  %v24735_v45 = vld [vmem:[%s28453_s11 + $0x828] ss:$40 sps:$4 sm:$0xff]   ;;  %v24740_v27 = vld [vmem:[%s28453_s11 + $0x874] ss:$40 sps:$4 sm:$0xff]  }
 0x641   : > { %9663 = vmatprep.subr.bf16.mxu1 %v24656_v46  ;;  %v24743_v46 = vld [vmem:[%s28453_s11 + $0x87c] ss:$40 sps:$4 sm:$0xff]  }
 0x643   : > { %9459 = vmatpush1.bf16.msra.mxu0 %v24658_v47  ;;  %v24738_v47 = vld [vmem:[%s28453_s11 + $0x870] ss:$40 sps:$4 sm:$0xff]  }
 0x644   : > { %9664 = vmatpush1.bf16.msra.mxu1 %v24659_v48  ;;  %9460 = vmatprep.subr.bf16.mxu0 %v24660_v50  ;;  %v24741_v48 = vld [vmem:[%s28453_s11 + $0x878] ss:$40 sps:$4 sm:$0xff]   ;;  %v24746_v50 = vld [vmem:[%s28453_s11 + $0x8c4] ss:$40 sps:$4 sm:$0xff]  }
 0x645   : > { %9665 = vmatprep.subr.bf16.mxu1 %v24662_v28  ;;  %v24749_v28 = vld [vmem:[%s28453_s11 + $0x8cc] ss:$40 sps:$4 sm:$0xff]  }
 0x647   : > { %9461 = vmatpush1.bf16.msra.mxu0 %v24664_v44  ;;  %v24747_v44 = vld [vmem:[%s28453_s11 + $0x8c8] ss:$40 sps:$4 sm:$0xff]  }
 0x648   : > { %9666 = vmatpush1.bf16.msra.mxu1 %v24665_v51  ;;  %9462 = vmatprep.subr.bf16.mxu0 %v24666_v52  ;;  %v24752_v51 = vld [vmem:[%s28453_s11 + $0x914] ss:$40 sps:$4 sm:$0xff]  }
 0x649   : > { %9667 = vmatprep.subr.bf16.mxu1 %v24668_v54  ;;  %v24755_v52 = vld [vmem:[%s28453_s11 + $0x91c] ss:$40 sps:$4 sm:$0xff]   ;;  %v24750_v54 = vld [vmem:[%s28453_s11 + $0x910] ss:$40 sps:$4 sm:$0xff]  }
 0x64b   : > { %9463 = vmatpush1.bf16.msra.mxu0 %v24670_v56  ;;  %v24753_v56 = vld [vmem:[%s28453_s11 + $0x918] ss:$40 sps:$4 sm:$0xff]  }
 0x64c   : > { %9668 = vmatpush1.bf16.msra.mxu1 %v24671_v10  ;;  %9473 = vmatprep.subr.bf16.mxu0 %v24674_v57  ;;  %v24758_v10 = vld [vmem:[%s28453_s11 + $0x964] ss:$40 sps:$4 sm:$0xff]  }
 0x64d   : > { %9678 = vmatprep.subr.bf16.mxu1 %v24677_v58  ;;  %v24761_v57 = vld [vmem:[%s28453_s11 + $0x96c] ss:$40 sps:$4 sm:$0xff]   ;;  %v24756_v58 = vld [vmem:[%s28453_s11 + $0x960] ss:$40 sps:$4 sm:$0xff]  }
 0x64e   : > { %9465 = vmatmul.mubr.bf16.vlgmr.msra.gmra.mrb[0].mxu0 %v28636_v32 }
 0x64f   : > { %9670 = vmatmul.mubr.bf16.vlgmr.msra.gmra.mrb[0].mxu1 %v28636_v32  ;;  %9474 = vmatpush1.bf16.msra.mxu0 %v24672_v60  ;;  %v24764_v60 = vld [vmem:[%s28453_s11 + $0x9b4] ss:$40 sps:$4 sm:$0xff]  }
 0x650   : > { %9679 = vmatpush1.bf16.msra.mxu1 %v24675_v61  ;;  %9475 = vmatprep.subr.bf16.mxu0 %v24680_v62  ;;  %v24767_v61 = vld [vmem:[%s28453_s11 + $0x9bc] ss:$40 sps:$4 sm:$0xff]   ;;  %v24762_v62 = vld [vmem:[%s28453_s11 + $0x9b0] ss:$40 sps:$4 sm:$0xff]  }
 0x651   : > { %9680 = vmatprep.subr.bf16.mxu1 %v24683_v63  ;;  %9505 = vmatprep.mubr.bf16.mxu0 %v28641_v0  ;;  %v24765_v63 = vld [vmem:[%s28453_s11 + $0x9b8] ss:$40 sps:$4 sm:$0xff]  }
 0x652   : > { %9710 = vmatprep.mubr.bf16.mxu1 %v28641_v0 }
 0x653   : > { %9476 = vmatpush1.bf16.msra.mxu0 %v24678_v1  ;;  %v24771_v1 = vld [vmem:[%s28453_s11 + $0xa04] ss:$40 sps:$4 sm:$0xff]  }
 0x654   : > { %9681 = vmatpush1.bf16.msra.mxu1 %v24681_v2  ;;  %9477 = vmatprep.subr.bf16.mxu0 %v24686_v3  ;;  %v24774_v2 = vld [vmem:[%s28453_s11 + $0xa0c] ss:$40 sps:$4 sm:$0xff]   ;;  %v24769_v3 = vld [vmem:[%s28453_s11 + $0xa00] ss:$40 sps:$4 sm:$0xff]  }
 0x655   : > { %9682 = vmatprep.subr.bf16.mxu1 %v24689_v4  ;;  %v28710_v4 = vpack.c.bf16 %v28627_v55, %v28627_v55 }
 0x657   : > { %9478 = vmatpush1.bf16.msra.mxu0 %v24684_v5  ;;  %v24772_v5 = vld [vmem:[%s28453_s11 + $0xa08] ss:$40 sps:$4 sm:$0xff]  }
 0x658   : > { %9683 = vmatpush1.bf16.msra.mxu1 %v24687_v6  ;;  %9479 = vmatprep.subr.bf16.mxu0 %v24692_v7  ;;  %v28713_v6 = vld [vmem:[#allocation3 + $0x8] sm:$0xff]  ;;  %v24777_v7 = vld [vmem:[%s28453_s11 + $0xa54] ss:$40 sps:$4 sm:$0xff]  }
 0x659   : > { %9684 = vmatprep.subr.bf16.mxu1 %v24695_v8  ;;  %v24780_v8 = vld [vmem:[%s28453_s11 + $0xa5c] ss:$40 sps:$4 sm:$0xff]  }
 0x65b   : > { %9480 = vmatpush1.bf16.msra.mxu0 %v24690_v9  ;;  %v28719_v9 = vrot.slane %v28713_v6, %v28601_v34 }
 0x65c   : > { %9685 = vmatpush1.bf16.msra.mxu1 %v24693_v11  ;;  %9481 = vmatprep.subr.bf16.mxu0 %v24698_v12  ;;  %v24775_v11 = vld [vmem:[%s28453_s11 + $0xa50] ss:$40 sps:$4 sm:$0xff]  }
 0x65d   : > { %9686 = vmatprep.subr.bf16.mxu1 %v24701_v13  ;;  %v4545_v55 = vcombine.high %v28719_v9, %v28719_v9  ;;  %v24778_v12 = vld [vmem:[%s28453_s11 + $0xa58] ss:$40 sps:$4 sm:$0xff]   ;;  %v24783_v13 = vld [vmem:[%s28453_s11 + $0xaa4] ss:$40 sps:$4 sm:$0xff]  }
 0x65f   : > { %9482 = vmatpush1.bf16.msra.mxu0 %v24696_v14  ;;  %v24786_v14 = vld [vmem:[%s28453_s11 + $0xaac] ss:$40 sps:$4 sm:$0xff]  }
 0x660   : > { %9687 = vmatpush1.bf16.msra.mxu1 %v24699_v15  ;;  %9483 = vmatprep.subr.bf16.mxu0 %v24704_v16  ;;  %v28729_v15 = vpack.c.bf16 %v4545_v55, %v4545_v55  ;;  %v24781_v16 = vld [vmem:[%s28453_s11 + $0xaa0] ss:$40 sps:$4 sm:$0xff]  }
 0x661   : > { %9688 = vmatprep.subr.bf16.mxu1 %v24707_v53  ;;  %v24784_v53 = vld [vmem:[%s28453_s11 + $0xaa8] ss:$40 sps:$4 sm:$0xff]  }
 0x662   : > { %v24856_v55 = vld [vmem:[%s28453_s11 + $0xe68] ss:$40 sps:$4 sm:$0xff]  }
 0x663   : > { %9484 = vmatpush1.bf16.msra.mxu0 %v24702_v17  ;;  %v24789_v17 = vld [vmem:[%s28453_s11 + $0xaf4] ss:$40 sps:$4 sm:$0xff]  }
 0x664   : > { %9689 = vmatpush1.bf16.msra.mxu1 %v24705_v18  ;;  %9485 = vmatprep.subr.bf16.mxu0 %v24710_v19  ;;  %v24792_v18 = vld [vmem:[%s28453_s11 + $0xafc] ss:$40 sps:$4 sm:$0xff]   ;;  %v24787_v19 = vld [vmem:[%s28453_s11 + $0xaf0] ss:$40 sps:$4 sm:$0xff]  }
 0x665   : > { %9690 = vmatprep.subr.bf16.mxu1 %v24713_v25  ;;  %v24790_v25 = vld [vmem:[%s28453_s11 + $0xaf8] ss:$40 sps:$4 sm:$0xff]  }
 0x667   : > { %9486 = vmatpush1.bf16.msra.mxu0 %v24708_v20  ;;  %v24795_v20 = vld [vmem:[%s28453_s11 + $0xb44] ss:$40 sps:$4 sm:$0xff]  }
 0x668   : > { %9691 = vmatpush1.bf16.msra.mxu1 %v24711_v21  ;;  %9487 = vmatprep.subr.bf16.mxu0 %v24716_v23  ;;  %v24798_v21 = vld [vmem:[%s28453_s11 + $0xb4c] ss:$40 sps:$4 sm:$0xff]   ;;  %v24793_v23 = vld [vmem:[%s28453_s11 + $0xb40] ss:$40 sps:$4 sm:$0xff]  }
 0x669   : > { %9692 = vmatprep.subr.bf16.mxu1 %v24719_v29  ;;  %v24796_v29 = vld [vmem:[%s28453_s11 + $0xb48] ss:$40 sps:$4 sm:$0xff]  }
 0x66b   : > { %9488 = vmatpush1.bf16.msra.mxu0 %v24714_v30  ;;  %v24801_v30 = vld [vmem:[%s28453_s11 + $0xb94] ss:$40 sps:$4 sm:$0xff]  }
 0x66c   : > { %9693 = vmatpush1.bf16.msra.mxu1 %v24717_v31  ;;  %9489 = vmatprep.subr.bf16.mxu0 %v24722_v33  ;;  %v24804_v31 = vld [vmem:[%s28453_s11 + $0xb9c] ss:$40 sps:$4 sm:$0xff]   ;;  %v24799_v33 = vld [vmem:[%s28453_s11 + $0xb90] ss:$40 sps:$4 sm:$0xff]  }
 0x66d   : > { %9694 = vmatprep.subr.bf16.mxu1 %v24725_v35  ;;  %v24802_v35 = vld [vmem:[%s28453_s11 + $0xb98] ss:$40 sps:$4 sm:$0xff]  }
 0x66f   : > { %9490 = vmatpush1.bf16.msra.mxu0 %v24720_v36  ;;  %v24807_v36 = vld [vmem:[%s28453_s11 + $0xbe4] ss:$40 sps:$4 sm:$0xff]  }
 0x670   : > { %9695 = vmatpush1.bf16.msra.mxu1 %v24723_v37  ;;  %9491 = vmatprep.subr.bf16.mxu0 %v24728_v38  ;;  %v24810_v37 = vld [vmem:[%s28453_s11 + $0xbec] ss:$40 sps:$4 sm:$0xff]   ;;  %v24805_v38 = vld [vmem:[%s28453_s11 + $0xbe0] ss:$40 sps:$4 sm:$0xff]  }
 0x671   : > { %9696 = vmatprep.subr.bf16.mxu1 %v24731_v39  ;;  %v24808_v39 = vld [vmem:[%s28453_s11 + $0xbe8] ss:$40 sps:$4 sm:$0xff]  }
 0x673   : > { %9492 = vmatpush1.bf16.msra.mxu0 %v24726_v41  ;;  %v24813_v41 = vld [vmem:[%s28453_s11 + $0xc34] ss:$40 sps:$4 sm:$0xff]  }
 0x674   : > { %9697 = vmatpush1.bf16.msra.mxu1 %v24729_v42  ;;  %9493 = vmatprep.subr.bf16.mxu0 %v24734_v43  ;;  %v24816_v42 = vld [vmem:[%s28453_s11 + $0xc3c] ss:$40 sps:$4 sm:$0xff]   ;;  %v24811_v43 = vld [vmem:[%s28453_s11 + $0xc30] ss:$40 sps:$4 sm:$0xff]  }
 0x675   : > { %9698 = vmatprep.subr.bf16.mxu1 %v24737_v24  ;;  %v24814_v24 = vld [vmem:[%s28453_s11 + $0xc38] ss:$40 sps:$4 sm:$0xff]  }
 0x677   : > { %9494 = vmatpush1.bf16.msra.mxu0 %v24732_v40  ;;  %v24819_v40 = vld [vmem:[%s28453_s11 + $0xc84] ss:$40 sps:$4 sm:$0xff]  }
 0x678   : > { %9699 = vmatpush1.bf16.msra.mxu1 %v24735_v45  ;;  %9495 = vmatprep.subr.bf16.mxu0 %v24740_v27  ;;  %v24822_v45 = vld [vmem:[%s28453_s11 + $0xc8c] ss:$40 sps:$4 sm:$0xff]   ;;  %v24817_v27 = vld [vmem:[%s28453_s11 + $0xc80] ss:$40 sps:$4 sm:$0xff]  }
 0x679   : > { %9700 = vmatprep.subr.bf16.mxu1 %v24743_v46  ;;  %v24820_v46 = vld [vmem:[%s28453_s11 + $0xc88] ss:$40 sps:$4 sm:$0xff]  }
 0x67b   : > { %9496 = vmatpush1.bf16.msra.mxu0 %v24738_v47  ;;  %v24825_v47 = vld [vmem:[%s28453_s11 + $0xcd4] ss:$40 sps:$4 sm:$0xff]  }
 0x67c   : > { %9701 = vmatpush1.bf16.msra.mxu1 %v24741_v48  ;;  %9497 = vmatprep.subr.bf16.mxu0 %v24746_v50  ;;  %v24828_v48 = vld [vmem:[%s28453_s11 + $0xcdc] ss:$40 sps:$4 sm:$0xff]   ;;  %v24823_v50 = vld [vmem:[%s28453_s11 + $0xcd0] ss:$40 sps:$4 sm:$0xff]  }
 0x67d   : > { %9702 = vmatprep.subr.bf16.mxu1 %v24749_v28  ;;  %v24826_v28 = vld [vmem:[%s28453_s11 + $0xcd8] ss:$40 sps:$4 sm:$0xff]  }
 0x67f   : > { %9498 = vmatpush1.bf16.msra.mxu0 %v24744_v49  ;;  %v24831_v49 = vld [vmem:[%s28453_s11 + $0xd24] ss:$40 sps:$4 sm:$0xff]  }
 0x680   : > { %9703 = vmatpush1.bf16.msra.mxu1 %v24747_v44  ;;  %9499 = vmatprep.subr.bf16.mxu0 %v24752_v51  ;;  %v24834_v44 = vld [vmem:[%s28453_s11 + $0xd2c] ss:$40 sps:$4 sm:$0xff]   ;;  %v24829_v51 = vld [vmem:[%s28453_s11 + $0xd20] ss:$40 sps:$4 sm:$0xff]  }
 0x681   : > { %9704 = vmatprep.subr.bf16.mxu1 %v24755_v52  ;;  %v24832_v52 = vld [vmem:[%s28453_s11 + $0xd28] ss:$40 sps:$4 sm:$0xff]  }
 0x683   : > { %9500 = vmatpush1.bf16.msra.mxu0 %v24750_v54  ;;  %v24837_v54 = vld [vmem:[%s28453_s11 + $0xd74] ss:$40 sps:$4 sm:$0xff]  }
 0x684   : > { %9705 = vmatpush1.bf16.msra.mxu1 %v24753_v56  ;;  %9501 = vmatprep.subr.bf16.mxu0 %v24758_v10  ;;  %v24840_v56 = vld [vmem:[%s28453_s11 + $0xd7c] ss:$40 sps:$4 sm:$0xff]   ;;  %v24835_v10 = vld [vmem:[%s28453_s11 + $0xd70] ss:$40 sps:$4 sm:$0xff]  }
 0x685   : > { %9706 = vmatprep.subr.bf16.mxu1 %v24761_v57  ;;  %v24838_v57 = vld [vmem:[%s28453_s11 + $0xd78] ss:$40 sps:$4 sm:$0xff]  }
 0x687   : > { %9502 = vmatpush1.bf16.msra.mxu0 %v24756_v58  ;;  %v24843_v58 = vld [vmem:[%s28453_s11 + $0xdc4] ss:$40 sps:$4 sm:$0xff]  }
 0x688   : > { %9707 = vmatpush1.bf16.msra.mxu1 %v24759_v59  ;;  %9503 = vmatprep.subr.bf16.mxu0 %v24764_v60  ;;  %v24846_v59 = vld [vmem:[%s28453_s11 + $0xdcc] ss:$40 sps:$4 sm:$0xff]   ;;  %v24841_v60 = vld [vmem:[%s28453_s11 + $0xdc0] ss:$40 sps:$4 sm:$0xff]  }
 0x689   : > { %9708 = vmatprep.subr.bf16.mxu1 %v24767_v61  ;;  %v24844_v61 = vld [vmem:[%s28453_s11 + $0xdc8] ss:$40 sps:$4 sm:$0xff]  }
 0x68b   : > { %9504 = vmatpush1.bf16.msra.mxu0 %v24762_v62  ;;  %v24849_v62 = vld [vmem:[%s28453_s11 + $0xe14] ss:$40 sps:$4 sm:$0xff]  }
 0x68c   : > { %9709 = vmatpush1.bf16.msra.mxu1 %v24765_v63  ;;  %9514 = vmatprep.subr.bf16.mxu0 %v24771_v1  ;;  %v24852_v63 = vld [vmem:[%s28453_s11 + $0xe1c] ss:$40 sps:$4 sm:$0xff]   ;;  %v24847_v1 = vld [vmem:[%s28453_s11 + $0xe10] ss:$40 sps:$4 sm:$0xff]  }
 0x68d   : > { %9719 = vmatprep.subr.bf16.mxu1 %v24774_v2  ;;  %v24850_v2 = vld [vmem:[%s28453_s11 + $0xe18] ss:$40 sps:$4 sm:$0xff]  }
 0x68e   : > { %9506 = vmatmul.mubr.bf16.vlgmr.msra.gmra.mrb[0].mxu0 %v28710_v4 }
 0x68f   : > { %9711 = vmatmul.mubr.bf16.vlgmr.msra.gmra.mrb[0].mxu1 %v28710_v4  ;;  %9515 = vmatpush1.bf16.msra.mxu0 %v24769_v3  ;;  %v24855_v3 = vld [vmem:[%s28453_s11 + $0xe64] ss:$40 sps:$4 sm:$0xff]  }
 0x690   : > { %9720 = vmatpush1.bf16.msra.mxu1 %v24772_v5  ;;  %9516 = vmatprep.subr.bf16.mxu0 %v24777_v7  ;;  %v24858_v5 = vld [vmem:[%s28453_s11 + $0xe6c] ss:$40 sps:$4 sm:$0xff]   ;;  %v4530_v7 = vcombine.high %v28713_v6, %v28713_v6  ;;  %v24859_v6 = vld [vmem:[%s28453_s11 + $0xeb0] ss:$40 sps:$4 sm:$0xff]  }
 0x691   : > { %9721 = vmatprep.subr.bf16.mxu1 %v24780_v8  ;;  %9546 = vmatprep.mubr.bf16.mxu0 %v28729_v15  ;;  %v24853_v8 = vld [vmem:[%s28453_s11 + $0xe60] ss:$40 sps:$4 sm:$0xff]  }
 0x692   : > { %9751 = vmatprep.mubr.bf16.mxu1 %v28729_v15 }
 0x693   : > { %9517 = vmatpush1.bf16.msra.mxu0 %v24775_v11  ;;  %v24861_v11 = vld [vmem:[%s28453_s11 + $0xeb4] ss:$40 sps:$4 sm:$0xff]  }
 0x694   : > { %9722 = vmatpush1.bf16.msra.mxu1 %v24778_v12  ;;  %9518 = vmatprep.subr.bf16.mxu0 %v24783_v13  ;;  %v24864_v12 = vld [vmem:[%s28453_s11 + $0xebc] ss:$40 sps:$4 sm:$0xff]   ;;  %v28788_v13 = vrot.slane %v4530_v7, %v28601_v34  ;;  %v24931_v7 = vld [vmem:[%s28453_s11 + $0x1270] ss:$40 sps:$4 sm:$0xff]  }
 0x695   : > { %9723 = vmatprep.subr.bf16.mxu1 %v24786_v14  ;;  %v24862_v14 = vld [vmem:[%s28453_s11 + $0xeb8] ss:$40 sps:$4 sm:$0xff]  }
 0x697   : > { %9519 = vmatpush1.bf16.msra.mxu0 %v24781_v16  ;;  %v24867_v16 = vld [vmem:[%s28453_s11 + $0xf04] ss:$40 sps:$4 sm:$0xff]  }
 0x698   : > { %9724 = vmatpush1.bf16.msra.mxu1 %v24784_v53  ;;  %9520 = vmatprep.subr.bf16.mxu0 %v24789_v17  ;;  %v24870_v53 = vld [vmem:[%s28453_s11 + $0xf0c] ss:$40 sps:$4 sm:$0xff]   ;;  %v4546_v17 = vcombine.high %v28788_v13, %v28788_v13 }
 0x699   : > { %9725 = vmatprep.subr.bf16.mxu1 %v24792_v18  ;;  %v28798_v18 = vpack.c.bf16 %v28719_v9, %v28719_v9  ;;  %v24871_v9 = vld [vmem:[%s28453_s11 + $0xf50] ss:$40 sps:$4 sm:$0xff]  }
 0x69b   : > { %9521 = vmatpush1.bf16.msra.mxu0 %v24787_v19  ;;  %v24865_v19 = vld [vmem:[%s28453_s11 + $0xf00] ss:$40 sps:$4 sm:$0xff]  }
 0x69c   : > { %9726 = vmatpush1.bf16.msra.mxu1 %v24790_v25  ;;  %9522 = vmatprep.subr.bf16.mxu0 %v24795_v20  ;;  %v24868_v25 = vld [vmem:[%s28453_s11 + $0xf08] ss:$40 sps:$4 sm:$0xff]   ;;  %v24873_v20 = vld [vmem:[%s28453_s11 + $0xf54] ss:$40 sps:$4 sm:$0xff]  }
 0x69d   : > { %9727 = vmatprep.subr.bf16.mxu1 %v24798_v21  ;;  %v24876_v21 = vld [vmem:[%s28453_s11 + $0xf5c] ss:$40 sps:$4 sm:$0xff]  }
 0x69f   : > { %9523 = vmatpush1.bf16.msra.mxu0 %v24793_v23  ;;  %v28804_v23 = vpack.c.bf16 %v4546_v17, %v4546_v17  ;;  %v24946_v17 = vld [vmem:[%s28453_s11 + $0x1318] ss:$40 sps:$4 sm:$0xff]  }
 0x6a0   : > { %9728 = vmatpush1.bf16.msra.mxu1 %v24796_v29  ;;  %9524 = vmatprep.subr.bf16.mxu0 %v24801_v30  ;;  %v24874_v29 = vld [vmem:[%s28453_s11 + $0xf58] ss:$40 sps:$4 sm:$0xff]   ;;  %v24879_v30 = vld [vmem:[%s28453_s11 + $0xfa4] ss:$40 sps:$4 sm:$0xff]  }
 0x6a1   : > { %9729 = vmatprep.subr.bf16.mxu1 %v24804_v31  ;;  %v24882_v31 = vld [vmem:[%s28453_s11 + $0xfac] ss:$40 sps:$4 sm:$0xff]  }
 0x6a3   : > { %9525 = vmatpush1.bf16.msra.mxu0 %v24799_v33  ;;  %v24877_v33 = vld [vmem:[%s28453_s11 + $0xfa0] ss:$40 sps:$4 sm:$0xff]  }
 0x6a4   : > { %9730 = vmatpush1.bf16.msra.mxu1 %v24802_v35  ;;  %9526 = vmatprep.subr.bf16.mxu0 %v24807_v36  ;;  %v24880_v35 = vld [vmem:[%s28453_s11 + $0xfa8] ss:$40 sps:$4 sm:$0xff]   ;;  %v24885_v36 = vld [vmem:[%s28453_s11 + $0xff4] ss:$40 sps:$4 sm:$0xff]  }
 0x6a5   : > { %9731 = vmatprep.subr.bf16.mxu1 %v24810_v37  ;;  %v24888_v37 = vld [vmem:[%s28453_s11 + $0xffc] ss:$40 sps:$4 sm:$0xff]  }
 0x6a7   : > { %9527 = vmatpush1.bf16.msra.mxu0 %v24805_v38  ;;  %v24883_v38 = vld [vmem:[%s28453_s11 + $0xff0] ss:$40 sps:$4 sm:$0xff]  }
 0x6a8   : > { %9732 = vmatpush1.bf16.msra.mxu1 %v24808_v39  ;;  %9528 = vmatprep.subr.bf16.mxu0 %v24813_v41  ;;  %v24886_v39 = vld [vmem:[%s28453_s11 + $0xff8] ss:$40 sps:$4 sm:$0xff]   ;;  %v24891_v41 = vld [vmem:[%s28453_s11 + $0x1044] ss:$40 sps:$4 sm:$0xff]  }
 0x6a9   : > { %9733 = vmatprep.subr.bf16.mxu1 %v24816_v42  ;;  %v24894_v42 = vld [vmem:[%s28453_s11 + $0x104c] ss:$40 sps:$4 sm:$0xff]  }
 0x6ab   : > { %9529 = vmatpush1.bf16.msra.mxu0 %v24811_v43  ;;  %v24889_v43 = vld [vmem:[%s28453_s11 + $0x1040] ss:$40 sps:$4 sm:$0xff]  }
 0x6ac   : > { %9734 = vmatpush1.bf16.msra.mxu1 %v24814_v24  ;;  %9530 = vmatprep.subr.bf16.mxu0 %v24819_v40  ;;  %v24892_v24 = vld [vmem:[%s28453_s11 + $0x1048] ss:$40 sps:$4 sm:$0xff]   ;;  %v24897_v40 = vld [vmem:[%s28453_s11 + $0x1094] ss:$40 sps:$4 sm:$0xff]  }
 0x6ad   : > { %9735 = vmatprep.subr.bf16.mxu1 %v24822_v45  ;;  %v24900_v45 = vld [vmem:[%s28453_s11 + $0x109c] ss:$40 sps:$4 sm:$0xff]  }
 0x6af   : > { %9531 = vmatpush1.bf16.msra.mxu0 %v24817_v27  ;;  %v24895_v27 = vld [vmem:[%s28453_s11 + $0x1090] ss:$40 sps:$4 sm:$0xff]  }
 0x6b0   : > { %9736 = vmatpush1.bf16.msra.mxu1 %v24820_v46  ;;  %9532 = vmatprep.subr.bf16.mxu0 %v24825_v47  ;;  %v24898_v46 = vld [vmem:[%s28453_s11 + $0x1098] ss:$40 sps:$4 sm:$0xff]   ;;  %v24903_v47 = vld [vmem:[%s28453_s11 + $0x10e4] ss:$40 sps:$4 sm:$0xff]  }
 0x6b1   : > { %9737 = vmatprep.subr.bf16.mxu1 %v24828_v48  ;;  %v24906_v48 = vld [vmem:[%s28453_s11 + $0x10ec] ss:$40 sps:$4 sm:$0xff]  }
 0x6b3   : > { %9533 = vmatpush1.bf16.msra.mxu0 %v24823_v50  ;;  %v24901_v50 = vld [vmem:[%s28453_s11 + $0x10e0] ss:$40 sps:$4 sm:$0xff]  }
 0x6b4   : > { %9738 = vmatpush1.bf16.msra.mxu1 %v24826_v28  ;;  %9534 = vmatprep.subr.bf16.mxu0 %v24831_v49  ;;  %v24904_v28 = vld [vmem:[%s28453_s11 + $0x10e8] ss:$40 sps:$4 sm:$0xff]   ;;  %v24909_v49 = vld [vmem:[%s28453_s11 + $0x1134] ss:$40 sps:$4 sm:$0xff]  }
 0x6b5   : > { %9739 = vmatprep.subr.bf16.mxu1 %v24834_v44  ;;  %v24912_v44 = vld [vmem:[%s28453_s11 + $0x113c] ss:$40 sps:$4 sm:$0xff]  }
 0x6b7   : > { %9535 = vmatpush1.bf16.msra.mxu0 %v24829_v51  ;;  %v24907_v51 = vld [vmem:[%s28453_s11 + $0x1130] ss:$40 sps:$4 sm:$0xff]  }
 0x6b8   : > { %9740 = vmatpush1.bf16.msra.mxu1 %v24832_v52  ;;  %9536 = vmatprep.subr.bf16.mxu0 %v24837_v54  ;;  %v24910_v52 = vld [vmem:[%s28453_s11 + $0x1138] ss:$40 sps:$4 sm:$0xff]   ;;  %v24915_v54 = vld [vmem:[%s28453_s11 + $0x1184] ss:$40 sps:$4 sm:$0xff]  }
 0x6b9   : > { %9741 = vmatprep.subr.bf16.mxu1 %v24840_v56  ;;  %v24918_v56 = vld [vmem:[%s28453_s11 + $0x118c] ss:$40 sps:$4 sm:$0xff]  }
 0x6bb   : > { %9537 = vmatpush1.bf16.msra.mxu0 %v24835_v10  ;;  %v24913_v10 = vld [vmem:[%s28453_s11 + $0x1180] ss:$40 sps:$4 sm:$0xff]  }
 0x6bc   : > { %9742 = vmatpush1.bf16.msra.mxu1 %v24838_v57  ;;  %9538 = vmatprep.subr.bf16.mxu0 %v24843_v58  ;;  %v24916_v57 = vld [vmem:[%s28453_s11 + $0x1188] ss:$40 sps:$4 sm:$0xff]   ;;  %v24921_v58 = vld [vmem:[%s28453_s11 + $0x11d4] ss:$40 sps:$4 sm:$0xff]  }
 0x6bd   : > { %9743 = vmatprep.subr.bf16.mxu1 %v24846_v59  ;;  %v24924_v59 = vld [vmem:[%s28453_s11 + $0x11dc] ss:$40 sps:$4 sm:$0xff]  }
 0x6bf   : > { %9539 = vmatpush1.bf16.msra.mxu0 %v24841_v60  ;;  %v24919_v60 = vld [vmem:[%s28453_s11 + $0x11d0] ss:$40 sps:$4 sm:$0xff]  }
 0x6c0   : > { %9744 = vmatpush1.bf16.msra.mxu1 %v24844_v61  ;;  %9540 = vmatprep.subr.bf16.mxu0 %v24849_v62  ;;  %v24922_v61 = vld [vmem:[%s28453_s11 + $0x11d8] ss:$40 sps:$4 sm:$0xff]   ;;  %v24927_v62 = vld [vmem:[%s28453_s11 + $0x1224] ss:$40 sps:$4 sm:$0xff]  }
 0x6c1   : > { %9745 = vmatprep.subr.bf16.mxu1 %v24852_v63  ;;  %v24930_v63 = vld [vmem:[%s28453_s11 + $0x122c] ss:$40 sps:$4 sm:$0xff]  }
 0x6c3   : > { %9541 = vmatpush1.bf16.msra.mxu0 %v24847_v1  ;;  %v24925_v1 = vld [vmem:[%s28453_s11 + $0x1220] ss:$40 sps:$4 sm:$0xff]  }
 0x6c4   : > { %9746 = vmatpush1.bf16.msra.mxu1 %v24850_v2  ;;  %9542 = vmatprep.subr.bf16.mxu0 %v24855_v3  ;;  %v24928_v2 = vld [vmem:[%s28453_s11 + $0x1228] ss:$40 sps:$4 sm:$0xff]   ;;  %v24933_v3 = vld [vmem:[%s28453_s11 + $0x1274] ss:$40 sps:$4 sm:$0xff]  }
 0x6c5   : > { %9747 = vmatprep.subr.bf16.mxu1 %v24858_v5  ;;  %v24936_v5 = vld [vmem:[%s28453_s11 + $0x127c] ss:$40 sps:$4 sm:$0xff]  }
 0x6c7   : > { %9543 = vmatpush1.bf16.msra.mxu0 %v24853_v8  ;;  %v24934_v8 = vld [vmem:[%s28453_s11 + $0x1278] ss:$40 sps:$4 sm:$0xff]  }
 0x6c8   : > { %9748 = vmatpush1.bf16.msra.mxu1 %v24856_v55  ;;  %9544 = vmatprep.subr.bf16.mxu0 %v24861_v11  ;;  %v24939_v55 = vld [vmem:[%s28453_s11 + $0x12c4] ss:$40 sps:$4 sm:$0xff]  }
 0x6c9   : > { %9749 = vmatprep.subr.bf16.mxu1 %v24864_v12  ;;  %v24942_v11 = vld [vmem:[%s28453_s11 + $0x12cc] ss:$40 sps:$4 sm:$0xff]   ;;  %v24937_v12 = vld [vmem:[%s28453_s11 + $0x12c0] ss:$40 sps:$4 sm:$0xff]  }
 0x6cb   : > { %9545 = vmatpush1.bf16.msra.mxu0 %v24859_v6  ;;  %v24940_v6 = vld [vmem:[%s28453_s11 + $0x12c8] ss:$40 sps:$4 sm:$0xff]  }
 0x6cc   : > { %9750 = vmatpush1.bf16.msra.mxu1 %v24862_v14  ;;  %9555 = vmatprep.subr.bf16.mxu0 %v24867_v16  ;;  %v24945_v14 = vld [vmem:[%s28453_s11 + $0x1314] ss:$40 sps:$4 sm:$0xff]  }
 0x6cd   : > { %9760 = vmatprep.subr.bf16.mxu1 %v24870_v53  ;;  %v24948_v16 = vld [vmem:[%s28453_s11 + $0x131c] ss:$40 sps:$4 sm:$0xff]   ;;  %v24943_v53 = vld [vmem:[%s28453_s11 + $0x1310] ss:$40 sps:$4 sm:$0xff]  }
 0x6ce   : > { %9547 = vmatmul.mubr.bf16.vlgmr.msra.gmra.mrb[0].mxu0 %v28798_v18 }
 0x6cf   : > { %9752 = vmatmul.mubr.bf16.vlgmr.msra.gmra.mrb[0].mxu1 %v28798_v18  ;;  %9556 = vmatpush1.bf16.msra.mxu0 %v24865_v19  ;;  %v24951_v19 = vld [vmem:[%s28453_s11 + $0x1364] ss:$40 sps:$4 sm:$0xff]  }
 0x6d0   : > { %9761 = vmatpush1.bf16.msra.mxu1 %v24868_v25  ;;  %9557 = vmatprep.subr.bf16.mxu0 %v24873_v20  ;;  %v24954_v25 = vld [vmem:[%s28453_s11 + $0x136c] ss:$40 sps:$4 sm:$0xff]   ;;  %v24949_v20 = vld [vmem:[%s28453_s11 + $0x1360] ss:$40 sps:$4 sm:$0xff]  }
 0x6d1   : > { %9762 = vmatprep.subr.bf16.mxu1 %v24876_v21  ;;  %9587 = vmatprep.mubr.bf16.mxu0 %v28804_v23  ;;  %v28863_v21 = vld.sshfl [vmem:[#allocation3 + $0x10] sm:$0x33 pattern:$0x76325410] }
 0x6d2   : > { %9792 = vmatprep.mubr.bf16.mxu1 %v28804_v23 }
 0x6d3   : > { %9558 = vmatpush1.bf16.msra.mxu0 %v24871_v9  ;;  %v24952_v9 = vld [vmem:[%s28453_s11 + $0x1368] ss:$40 sps:$4 sm:$0xff]  }
 0x6d4   : > { %9763 = vmatpush1.bf16.msra.mxu1 %v24874_v29  ;;  %9559 = vmatprep.subr.bf16.mxu0 %v24879_v30  ;;  %v24957_v29 = vld [vmem:[%s28453_s11 + $0x13b4] ss:$40 sps:$4 sm:$0xff]  }
 0x6d5   : > { %9764 = vmatprep.subr.bf16.mxu1 %v24882_v31  ;;  %v24960_v30 = vld [vmem:[%s28453_s11 + $0x13bc] ss:$40 sps:$4 sm:$0xff]   ;;  %v24955_v31 = vld [vmem:[%s28453_s11 + $0x13b0] ss:$40 sps:$4 sm:$0xff]  }
 0x6d7   : > { %9560 = vmatpush1.bf16.msra.mxu0 %v24877_v33  ;;  %v24958_v33 = vld [vmem:[%s28453_s11 + $0x13b8] ss:$40 sps:$4 sm:$0xff]  }
 0x6d8   : > { %9765 = vmatpush1.bf16.msra.mxu1 %v24880_v35  ;;  %9561 = vmatprep.subr.bf16.mxu0 %v24885_v36  ;;  %v24964_v35 = vld [vmem:[%s28453_s11 + $0x1404] ss:$40 sps:$4 sm:$0xff]  }
 0x6d9   : > { %9766 = vmatprep.subr.bf16.mxu1 %v24888_v37  ;;  %v24967_v36 = vld [vmem:[%s28453_s11 + $0x140c] ss:$40 sps:$4 sm:$0xff]   ;;  %v4554_v37 = vcombine.high %v28863_v21, %v28863_v21 }
 0x6db   : > { %9562 = vmatpush1.bf16.msra.mxu0 %v24883_v38  ;;  %v24962_v38 = vld [vmem:[%s28453_s11 + $0x1400] ss:$40 sps:$4 sm:$0xff]  }
 0x6dc   : > { %9767 = vmatpush1.bf16.msra.mxu1 %v24886_v39  ;;  %9563 = vmatprep.subr.bf16.mxu0 %v24891_v41  ;;  %v28877_v39 = vpack.c.bf16 %v28788_v13, %v28788_v13  ;;  %v24965_v41 = vld [vmem:[%s28453_s11 + $0x1408] ss:$40 sps:$4 sm:$0xff]   ;;  %v24971_v13 = vld [vmem:[%s28453_s11 + $0x1458] ss:$40 sps:$4 sm:$0xff]  }
 0x6dd   : > { %9768 = vmatprep.subr.bf16.mxu1 %v24894_v42  ;;  %v24970_v42 = vld [vmem:[%s28453_s11 + $0x1454] ss:$40 sps:$4 sm:$0xff]  }
 0x6df   : > { %9564 = vmatpush1.bf16.msra.mxu0 %v24889_v43  ;;  %v24973_v43 = vld [vmem:[%s28453_s11 + $0x145c] ss:$40 sps:$4 sm:$0xff]  }
 0x6e0   : > { %9769 = vmatpush1.bf16.msra.mxu1 %v24892_v24  ;;  %9565 = vmatprep.subr.bf16.mxu0 %v24897_v40  ;;  %v28882_v24 = vpack.c.bf16 %v4554_v37, %v4554_v37  ;;  %v24968_v40 = vld [vmem:[%s28453_s11 + $0x1450] ss:$40 sps:$4 sm:$0xff]   ;;  %v25045_v37 = vld [vmem:[%s28453_s11 + $0x181c] ss:$40 sps:$4 sm:$0xff]  }
 0x6e1   : > { %9770 = vmatprep.subr.bf16.mxu1 %v24900_v45  ;;  %v24976_v45 = vld [vmem:[%s28453_s11 + $0x14a4] ss:$40 sps:$4 sm:$0xff]  }
 0x6e3   : > { %9566 = vmatpush1.bf16.msra.mxu0 %v24895_v27  ;;  %v24979_v27 = vld [vmem:[%s28453_s11 + $0x14ac] ss:$40 sps:$4 sm:$0xff]  }
 0x6e4   : > { %9771 = vmatpush1.bf16.msra.mxu1 %v24898_v46  ;;  %9567 = vmatprep.subr.bf16.mxu0 %v24903_v47  ;;  %v24974_v46 = vld [vmem:[%s28453_s11 + $0x14a0] ss:$40 sps:$4 sm:$0xff]  }
 0x6e5   : > { %9772 = vmatprep.subr.bf16.mxu1 %v24906_v48  ;;  %v24977_v47 = vld [vmem:[%s28453_s11 + $0x14a8] ss:$40 sps:$4 sm:$0xff]   ;;  %v24982_v48 = vld [vmem:[%s28453_s11 + $0x14f4] ss:$40 sps:$4 sm:$0xff]  }
 0x6e7   : > { %9568 = vmatpush1.bf16.msra.mxu0 %v24901_v50  ;;  %v24985_v50 = vld [vmem:[%s28453_s11 + $0x14fc] ss:$40 sps:$4 sm:$0xff]  }
 0x6e8   : > { %9773 = vmatpush1.bf16.msra.mxu1 %v24904_v28  ;;  %9569 = vmatprep.subr.bf16.mxu0 %v24909_v49  ;;  %v24980_v28 = vld [vmem:[%s28453_s11 + $0x14f0] ss:$40 sps:$4 sm:$0xff]  }
 0x6e9   : > { %9774 = vmatprep.subr.bf16.mxu1 %v24912_v44  ;;  %v24983_v49 = vld [vmem:[%s28453_s11 + $0x14f8] ss:$40 sps:$4 sm:$0xff]   ;;  %v24988_v44 = vld [vmem:[%s28453_s11 + $0x1544] ss:$40 sps:$4 sm:$0xff]  }
 0x6eb   : > { %9570 = vmatpush1.bf16.msra.mxu0 %v24907_v51  ;;  %v24991_v51 = vld [vmem:[%s28453_s11 + $0x154c] ss:$40 sps:$4 sm:$0xff]  }
 0x6ec   : > { %9775 = vmatpush1.bf16.msra.mxu1 %v24910_v52  ;;  %9571 = vmatprep.subr.bf16.mxu0 %v24915_v54  ;;  %v24986_v52 = vld [vmem:[%s28453_s11 + $0x1540] ss:$40 sps:$4 sm:$0xff]  }
 0x6ed   : > { %9776 = vmatprep.subr.bf16.mxu1 %v24918_v56  ;;  %v24989_v54 = vld [vmem:[%s28453_s11 + $0x1548] ss:$40 sps:$4 sm:$0xff]   ;;  %v24994_v56 = vld [vmem:[%s28453_s11 + $0x1594] ss:$40 sps:$4 sm:$0xff]  }
 0x6ef   : > { %9572 = vmatpush1.bf16.msra.mxu0 %v24913_v10  ;;  %v24997_v10 = vld [vmem:[%s28453_s11 + $0x159c] ss:$40 sps:$4 sm:$0xff]  }
 0x6f0   : > { %9777 = vmatpush1.bf16.msra.mxu1 %v24916_v57  ;;  %9573 = vmatprep.subr.bf16.mxu0 %v24921_v58  ;;  %v24992_v57 = vld [vmem:[%s28453_s11 + $0x1590] ss:$40 sps:$4 sm:$0xff]  }
 0x6f1   : > { %9778 = vmatprep.subr.bf16.mxu1 %v24924_v59  ;;  %v24995_v58 = vld [vmem:[%s28453_s11 + $0x1598] ss:$40 sps:$4 sm:$0xff]   ;;  %v25000_v59 = vld [vmem:[%s28453_s11 + $0x15e4] ss:$40 sps:$4 sm:$0xff]  }
 0x6f3   : > { %9574 = vmatpush1.bf16.msra.mxu0 %v24919_v60  ;;  %v25003_v60 = vld [vmem:[%s28453_s11 + $0x15ec] ss:$40 sps:$4 sm:$0xff]  }
 0x6f4   : > { %9779 = vmatpush1.bf16.msra.mxu1 %v24922_v61  ;;  %9575 = vmatprep.subr.bf16.mxu0 %v24927_v62  ;;  %v24998_v61 = vld [vmem:[%s28453_s11 + $0x15e0] ss:$40 sps:$4 sm:$0xff]  }
 0x6f5   : > { %9780 = vmatprep.subr.bf16.mxu1 %v24930_v63  ;;  %v25001_v62 = vld [vmem:[%s28453_s11 + $0x15e8] ss:$40 sps:$4 sm:$0xff]   ;;  %v25006_v63 = vld [vmem:[%s28453_s11 + $0x1634] ss:$40 sps:$4 sm:$0xff]  }
 0x6f7   : > { %9576 = vmatpush1.bf16.msra.mxu0 %v24925_v1  ;;  %v25009_v1 = vld [vmem:[%s28453_s11 + $0x163c] ss:$40 sps:$4 sm:$0xff]  }
 0x6f8   : > { %9781 = vmatpush1.bf16.msra.mxu1 %v24928_v2  ;;  %9577 = vmatprep.subr.bf16.mxu0 %v24933_v3  ;;  %v25004_v2 = vld [vmem:[%s28453_s11 + $0x1630] ss:$40 sps:$4 sm:$0xff]  }
 0x6f9   : > { %9782 = vmatprep.subr.bf16.mxu1 %v24936_v5  ;;  %v25007_v3 = vld [vmem:[%s28453_s11 + $0x1638] ss:$40 sps:$4 sm:$0xff]   ;;  %v25012_v5 = vld [vmem:[%s28453_s11 + $0x1684] ss:$40 sps:$4 sm:$0xff]  }
 0x6fb   : > { %9578 = vmatpush1.bf16.msra.mxu0 %v24931_v7  ;;  %v25015_v7 = vld [vmem:[%s28453_s11 + $0x168c] ss:$40 sps:$4 sm:$0xff]  }
 0x6fc   : > { %9783 = vmatpush1.bf16.msra.mxu1 %v24934_v8  ;;  %9579 = vmatprep.subr.bf16.mxu0 %v24939_v55  ;;  %v25010_v8 = vld [vmem:[%s28453_s11 + $0x1680] ss:$40 sps:$4 sm:$0xff]  }
 0x6fd   : > { %9784 = vmatprep.subr.bf16.mxu1 %v24942_v11  ;;  %v25013_v55 = vld [vmem:[%s28453_s11 + $0x1688] ss:$40 sps:$4 sm:$0xff]   ;;  %v25018_v11 = vld [vmem:[%s28453_s11 + $0x16d4] ss:$40 sps:$4 sm:$0xff]  }
 0x6ff   : > { %9580 = vmatpush1.bf16.msra.mxu0 %v24937_v12  ;;  %v25021_v12 = vld [vmem:[%s28453_s11 + $0x16dc] ss:$40 sps:$4 sm:$0xff]  }
 0x700   : > { %9785 = vmatpush1.bf16.msra.mxu1 %v24940_v6  ;;  %9581 = vmatprep.subr.bf16.mxu0 %v24945_v14  ;;  %v25016_v6 = vld [vmem:[%s28453_s11 + $0x16d0] ss:$40 sps:$4 sm:$0xff]  }
 0x701   : > { %9786 = vmatprep.subr.bf16.mxu1 %v24948_v16  ;;  %v25019_v14 = vld [vmem:[%s28453_s11 + $0x16d8] ss:$40 sps:$4 sm:$0xff]   ;;  %v25024_v16 = vld [vmem:[%s28453_s11 + $0x1724] ss:$40 sps:$4 sm:$0xff]  }
 0x703   : > { %9582 = vmatpush1.bf16.msra.mxu0 %v24943_v53  ;;  %v25027_v53 = vld [vmem:[%s28453_s11 + $0x172c] ss:$40 sps:$4 sm:$0xff]  }
 0x704   : > { %9787 = vmatpush1.bf16.msra.mxu1 %v24946_v17  ;;  %9583 = vmatprep.subr.bf16.mxu0 %v24951_v19  ;;  %v25022_v17 = vld [vmem:[%s28453_s11 + $0x1720] ss:$40 sps:$4 sm:$0xff]  }
 0x705   : > { %9788 = vmatprep.subr.bf16.mxu1 %v24954_v25  ;;  %v25025_v19 = vld [vmem:[%s28453_s11 + $0x1728] ss:$40 sps:$4 sm:$0xff]   ;;  %v25030_v25 = vld [vmem:[%s28453_s11 + $0x1774] ss:$40 sps:$4 sm:$0xff]  }
 0x707   : > { %9584 = vmatpush1.bf16.msra.mxu0 %v24949_v20  ;;  %v25033_v20 = vld [vmem:[%s28453_s11 + $0x177c] ss:$40 sps:$4 sm:$0xff]  }
 0x708   : > { %9789 = vmatpush1.bf16.msra.mxu1 %v24952_v9  ;;  %9585 = vmatprep.subr.bf16.mxu0 %v24957_v29  ;;  %v25028_v9 = vld [vmem:[%s28453_s11 + $0x1770] ss:$40 sps:$4 sm:$0xff]  }
 0x709   : > { %9790 = vmatprep.subr.bf16.mxu1 %v24960_v30  ;;  %v25031_v29 = vld [vmem:[%s28453_s11 + $0x1778] ss:$40 sps:$4 sm:$0xff]   ;;  %v25036_v30 = vld [vmem:[%s28453_s11 + $0x17c4] ss:$40 sps:$4 sm:$0xff]  }
 0x70b   : > { %9586 = vmatpush1.bf16.msra.mxu0 %v24955_v31  ;;  %v25039_v31 = vld [vmem:[%s28453_s11 + $0x17cc] ss:$40 sps:$4 sm:$0xff]  }
 0x70c   : > { %9791 = vmatpush1.bf16.msra.mxu1 %v24958_v33  ;;  %9596 = vmatprep.subr.bf16.mxu0 %v24964_v35  ;;  %v25034_v33 = vld [vmem:[%s28453_s11 + $0x17c0] ss:$40 sps:$4 sm:$0xff]  }
 0x70d   : > { %9801 = vmatprep.subr.bf16.mxu1 %v24967_v36  ;;  %v25037_v35 = vld [vmem:[%s28453_s11 + $0x17c8] ss:$40 sps:$4 sm:$0xff]   ;;  %v25042_v36 = vld [vmem:[%s28453_s11 + $0x1814] ss:$40 sps:$4 sm:$0xff]  }
 0x70e   : > { %9588 = vmatmul.mubr.bf16.vlgmr.msra.gmra.mrb[0].mxu0 %v28877_v39 }
 0x70f   : > { %9793 = vmatmul.mubr.bf16.vlgmr.msra.gmra.mrb[0].mxu1 %v28877_v39  ;;  %9597 = vmatpush1.bf16.msra.mxu0 %v24962_v38  ;;  %v25040_v38 = vld [vmem:[%s28453_s11 + $0x1810] ss:$40 sps:$4 sm:$0xff]  }
 0x710   : > { %9802 = vmatpush1.bf16.msra.mxu1 %v24965_v41  ;;  %9598 = vmatprep.subr.bf16.mxu0 %v24970_v42  ;;  %v25043_v41 = vld [vmem:[%s28453_s11 + $0x1818] ss:$40 sps:$4 sm:$0xff]   ;;  %v25048_v42 = vld [vmem:[%s28453_s11 + $0x1864] ss:$40 sps:$4 sm:$0xff]  }
 0x711   : > { %9803 = vmatprep.subr.bf16.mxu1 %v24973_v43  ;;  %9628 = vmatprep.mubr.bf16.mxu0 %v28882_v24  ;;  %v25051_v43 = vld [vmem:[%s28453_s11 + $0x186c] ss:$40 sps:$4 sm:$0xff]  }
 0x712   : > { %9833 = vmatprep.mubr.bf16.mxu1 %v28882_v24 }
 0x713   : > { %9599 = vmatpush1.bf16.msra.mxu0 %v24968_v40  ;;  %v25046_v40 = vld [vmem:[%s28453_s11 + $0x1860] ss:$40 sps:$4 sm:$0xff]  }
 0x714   : > { %9804 = vmatpush1.bf16.msra.mxu1 %v24971_v13  ;;  %9600 = vmatprep.subr.bf16.mxu0 %v24976_v45  ;;  %v25049_v13 = vld [vmem:[%s28453_s11 + $0x1868] ss:$40 sps:$4 sm:$0xff]   ;;  %v25054_v45 = vld [vmem:[%s28453_s11 + $0x18b4] ss:$40 sps:$4 sm:$0xff]  }
 0x715   : > { %9805 = vmatprep.subr.bf16.mxu1 %v24979_v27  ;;  %v25057_v27 = vld [vmem:[%s28453_s11 + $0x18bc] ss:$40 sps:$4 sm:$0xff]  }
 0x717   : > { %9601 = vmatpush1.bf16.msra.mxu0 %v24974_v46  ;;  %v25052_v46 = vld [vmem:[%s28453_s11 + $0x18b0] ss:$40 sps:$4 sm:$0xff]  }
 0x718   : > { %9806 = vmatpush1.bf16.msra.mxu1 %v24977_v47  ;;  %9602 = vmatprep.subr.bf16.mxu0 %v24982_v48  ;;  %v25055_v47 = vld [vmem:[%s28453_s11 + $0x18b8] ss:$40 sps:$4 sm:$0xff]   ;;  %v25060_v48 = vld [vmem:[%s28453_s11 + $0x14] ss:$40 sps:$4 sm:$0xff]  }
 0x719   : > { %9807 = vmatprep.subr.bf16.mxu1 %v24985_v50  ;;  %v25063_v50 = vld [vmem:[%s28453_s11 + $0x1c] ss:$40 sps:$4 sm:$0xff]  }
 0x71b   : > { %9603 = vmatpush1.bf16.msra.mxu0 %v24980_v28  ;;  %v28950_v28 = vpack.c.bf16 %v28863_v21, %v28863_v21  ;;  %v25064_v21 = vld [vmem:[%s28453_s11 + $0x60] ss:$40 sps:$4 sm:$0xff]  }
 0x71c   : > { %9808 = vmatpush1.bf16.msra.mxu1 %v24983_v49  ;;  %9604 = vmatprep.subr.bf16.mxu0 %v24988_v44  ;;  %v25058_v49 = vld [vmem:[%s28453_s11 + $0x10] ss:$40 sps:$4 sm:$0xff]  }
 0x71d   : > { %9809 = vmatprep.subr.bf16.mxu1 %v24991_v51  ;;  %v25061_v44 = vld [vmem:[%s28453_s11 + $0x18] ss:$40 sps:$4 sm:$0xff]   ;;  %v25066_v51 = vld [vmem:[%s28453_s11 + $0x64] ss:$40 sps:$4 sm:$0xff]  }
 0x71f   : > { %9605 = vmatpush1.bf16.msra.mxu0 %v24986_v52  ;;  %v25069_v52 = vld [vmem:[%s28453_s11 + $0x6c] ss:$40 sps:$4 sm:$0xff]  }
 0x720   : > { %9810 = vmatpush1.bf16.msra.mxu1 %v24989_v54  ;;  %9606 = vmatprep.subr.bf16.mxu0 %v24994_v56  ;;  %v25067_v54 = vld [vmem:[%s28453_s11 + $0x68] ss:$40 sps:$4 sm:$0xff]   ;;  %v25072_v56 = vld [vmem:[%s28453_s11 + $0xb4] ss:$40 sps:$4 sm:$0xff]  }
 0x721   : > { %9811 = vmatprep.subr.bf16.mxu1 %v24997_v10  ;;  %v25075_v10 = vld [vmem:[%s28453_s11 + $0xbc] ss:$40 sps:$4 sm:$0xff]  }
 0x723   : > { %9607 = vmatpush1.bf16.msra.mxu0 %v24992_v57  ;;  %v25070_v57 = vld [vmem:[%s28453_s11 + $0xb0] ss:$40 sps:$4 sm:$0xff]  }
 0x724   : > { %9812 = vmatpush1.bf16.msra.mxu1 %v24995_v58  ;;  %9608 = vmatprep.subr.bf16.mxu0 %v25000_v59  ;;  %v25073_v58 = vld [vmem:[%s28453_s11 + $0xb8] ss:$40 sps:$4 sm:$0xff]   ;;  %v25078_v59 = vld [vmem:[%s28453_s11 + $0x104] ss:$40 sps:$4 sm:$0xff]  }
 0x725   : > { %9813 = vmatprep.subr.bf16.mxu1 %v25003_v60  ;;  %v25081_v60 = vld [vmem:[%s28453_s11 + $0x10c] ss:$40 sps:$4 sm:$0xff]  }
 0x727   : > { %9609 = vmatpush1.bf16.msra.mxu0 %v24998_v61  ;;  %v25076_v61 = vld [vmem:[%s28453_s11 + $0x100] ss:$40 sps:$4 sm:$0xff]  }
 0x728   : > { %9814 = vmatpush1.bf16.msra.mxu1 %v25001_v62  ;;  %9610 = vmatprep.subr.bf16.mxu0 %v25006_v63  ;;  %v25079_v62 = vld [vmem:[%s28453_s11 + $0x108] ss:$40 sps:$4 sm:$0xff]   ;;  %v25084_v63 = vld [vmem:[%s28453_s11 + $0x154] ss:$40 sps:$4 sm:$0xff]  }
 0x729   : > { %9815 = vmatprep.subr.bf16.mxu1 %v25009_v1  ;;  %v25087_v1 = vld [vmem:[%s28453_s11 + $0x15c] ss:$40 sps:$4 sm:$0xff]  }
 0x72b   : > { %9611 = vmatpush1.bf16.msra.mxu0 %v25004_v2  ;;  %v25082_v2 = vld [vmem:[%s28453_s11 + $0x150] ss:$40 sps:$4 sm:$0xff]  }
 0x72c   : > { %9816 = vmatpush1.bf16.msra.mxu1 %v25007_v3  ;;  %9612 = vmatprep.subr.bf16.mxu0 %v25012_v5  ;;  %v25085_v3 = vld [vmem:[%s28453_s11 + $0x158] ss:$40 sps:$4 sm:$0xff]   ;;  %v25090_v5 = vld [vmem:[%s28453_s11 + $0x1a4] ss:$40 sps:$4 sm:$0xff]  }
 0x72d   : > { %9817 = vmatprep.subr.bf16.mxu1 %v25015_v7  ;;  %v25093_v7 = vld [vmem:[%s28453_s11 + $0x1ac] ss:$40 sps:$4 sm:$0xff]  }
 0x72f   : > { %9613 = vmatpush1.bf16.msra.mxu0 %v25010_v8  ;;  %v25088_v8 = vld [vmem:[%s28453_s11 + $0x1a0] ss:$40 sps:$4 sm:$0xff]  }
 0x730   : > { %9818 = vmatpush1.bf16.msra.mxu1 %v25013_v55  ;;  %9614 = vmatprep.subr.bf16.mxu0 %v25018_v11  ;;  %v25091_v55 = vld [vmem:[%s28453_s11 + $0x1a8] ss:$40 sps:$4 sm:$0xff]   ;;  %v25096_v11 = vld [vmem:[%s28453_s11 + $0x1f4] ss:$40 sps:$4 sm:$0xff]  }
 0x731   : > { %9819 = vmatprep.subr.bf16.mxu1 %v25021_v12  ;;  %v25099_v12 = vld [vmem:[%s28453_s11 + $0x1fc] ss:$40 sps:$4 sm:$0xff]  }
 0x733   : > { %9615 = vmatpush1.bf16.msra.mxu0 %v25016_v6  ;;  %v25094_v6 = vld [vmem:[%s28453_s11 + $0x1f0] ss:$40 sps:$4 sm:$0xff]  }
 0x734   : > { %9820 = vmatpush1.bf16.msra.mxu1 %v25019_v14  ;;  %9616 = vmatprep.subr.bf16.mxu0 %v25024_v16  ;;  %v25097_v14 = vld [vmem:[%s28453_s11 + $0x1f8] ss:$40 sps:$4 sm:$0xff]   ;;  %v25102_v16 = vld [vmem:[%s28453_s11 + $0x244] ss:$40 sps:$4 sm:$0xff]  }
 0x735   : > { %9821 = vmatprep.subr.bf16.mxu1 %v25027_v53  ;;  %v25105_v53 = vld [vmem:[%s28453_s11 + $0x24c] ss:$40 sps:$4 sm:$0xff]  }
 0x737   : > { %9617 = vmatpush1.bf16.msra.mxu0 %v25022_v17  ;;  %v25100_v17 = vld [vmem:[%s28453_s11 + $0x240] ss:$40 sps:$4 sm:$0xff]  }
 0x738   : > { %9822 = vmatpush1.bf16.msra.mxu1 %v25025_v19  ;;  %9618 = vmatprep.subr.bf16.mxu0 %v25030_v25  ;;  %v25103_v19 = vld [vmem:[%s28453_s11 + $0x248] ss:$40 sps:$4 sm:$0xff]   ;;  %v25108_v25 = vld [vmem:[%s28453_s11 + $0x294] ss:$40 sps:$4 sm:$0xff]  }
 0x739   : > { %9823 = vmatprep.subr.bf16.mxu1 %v25033_v20  ;;  %v25111_v20 = vld [vmem:[%s28453_s11 + $0x29c] ss:$40 sps:$4 sm:$0xff]  }
 0x73b   : > { %9619 = vmatpush1.bf16.msra.mxu0 %v25028_v9  ;;  %v25106_v9 = vld [vmem:[%s28453_s11 + $0x290] ss:$40 sps:$4 sm:$0xff]  }
 0x73c   : > { %9824 = vmatpush1.bf16.msra.mxu1 %v25031_v29  ;;  %9620 = vmatprep.subr.bf16.mxu0 %v25036_v30  ;;  %v25109_v29 = vld [vmem:[%s28453_s11 + $0x298] ss:$40 sps:$4 sm:$0xff]   ;;  %v25114_v30 = vld [vmem:[%s28453_s11 + $0x2e4] ss:$40 sps:$4 sm:$0xff]  }
 0x73d   : > { %9825 = vmatprep.subr.bf16.mxu1 %v25039_v31  ;;  %v25117_v31 = vld [vmem:[%s28453_s11 + $0x2ec] ss:$40 sps:$4 sm:$0xff]  }
 0x73f   : > { %9621 = vmatpush1.bf16.msra.mxu0 %v25034_v33  ;;  %v25112_v33 = vld [vmem:[%s28453_s11 + $0x2e0] ss:$40 sps:$4 sm:$0xff]  }
 0x740   : > { %9826 = vmatpush1.bf16.msra.mxu1 %v25037_v35  ;;  %9622 = vmatprep.subr.bf16.mxu0 %v25042_v36  ;;  %v25115_v35 = vld [vmem:[%s28453_s11 + $0x2e8] ss:$40 sps:$4 sm:$0xff]   ;;  %v25120_v36 = vld [vmem:[%s28453_s11 + $0x334] ss:$40 sps:$4 sm:$0xff]  }
 0x741   : > { %9827 = vmatprep.subr.bf16.mxu1 %v25045_v37  ;;  %v25123_v37 = vld [vmem:[%s28453_s11 + $0x33c] ss:$40 sps:$4 sm:$0xff]  }
 0x743   : > { %9623 = vmatpush1.bf16.msra.mxu0 %v25040_v38  ;;  %v25118_v38 = vld [vmem:[%s28453_s11 + $0x330] ss:$40 sps:$4 sm:$0xff]  }
 0x744   : > { %9828 = vmatpush1.bf16.msra.mxu1 %v25043_v41  ;;  %9624 = vmatprep.subr.bf16.mxu0 %v25048_v42  ;;  %v25121_v41 = vld [vmem:[%s28453_s11 + $0x338] ss:$40 sps:$4 sm:$0xff]   ;;  %v25126_v42 = vld [vmem:[%s28453_s11 + $0x384] ss:$40 sps:$4 sm:$0xff]  }
 0x745   : > { %9829 = vmatprep.subr.bf16.mxu1 %v25051_v43  ;;  %v25129_v43 = vld [vmem:[%s28453_s11 + $0x38c] ss:$40 sps:$4 sm:$0xff]  }
 0x747   : > { %9625 = vmatpush1.bf16.msra.mxu0 %v25046_v40  ;;  %v25124_v40 = vld [vmem:[%s28453_s11 + $0x380] ss:$40 sps:$4 sm:$0xff]  }
 0x748   : > { %9830 = vmatpush1.bf16.msra.mxu1 %v25049_v13  ;;  %9626 = vmatprep.subr.bf16.mxu0 %v25054_v45  ;;  %v25127_v13 = vld [vmem:[%s28453_s11 + $0x388] ss:$40 sps:$4 sm:$0xff]   ;;  %v25132_v45 = vld [vmem:[%s28453_s11 + $0x3d4] ss:$40 sps:$4 sm:$0xff]  }
 0x749   : > { %9831 = vmatprep.subr.bf16.mxu1 %v25057_v27  ;;  %v25135_v27 = vld [vmem:[%s28453_s11 + $0x3dc] ss:$40 sps:$4 sm:$0xff]  }
 0x74b   : > { %9627 = vmatpush1.bf16.msra.mxu0 %v25052_v46  ;;  %v25130_v46 = vld [vmem:[%s28453_s11 + $0x3d0] ss:$40 sps:$4 sm:$0xff]  }
 0x74c   : > { %9832 = vmatpush1.bf16.msra.mxu1 %v25055_v47  ;;  %9842 = vmatprep.subr.bf16.mxu0 %v25060_v48  ;;  %v25133_v47 = vld [vmem:[%s28453_s11 + $0x3d8] ss:$40 sps:$4 sm:$0xff]   ;;  %v25138_v48 = vld [vmem:[%s28453_s11 + $0x424] ss:$40 sps:$4 sm:$0xff]  }
 0x74d   : > { %10047 = vmatprep.subr.bf16.mxu1 %v25063_v50  ;;  %v25141_v50 = vld [vmem:[%s28453_s11 + $0x42c] ss:$40 sps:$4 sm:$0xff]  }
 0x74e   : > { %9629 = vmatmul.mubr.bf16.vlgmr.msra.gmra.mrb[0].mxu0 %v28950_v28 }
 0x74f   : > { %9834 = vmatmul.mubr.bf16.vlgmr.msra.gmra.mrb[0].mxu1 %v28950_v28  ;;  %9843 = vmatpush1.bf16.msra.mxu0 %v25058_v49  ;;  %v25136_v49 = vld [vmem:[%s28453_s11 + $0x420] ss:$40 sps:$4 sm:$0xff]  }
 0x750   : > { %10048 = vmatpush1.bf16.msra.mxu1 %v25061_v44  ;;  %9844 = vmatprep.subr.bf16.mxu0 %v25066_v51  ;;  %v25139_v44 = vld [vmem:[%s28453_s11 + $0x428] ss:$40 sps:$4 sm:$0xff]   ;;  %v25144_v51 = vld [vmem:[%s28453_s11 + $0x474] ss:$40 sps:$4 sm:$0xff]  }
 0x751   : > { %10049 = vmatprep.subr.bf16.mxu1 %v25069_v52  ;;  %9874 = vmatprep.mubr.bf16.mxu0 %v28611_v26  ;;  %v25147_v52 = vld [vmem:[%s28453_s11 + $0x47c] ss:$40 sps:$4 sm:$0xff]  }
 0x752   : > { %10079 = vmatprep.mubr.bf16.mxu1 %v28611_v26 }
 0x753   : > { %9845 = vmatpush1.bf16.msra.mxu0 %v25064_v21  ;;  %v25142_v21 = vld [vmem:[%s28453_s11 + $0x470] ss:$40 sps:$4 sm:$0xff]  }
 0x754   : > { %10050 = vmatpush1.bf16.msra.mxu1 %v25067_v54  ;;  %9846 = vmatprep.subr.bf16.mxu0 %v25072_v56  ;;  %v25145_v54 = vld [vmem:[%s28453_s11 + $0x478] ss:$40 sps:$4 sm:$0xff]   ;;  %v25150_v56 = vld [vmem:[%s28453_s11 + $0x4c4] ss:$40 sps:$4 sm:$0xff]  }
 0x755   : > { %10051 = vmatprep.subr.bf16.mxu1 %v25075_v10  ;;  %v25153_v10 = vld [vmem:[%s28453_s11 + $0x4cc] ss:$40 sps:$4 sm:$0xff]  }
 0x757   : > { %9847 = vmatpush1.bf16.msra.mxu0 %v25070_v57  ;;  %v25148_v57 = vld [vmem:[%s28453_s11 + $0x4c0] ss:$40 sps:$4 sm:$0xff]  }
 0x758   : > { %10052 = vmatpush1.bf16.msra.mxu1 %v25073_v58  ;;  %9848 = vmatprep.subr.bf16.mxu0 %v25078_v59  ;;  %v25151_v58 = vld [vmem:[%s28453_s11 + $0x4c8] ss:$40 sps:$4 sm:$0xff]   ;;  %v25156_v59 = vld [vmem:[%s28453_s11 + $0x514] ss:$40 sps:$4 sm:$0xff]  }
 0x759   : > { %10053 = vmatprep.subr.bf16.mxu1 %v25081_v60  ;;  %v25159_v60 = vld [vmem:[%s28453_s11 + $0x51c] ss:$40 sps:$4 sm:$0xff]  }
 0x75b   : > { %9849 = vmatpush1.bf16.msra.mxu0 %v25076_v61  ;;  %v25154_v61 = vld [vmem:[%s28453_s11 + $0x510] ss:$40 sps:$4 sm:$0xff]  }
 0x75c   : > { %10054 = vmatpush1.bf16.msra.mxu1 %v25079_v62  ;;  %9850 = vmatprep.subr.bf16.mxu0 %v25084_v63  ;;  %v25157_v62 = vld [vmem:[%s28453_s11 + $0x518] ss:$40 sps:$4 sm:$0xff]   ;;  %v25162_v63 = vld [vmem:[%s28453_s11 + $0x564] ss:$40 sps:$4 sm:$0xff]  }
 0x75d   : > { %10055 = vmatprep.subr.bf16.mxu1 %v25087_v1  ;;  %v25165_v1 = vld [vmem:[%s28453_s11 + $0x56c] ss:$40 sps:$4 sm:$0xff]  }
 0x75f   : > { %9851 = vmatpush1.bf16.msra.mxu0 %v25082_v2  ;;  %v25160_v2 = vld [vmem:[%s28453_s11 + $0x560] ss:$40 sps:$4 sm:$0xff]  }
 0x760   : > { %10056 = vmatpush1.bf16.msra.mxu1 %v25085_v3  ;;  %9852 = vmatprep.subr.bf16.mxu0 %v25090_v5  ;;  %v25163_v3 = vld [vmem:[%s28453_s11 + $0x568] ss:$40 sps:$4 sm:$0xff]   ;;  %v25168_v5 = vld [vmem:[%s28453_s11 + $0x5b4] ss:$40 sps:$4 sm:$0xff]  }
 0x761   : > { %10057 = vmatprep.subr.bf16.mxu1 %v25093_v7  ;;  %v25171_v7 = vld [vmem:[%s28453_s11 + $0x5bc] ss:$40 sps:$4 sm:$0xff]  }
 0x763   : > { %9853 = vmatpush1.bf16.msra.mxu0 %v25088_v8  ;;  %v25166_v8 = vld [vmem:[%s28453_s11 + $0x5b0] ss:$40 sps:$4 sm:$0xff]  }
 0x764   : > { %10058 = vmatpush1.bf16.msra.mxu1 %v25091_v55  ;;  %9854 = vmatprep.subr.bf16.mxu0 %v25096_v11  ;;  %v25169_v55 = vld [vmem:[%s28453_s11 + $0x5b8] ss:$40 sps:$4 sm:$0xff]   ;;  %v25174_v11 = vld [vmem:[%s28453_s11 + $0x604] ss:$40 sps:$4 sm:$0xff]  }
 0x765   : > { %10059 = vmatprep.subr.bf16.mxu1 %v25099_v12  ;;  %v25177_v12 = vld [vmem:[%s28453_s11 + $0x60c] ss:$40 sps:$4 sm:$0xff]  }
 0x767   : > { %9855 = vmatpush1.bf16.msra.mxu0 %v25094_v6  ;;  %v25172_v6 = vld [vmem:[%s28453_s11 + $0x600] ss:$40 sps:$4 sm:$0xff]  }
 0x768   : > { %10060 = vmatpush1.bf16.msra.mxu1 %v25097_v14  ;;  %9856 = vmatprep.subr.bf16.mxu0 %v25102_v16  ;;  %v25175_v14 = vld [vmem:[%s28453_s11 + $0x608] ss:$40 sps:$4 sm:$0xff]   ;;  %v25180_v16 = vld [vmem:[%s28453_s11 + $0x654] ss:$40 sps:$4 sm:$0xff]  }
 0x769   : > { %10061 = vmatprep.subr.bf16.mxu1 %v25105_v53  ;;  %v25183_v53 = vld [vmem:[%s28453_s11 + $0x65c] ss:$40 sps:$4 sm:$0xff]  }
 0x76b   : > { %9857 = vmatpush1.bf16.msra.mxu0 %v25100_v17  ;;  %v25178_v17 = vld [vmem:[%s28453_s11 + $0x650] ss:$40 sps:$4 sm:$0xff]  }
 0x76c   : > { %10062 = vmatpush1.bf16.msra.mxu1 %v25103_v19  ;;  %9858 = vmatprep.subr.bf16.mxu0 %v25108_v25  ;;  %v25181_v19 = vld [vmem:[%s28453_s11 + $0x658] ss:$40 sps:$4 sm:$0xff]   ;;  %v25186_v25 = vld [vmem:[%s28453_s11 + $0x6a4] ss:$40 sps:$4 sm:$0xff]  }
 0x76d   : > { %10063 = vmatprep.subr.bf16.mxu1 %v25111_v20  ;;  %v25189_v20 = vld [vmem:[%s28453_s11 + $0x6ac] ss:$40 sps:$4 sm:$0xff]  }
 0x76f   : > { %9859 = vmatpush1.bf16.msra.mxu0 %v25106_v9  ;;  %v25184_v9 = vld [vmem:[%s28453_s11 + $0x6a0] ss:$40 sps:$4 sm:$0xff]  }
 0x770   : > { %10064 = vmatpush1.bf16.msra.mxu1 %v25109_v29  ;;  %9860 = vmatprep.subr.bf16.mxu0 %v25114_v30  ;;  %v25187_v29 = vld [vmem:[%s28453_s11 + $0x6a8] ss:$40 sps:$4 sm:$0xff]   ;;  %v25192_v30 = vld [vmem:[%s28453_s11 + $0x6f4] ss:$40 sps:$4 sm:$0xff]  }
 0x771   : > { %10065 = vmatprep.subr.bf16.mxu1 %v25117_v31  ;;  %v25195_v31 = vld [vmem:[%s28453_s11 + $0x6fc] ss:$40 sps:$4 sm:$0xff]  }
 0x773   : > { %9861 = vmatpush1.bf16.msra.mxu0 %v25112_v33  ;;  %v25190_v33 = vld [vmem:[%s28453_s11 + $0x6f0] ss:$40 sps:$4 sm:$0xff]  }
 0x774   : > { %10066 = vmatpush1.bf16.msra.mxu1 %v25115_v35  ;;  %9862 = vmatprep.subr.bf16.mxu0 %v25120_v36  ;;  %v25193_v35 = vld [vmem:[%s28453_s11 + $0x6f8] ss:$40 sps:$4 sm:$0xff]   ;;  %v25198_v36 = vld [vmem:[%s28453_s11 + $0x744] ss:$40 sps:$4 sm:$0xff]  }
 0x775   : > { %10067 = vmatprep.subr.bf16.mxu1 %v25123_v37  ;;  %v25201_v37 = vld [vmem:[%s28453_s11 + $0x74c] ss:$40 sps:$4 sm:$0xff]  }
 0x777   : > { %9863 = vmatpush1.bf16.msra.mxu0 %v25118_v38  ;;  %v25196_v38 = vld [vmem:[%s28453_s11 + $0x740] ss:$40 sps:$4 sm:$0xff]  }
 0x778   : > { %10068 = vmatpush1.bf16.msra.mxu1 %v25121_v41  ;;  %9864 = vmatprep.subr.bf16.mxu0 %v25126_v42  ;;  %v25199_v41 = vld [vmem:[%s28453_s11 + $0x748] ss:$40 sps:$4 sm:$0xff]   ;;  %v25204_v42 = vld [vmem:[%s28453_s11 + $0x794] ss:$40 sps:$4 sm:$0xff]  }
 0x779   : > { %10069 = vmatprep.subr.bf16.mxu1 %v25129_v43  ;;  %v25207_v43 = vld [vmem:[%s28453_s11 + $0x79c] ss:$40 sps:$4 sm:$0xff]  }
 0x77b   : > { %9865 = vmatpush1.bf16.msra.mxu0 %v25124_v40  ;;  %v25202_v40 = vld [vmem:[%s28453_s11 + $0x790] ss:$40 sps:$4 sm:$0xff]  }
 0x77c   : > { %10070 = vmatpush1.bf16.msra.mxu1 %v25127_v13  ;;  %9866 = vmatprep.subr.bf16.mxu0 %v25132_v45  ;;  %v25205_v13 = vld [vmem:[%s28453_s11 + $0x798] ss:$40 sps:$4 sm:$0xff]   ;;  %v25210_v45 = vld [vmem:[%s28453_s11 + $0x7e4] ss:$40 sps:$4 sm:$0xff]  }
 0x77d   : > { %10071 = vmatprep.subr.bf16.mxu1 %v25135_v27  ;;  %v25213_v27 = vld [vmem:[%s28453_s11 + $0x7ec] ss:$40 sps:$4 sm:$0xff]  }
 0x77f   : > { %9867 = vmatpush1.bf16.msra.mxu0 %v25130_v46  ;;  %v25208_v46 = vld [vmem:[%s28453_s11 + $0x7e0] ss:$40 sps:$4 sm:$0xff]  }
 0x780   : > { %10072 = vmatpush1.bf16.msra.mxu1 %v25133_v47  ;;  %9868 = vmatprep.subr.bf16.mxu0 %v25138_v48  ;;  %v25211_v47 = vld [vmem:[%s28453_s11 + $0x7e8] ss:$40 sps:$4 sm:$0xff]   ;;  %v25216_v48 = vld [vmem:[%s28453_s11 + $0x834] ss:$40 sps:$4 sm:$0xff]  }
 0x781   : > { %10073 = vmatprep.subr.bf16.mxu1 %v25141_v50  ;;  %v25219_v50 = vld [vmem:[%s28453_s11 + $0x83c] ss:$40 sps:$4 sm:$0xff]  }
 0x783   : > { %9869 = vmatpush1.bf16.msra.mxu0 %v25136_v49  ;;  %v25214_v49 = vld [vmem:[%s28453_s11 + $0x830] ss:$40 sps:$4 sm:$0xff]  }
 0x784   : > { %10074 = vmatpush1.bf16.msra.mxu1 %v25139_v44  ;;  %9870 = vmatprep.subr.bf16.mxu0 %v25144_v51  ;;  %v25217_v44 = vld [vmem:[%s28453_s11 + $0x838] ss:$40 sps:$4 sm:$0xff]   ;;  %v25222_v51 = vld [vmem:[%s28453_s11 + $0x884] ss:$40 sps:$4 sm:$0xff]  }
 0x785   : > { %10075 = vmatprep.subr.bf16.mxu1 %v25147_v52  ;;  %v25225_v52 = vld [vmem:[%s28453_s11 + $0x88c] ss:$40 sps:$4 sm:$0xff]  }
 0x787   : > { %9871 = vmatpush1.bf16.msra.mxu0 %v25142_v21  ;;  %v25220_v21 = vld [vmem:[%s28453_s11 + $0x880] ss:$40 sps:$4 sm:$0xff]  }
 0x788   : > { %10076 = vmatpush1.bf16.msra.mxu1 %v25145_v54  ;;  %9872 = vmatprep.subr.bf16.mxu0 %v25150_v56  ;;  %v25223_v54 = vld [vmem:[%s28453_s11 + $0x888] ss:$40 sps:$4 sm:$0xff]   ;;  %v25228_v56 = vld [vmem:[%s28453_s11 + $0x8d4] ss:$40 sps:$4 sm:$0xff]  }
 0x789   : > { %10077 = vmatprep.subr.bf16.mxu1 %v25153_v10  ;;  %v25231_v10 = vld [vmem:[%s28453_s11 + $0x8dc] ss:$40 sps:$4 sm:$0xff]  }
 0x78b   : > { %9873 = vmatpush1.bf16.msra.mxu0 %v25148_v57  ;;  %v25226_v57 = vld [vmem:[%s28453_s11 + $0x8d0] ss:$40 sps:$4 sm:$0xff]  }
 0x78c   : > { %10078 = vmatpush1.bf16.msra.mxu1 %v25151_v58  ;;  %9883 = vmatprep.subr.bf16.mxu0 %v25156_v59  ;;  %v25229_v58 = vld [vmem:[%s28453_s11 + $0x8d8] ss:$40 sps:$4 sm:$0xff]   ;;  %v25234_v59 = vld [vmem:[%s28453_s11 + $0x924] ss:$40 sps:$4 sm:$0xff]  }
 0x78d   : > { %10088 = vmatprep.subr.bf16.mxu1 %v25159_v60  ;;  %v25237_v60 = vld [vmem:[%s28453_s11 + $0x92c] ss:$40 sps:$4 sm:$0xff]  }
 0x78e   : > { %9875 = vmatmul.mubr.bf16.vlgmr.msra.gmra.mrb[4].mxu0 %v28636_v32 }
 0x78f   : > { %10080 = vmatmul.mubr.bf16.vlgmr.msra.gmra.mrb[4].mxu1 %v28636_v32  ;;  %9884 = vmatpush1.bf16.msra.mxu0 %v25154_v61  ;;  %v25232_v61 = vld [vmem:[%s28453_s11 + $0x920] ss:$40 sps:$4 sm:$0xff]  }
 0x790   : > { %10089 = vmatpush1.bf16.msra.mxu1 %v25157_v62  ;;  %9885 = vmatprep.subr.bf16.mxu0 %v25162_v63  ;;  %v25235_v62 = vld [vmem:[%s28453_s11 + $0x928] ss:$40 sps:$4 sm:$0xff]   ;;  %v25240_v63 = vld [vmem:[%s28453_s11 + $0x974] ss:$40 sps:$4 sm:$0xff]  }
 0x791   : > { %10090 = vmatprep.subr.bf16.mxu1 %v25165_v1  ;;  %9915 = vmatprep.mubr.bf16.mxu0 %v28641_v0  ;;  %v25243_v1 = vld [vmem:[%s28453_s11 + $0x97c] ss:$40 sps:$4 sm:$0xff]  }
 0x792   : > { %10120 = vmatprep.mubr.bf16.mxu1 %v28641_v0 }
 0x793   : > { %9886 = vmatpush1.bf16.msra.mxu0 %v25160_v2  ;;  %v25238_v2 = vld [vmem:[%s28453_s11 + $0x970] ss:$40 sps:$4 sm:$0xff]  }
 0x794   : > { %10091 = vmatpush1.bf16.msra.mxu1 %v25163_v3  ;;  %9887 = vmatprep.subr.bf16.mxu0 %v25168_v5  ;;  %v25241_v3 = vld [vmem:[%s28453_s11 + $0x978] ss:$40 sps:$4 sm:$0xff]   ;;  %v25246_v5 = vld [vmem:[%s28453_s11 + $0x9c4] ss:$40 sps:$4 sm:$0xff]  }
 0x795   : > { %10092 = vmatprep.subr.bf16.mxu1 %v25171_v7  ;;  %v25249_v7 = vld [vmem:[%s28453_s11 + $0x9cc] ss:$40 sps:$4 sm:$0xff]  }
 0x797   : > { %9888 = vmatpush1.bf16.msra.mxu0 %v25166_v8  ;;  %v25244_v8 = vld [vmem:[%s28453_s11 + $0x9c0] ss:$40 sps:$4 sm:$0xff]  }
 0x798   : > { %10093 = vmatpush1.bf16.msra.mxu1 %v25169_v55  ;;  %9889 = vmatprep.subr.bf16.mxu0 %v25174_v11  ;;  %v25247_v55 = vld [vmem:[%s28453_s11 + $0x9c8] ss:$40 sps:$4 sm:$0xff]   ;;  %v25252_v11 = vld [vmem:[%s28453_s11 + $0xa14] ss:$40 sps:$4 sm:$0xff]  }
 0x799   : > { %10094 = vmatprep.subr.bf16.mxu1 %v25177_v12  ;;  %v25255_v12 = vld [vmem:[%s28453_s11 + $0xa1c] ss:$40 sps:$4 sm:$0xff]  }
 0x79b   : > { %9890 = vmatpush1.bf16.msra.mxu0 %v25172_v6  ;;  %v25250_v6 = vld [vmem:[%s28453_s11 + $0xa10] ss:$40 sps:$4 sm:$0xff]  }
 0x79c   : > { %10095 = vmatpush1.bf16.msra.mxu1 %v25175_v14  ;;  %9891 = vmatprep.subr.bf16.mxu0 %v25180_v16  ;;  %v25253_v14 = vld [vmem:[%s28453_s11 + $0xa18] ss:$40 sps:$4 sm:$0xff]   ;;  %v25258_v16 = vld [vmem:[%s28453_s11 + $0xa64] ss:$40 sps:$4 sm:$0xff]  }
 0x79d   : > { %10096 = vmatprep.subr.bf16.mxu1 %v25183_v53  ;;  %v25261_v53 = vld [vmem:[%s28453_s11 + $0xa6c] ss:$40 sps:$4 sm:$0xff]  }
 0x79f   : > { %9892 = vmatpush1.bf16.msra.mxu0 %v25178_v17  ;;  %v25256_v17 = vld [vmem:[%s28453_s11 + $0xa60] ss:$40 sps:$4 sm:$0xff]  }
 0x7a0   : > { %10097 = vmatpush1.bf16.msra.mxu1 %v25181_v19  ;;  %9893 = vmatprep.subr.bf16.mxu0 %v25186_v25  ;;  %v25259_v19 = vld [vmem:[%s28453_s11 + $0xa68] ss:$40 sps:$4 sm:$0xff]   ;;  %v25264_v25 = vld [vmem:[%s28453_s11 + $0xab4] ss:$40 sps:$4 sm:$0xff]  }
 0x7a1   : > { %10098 = vmatprep.subr.bf16.mxu1 %v25189_v20  ;;  %v25267_v20 = vld [vmem:[%s28453_s11 + $0xabc] ss:$40 sps:$4 sm:$0xff]  }
 0x7a3   : > { %9894 = vmatpush1.bf16.msra.mxu0 %v25184_v9  ;;  %v25262_v9 = vld [vmem:[%s28453_s11 + $0xab0] ss:$40 sps:$4 sm:$0xff]  }
 0x7a4   : > { %10099 = vmatpush1.bf16.msra.mxu1 %v25187_v29  ;;  %9895 = vmatprep.subr.bf16.mxu0 %v25192_v30  ;;  %v25265_v29 = vld [vmem:[%s28453_s11 + $0xab8] ss:$40 sps:$4 sm:$0xff]   ;;  %v25270_v30 = vld [vmem:[%s28453_s11 + $0xb04] ss:$40 sps:$4 sm:$0xff]  }
 0x7a5   : > { %10100 = vmatprep.subr.bf16.mxu1 %v25195_v31  ;;  %v25273_v31 = vld [vmem:[%s28453_s11 + $0xb0c] ss:$40 sps:$4 sm:$0xff]  }
 0x7a7   : > { %9896 = vmatpush1.bf16.msra.mxu0 %v25190_v33  ;;  %v25268_v33 = vld [vmem:[%s28453_s11 + $0xb00] ss:$40 sps:$4 sm:$0xff]  }
 0x7a8   : > { %10101 = vmatpush1.bf16.msra.mxu1 %v25193_v35  ;;  %9897 = vmatprep.subr.bf16.mxu0 %v25198_v36  ;;  %v25271_v35 = vld [vmem:[%s28453_s11 + $0xb08] ss:$40 sps:$4 sm:$0xff]   ;;  %v25276_v36 = vld [vmem:[%s28453_s11 + $0xb54] ss:$40 sps:$4 sm:$0xff]  }
 0x7a9   : > { %10102 = vmatprep.subr.bf16.mxu1 %v25201_v37  ;;  %v25279_v37 = vld [vmem:[%s28453_s11 + $0xb5c] ss:$40 sps:$4 sm:$0xff]  }
 0x7ab   : > { %9898 = vmatpush1.bf16.msra.mxu0 %v25196_v38  ;;  %v25274_v38 = vld [vmem:[%s28453_s11 + $0xb50] ss:$40 sps:$4 sm:$0xff]  }
 0x7ac   : > { %10103 = vmatpush1.bf16.msra.mxu1 %v25199_v41  ;;  %9899 = vmatprep.subr.bf16.mxu0 %v25204_v42  ;;  %v25277_v41 = vld [vmem:[%s28453_s11 + $0xb58] ss:$40 sps:$4 sm:$0xff]   ;;  %v25282_v42 = vld [vmem:[%s28453_s11 + $0xba4] ss:$40 sps:$4 sm:$0xff]  }
 0x7ad   : > { %10104 = vmatprep.subr.bf16.mxu1 %v25207_v43  ;;  %v25285_v43 = vld [vmem:[%s28453_s11 + $0xbac] ss:$40 sps:$4 sm:$0xff]  }
 0x7af   : > { %9900 = vmatpush1.bf16.msra.mxu0 %v25202_v40  ;;  %v25280_v40 = vld [vmem:[%s28453_s11 + $0xba0] ss:$40 sps:$4 sm:$0xff]  }
 0x7b0   : > { %10105 = vmatpush1.bf16.msra.mxu1 %v25205_v13  ;;  %9901 = vmatprep.subr.bf16.mxu0 %v25210_v45  ;;  %v25283_v13 = vld [vmem:[%s28453_s11 + $0xba8] ss:$40 sps:$4 sm:$0xff]   ;;  %v25288_v45 = vld [vmem:[%s28453_s11 + $0xbf4] ss:$40 sps:$4 sm:$0xff]  }
 0x7b1   : > { %10106 = vmatprep.subr.bf16.mxu1 %v25213_v27  ;;  %v25291_v27 = vld [vmem:[%s28453_s11 + $0xbfc] ss:$40 sps:$4 sm:$0xff]  }
 0x7b3   : > { %9902 = vmatpush1.bf16.msra.mxu0 %v25208_v46  ;;  %v25286_v46 = vld [vmem:[%s28453_s11 + $0xbf0] ss:$40 sps:$4 sm:$0xff]  }
 0x7b4   : > { %10107 = vmatpush1.bf16.msra.mxu1 %v25211_v47  ;;  %9903 = vmatprep.subr.bf16.mxu0 %v25216_v48  ;;  %v25289_v47 = vld [vmem:[%s28453_s11 + $0xbf8] ss:$40 sps:$4 sm:$0xff]   ;;  %v25294_v48 = vld [vmem:[%s28453_s11 + $0xc44] ss:$40 sps:$4 sm:$0xff]  }
 0x7b5   : > { %10108 = vmatprep.subr.bf16.mxu1 %v25219_v50  ;;  %v25297_v50 = vld [vmem:[%s28453_s11 + $0xc4c] ss:$40 sps:$4 sm:$0xff]  }
 0x7b7   : > { %9904 = vmatpush1.bf16.msra.mxu0 %v25214_v49  ;;  %v25292_v49 = vld [vmem:[%s28453_s11 + $0xc40] ss:$40 sps:$4 sm:$0xff]  }
 0x7b8   : > { %10109 = vmatpush1.bf16.msra.mxu1 %v25217_v44  ;;  %9905 = vmatprep.subr.bf16.mxu0 %v25222_v51  ;;  %v25295_v44 = vld [vmem:[%s28453_s11 + $0xc48] ss:$40 sps:$4 sm:$0xff]   ;;  %v25300_v51 = vld [vmem:[%s28453_s11 + $0xc94] ss:$40 sps:$4 sm:$0xff]  }
 0x7b9   : > { %10110 = vmatprep.subr.bf16.mxu1 %v25225_v52  ;;  %v25303_v52 = vld [vmem:[%s28453_s11 + $0xc9c] ss:$40 sps:$4 sm:$0xff]  }
 0x7bb   : > { %9906 = vmatpush1.bf16.msra.mxu0 %v25220_v21  ;;  %v25298_v21 = vld [vmem:[%s28453_s11 + $0xc90] ss:$40 sps:$4 sm:$0xff]  }
 0x7bc   : > { %10111 = vmatpush1.bf16.msra.mxu1 %v25223_v54  ;;  %9907 = vmatprep.subr.bf16.mxu0 %v25228_v56  ;;  %v25301_v54 = vld [vmem:[%s28453_s11 + $0xc98] ss:$40 sps:$4 sm:$0xff]   ;;  %v25306_v56 = vld [vmem:[%s28453_s11 + $0xce4] ss:$40 sps:$4 sm:$0xff]  }
 0x7bd   : > { %10112 = vmatprep.subr.bf16.mxu1 %v25231_v10  ;;  %v25309_v10 = vld [vmem:[%s28453_s11 + $0xcec] ss:$40 sps:$4 sm:$0xff]  }
 0x7bf   : > { %9908 = vmatpush1.bf16.msra.mxu0 %v25226_v57  ;;  %v25304_v57 = vld [vmem:[%s28453_s11 + $0xce0] ss:$40 sps:$4 sm:$0xff]  }
 0x7c0   : > { %10113 = vmatpush1.bf16.msra.mxu1 %v25229_v58  ;;  %9909 = vmatprep.subr.bf16.mxu0 %v25234_v59  ;;  %v25307_v58 = vld [vmem:[%s28453_s11 + $0xce8] ss:$40 sps:$4 sm:$0xff]   ;;  %v25312_v59 = vld [vmem:[%s28453_s11 + $0xd34] ss:$40 sps:$4 sm:$0xff]  }
 0x7c1   : > { %10114 = vmatprep.subr.bf16.mxu1 %v25237_v60  ;;  %v25315_v60 = vld [vmem:[%s28453_s11 + $0xd3c] ss:$40 sps:$4 sm:$0xff]  }
 0x7c3   : > { %9910 = vmatpush1.bf16.msra.mxu0 %v25232_v61  ;;  %v25310_v61 = vld [vmem:[%s28453_s11 + $0xd30] ss:$40 sps:$4 sm:$0xff]  }
 0x7c4   : > { %10115 = vmatpush1.bf16.msra.mxu1 %v25235_v62  ;;  %9911 = vmatprep.subr.bf16.mxu0 %v25240_v63  ;;  %v25313_v62 = vld [vmem:[%s28453_s11 + $0xd38] ss:$40 sps:$4 sm:$0xff]   ;;  %v25318_v63 = vld [vmem:[%s28453_s11 + $0xd84] ss:$40 sps:$4 sm:$0xff]  }
 0x7c5   : > { %10116 = vmatprep.subr.bf16.mxu1 %v25243_v1  ;;  %v25321_v1 = vld [vmem:[%s28453_s11 + $0xd8c] ss:$40 sps:$4 sm:$0xff]  }
 0x7c7   : > { %9912 = vmatpush1.bf16.msra.mxu0 %v25238_v2  ;;  %v25316_v2 = vld [vmem:[%s28453_s11 + $0xd80] ss:$40 sps:$4 sm:$0xff]  }
 0x7c8   : > { %10117 = vmatpush1.bf16.msra.mxu1 %v25241_v3  ;;  %9913 = vmatprep.subr.bf16.mxu0 %v25246_v5  ;;  %v25319_v3 = vld [vmem:[%s28453_s11 + $0xd88] ss:$40 sps:$4 sm:$0xff]   ;;  %v25324_v5 = vld [vmem:[%s28453_s11 + $0xdd4] ss:$40 sps:$4 sm:$0xff]  }
 0x7c9   : > { %10118 = vmatprep.subr.bf16.mxu1 %v25249_v7  ;;  %v25327_v7 = vld [vmem:[%s28453_s11 + $0xddc] ss:$40 sps:$4 sm:$0xff]  }
 0x7cb   : > { %9914 = vmatpush1.bf16.msra.mxu0 %v25244_v8  ;;  %v25322_v8 = vld [vmem:[%s28453_s11 + $0xdd0] ss:$40 sps:$4 sm:$0xff]  }
 0x7cc   : > { %10119 = vmatpush1.bf16.msra.mxu1 %v25247_v55  ;;  %9924 = vmatprep.subr.bf16.mxu0 %v25252_v11  ;;  %v25325_v55 = vld [vmem:[%s28453_s11 + $0xdd8] ss:$40 sps:$4 sm:$0xff]   ;;  %v25330_v11 = vld [vmem:[%s28453_s11 + $0xe24] ss:$40 sps:$4 sm:$0xff]  }
 0x7cd   : > { %10129 = vmatprep.subr.bf16.mxu1 %v25255_v12  ;;  %v25333_v12 = vld [vmem:[%s28453_s11 + $0xe2c] ss:$40 sps:$4 sm:$0xff]  }
 0x7ce   : > { %9916 = vmatmul.mubr.bf16.vlgmr.msra.gmra.mrb[4].mxu0 %v28710_v4 }
 0x7cf   : > { %10121 = vmatmul.mubr.bf16.vlgmr.msra.gmra.mrb[4].mxu1 %v28710_v4  ;;  %9925 = vmatpush1.bf16.msra.mxu0 %v25250_v6  ;;  %v25328_v6 = vld [vmem:[%s28453_s11 + $0xe20] ss:$40 sps:$4 sm:$0xff]  }
 0x7d0   : > { %10130 = vmatpush1.bf16.msra.mxu1 %v25253_v14  ;;  %9926 = vmatprep.subr.bf16.mxu0 %v25258_v16  ;;  %v25331_v14 = vld [vmem:[%s28453_s11 + $0xe28] ss:$40 sps:$4 sm:$0xff]   ;;  %v25336_v16 = vld [vmem:[%s28453_s11 + $0xe74] ss:$40 sps:$4 sm:$0xff]  }
 0x7d1   : > { %10131 = vmatprep.subr.bf16.mxu1 %v25261_v53  ;;  %9956 = vmatprep.mubr.bf16.mxu0 %v28729_v15  ;;  %v25339_v53 = vld [vmem:[%s28453_s11 + $0xe7c] ss:$40 sps:$4 sm:$0xff]  }
 0x7d2   : > { %10161 = vmatprep.mubr.bf16.mxu1 %v28729_v15 }
 0x7d3   : > { %9927 = vmatpush1.bf16.msra.mxu0 %v25256_v17  ;;  %v25334_v17 = vld [vmem:[%s28453_s11 + $0xe70] ss:$40 sps:$4 sm:$0xff]  }
 0x7d4   : > { %10132 = vmatpush1.bf16.msra.mxu1 %v25259_v19  ;;  %9928 = vmatprep.subr.bf16.mxu0 %v25264_v25  ;;  %v25337_v19 = vld [vmem:[%s28453_s11 + $0xe78] ss:$40 sps:$4 sm:$0xff]   ;;  %v25342_v25 = vld [vmem:[%s28453_s11 + $0xec4] ss:$40 sps:$4 sm:$0xff]  }
 0x7d5   : > { %10133 = vmatprep.subr.bf16.mxu1 %v25267_v20  ;;  %v25345_v20 = vld [vmem:[%s28453_s11 + $0xecc] ss:$40 sps:$4 sm:$0xff]  }
 0x7d7   : > { %9929 = vmatpush1.bf16.msra.mxu0 %v25262_v9  ;;  %v25340_v9 = vld [vmem:[%s28453_s11 + $0xec0] ss:$40 sps:$4 sm:$0xff]  }
 0x7d8   : > { %10134 = vmatpush1.bf16.msra.mxu1 %v25265_v29  ;;  %9930 = vmatprep.subr.bf16.mxu0 %v25270_v30  ;;  %v25343_v29 = vld [vmem:[%s28453_s11 + $0xec8] ss:$40 sps:$4 sm:$0xff]   ;;  %v25348_v30 = vld [vmem:[%s28453_s11 + $0xf14] ss:$40 sps:$4 sm:$0xff]  }
 0x7d9   : > { %10135 = vmatprep.subr.bf16.mxu1 %v25273_v31  ;;  %v25351_v31 = vld [vmem:[%s28453_s11 + $0xf1c] ss:$40 sps:$4 sm:$0xff]  }
 0x7db   : > { %9931 = vmatpush1.bf16.msra.mxu0 %v25268_v33  ;;  %v25346_v33 = vld [vmem:[%s28453_s11 + $0xf10] ss:$40 sps:$4 sm:$0xff]  }
 0x7dc   : > { %10136 = vmatpush1.bf16.msra.mxu1 %v25271_v35  ;;  %9932 = vmatprep.subr.bf16.mxu0 %v25276_v36  ;;  %v25349_v35 = vld [vmem:[%s28453_s11 + $0xf18] ss:$40 sps:$4 sm:$0xff]   ;;  %v25354_v36 = vld [vmem:[%s28453_s11 + $0xf64] ss:$40 sps:$4 sm:$0xff]  }
 0x7dd   : > { %10137 = vmatprep.subr.bf16.mxu1 %v25279_v37  ;;  %v25357_v37 = vld [vmem:[%s28453_s11 + $0xf6c] ss:$40 sps:$4 sm:$0xff]  }
 0x7df   : > { %9933 = vmatpush1.bf16.msra.mxu0 %v25274_v38  ;;  %v25352_v38 = vld [vmem:[%s28453_s11 + $0xf60] ss:$40 sps:$4 sm:$0xff]  }
 0x7e0   : > { %10138 = vmatpush1.bf16.msra.mxu1 %v25277_v41  ;;  %9934 = vmatprep.subr.bf16.mxu0 %v25282_v42  ;;  %v25355_v41 = vld [vmem:[%s28453_s11 + $0xf68] ss:$40 sps:$4 sm:$0xff]   ;;  %v25360_v42 = vld [vmem:[%s28453_s11 + $0xfb4] ss:$40 sps:$4 sm:$0xff]  }
 0x7e1   : > { %10139 = vmatprep.subr.bf16.mxu1 %v25285_v43  ;;  %v25363_v43 = vld [vmem:[%s28453_s11 + $0xfbc] ss:$40 sps:$4 sm:$0xff]  }
 0x7e3   : > { %9935 = vmatpush1.bf16.msra.mxu0 %v25280_v40  ;;  %v25358_v40 = vld [vmem:[%s28453_s11 + $0xfb0] ss:$40 sps:$4 sm:$0xff]  }
 0x7e4   : > { %10140 = vmatpush1.bf16.msra.mxu1 %v25283_v13  ;;  %9936 = vmatprep.subr.bf16.mxu0 %v25288_v45  ;;  %v25361_v13 = vld [vmem:[%s28453_s11 + $0xfb8] ss:$40 sps:$4 sm:$0xff]   ;;  %v25366_v45 = vld [vmem:[%s28453_s11 + $0x1004] ss:$40 sps:$4 sm:$0xff]  }
 0x7e5   : > { %10141 = vmatprep.subr.bf16.mxu1 %v25291_v27  ;;  %v25369_v27 = vld [vmem:[%s28453_s11 + $0x100c] ss:$40 sps:$4 sm:$0xff]  }
 0x7e7   : > { %9937 = vmatpush1.bf16.msra.mxu0 %v25286_v46  ;;  %v25364_v46 = vld [vmem:[%s28453_s11 + $0x1000] ss:$40 sps:$4 sm:$0xff]  }
 0x7e8   : > { %10142 = vmatpush1.bf16.msra.mxu1 %v25289_v47  ;;  %9938 = vmatprep.subr.bf16.mxu0 %v25294_v48  ;;  %v25367_v47 = vld [vmem:[%s28453_s11 + $0x1008] ss:$40 sps:$4 sm:$0xff]   ;;  %v25372_v48 = vld [vmem:[%s28453_s11 + $0x1054] ss:$40 sps:$4 sm:$0xff]  }
 0x7e9   : > { %10143 = vmatprep.subr.bf16.mxu1 %v25297_v50  ;;  %v25375_v50 = vld [vmem:[%s28453_s11 + $0x105c] ss:$40 sps:$4 sm:$0xff]  }
 0x7eb   : > { %9939 = vmatpush1.bf16.msra.mxu0 %v25292_v49  ;;  %v25370_v49 = vld [vmem:[%s28453_s11 + $0x1050] ss:$40 sps:$4 sm:$0xff]  }
 0x7ec   : > { %10144 = vmatpush1.bf16.msra.mxu1 %v25295_v44  ;;  %9940 = vmatprep.subr.bf16.mxu0 %v25300_v51  ;;  %v25373_v44 = vld [vmem:[%s28453_s11 + $0x1058] ss:$40 sps:$4 sm:$0xff]   ;;  %v25378_v51 = vld [vmem:[%s28453_s11 + $0x10a4] ss:$40 sps:$4 sm:$0xff]  }
 0x7ed   : > { %10145 = vmatprep.subr.bf16.mxu1 %v25303_v52  ;;  %v25381_v52 = vld [vmem:[%s28453_s11 + $0x10ac] ss:$40 sps:$4 sm:$0xff]  }
 0x7ef   : > { %9941 = vmatpush1.bf16.msra.mxu0 %v25298_v21  ;;  %v25376_v21 = vld [vmem:[%s28453_s11 + $0x10a0] ss:$40 sps:$4 sm:$0xff]  }
 0x7f0   : > { %10146 = vmatpush1.bf16.msra.mxu1 %v25301_v54  ;;  %9942 = vmatprep.subr.bf16.mxu0 %v25306_v56  ;;  %v25379_v54 = vld [vmem:[%s28453_s11 + $0x10a8] ss:$40 sps:$4 sm:$0xff]   ;;  %v25384_v56 = vld [vmem:[%s28453_s11 + $0x10f4] ss:$40 sps:$4 sm:$0xff]  }
 0x7f1   : > { %10147 = vmatprep.subr.bf16.mxu1 %v25309_v10  ;;  %v25387_v10 = vld [vmem:[%s28453_s11 + $0x10fc] ss:$40 sps:$4 sm:$0xff]  }
 0x7f3   : > { %9943 = vmatpush1.bf16.msra.mxu0 %v25304_v57 }
 0x7f4   : > { %10148 = vmatpush1.bf16.msra.mxu1 %v25307_v58  ;;  %9944 = vmatprep.subr.bf16.mxu0 %v25312_v59 }
 0x7f5   : > { %10149 = vmatprep.subr.bf16.mxu1 %v25315_v60 }
 0x7f7   : > { %9945 = vmatpush1.bf16.msra.mxu0 %v25310_v61 }
 0x7f8   : > { %10150 = vmatpush1.bf16.msra.mxu1 %v25313_v62  ;;  %9946 = vmatprep.subr.bf16.mxu0 %v25318_v63  ;;  %v25382_v63 = vld [vmem:[%s28453_s11 + $0x10f0] ss:$40 sps:$4 sm:$0xff]  }
 0x7f9   : > { %10151 = vmatprep.subr.bf16.mxu1 %v25321_v1  ;;  %v25385_v1 = vld [vmem:[%s28453_s11 + $0x10f8] ss:$40 sps:$4 sm:$0xff]  }
 0x7fb   : > { %9947 = vmatpush1.bf16.msra.mxu0 %v25316_v2 }
 0x7fc   : > { %10152 = vmatpush1.bf16.msra.mxu1 %v25319_v3  ;;  %9948 = vmatprep.subr.bf16.mxu0 %v25324_v5  ;;  %v25390_v5 = vld [vmem:[%s28453_s11 + $0x1144] ss:$40 sps:$4 sm:$0xff]  }
 0x7fd   : > { %10153 = vmatprep.subr.bf16.mxu1 %v25327_v7  ;;  %v25393_v7 = vld [vmem:[%s28453_s11 + $0x114c] ss:$40 sps:$4 sm:$0xff]  }
 0x7ff   : > { %9949 = vmatpush1.bf16.msra.mxu0 %v25322_v8  ;;  %v25388_v8 = vld [vmem:[%s28453_s11 + $0x1140] ss:$40 sps:$4 sm:$0xff]  }
 0x800   : > { %10154 = vmatpush1.bf16.msra.mxu1 %v25325_v55  ;;  %9950 = vmatprep.subr.bf16.mxu0 %v25330_v11  ;;  %v25391_v55 = vld [vmem:[%s28453_s11 + $0x1148] ss:$40 sps:$4 sm:$0xff]   ;;  %v25396_v11 = vld [vmem:[%s28453_s11 + $0x1194] ss:$40 sps:$4 sm:$0xff]  }
 0x801   : > { %10155 = vmatprep.subr.bf16.mxu1 %v25333_v12  ;;  %v25399_v12 = vld [vmem:[%s28453_s11 + $0x119c] ss:$40 sps:$4 sm:$0xff]  }
 0x803   : > { %9951 = vmatpush1.bf16.msra.mxu0 %v25328_v6  ;;  %v25394_v6 = vld [vmem:[%s28453_s11 + $0x1190] ss:$40 sps:$4 sm:$0xff]  }
 0x804   : > { %10156 = vmatpush1.bf16.msra.mxu1 %v25331_v14  ;;  %9952 = vmatprep.subr.bf16.mxu0 %v25336_v16  ;;  %v25397_v14 = vld [vmem:[%s28453_s11 + $0x1198] ss:$40 sps:$4 sm:$0xff]   ;;  %v25402_v16 = vld [vmem:[%s28453_s11 + $0x11e4] ss:$40 sps:$4 sm:$0xff]  }
 0x805   : > { %10157 = vmatprep.subr.bf16.mxu1 %v25339_v53  ;;  %v25405_v53 = vld [vmem:[%s28453_s11 + $0x11ec] ss:$40 sps:$4 sm:$0xff]  }
 0x807   : > { %9953 = vmatpush1.bf16.msra.mxu0 %v25334_v17  ;;  %v25400_v17 = vld [vmem:[%s28453_s11 + $0x11e0] ss:$40 sps:$4 sm:$0xff]  }
 0x808   : > { %10158 = vmatpush1.bf16.msra.mxu1 %v25337_v19  ;;  %9954 = vmatprep.subr.bf16.mxu0 %v25342_v25  ;;  %v25403_v19 = vld [vmem:[%s28453_s11 + $0x11e8] ss:$40 sps:$4 sm:$0xff]   ;;  %v25408_v25 = vld [vmem:[%s28453_s11 + $0x1234] ss:$40 sps:$4 sm:$0xff]  }
 0x809   : > { %10159 = vmatprep.subr.bf16.mxu1 %v25345_v20  ;;  %v25411_v20 = vld [vmem:[%s28453_s11 + $0x123c] ss:$40 sps:$4 sm:$0xff]  }
 0x80b   : > { %9955 = vmatpush1.bf16.msra.mxu0 %v25340_v9  ;;  %v25406_v9 = vld [vmem:[%s28453_s11 + $0x1230] ss:$40 sps:$4 sm:$0xff]  }
 0x80c   : > { %10160 = vmatpush1.bf16.msra.mxu1 %v25343_v29  ;;  %9965 = vmatprep.subr.bf16.mxu0 %v25348_v30  ;;  %v25409_v29 = vld [vmem:[%s28453_s11 + $0x1238] ss:$40 sps:$4 sm:$0xff]   ;;  %v25414_v30 = vld [vmem:[%s28453_s11 + $0x1284] ss:$40 sps:$4 sm:$0xff]  }
 0x80d   : > { %10170 = vmatprep.subr.bf16.mxu1 %v25351_v31  ;;  %v25417_v31 = vld [vmem:[%s28453_s11 + $0x128c] ss:$40 sps:$4 sm:$0xff]  }
 0x80e   : > { %9957 = vmatmul.mubr.bf16.vlgmr.msra.gmra.mrb[4].mxu0 %v28798_v18 }
 0x80f   : > { %10162 = vmatmul.mubr.bf16.vlgmr.msra.gmra.mrb[4].mxu1 %v28798_v18  ;;  %9966 = vmatpush1.bf16.msra.mxu0 %v25346_v33  ;;  %v25412_v33 = vld [vmem:[%s28453_s11 + $0x1280] ss:$40 sps:$4 sm:$0xff]  }
 0x810   : > { %10171 = vmatpush1.bf16.msra.mxu1 %v25349_v35  ;;  %9967 = vmatprep.subr.bf16.mxu0 %v25354_v36  ;;  %v25415_v35 = vld [vmem:[%s28453_s11 + $0x1288] ss:$40 sps:$4 sm:$0xff]   ;;  %v25420_v36 = vld [vmem:[%s28453_s11 + $0x12d4] ss:$40 sps:$4 sm:$0xff]  }
 0x811   : > { %10172 = vmatprep.subr.bf16.mxu1 %v25357_v37  ;;  %9997 = vmatprep.mubr.bf16.mxu0 %v28804_v23  ;;  %v25423_v37 = vld [vmem:[%s28453_s11 + $0x12dc] ss:$40 sps:$4 sm:$0xff]  }
 0x812   : > { %10202 = vmatprep.mubr.bf16.mxu1 %v28804_v23 }
 0x813   : > { %9968 = vmatpush1.bf16.msra.mxu0 %v25352_v38  ;;  %v25418_v38 = vld [vmem:[%s28453_s11 + $0x12d0] ss:$40 sps:$4 sm:$0xff]  }
 0x814   : > { %10173 = vmatpush1.bf16.msra.mxu1 %v25355_v41  ;;  %9969 = vmatprep.subr.bf16.mxu0 %v25360_v42  ;;  %v25421_v41 = vld [vmem:[%s28453_s11 + $0x12d8] ss:$40 sps:$4 sm:$0xff]   ;;  %v25426_v42 = vld [vmem:[%s28453_s11 + $0x1324] ss:$40 sps:$4 sm:$0xff]  }
 0x815   : > { %10174 = vmatprep.subr.bf16.mxu1 %v25363_v43  ;;  %v25429_v43 = vld [vmem:[%s28453_s11 + $0x132c] ss:$40 sps:$4 sm:$0xff]  }
 0x817   : > { %9970 = vmatpush1.bf16.msra.mxu0 %v25358_v40  ;;  %v25424_v40 = vld [vmem:[%s28453_s11 + $0x1320] ss:$40 sps:$4 sm:$0xff]  }
 0x818   : > { %10175 = vmatpush1.bf16.msra.mxu1 %v25361_v13  ;;  %9971 = vmatprep.subr.bf16.mxu0 %v25366_v45  ;;  %v25427_v13 = vld [vmem:[%s28453_s11 + $0x1328] ss:$40 sps:$4 sm:$0xff]   ;;  %v25432_v45 = vld [vmem:[%s28453_s11 + $0x1374] ss:$40 sps:$4 sm:$0xff]  }
 0x819   : > { %10176 = vmatprep.subr.bf16.mxu1 %v25369_v27  ;;  %v25435_v27 = vld [vmem:[%s28453_s11 + $0x137c] ss:$40 sps:$4 sm:$0xff]  }
 0x81b   : > { %9972 = vmatpush1.bf16.msra.mxu0 %v25364_v46  ;;  %v25430_v46 = vld [vmem:[%s28453_s11 + $0x1370] ss:$40 sps:$4 sm:$0xff]  }
 0x81c   : > { %10177 = vmatpush1.bf16.msra.mxu1 %v25367_v47  ;;  %9973 = vmatprep.subr.bf16.mxu0 %v25372_v48  ;;  %v25433_v47 = vld [vmem:[%s28453_s11 + $0x1378] ss:$40 sps:$4 sm:$0xff]   ;;  %v25438_v48 = vld [vmem:[%s28453_s11 + $0x13c4] ss:$40 sps:$4 sm:$0xff]  }
 0x81d   : > { %10178 = vmatprep.subr.bf16.mxu1 %v25375_v50  ;;  %v25441_v50 = vld [vmem:[%s28453_s11 + $0x13cc] ss:$40 sps:$4 sm:$0xff]  }
 0x81f   : > { %9974 = vmatpush1.bf16.msra.mxu0 %v25370_v49  ;;  %v25436_v49 = vld [vmem:[%s28453_s11 + $0x13c0] ss:$40 sps:$4 sm:$0xff]  }
 0x820   : > { %10179 = vmatpush1.bf16.msra.mxu1 %v25373_v44  ;;  %9975 = vmatprep.subr.bf16.mxu0 %v25378_v51  ;;  %v25439_v44 = vld [vmem:[%s28453_s11 + $0x13c8] ss:$40 sps:$4 sm:$0xff]   ;;  %v25444_v51 = vld [vmem:[%s28453_s11 + $0x1414] ss:$40 sps:$4 sm:$0xff]  }
 0x821   : > { %10180 = vmatprep.subr.bf16.mxu1 %v25381_v52  ;;  %v29184_v57 = vpop.f32.mrb[0].mxu0  ;;  %v25447_v52 = vld [vmem:[%s28453_s11 + $0x141c] ss:$40 sps:$4 sm:$0xff]  }
 0x822   : > { %v29186_v58 = vpop.f32.mrb[0].mxu1  ;;  %v29188_v59 = vpop.f32.mrb[1].mxu0 }
 0x823   : > { %v29190_v60 = vpop.f32.mrb[1].mxu1  ;;  %v9634_v61 = vpop.f32.mrb[2].mxu0  ;;  %9976 = vmatpush1.bf16.msra.mxu0 %v25376_v21  ;;  %v25442_v21 = vld [vmem:[%s28453_s11 + $0x1410] ss:$40 sps:$4 sm:$0xff]  }
 0x824   : > { %v9839_v62 = vpop.f32.mrb[2].mxu1  ;;  %10181 = vmatpush1.bf16.msra.mxu1 %v25379_v54  ;;  %v9635_v2 = vpop.f32.mrb[3].mxu0  ;;  %9977 = vmatprep.subr.bf16.mxu0 %v25384_v56  ;;  %v25445_v54 = vld [vmem:[%s28453_s11 + $0x1418] ss:$40 sps:$4 sm:$0xff]   ;;  %v25450_v56 = vld [vmem:[%s28453_s11 + $0x1464] ss:$40 sps:$4 sm:$0xff]  }
 0x825   : > { %v9840_v3 = vpop.f32.mrb[3].mxu1  ;;  %10182 = vmatprep.subr.bf16.mxu1 %v25387_v10  ;;  %v25453_v10 = vld [vmem:[%s28453_s11 + $0x146c] ss:$40 sps:$4 sm:$0xff]   ;;  %v25448_v61 = vld [vmem:[%s28453_s11 + $0x1460] ss:$40 sps:$4 sm:$0xff]  }
 0x826   : > { %v25451_v62 = vld [vmem:[%s28453_s11 + $0x1468] ss:$40 sps:$4 sm:$0xff]   ;;  %v25457_v3 = vld [vmem:[%s28453_s11 + $0x14b8] ss:$40 sps:$4 sm:$0xff]  }
 0x827   : > { %9978 = vmatpush1.bf16.msra.mxu0 %v25382_v63  ;;  %v25456_v63 = vld [vmem:[%s28453_s11 + $0x14b4] ss:$40 sps:$4 sm:$0xff]   ;;  %v25454_v2 = vld [vmem:[%s28453_s11 + $0x14b0] ss:$40 sps:$4 sm:$0xff]  }
 0x828   : > { %10183 = vmatpush1.bf16.msra.mxu1 %v25385_v1  ;;  %9979 = vmatprep.subr.bf16.mxu0 %v25390_v5  ;;  %v25459_v1 = vld [vmem:[%s28453_s11 + $0x14bc] ss:$40 sps:$4 sm:$0xff]  }
 0x829   : > { %10184 = vmatprep.subr.bf16.mxu1 %v25393_v7  ;;  %v25462_v5 = vld [vmem:[%s28453_s11 + $0x1504] ss:$40 sps:$4 sm:$0xff]  }
 0x82a   : > { %v25465_v7 = vld [vmem:[%s28453_s11 + $0x150c] ss:$40 sps:$4 sm:$0xff]  }
 0x82b   : > { %9980 = vmatpush1.bf16.msra.mxu0 %v25388_v8  ;;  %v25460_v8 = vld [vmem:[%s28453_s11 + $0x1500] ss:$40 sps:$4 sm:$0xff]  }
 0x82c   : > { %10185 = vmatpush1.bf16.msra.mxu1 %v25391_v55  ;;  %9981 = vmatprep.subr.bf16.mxu0 %v25396_v11  ;;  %v25463_v55 = vld [vmem:[%s28453_s11 + $0x1508] ss:$40 sps:$4 sm:$0xff]   ;;  %v25468_v11 = vld [vmem:[%s28453_s11 + $0x1554] ss:$40 sps:$4 sm:$0xff]  }
 0x82d   : > { %10186 = vmatprep.subr.bf16.mxu1 %v25399_v12  ;;  %v25471_v12 = vld [vmem:[%s28453_s11 + $0x155c] ss:$40 sps:$4 sm:$0xff]  }
 0x82f   : > { %9982 = vmatpush1.bf16.msra.mxu0 %v25394_v6  ;;  %v25466_v6 = vld [vmem:[%s28453_s11 + $0x1550] ss:$40 sps:$4 sm:$0xff]  }
 0x830   : > { %10187 = vmatpush1.bf16.msra.mxu1 %v25397_v14  ;;  %9983 = vmatprep.subr.bf16.mxu0 %v25402_v16  ;;  %v25469_v14 = vld [vmem:[%s28453_s11 + $0x1558] ss:$40 sps:$4 sm:$0xff]   ;;  %v25474_v16 = vld [vmem:[%s28453_s11 + $0x15a4] ss:$40 sps:$4 sm:$0xff]  }
 0x831   : > { %10188 = vmatprep.subr.bf16.mxu1 %v25405_v53  ;;  %v25477_v53 = vld [vmem:[%s28453_s11 + $0x15ac] ss:$40 sps:$4 sm:$0xff]  }
 0x833   : > { %9984 = vmatpush1.bf16.msra.mxu0 %v25400_v17  ;;  %v25472_v17 = vld [vmem:[%s28453_s11 + $0x15a0] ss:$40 sps:$4 sm:$0xff]  }
 0x834   : > { %10189 = vmatpush1.bf16.msra.mxu1 %v25403_v19  ;;  %9985 = vmatprep.subr.bf16.mxu0 %v25408_v25  ;;  %v25475_v19 = vld [vmem:[%s28453_s11 + $0x15a8] ss:$40 sps:$4 sm:$0xff]   ;;  %v25480_v25 = vld [vmem:[%s28453_s11 + $0x15f4] ss:$40 sps:$4 sm:$0xff]  }
 0x835   : > { %10190 = vmatprep.subr.bf16.mxu1 %v25411_v20  ;;  %v25483_v20 = vld [vmem:[%s28453_s11 + $0x15fc] ss:$40 sps:$4 sm:$0xff]  }
 0x837   : > { %9986 = vmatpush1.bf16.msra.mxu0 %v25406_v9  ;;  %v25478_v9 = vld [vmem:[%s28453_s11 + $0x15f0] ss:$40 sps:$4 sm:$0xff]  }
 0x838   : > { %10191 = vmatpush1.bf16.msra.mxu1 %v25409_v29  ;;  %9987 = vmatprep.subr.bf16.mxu0 %v25414_v30  ;;  %v25481_v29 = vld [vmem:[%s28453_s11 + $0x15f8] ss:$40 sps:$4 sm:$0xff]   ;;  %v25486_v30 = vld [vmem:[%s28453_s11 + $0x1644] ss:$40 sps:$4 sm:$0xff]  }
 0x839   : > { %10192 = vmatprep.subr.bf16.mxu1 %v25417_v31  ;;  %v25489_v31 = vld [vmem:[%s28453_s11 + $0x164c] ss:$40 sps:$4 sm:$0xff]  }
 0x83b   : > { %9988 = vmatpush1.bf16.msra.mxu0 %v25412_v33  ;;  %v25484_v33 = vld [vmem:[%s28453_s11 + $0x1640] ss:$40 sps:$4 sm:$0xff]  }
 0x83c   : > { %10193 = vmatpush1.bf16.msra.mxu1 %v25415_v35  ;;  %9989 = vmatprep.subr.bf16.mxu0 %v25420_v36  ;;  %v25487_v35 = vld [vmem:[%s28453_s11 + $0x1648] ss:$40 sps:$4 sm:$0xff]   ;;  %v25492_v36 = vld [vmem:[%s28453_s11 + $0x1694] ss:$40 sps:$4 sm:$0xff]  }
 0x83d   : > { %10194 = vmatprep.subr.bf16.mxu1 %v25423_v37  ;;  %v25495_v37 = vld [vmem:[%s28453_s11 + $0x169c] ss:$40 sps:$4 sm:$0xff]  }
 0x83f   : > { %9990 = vmatpush1.bf16.msra.mxu0 %v25418_v38  ;;  %v25490_v38 = vld [vmem:[%s28453_s11 + $0x1690] ss:$40 sps:$4 sm:$0xff]  }
 0x840   : > { %10195 = vmatpush1.bf16.msra.mxu1 %v25421_v41  ;;  %9991 = vmatprep.subr.bf16.mxu0 %v25426_v42  ;;  %v25493_v41 = vld [vmem:[%s28453_s11 + $0x1698] ss:$40 sps:$4 sm:$0xff]   ;;  %v25498_v42 = vld [vmem:[%s28453_s11 + $0x16e4] ss:$40 sps:$4 sm:$0xff]  }
 0x841   : > { %10196 = vmatprep.subr.bf16.mxu1 %v25429_v43  ;;  %v25501_v43 = vld [vmem:[%s28453_s11 + $0x16ec] ss:$40 sps:$4 sm:$0xff]  }
 0x843   : > { %9992 = vmatpush1.bf16.msra.mxu0 %v25424_v40  ;;  %v25496_v40 = vld [vmem:[%s28453_s11 + $0x16e0] ss:$40 sps:$4 sm:$0xff]  }
 0x844   : > { %10197 = vmatpush1.bf16.msra.mxu1 %v25427_v13  ;;  %9993 = vmatprep.subr.bf16.mxu0 %v25432_v45  ;;  %v25499_v13 = vld [vmem:[%s28453_s11 + $0x16e8] ss:$40 sps:$4 sm:$0xff]   ;;  %v25504_v45 = vld [vmem:[%s28453_s11 + $0x1734] ss:$40 sps:$4 sm:$0xff]  }
 0x845   : > { %10198 = vmatprep.subr.bf16.mxu1 %v25435_v27  ;;  %v25507_v27 = vld [vmem:[%s28453_s11 + $0x173c] ss:$40 sps:$4 sm:$0xff]  }
 0x847   : > { %9994 = vmatpush1.bf16.msra.mxu0 %v25430_v46  ;;  %v25502_v46 = vld [vmem:[%s28453_s11 + $0x1730] ss:$40 sps:$4 sm:$0xff]  }
 0x848   : > { %10199 = vmatpush1.bf16.msra.mxu1 %v25433_v47  ;;  %9995 = vmatprep.subr.bf16.mxu0 %v25438_v48  ;;  %v25505_v47 = vld [vmem:[%s28453_s11 + $0x1738] ss:$40 sps:$4 sm:$0xff]   ;;  %v25510_v48 = vld [vmem:[%s28453_s11 + $0x1784] ss:$40 sps:$4 sm:$0xff]  }
 0x849   : > { %10200 = vmatprep.subr.bf16.mxu1 %v25441_v50  ;;  %v25513_v50 = vld [vmem:[%s28453_s11 + $0x178c] ss:$40 sps:$4 sm:$0xff]  }
 0x84b   : > { %9996 = vmatpush1.bf16.msra.mxu0 %v25436_v49  ;;  %v25508_v49 = vld [vmem:[%s28453_s11 + $0x1780] ss:$40 sps:$4 sm:$0xff]  }
 0x84c   : > { %10201 = vmatpush1.bf16.msra.mxu1 %v25439_v44  ;;  %10006 = vmatprep.subr.bf16.mxu0 %v25444_v51  ;;  %v25511_v44 = vld [vmem:[%s28453_s11 + $0x1788] ss:$40 sps:$4 sm:$0xff]   ;;  %v25516_v51 = vld [vmem:[%s28453_s11 + $0x17d4] ss:$40 sps:$4 sm:$0xff]  }
 0x84d   : > { %10211 = vmatprep.subr.bf16.mxu1 %v25447_v52  ;;  %v25519_v52 = vld [vmem:[%s28453_s11 + $0x17dc] ss:$40 sps:$4 sm:$0xff]  }
 0x84e   : > { %9998 = vmatmul.mubr.bf16.vlgmr.msra.gmra.mrb[4].mxu0 %v28877_v39 }
 0x84f   : > { %10203 = vmatmul.mubr.bf16.vlgmr.msra.gmra.mrb[4].mxu1 %v28877_v39  ;;  %10007 = vmatpush1.bf16.msra.mxu0 %v25442_v21  ;;  %v25514_v21 = vld [vmem:[%s28453_s11 + $0x17d0] ss:$40 sps:$4 sm:$0xff]  }
 0x850   : > { %10212 = vmatpush1.bf16.msra.mxu1 %v25445_v54  ;;  %10008 = vmatprep.subr.bf16.mxu0 %v25450_v56  ;;  %v25517_v54 = vld [vmem:[%s28453_s11 + $0x17d8] ss:$40 sps:$4 sm:$0xff]   ;;  %v25522_v56 = vld [vmem:[%s28453_s11 + $0x1824] ss:$40 sps:$4 sm:$0xff]  }
 0x851   : > { %10213 = vmatprep.subr.bf16.mxu1 %v25453_v10  ;;  %10038 = vmatprep.mubr.bf16.mxu0 %v28882_v24  ;;  %v25525_v10 = vld [vmem:[%s28453_s11 + $0x182c] ss:$40 sps:$4 sm:$0xff]  }
 0x852   : > { %10243 = vmatprep.mubr.bf16.mxu1 %v28882_v24 }
 0x853   : > { %10009 = vmatpush1.bf16.msra.mxu0 %v25448_v61  ;;  %v29292_v61 = vld [vmem:[%s29289_s26] sm:$0xff] }
 0x854   : > { %10214 = vmatpush1.bf16.msra.mxu1 %v25451_v62  ;;  %10010 = vmatprep.subr.bf16.mxu0 %v25456_v63  ;;  %v29295_v62 = vsub.s32 1, %v28593_v22  ;;  %v25520_v63 = vld [vmem:[%s28453_s11 + $0x1820] ss:$40 sps:$4 sm:$0xff]  }
 0x855   : > { %10215 = vmatprep.subr.bf16.mxu1 %v25459_v1  ;;  %v25523_v1 = vld [vmem:[%s28453_s11 + $0x1828] ss:$40 sps:$4 sm:$0xff]  }
 0x857   : > { %10011 = vmatpush1.bf16.msra.mxu0 %v25454_v2  ;;  %v25528_v2 = vld [vmem:[%s28453_s11 + $0x1874] ss:$40 sps:$4 sm:$0xff]  }
 0x858   : > { %10216 = vmatpush1.bf16.msra.mxu1 %v25457_v3  ;;  %10012 = vmatprep.subr.bf16.mxu0 %v25462_v5  ;;  %v25531_v3 = vld [vmem:[%s28453_s11 + $0x187c] ss:$40 sps:$4 sm:$0xff]   ;;  %v5389_v5 = vrot.slane %v29292_v61, %v29295_v62 }
 0x859   : > { %10217 = vmatprep.subr.bf16.mxu1 %v25465_v7  ;;  %v25526_v7 = vld [vmem:[%s28453_s11 + $0x1870] ss:$40 sps:$4 sm:$0xff]  }
 0x85b   : > { %10013 = vmatpush1.bf16.msra.mxu0 %v25460_v8  ;;  %v25529_v8 = vld [vmem:[%s28453_s11 + $0x1878] ss:$40 sps:$4 sm:$0xff]  }
 0x85c   : > { %10218 = vmatpush1.bf16.msra.mxu1 %v25463_v55  ;;  %10014 = vmatprep.subr.bf16.mxu0 %v25468_v11  ;;  %v25534_v55 = vld [vmem:[%s28453_s11 + $0x18c4] ss:$40 sps:$4 sm:$0xff]  }
 0x85d   : > { %10219 = vmatprep.subr.bf16.mxu1 %v25471_v12  ;;  %v25537_v11 = vld [vmem:[%s28453_s11 + $0x18cc] ss:$40 sps:$4 sm:$0xff]   ;;  %v23426_v12 = vadd.f32 %v29188_v59, %v5389_v5  ;;  %v25592_v5 = vld [vmem:[%s28453_s11 + $0x2f0] ss:$40 sps:$4 sm:$0xff]  }
 0x85e   : > { %v25549_v59 = vld [vmem:[%s28453_s11 + $0x1954] ss:$40 sps:$4 sm:$0xff]  }
 0x85f   : > { %10015 = vmatpush1.bf16.msra.mxu0 %v25466_v6  ;;  %v25532_v6 = vld [vmem:[%s28453_s11 + $0x18c0] ss:$40 sps:$4 sm:$0xff]  }
 0x860   : > { %10220 = vmatpush1.bf16.msra.mxu1 %v25469_v14  ;;  %10016 = vmatprep.subr.bf16.mxu0 %v25474_v16  ;;  %v25535_v14 = vld [vmem:[%s28453_s11 + $0x18c8] ss:$40 sps:$4 sm:$0xff]   ;;  %v25540_v16 = vld [vmem:[%s28453_s11 + $0x24] ss:$40 sps:$4 sm:$0xff]  }
 0x861   : > { %10221 = vmatprep.subr.bf16.mxu1 %v25477_v53  ;;  %v25543_v53 = vld [vmem:[%s28453_s11 + $0x1904] ss:$40 sps:$4 sm:$0xff]  }
 0x863   : > { %10017 = vmatpush1.bf16.msra.mxu0 %v25472_v17  ;;  %v25538_v17 = vld [vmem:[%s28453_s11 + $0x20] ss:$40 sps:$4 sm:$0xff]  }
 0x864   : > { %10222 = vmatpush1.bf16.msra.mxu1 %v25475_v19  ;;  %10018 = vmatprep.subr.bf16.mxu0 %v25480_v25  ;;  %v25541_v19 = vld [vmem:[%s28453_s11 + $0x1900] ss:$40 sps:$4 sm:$0xff]   ;;  %v10458_v25 = vmax.f32 %v23426_v12, 0.0 }
 0x865   : > { %10223 = vmatprep.subr.bf16.mxu1 %v25483_v20  ;;  %v25546_v20 = vld [vmem:[%s28453_s11 + $0x74] ss:$40 sps:$4 sm:$0xff]   ;;  %v25601_v12 = vld [vmem:[%s28453_s11 + $0x1c20] ss:$40 sps:$4 sm:$0xff]  }
 0x867   : > { %10019 = vmatpush1.bf16.msra.mxu0 %v25478_v9  ;;  %v25544_v9 = vld [vmem:[%s28453_s11 + $0x70] ss:$40 sps:$4 sm:$0xff]  }
 0x868   : > { %10224 = vmatpush1.bf16.msra.mxu1 %v25481_v29  ;;  %10020 = vmatprep.subr.bf16.mxu0 %v25486_v30  ;;  %v25547_v29 = vld [vmem:[%s28453_s11 + $0x1950] ss:$40 sps:$4 sm:$0xff]   ;;  %v29318_v30 = vpack.c.bf16 %v10458_v25, %v10458_v25  ;;  %v25610_v25 = vld [vmem:[%s28453_s11 + $0x3e0] ss:$40 sps:$4 sm:$0xff]  }
 0x869   : > { %10225 = vmatprep.subr.bf16.mxu1 %v25489_v31  ;;  %v25552_v31 = vld [vmem:[%s28453_s11 + $0xc4] ss:$40 sps:$4 sm:$0xff]  }
 0x86b   : > { %10021 = vmatpush1.bf16.msra.mxu0 %v25484_v33  ;;  %v25555_v33 = vld [vmem:[%s28453_s11 + $0x19a4] ss:$40 sps:$4 sm:$0xff]  }
 0x86c   : > { %10226 = vmatpush1.bf16.msra.mxu1 %v25487_v35  ;;  %10022 = vmatprep.subr.bf16.mxu0 %v25492_v36  ;;  %v25550_v35 = vld [vmem:[%s28453_s11 + $0xc0] ss:$40 sps:$4 sm:$0xff]  }
 0x86d   : > { %10227 = vmatprep.subr.bf16.mxu1 %v25495_v37  ;;  %v25553_v36 = vld [vmem:[%s28453_s11 + $0x19a0] ss:$40 sps:$4 sm:$0xff]   ;;  %v25558_v37 = vld [vmem:[%s28453_s11 + $0x114] ss:$40 sps:$4 sm:$0xff]  }
 0x86f   : > { %10023 = vmatpush1.bf16.msra.mxu0 %v25490_v38  ;;  %v25561_v38 = vld [vmem:[%s28453_s11 + $0x19f4] ss:$40 sps:$4 sm:$0xff]  }
 0x870   : > { %10228 = vmatpush1.bf16.msra.mxu1 %v25493_v41  ;;  %10024 = vmatprep.subr.bf16.mxu0 %v25498_v42  ;;  %v25556_v41 = vld [vmem:[%s28453_s11 + $0x110] ss:$40 sps:$4 sm:$0xff]  }
 0x871   : > { %10229 = vmatprep.subr.bf16.mxu1 %v25501_v43  ;;  %v25559_v42 = vld [vmem:[%s28453_s11 + $0x19f0] ss:$40 sps:$4 sm:$0xff]   ;;  %v25564_v43 = vld [vmem:[%s28453_s11 + $0x164] ss:$40 sps:$4 sm:$0xff]  }
 0x873   : > { %10025 = vmatpush1.bf16.msra.mxu0 %v25496_v40  ;;  %v25567_v40 = vld [vmem:[%s28453_s11 + $0x1a44] ss:$40 sps:$4 sm:$0xff]  }
 0x874   : > { %10230 = vmatpush1.bf16.msra.mxu1 %v25499_v13  ;;  %10026 = vmatprep.subr.bf16.mxu0 %v25504_v45  ;;  %v25565_v13 = vld [vmem:[%s28453_s11 + $0x1a40] ss:$40 sps:$4 sm:$0xff]   ;;  %v25570_v45 = vld [vmem:[%s28453_s11 + $0x1b4] ss:$40 sps:$4 sm:$0xff]  }
 0x875   : > { %10231 = vmatprep.subr.bf16.mxu1 %v25507_v27  ;;  %v25573_v27 = vld [vmem:[%s28453_s11 + $0x1a94] ss:$40 sps:$4 sm:$0xff]  }
 0x877   : > { %10027 = vmatpush1.bf16.msra.mxu0 %v25502_v46  ;;  %v25568_v46 = vld [vmem:[%s28453_s11 + $0x1b0] ss:$40 sps:$4 sm:$0xff]  }
 0x878   : > { %10232 = vmatpush1.bf16.msra.mxu1 %v25505_v47  ;;  %10028 = vmatprep.subr.bf16.mxu0 %v25510_v48  ;;  %v25571_v47 = vld [vmem:[%s28453_s11 + $0x1a90] ss:$40 sps:$4 sm:$0xff]   ;;  %v25576_v48 = vld [vmem:[%s28453_s11 + $0x204] ss:$40 sps:$4 sm:$0xff]  }
 0x879   : > { %10233 = vmatprep.subr.bf16.mxu1 %v25513_v50  ;;  %v25579_v50 = vld [vmem:[%s28453_s11 + $0x1ae4] ss:$40 sps:$4 sm:$0xff]  }
 0x87b   : > { %10029 = vmatpush1.bf16.msra.mxu0 %v25508_v49  ;;  %v25574_v49 = vld [vmem:[%s28453_s11 + $0x200] ss:$40 sps:$4 sm:$0xff]  }
 0x87c   : > { %10234 = vmatpush1.bf16.msra.mxu1 %v25511_v44  ;;  %10030 = vmatprep.subr.bf16.mxu0 %v25516_v51  ;;  %v25577_v44 = vld [vmem:[%s28453_s11 + $0x1ae0] ss:$40 sps:$4 sm:$0xff]   ;;  %v25582_v51 = vld [vmem:[%s28453_s11 + $0x254] ss:$40 sps:$4 sm:$0xff]  }
 0x87d   : > { %10235 = vmatprep.subr.bf16.mxu1 %v25519_v52  ;;  %v25585_v52 = vld [vmem:[%s28453_s11 + $0x1b34] ss:$40 sps:$4 sm:$0xff]  }
 0x87f   : > { %10031 = vmatpush1.bf16.msra.mxu0 %v25514_v21  ;;  %v25580_v21 = vld [vmem:[%s28453_s11 + $0x250] ss:$40 sps:$4 sm:$0xff]  }
 0x880   : > { %10236 = vmatpush1.bf16.msra.mxu1 %v25517_v54  ;;  %10032 = vmatprep.subr.bf16.mxu0 %v25522_v56  ;;  %v25583_v54 = vld [vmem:[%s28453_s11 + $0x1b30] ss:$40 sps:$4 sm:$0xff]   ;;  %v25588_v56 = vld [vmem:[%s28453_s11 + $0x2a4] ss:$40 sps:$4 sm:$0xff]  }
 0x881   : > { %10237 = vmatprep.subr.bf16.mxu1 %v25525_v10  ;;  %v25591_v10 = vld [vmem:[%s28453_s11 + $0x1b84] ss:$40 sps:$4 sm:$0xff]  }
 0x883   : > { %10033 = vmatpush1.bf16.msra.mxu0 %v25520_v63  ;;  %v25586_v63 = vld [vmem:[%s28453_s11 + $0x2a0] ss:$40 sps:$4 sm:$0xff]  }
 0x884   : > { %10238 = vmatpush1.bf16.msra.mxu1 %v25523_v1  ;;  %10034 = vmatprep.subr.bf16.mxu0 %v25528_v2  ;;  %v25589_v1 = vld [vmem:[%s28453_s11 + $0x1b80] ss:$40 sps:$4 sm:$0xff]   ;;  %v25594_v2 = vld [vmem:[%s28453_s11 + $0x2f4] ss:$40 sps:$4 sm:$0xff]  }
 0x885   : > { %10239 = vmatprep.subr.bf16.mxu1 %v25531_v3  ;;  %v25597_v3 = vld [vmem:[%s28453_s11 + $0x1bd4] ss:$40 sps:$4 sm:$0xff]  }
 0x887   : > { %10035 = vmatpush1.bf16.msra.mxu0 %v25526_v7  ;;  %v25595_v7 = vld [vmem:[%s28453_s11 + $0x1bd0] ss:$40 sps:$4 sm:$0xff]  }
 0x888   : > { %10240 = vmatpush1.bf16.msra.mxu1 %v25529_v8  ;;  %10036 = vmatprep.subr.bf16.mxu0 %v25534_v55  ;;  %v25600_v8 = vld [vmem:[%s28453_s11 + $0x344] ss:$40 sps:$4 sm:$0xff]  }
 0x889   : > { %10241 = vmatprep.subr.bf16.mxu1 %v25537_v11  ;;  %v25603_v55 = vld [vmem:[%s28453_s11 + $0x1c24] ss:$40 sps:$4 sm:$0xff]   ;;  %v25598_v11 = vld [vmem:[%s28453_s11 + $0x340] ss:$40 sps:$4 sm:$0xff]  }
 0x88b   : > { %10037 = vmatpush1.bf16.msra.mxu0 %v25532_v6  ;;  %v25606_v6 = vld [vmem:[%s28453_s11 + $0x394] ss:$40 sps:$4 sm:$0xff]  }
 0x88c   : > { %10242 = vmatpush1.bf16.msra.mxu1 %v25535_v14  ;;  %10252 = vmatprep.subr.bf16.mxu0 %v25540_v16  ;;  %v25609_v14 = vld [vmem:[%s28453_s11 + $0x1c74] ss:$40 sps:$4 sm:$0xff]   ;;  %v25604_v16 = vld [vmem:[%s28453_s11 + $0x390] ss:$40 sps:$4 sm:$0xff]  }
 0x88d   : > { %15335 = vmatprep.subr.bf16.mxu1 %v25543_v53  ;;  %v25607_v53 = vld [vmem:[%s28453_s11 + $0x1c70] ss:$40 sps:$4 sm:$0xff]  }
 0x88e   : > { %10039 = vmatmul.mubr.bf16.vlgmr.msra.gmra.mrb[4].mxu0 %v28950_v28 }
 0x88f   : > { %10244 = vmatmul.mubr.bf16.vlgmr.msra.gmra.mrb[4].mxu1 %v28950_v28  ;;  %10253 = vmatpush1.bf16.msra.mxu0 %v25538_v17  ;;  %v25612_v17 = vld [vmem:[%s28453_s11 + $0x3e4] ss:$40 sps:$4 sm:$0xff]  }
 0x890   : > { %15336 = vmatpush1.bf16.msra.mxu1 %v25541_v19  ;;  %15367 = vmatprep.mubr.bf16.mxu1 %v29318_v30  ;;  %v25615_v19 = vld [vmem:[%s28453_s11 + $0x1cc4] ss:$40 sps:$4 sm:$0xff]  }
 0x891   : > { %10254 = vmatprep.subr.bf16.mxu0 %v25546_v20  ;;  %15337 = vmatprep.subr.bf16.mxu1 %v25549_v59  ;;  %v25613_v20 = vld [vmem:[%s28453_s11 + $0x1cc0] ss:$40 sps:$4 sm:$0xff]   ;;  %v25618_v59 = vld [vmem:[%s28453_s11 + $0x434] ss:$40 sps:$4 sm:$0xff]  }
 0x892   : > { %10284 = vmatprep.mubr.bf16.mxu0 %v28611_v26  ;;  %v25562_v26 = vld [vmem:[%s28453_s11 + $0x160] ss:$40 sps:$4 sm:$0xff]  }
 0x893   : > { %10255 = vmatpush1.bf16.msra.mxu0 %v25544_v9  ;;  %v29370_v9 = vsub.s32 0, %v28593_v22 }
 0x894   : > { %15338 = vmatpush1.bf16.msra.mxu1 %v25547_v29  ;;  %10256 = vmatprep.subr.bf16.mxu0 %v25552_v31  ;;  %v25621_v29 = vld [vmem:[%s28453_s11 + $0x1d14] ss:$40 sps:$4 sm:$0xff]   ;;  %v29374_v31 = vsub.s32 3, %v28593_v22 }
 0x895   : > { %15339 = vmatprep.subr.bf16.mxu1 %v25555_v33  ;;  %v25616_v33 = vld [vmem:[%s28453_s11 + $0x430] ss:$40 sps:$4 sm:$0xff]  }
 0x897   : > { %10257 = vmatpush1.bf16.msra.mxu0 %v25550_v35  ;;  %v25619_v35 = vld [vmem:[%s28453_s11 + $0x1d10] ss:$40 sps:$4 sm:$0xff]  }
 0x898   : > { %15340 = vmatpush1.bf16.msra.mxu1 %v25553_v36  ;;  %10258 = vmatprep.subr.bf16.mxu0 %v25558_v37  ;;  %v25624_v36 = vld [vmem:[%s28453_s11 + $0x484] ss:$40 sps:$4 sm:$0xff]   ;;  %v5385_v37 = vrot.slane %v29292_v61, %v29370_v9 }
 0x899   : > { %15341 = vmatprep.subr.bf16.mxu1 %v25561_v38  ;;  %v25627_v38 = vld [vmem:[%s28453_s11 + $0x1d64] ss:$40 sps:$4 sm:$0xff]  }
 0x89b   : > { %10259 = vmatpush1.bf16.msra.mxu0 %v25556_v41  ;;  %v5397_v41 = vrot.slane %v29292_v61, %v29374_v31  ;;  %v25631_v61 = vld [vmem:[%s28453_s11 + $0x1db0] ss:$40 sps:$4 sm:$0xff]  }
 0x89c   : > { %15342 = vmatpush1.bf16.msra.mxu1 %v25559_v42  ;;  %10260 = vmatprep.subr.bf16.mxu0 %v25564_v43  ;;  %v25622_v42 = vld [vmem:[%s28453_s11 + $0x480] ss:$40 sps:$4 sm:$0xff]  }
 0x89d   : > { %15343 = vmatprep.subr.bf16.mxu1 %v25567_v40  ;;  %v25625_v43 = vld [vmem:[%s28453_s11 + $0x1d60] ss:$40 sps:$4 sm:$0xff]   ;;  %v25630_v40 = vld [vmem:[%s28453_s11 + $0x4d4] ss:$40 sps:$4 sm:$0xff]  }
 0x89f   : > { %10261 = vmatpush1.bf16.msra.mxu0 %v25562_v26  ;;  %v23425_v26 = vadd.f32 %v29184_v57, %v5385_v37  ;;  %v25685_v37 = vld [vmem:[%s28453_s11 + $0x2080] ss:$40 sps:$4 sm:$0xff]  }
 0x8a0   : > { %15344 = vmatpush1.bf16.msra.mxu1 %v25565_v13  ;;  %10262 = vmatprep.subr.bf16.mxu0 %v25570_v45  ;;  %v25633_v13 = vld [vmem:[%s28453_s11 + $0x1db4] ss:$40 sps:$4 sm:$0xff]   ;;  %v23428_v45 = vadd.f32 %v29190_v60, %v5397_v41 }
 0x8a1   : > { %15345 = vmatprep.subr.bf16.mxu1 %v25573_v27  ;;  %v25628_v27 = vld [vmem:[%s28453_s11 + $0x4d0] ss:$40 sps:$4 sm:$0xff]   ;;  %v25642_v60 = vld [vmem:[%s28453_s11 + $0x574] ss:$40 sps:$4 sm:$0xff]  }
 0x8a2   : > { %v10460_v57 = vmax.f32 %v23428_v45, 0.0  ;;  %v25693_v41 = vld [vmem:[%s28453_s11 + $0x20d4] ss:$40 sps:$4 sm:$0xff]   ;;  %v25697_v45 = vld [vmem:[%s28453_s11 + $0x2120] ss:$40 sps:$4 sm:$0xff]  }
 0x8a3   : > { %10263 = vmatpush1.bf16.msra.mxu0 %v25568_v46  ;;  %v25636_v46 = vld [vmem:[%s28453_s11 + $0x524] ss:$40 sps:$4 sm:$0xff]  }
 0x8a4   : > { %15346 = vmatpush1.bf16.msra.mxu1 %v25571_v47  ;;  %10264 = vmatprep.subr.bf16.mxu0 %v25576_v48  ;;  %v10457_v47 = vmax.f32 %v23425_v26, 0.0  ;;  %v25639_v48 = vld [vmem:[%s28453_s11 + $0x1e04] ss:$40 sps:$4 sm:$0xff]  }
 0x8a5   : > { %15347 = vmatprep.subr.bf16.mxu1 %v25579_v50  ;;  %v25634_v50 = vld [vmem:[%s28453_s11 + $0x520] ss:$40 sps:$4 sm:$0xff]   ;;  %v25699_v26 = vld [vmem:[%s28453_s11 + $0x2124] ss:$40 sps:$4 sm:$0xff]  }
 0x8a7   : > { %10265 = vmatpush1.bf16.msra.mxu0 %v25574_v49  ;;  %v25637_v49 = vld [vmem:[%s28453_s11 + $0x1e00] ss:$40 sps:$4 sm:$0xff]  }
 0x8a8   : > { %15348 = vmatpush1.bf16.msra.mxu1 %v25577_v44  ;;  %10266 = vmatprep.subr.bf16.mxu0 %v25582_v51  ;;  %v29397_v44 = vpack.c.bf16 %v10457_v47, %v10457_v47  ;;  %v25645_v51 = vld [vmem:[%s28453_s11 + $0x1e54] ss:$40 sps:$4 sm:$0xff]   ;;  %v25703_v47 = vld [vmem:[%s28453_s11 + $0x2170] ss:$40 sps:$4 sm:$0xff]  }
 0x8a9   : > { %15349 = vmatprep.subr.bf16.mxu1 %v25585_v52  ;;  %v29400_v52 = vpack.c.bf16 %v10460_v57, %v10460_v57  ;;  %v25711_v57 = vld [vmem:[%s28453_s11 + $0x21c4] ss:$40 sps:$4 sm:$0xff]  }
 0x8ab   : > { %10267 = vmatpush1.bf16.msra.mxu0 %v25580_v21  ;;  %v25640_v21 = vld [vmem:[%s28453_s11 + $0x570] ss:$40 sps:$4 sm:$0xff]  }
 0x8ac   : > { %15350 = vmatpush1.bf16.msra.mxu1 %v25583_v54  ;;  %10268 = vmatprep.subr.bf16.mxu0 %v25588_v56  ;;  %v25643_v54 = vld [vmem:[%s28453_s11 + $0x1e50] ss:$40 sps:$4 sm:$0xff]   ;;  %v25648_v56 = vld [vmem:[%s28453_s11 + $0x5c4] ss:$40 sps:$4 sm:$0xff]  }
 0x8ad   : > { %15351 = vmatprep.subr.bf16.mxu1 %v25591_v10  ;;  %v25651_v10 = vld [vmem:[%s28453_s11 + $0x1ea4] ss:$40 sps:$4 sm:$0xff]  }
 0x8af   : > { %10269 = vmatpush1.bf16.msra.mxu0 %v25586_v63  ;;  %v25649_v63 = vld [vmem:[%s28453_s11 + $0x1ea0] ss:$40 sps:$4 sm:$0xff]  }
 0x8b0   : > { %15352 = vmatpush1.bf16.msra.mxu1 %v25589_v1  ;;  %10270 = vmatprep.subr.bf16.mxu0 %v25594_v2  ;;  %v25654_v1 = vld [vmem:[%s28453_s11 + $0x614] ss:$40 sps:$4 sm:$0xff]  }
 0x8b1   : > { %15353 = vmatprep.subr.bf16.mxu1 %v25597_v3  ;;  %v25657_v2 = vld [vmem:[%s28453_s11 + $0x1ef4] ss:$40 sps:$4 sm:$0xff]   ;;  %v25652_v3 = vld [vmem:[%s28453_s11 + $0x610] ss:$40 sps:$4 sm:$0xff]  }
 0x8b3   : > { %10271 = vmatpush1.bf16.msra.mxu0 %v25592_v5  ;;  %v25660_v5 = vld [vmem:[%s28453_s11 + $0x664] ss:$40 sps:$4 sm:$0xff]  }
 0x8b4   : > { %15354 = vmatpush1.bf16.msra.mxu1 %v25595_v7  ;;  %10272 = vmatprep.subr.bf16.mxu0 %v25600_v8  ;;  %v25663_v7 = vld [vmem:[%s28453_s11 + $0x1f44] ss:$40 sps:$4 sm:$0xff]   ;;  %v25658_v8 = vld [vmem:[%s28453_s11 + $0x660] ss:$40 sps:$4 sm:$0xff]  }
 0x8b5   : > { %15355 = vmatprep.subr.bf16.mxu1 %v25603_v55  ;;  %v25661_v55 = vld [vmem:[%s28453_s11 + $0x1f40] ss:$40 sps:$4 sm:$0xff]  }
 0x8b7   : > { %10273 = vmatpush1.bf16.msra.mxu0 %v25598_v11  ;;  %v25666_v11 = vld [vmem:[%s28453_s11 + $0x6b4] ss:$40 sps:$4 sm:$0xff]  }
 0x8b8   : > { %15356 = vmatpush1.bf16.msra.mxu1 %v25601_v12  ;;  %10274 = vmatprep.subr.bf16.mxu0 %v25606_v6  ;;  %v25669_v12 = vld [vmem:[%s28453_s11 + $0x1f94] ss:$40 sps:$4 sm:$0xff]   ;;  %v25664_v6 = vld [vmem:[%s28453_s11 + $0x6b0] ss:$40 sps:$4 sm:$0xff]  }
 0x8b9   : > { %15357 = vmatprep.subr.bf16.mxu1 %v25609_v14  ;;  %v25667_v14 = vld [vmem:[%s28453_s11 + $0x1f90] ss:$40 sps:$4 sm:$0xff]  }
 0x8bb   : > { %10275 = vmatpush1.bf16.msra.mxu0 %v25604_v16  ;;  %v25672_v16 = vld [vmem:[%s28453_s11 + $0x704] ss:$40 sps:$4 sm:$0xff]  }
 0x8bc   : > { %15358 = vmatpush1.bf16.msra.mxu1 %v25607_v53  ;;  %10276 = vmatprep.subr.bf16.mxu0 %v25612_v17  ;;  %v25675_v53 = vld [vmem:[%s28453_s11 + $0x1fe4] ss:$40 sps:$4 sm:$0xff]   ;;  %v25670_v17 = vld [vmem:[%s28453_s11 + $0x700] ss:$40 sps:$4 sm:$0xff]  }
 0x8bd   : > { %15359 = vmatprep.subr.bf16.mxu1 %v25615_v19  ;;  %v25673_v19 = vld [vmem:[%s28453_s11 + $0x1fe0] ss:$40 sps:$4 sm:$0xff]  }
 0x8bf   : > { %10277 = vmatpush1.bf16.msra.mxu0 %v25610_v25  ;;  %v25678_v25 = vld [vmem:[%s28453_s11 + $0x754] ss:$40 sps:$4 sm:$0xff]  }
 0x8c0   : > { %15360 = vmatpush1.bf16.msra.mxu1 %v25613_v20  ;;  %10278 = vmatprep.subr.bf16.mxu0 %v25618_v59  ;;  %v25681_v20 = vld [vmem:[%s28453_s11 + $0x2034] ss:$40 sps:$4 sm:$0xff]   ;;  %v25676_v59 = vld [vmem:[%s28453_s11 + $0x750] ss:$40 sps:$4 sm:$0xff]  }
 0x8c1   : > { %15361 = vmatprep.subr.bf16.mxu1 %v25621_v29  ;;  %v25679_v29 = vld [vmem:[%s28453_s11 + $0x2030] ss:$40 sps:$4 sm:$0xff]  }
 0x8c3   : > { %10279 = vmatpush1.bf16.msra.mxu0 %v25616_v33  ;;  %v25684_v33 = vld [vmem:[%s28453_s11 + $0x7a4] ss:$40 sps:$4 sm:$0xff]  }
 0x8c4   : > { %15362 = vmatpush1.bf16.msra.mxu1 %v25619_v35  ;;  %10280 = vmatprep.subr.bf16.mxu0 %v25624_v36  ;;  %v25687_v35 = vld [vmem:[%s28453_s11 + $0x2084] ss:$40 sps:$4 sm:$0xff]   ;;  %v25682_v36 = vld [vmem:[%s28453_s11 + $0x7a0] ss:$40 sps:$4 sm:$0xff]  }
 0x8c5   : > { %15363 = vmatprep.subr.bf16.mxu1 %v25627_v38  ;;  %v25690_v38 = vld [vmem:[%s28453_s11 + $0x7f4] ss:$40 sps:$4 sm:$0xff]  }
 0x8c7   : > { %10281 = vmatpush1.bf16.msra.mxu0 %v25622_v42  ;;  %v25688_v42 = vld [vmem:[%s28453_s11 + $0x7f0] ss:$40 sps:$4 sm:$0xff]  }
 0x8c8   : > { %15364 = vmatpush1.bf16.msra.mxu1 %v25625_v43  ;;  %10282 = vmatprep.subr.bf16.mxu0 %v25630_v40  ;;  %v25691_v43 = vld [vmem:[%s28453_s11 + $0x20d0] ss:$40 sps:$4 sm:$0xff]   ;;  %v25696_v40 = vld [vmem:[%s28453_s11 + $0x844] ss:$40 sps:$4 sm:$0xff]  }
 0x8c9   : > { %15365 = vmatprep.subr.bf16.mxu1 %v25633_v13  ;;  %v25694_v13 = vld [vmem:[%s28453_s11 + $0x840] ss:$40 sps:$4 sm:$0xff]  }
 0x8cb   : > { %10283 = vmatpush1.bf16.msra.mxu0 %v25628_v27  ;;  %v25702_v27 = vld [vmem:[%s28453_s11 + $0x894] ss:$40 sps:$4 sm:$0xff]  }
 0x8cc   : > { %15366 = vmatpush1.bf16.msra.mxu1 %v25631_v61  ;;  %10293 = vmatprep.subr.bf16.mxu0 %v25636_v46  ;;  %v25705_v61 = vld [vmem:[%s28453_s11 + $0x2174] ss:$40 sps:$4 sm:$0xff]   ;;  %v25700_v46 = vld [vmem:[%s28453_s11 + $0x890] ss:$40 sps:$4 sm:$0xff]  }
 0x8cd   : > { %15376 = vmatprep.subr.bf16.mxu1 %v25639_v48  ;;  %v25708_v48 = vld [vmem:[%s28453_s11 + $0x8e4] ss:$40 sps:$4 sm:$0xff]  }
 0x8ce   : > { %10285 = vmatmul.mubr.bf16.vlgmr.msra.gmra.mrb[8].mxu0 %v28636_v32  ;;  %v25646_v32 = vld [vmem:[%s28453_s11 + $0x5c0] ss:$40 sps:$4 sm:$0xff]  }
 0x8cf   : > { %15368 = vmatmul.mubr.bf16.vlgmr.msra.gmra.mrb[8].mxu1 %v29397_v44  ;;  %10294 = vmatpush1.bf16.msra.mxu0 %v25634_v50  ;;  %v25706_v50 = vld [vmem:[%s28453_s11 + $0x8e0] ss:$40 sps:$4 sm:$0xff]  }
 0x8d0   : > { %15377 = vmatpush1.bf16.msra.mxu1 %v25637_v49  ;;  %15408 = vmatprep.mubr.bf16.mxu1 %v29400_v52  ;;  %v25709_v49 = vld [vmem:[%s28453_s11 + $0x21c0] ss:$40 sps:$4 sm:$0xff]  }
 0x8d1   : > { %10295 = vmatprep.subr.bf16.mxu0 %v25642_v60  ;;  %15378 = vmatprep.subr.bf16.mxu1 %v25645_v51  ;;  %v29453_v60 = vsub.s32 2, %v28593_v22  ;;  %v25714_v51 = vld [vmem:[%s28453_s11 + $0x934] ss:$40 sps:$4 sm:$0xff]  }
 0x8d2   : > { %10325 = vmatprep.mubr.bf16.mxu0 %v28641_v0  ;;  %v25655_v0 = vld [vmem:[%s28453_s11 + $0x1ef0] ss:$40 sps:$4 sm:$0xff]  }
 0x8d3   : > { %10296 = vmatpush1.bf16.msra.mxu0 %v25640_v21  ;;  %v25717_v21 = vld [vmem:[%s28453_s11 + $0x2214] ss:$40 sps:$4 sm:$0xff]  }
 0x8d4   : > { %15379 = vmatpush1.bf16.msra.mxu1 %v25643_v54  ;;  %10297 = vmatprep.subr.bf16.mxu0 %v25648_v56  ;;  %v25712_v54 = vld [vmem:[%s28453_s11 + $0x930] ss:$40 sps:$4 sm:$0xff]  }
 0x8d5   : > { %15380 = vmatprep.subr.bf16.mxu1 %v25651_v10  ;;  %v25715_v56 = vld [vmem:[%s28453_s11 + $0x2210] ss:$40 sps:$4 sm:$0xff]  }
 0x8d6   : > { %v29460_v10 = vld [vmem:[%s29289_s26] sm:$0xff] }
 0x8d7   : > { %10298 = vmatpush1.bf16.msra.mxu0 %v25646_v32  ;;  %v5393_v32 = vrot.slane %v29460_v10, %v29453_v60 }
 0x8d8   : > { %15381 = vmatpush1.bf16.msra.mxu1 %v25649_v63  ;;  %10299 = vmatprep.subr.bf16.mxu0 %v25654_v1  ;;  %v25720_v63 = vld [vmem:[%s28453_s11 + $0x984] ss:$40 sps:$4 sm:$0xff]  }
 0x8d9   : > { %15382 = vmatprep.subr.bf16.mxu1 %v25657_v2  ;;  %v25723_v1 = vld [vmem:[%s28453_s11 + $0x2264] ss:$40 sps:$4 sm:$0xff]   ;;  %v25718_v2 = vld [vmem:[%s28453_s11 + $0x980] ss:$40 sps:$4 sm:$0xff]  }
 0x8db   : > { %10300 = vmatpush1.bf16.msra.mxu0 %v25652_v3  ;;  %v25721_v3 = vld [vmem:[%s28453_s11 + $0x2260] ss:$40 sps:$4 sm:$0xff]  }
 0x8dc   : > { %15383 = vmatpush1.bf16.msra.mxu1 %v25655_v0  ;;  %10301 = vmatprep.subr.bf16.mxu0 %v25660_v5  ;;  %v23427_v0 = vadd.f32 %v29186_v58, %v5393_v32  ;;  %v25726_v5 = vld [vmem:[%s28453_s11 + $0x9d4] ss:$40 sps:$4 sm:$0xff]   ;;  %v25730_v58 = vld [vmem:[%s28453_s11 + $0xa20] ss:$40 sps:$4 sm:$0xff]  }
 0x8dd   : > { %15384 = vmatprep.subr.bf16.mxu1 %v25663_v7  ;;  %v25729_v7 = vld [vmem:[%s28453_s11 + $0x22b4] ss:$40 sps:$4 sm:$0xff]  }
 0x8de   : > { %v25807_v32 = vld [vmem:[%s28453_s11 + $0x25d4] ss:$40 sps:$4 sm:$0xff]  }
 0x8df   : > { %10302 = vmatpush1.bf16.msra.mxu0 %v25658_v8  ;;  %v25724_v8 = vld [vmem:[%s28453_s11 + $0x9d0] ss:$40 sps:$4 sm:$0xff]  }
 0x8e0   : > { %15385 = vmatpush1.bf16.msra.mxu1 %v25661_v55  ;;  %10303 = vmatprep.subr.bf16.mxu0 %v25666_v11  ;;  %v25727_v55 = vld [vmem:[%s28453_s11 + $0x22b0] ss:$40 sps:$4 sm:$0xff]   ;;  %v10459_v11 = vmax.f32 %v23427_v0, 0.0  ;;  %v25772_v0 = vld [vmem:[%s28453_s11 + $0xd40] ss:$40 sps:$4 sm:$0xff]  }
 0x8e1   : > { %15386 = vmatprep.subr.bf16.mxu1 %v25669_v12  ;;  %v25732_v12 = vld [vmem:[%s28453_s11 + $0xa24] ss:$40 sps:$4 sm:$0xff]  }
 0x8e3   : > { %10304 = vmatpush1.bf16.msra.mxu0 %v25664_v6  ;;  %v25753_v6 = vld [vmem:[%s28453_s11 + $0x2304] ss:$40 sps:$4 sm:$0xff]  }
 0x8e4   : > { %15387 = vmatpush1.bf16.msra.mxu1 %v25667_v14  ;;  %10305 = vmatprep.subr.bf16.mxu0 %v25672_v16  ;;  %v25751_v14 = vld [vmem:[%s28453_s11 + $0x2300] ss:$40 sps:$4 sm:$0xff]   ;;  %v29477_v16 = vpack.c.bf16 %v10459_v11, %v10459_v11  ;;  %v25786_v11 = vld [vmem:[%s28453_s11 + $0xde4] ss:$40 sps:$4 sm:$0xff]  }
 0x8e5   : > { %15388 = vmatprep.subr.bf16.mxu1 %v25675_v53  ;;  %v25735_v53 = vld [vmem:[%s28453_s11 + $0xa74] ss:$40 sps:$4 sm:$0xff]  }
 0x8e7   : > { %10306 = vmatpush1.bf16.msra.mxu0 %v25670_v17  ;;  %v25759_v17 = vld [vmem:[%s28453_s11 + $0x2354] ss:$40 sps:$4 sm:$0xff]  }
 0x8e8   : > { %15389 = vmatpush1.bf16.msra.mxu1 %v25673_v19  ;;  %10307 = vmatprep.subr.bf16.mxu0 %v25678_v25  ;;  %v25733_v19 = vld [vmem:[%s28453_s11 + $0xa70] ss:$40 sps:$4 sm:$0xff]  }
 0x8e9   : > { %15390 = vmatprep.subr.bf16.mxu1 %v25681_v20  ;;  %v25757_v25 = vld [vmem:[%s28453_s11 + $0x2350] ss:$40 sps:$4 sm:$0xff]   ;;  %v25738_v20 = vld [vmem:[%s28453_s11 + $0xac4] ss:$40 sps:$4 sm:$0xff]  }
 0x8eb   : > { %10308 = vmatpush1.bf16.msra.mxu0 %v25676_v59  ;;  %v25765_v59 = vld [vmem:[%s28453_s11 + $0x23a4] ss:$40 sps:$4 sm:$0xff]  }
 0x8ec   : > { %15391 = vmatpush1.bf16.msra.mxu1 %v25679_v29  ;;  %10309 = vmatprep.subr.bf16.mxu0 %v25684_v33  ;;  %v25736_v29 = vld [vmem:[%s28453_s11 + $0xac0] ss:$40 sps:$4 sm:$0xff]   ;;  %v25741_v33 = vld [vmem:[%s28453_s11 + $0xb14] ss:$40 sps:$4 sm:$0xff]  }
 0x8ed   : > { %15392 = vmatprep.subr.bf16.mxu1 %v25687_v35  ;;  %v25771_v35 = vld [vmem:[%s28453_s11 + $0x23f4] ss:$40 sps:$4 sm:$0xff]  }
 0x8ef   : > { %10310 = vmatpush1.bf16.msra.mxu0 %v25682_v36  ;;  %v25739_v36 = vld [vmem:[%s28453_s11 + $0xb10] ss:$40 sps:$4 sm:$0xff]  }
 0x8f0   : > { %15393 = vmatpush1.bf16.msra.mxu1 %v25685_v37  ;;  %10311 = vmatprep.subr.bf16.mxu0 %v25690_v38  ;;  %v25769_v37 = vld [vmem:[%s28453_s11 + $0x23f0] ss:$40 sps:$4 sm:$0xff]   ;;  %v25777_v38 = vld [vmem:[%s28453_s11 + $0x2444] ss:$40 sps:$4 sm:$0xff]  }
 0x8f1   : > { %15394 = vmatprep.subr.bf16.mxu1 %v25693_v41  ;;  %v25742_v41 = vld [vmem:[%s28453_s11 + $0xb60] ss:$40 sps:$4 sm:$0xff]  }
 0x8f3   : > { %10312 = vmatpush1.bf16.msra.mxu0 %v25688_v42  ;;  %v25775_v42 = vld [vmem:[%s28453_s11 + $0x2440] ss:$40 sps:$4 sm:$0xff]  }
 0x8f4   : > { %15395 = vmatpush1.bf16.msra.mxu1 %v25691_v43  ;;  %10313 = vmatprep.subr.bf16.mxu0 %v25696_v40  ;;  %v25747_v43 = vld [vmem:[%s28453_s11 + $0xbb4] ss:$40 sps:$4 sm:$0xff]  }
 0x8f5   : > { %15396 = vmatprep.subr.bf16.mxu1 %v25699_v26  ;;  %v25783_v40 = vld [vmem:[%s28453_s11 + $0x2494] ss:$40 sps:$4 sm:$0xff]   ;;  %v25745_v26 = vld [vmem:[%s28453_s11 + $0xbb0] ss:$40 sps:$4 sm:$0xff]  }
 0x8f7   : > { %10314 = vmatpush1.bf16.msra.mxu0 %v25694_v13  ;;  %v25781_v13 = vld [vmem:[%s28453_s11 + $0x2490] ss:$40 sps:$4 sm:$0xff]  }
 0x8f8   : > { %15397 = vmatpush1.bf16.msra.mxu1 %v25697_v45  ;;  %10315 = vmatprep.subr.bf16.mxu0 %v25702_v27  ;;  %v25750_v45 = vld [vmem:[%s28453_s11 + $0xc04] ss:$40 sps:$4 sm:$0xff]  }
 0x8f9   : > { %15398 = vmatprep.subr.bf16.mxu1 %v25705_v61  ;;  %v25789_v27 = vld [vmem:[%s28453_s11 + $0x24e4] ss:$40 sps:$4 sm:$0xff]   ;;  %v25748_v61 = vld [vmem:[%s28453_s11 + $0xc00] ss:$40 sps:$4 sm:$0xff]  }
 0x8fb   : > { %10316 = vmatpush1.bf16.msra.mxu0 %v25700_v46  ;;  %v25787_v46 = vld [vmem:[%s28453_s11 + $0x24e0] ss:$40 sps:$4 sm:$0xff]  }
 0x8fc   : > { %15399 = vmatpush1.bf16.msra.mxu1 %v25703_v47  ;;  %10317 = vmatprep.subr.bf16.mxu0 %v25708_v48  ;;  %v25756_v47 = vld [vmem:[%s28453_s11 + $0xc54] ss:$40 sps:$4 sm:$0xff]  }
 0x8fd   : > { %15400 = vmatprep.subr.bf16.mxu1 %v25711_v57  ;;  %v25795_v48 = vld [vmem:[%s28453_s11 + $0x2534] ss:$40 sps:$4 sm:$0xff]   ;;  %v25754_v57 = vld [vmem:[%s28453_s11 + $0xc50] ss:$40 sps:$4 sm:$0xff]  }
 0x8ff   : > { %10318 = vmatpush1.bf16.msra.mxu0 %v25706_v50  ;;  %v25793_v50 = vld [vmem:[%s28453_s11 + $0x2530] ss:$40 sps:$4 sm:$0xff]  }
 0x900   : > { %15401 = vmatpush1.bf16.msra.mxu1 %v25709_v49  ;;  %10319 = vmatprep.subr.bf16.mxu0 %v25714_v51  ;;  %v25762_v49 = vld [vmem:[%s28453_s11 + $0xca4] ss:$40 sps:$4 sm:$0xff]  }
 0x901   : > { %15402 = vmatprep.subr.bf16.mxu1 %v25717_v21  ;;  %v25801_v51 = vld [vmem:[%s28453_s11 + $0x2584] ss:$40 sps:$4 sm:$0xff]   ;;  %v25760_v21 = vld [vmem:[%s28453_s11 + $0xca0] ss:$40 sps:$4 sm:$0xff]  }
 0x903   : > { %10320 = vmatpush1.bf16.msra.mxu0 %v25712_v54  ;;  %v25768_v54 = vld [vmem:[%s28453_s11 + $0xcf4] ss:$40 sps:$4 sm:$0xff]  }
 0x904   : > { %15403 = vmatpush1.bf16.msra.mxu1 %v25715_v56  ;;  %10321 = vmatprep.subr.bf16.mxu0 %v25720_v63  ;;  %v25799_v56 = vld [vmem:[%s28453_s11 + $0x2580] ss:$40 sps:$4 sm:$0xff]   ;;  %v25766_v63 = vld [vmem:[%s28453_s11 + $0xcf0] ss:$40 sps:$4 sm:$0xff]  }
 0x905   : > { %15404 = vmatprep.subr.bf16.mxu1 %v25723_v1  ;;  %v25774_v1 = vld [vmem:[%s28453_s11 + $0xd44] ss:$40 sps:$4 sm:$0xff]  }
 0x907   : > { %10322 = vmatpush1.bf16.msra.mxu0 %v25718_v2  ;;  %v25805_v2 = vld [vmem:[%s28453_s11 + $0x25d0] ss:$40 sps:$4 sm:$0xff]  }
 0x908   : > { %15405 = vmatpush1.bf16.msra.mxu1 %v25721_v3  ;;  %10323 = vmatprep.subr.bf16.mxu0 %v25726_v5  ;;  %v25813_v3 = vld [vmem:[%s28453_s11 + $0x2624] ss:$40 sps:$4 sm:$0xff]   ;;  %v25780_v5 = vld [vmem:[%s28453_s11 + $0xd94] ss:$40 sps:$4 sm:$0xff]  }
 0x909   : > { %15406 = vmatprep.subr.bf16.mxu1 %v25729_v7  ;;  %v25811_v7 = vld [vmem:[%s28453_s11 + $0x2620] ss:$40 sps:$4 sm:$0xff]  }
 0x90b   : > { %10324 = vmatpush1.bf16.msra.mxu0 %v25724_v8  ;;  %v25819_v8 = vld [vmem:[%s28453_s11 + $0x2674] ss:$40 sps:$4 sm:$0xff]  }
 0x90c   : > { %15407 = vmatpush1.bf16.msra.mxu1 %v25727_v55  ;;  %10334 = vmatprep.subr.bf16.mxu0 %v25732_v12  ;;  %v25778_v55 = vld [vmem:[%s28453_s11 + $0xd90] ss:$40 sps:$4 sm:$0xff]  }
 0x90d   : > { %15417 = vmatprep.subr.bf16.mxu1 %v25753_v6  ;;  %v25817_v12 = vld [vmem:[%s28453_s11 + $0x2670] ss:$40 sps:$4 sm:$0xff]   ;;  %v25825_v6 = vld [vmem:[%s28453_s11 + $0x26c4] ss:$40 sps:$4 sm:$0xff]  }
 0x90e   : > { %10326 = vmatmul.mubr.bf16.vlgmr.msra.gmra.mrb[8].mxu0 %v28710_v4  ;;  %v25763_v4 = vld [vmem:[%s28453_s11 + $0x23a0] ss:$40 sps:$4 sm:$0xff]  }
 0x90f   : > { %15409 = vmatmul.mubr.bf16.vlgmr.msra.gmra.mrb[8].mxu1 %v29477_v16  ;;  %10335 = vmatpush1.bf16.msra.mxu0 %v25730_v58  ;;  %v25784_v58 = vld [vmem:[%s28453_s11 + $0xde0] ss:$40 sps:$4 sm:$0xff]  }
 0x910   : > { %15418 = vmatpush1.bf16.msra.mxu1 %v25751_v14  ;;  %10336 = vmatprep.subr.bf16.mxu0 %v25735_v53  ;;  %v25792_v14 = vld [vmem:[%s28453_s11 + $0xe34] ss:$40 sps:$4 sm:$0xff]   ;;  %v25823_v53 = vld [vmem:[%s28453_s11 + $0x26c0] ss:$40 sps:$4 sm:$0xff]  }
 0x911   : > { %15419 = vmatprep.subr.bf16.mxu1 %v25759_v17  ;;  %10366 = vmatprep.mubr.bf16.mxu0 %v28729_v15  ;;  %v25744_v15 = vld [vmem:[%s28453_s11 + $0xb64] ss:$40 sps:$4 sm:$0xff]   ;;  %v25831_v17 = vld [vmem:[%s28453_s11 + $0x2714] ss:$40 sps:$4 sm:$0xff]  }
 0x913   : > { %10337 = vmatpush1.bf16.msra.mxu0 %v25733_v19  ;;  %v25790_v19 = vld [vmem:[%s28453_s11 + $0xe30] ss:$40 sps:$4 sm:$0xff]  }
 0x914   : > { %15420 = vmatpush1.bf16.msra.mxu1 %v25757_v25  ;;  %10338 = vmatprep.subr.bf16.mxu0 %v25738_v20  ;;  %v25798_v25 = vld [vmem:[%s28453_s11 + $0xe84] ss:$40 sps:$4 sm:$0xff]   ;;  %v25829_v20 = vld [vmem:[%s28453_s11 + $0x2710] ss:$40 sps:$4 sm:$0xff]  }
 0x915   : > { %15421 = vmatprep.subr.bf16.mxu1 %v25765_v59  ;;  %v25837_v59 = vld [vmem:[%s28453_s11 + $0x2764] ss:$40 sps:$4 sm:$0xff]  }
 0x917   : > { %10339 = vmatpush1.bf16.msra.mxu0 %v25736_v29  ;;  %v25796_v29 = vld [vmem:[%s28453_s11 + $0xe80] ss:$40 sps:$4 sm:$0xff]  }
 0x918   : > { %15422 = vmatpush1.bf16.msra.mxu1 %v25763_v4  ;;  %10340 = vmatprep.subr.bf16.mxu0 %v25741_v33  ;;  %v25804_v4 = vld [vmem:[%s28453_s11 + $0xed4] ss:$40 sps:$4 sm:$0xff]   ;;  %v25835_v33 = vld [vmem:[%s28453_s11 + $0x2760] ss:$40 sps:$4 sm:$0xff]  }
 0x919   : > { %15423 = vmatprep.subr.bf16.mxu1 %v25771_v35  ;;  %v25843_v35 = vld [vmem:[%s28453_s11 + $0x27b4] ss:$40 sps:$4 sm:$0xff]  }
 0x91b   : > { %10341 = vmatpush1.bf16.msra.mxu0 %v25739_v36  ;;  %v25802_v36 = vld [vmem:[%s28453_s11 + $0xed0] ss:$40 sps:$4 sm:$0xff]  }
 0x91c   : > { %15424 = vmatpush1.bf16.msra.mxu1 %v25769_v37  ;;  %10342 = vmatprep.subr.bf16.mxu0 %v25744_v15  ;;  %v25810_v37 = vld [vmem:[%s28453_s11 + $0xf24] ss:$40 sps:$4 sm:$0xff]   ;;  %v25841_v15 = vld [vmem:[%s28453_s11 + $0x27b0] ss:$40 sps:$4 sm:$0xff]  }
 0x91d   : > { %15425 = vmatprep.subr.bf16.mxu1 %v25777_v38  ;;  %v25849_v38 = vld [vmem:[%s28453_s11 + $0x2804] ss:$40 sps:$4 sm:$0xff]  }
 0x91f   : > { %10343 = vmatpush1.bf16.msra.mxu0 %v25742_v41  ;;  %v25808_v41 = vld [vmem:[%s28453_s11 + $0xf20] ss:$40 sps:$4 sm:$0xff]  }
 0x920   : > { %15426 = vmatpush1.bf16.msra.mxu1 %v25775_v42  ;;  %10344 = vmatprep.subr.bf16.mxu0 %v25747_v43  ;;  %v25816_v42 = vld [vmem:[%s28453_s11 + $0xf74] ss:$40 sps:$4 sm:$0xff]   ;;  %v25814_v43 = vld [vmem:[%s28453_s11 + $0xf70] ss:$40 sps:$4 sm:$0xff]  }
 0x921   : > { %15427 = vmatprep.subr.bf16.mxu1 %v25783_v40  ;;  %v25822_v40 = vld [vmem:[%s28453_s11 + $0xfc4] ss:$40 sps:$4 sm:$0xff]  }
 0x923   : > { %10345 = vmatpush1.bf16.msra.mxu0 %v25745_v26  ;;  %v25820_v26 = vld [vmem:[%s28453_s11 + $0xfc0] ss:$40 sps:$4 sm:$0xff]  }
 0x924   : > { %15428 = vmatpush1.bf16.msra.mxu1 %v25781_v13  ;;  %10346 = vmatprep.subr.bf16.mxu0 %v25750_v45  ;;  %v25828_v13 = vld [vmem:[%s28453_s11 + $0x1014] ss:$40 sps:$4 sm:$0xff]   ;;  %v25826_v45 = vld [vmem:[%s28453_s11 + $0x1010] ss:$40 sps:$4 sm:$0xff]  }
 0x925   : > { %15429 = vmatprep.subr.bf16.mxu1 %v25789_v27  ;;  %v25834_v27 = vld [vmem:[%s28453_s11 + $0x1064] ss:$40 sps:$4 sm:$0xff]  }
 0x927   : > { %10347 = vmatpush1.bf16.msra.mxu0 %v25748_v61  ;;  %v25832_v61 = vld [vmem:[%s28453_s11 + $0x1060] ss:$40 sps:$4 sm:$0xff]  }
 0x928   : > { %15430 = vmatpush1.bf16.msra.mxu1 %v25787_v46  ;;  %10348 = vmatprep.subr.bf16.mxu0 %v25756_v47  ;;  %v5404_v46 = vsub.s32 5, %v28593_v22  ;;  %v25840_v47 = vld [vmem:[%s28453_s11 + $0x10b4] ss:$40 sps:$4 sm:$0xff]  }
 0x929   : > { %15431 = vmatprep.subr.bf16.mxu1 %v25795_v48 }
 0x92b   : > { %10349 = vmatpush1.bf16.msra.mxu0 %v25754_v57  ;;  %v5405_v57 = vrot.slane %v29460_v10, %v5404_v46 }
 0x92c   : > { %15432 = vmatpush1.bf16.msra.mxu1 %v25793_v50  ;;  %10350 = vmatprep.subr.bf16.mxu0 %v25762_v49  ;;  %v25838_v49 = vld [vmem:[%s28453_s11 + $0x10b0] ss:$40 sps:$4 sm:$0xff]  }
 0x92d   : > { %15433 = vmatprep.subr.bf16.mxu1 %v25801_v51  ;;  %v25846_v51 = vld [vmem:[%s28453_s11 + $0x1104] ss:$40 sps:$4 sm:$0xff]  }
 0x92f   : > { %10351 = vmatpush1.bf16.msra.mxu0 %v25760_v21 }
 0x930   : > { %15434 = vmatpush1.bf16.msra.mxu1 %v25799_v56  ;;  %10352 = vmatprep.subr.bf16.mxu0 %v25768_v54 }
 0x931   : > { %15435 = vmatprep.subr.bf16.mxu1 %v25807_v32 }
 0x933   : > { %10353 = vmatpush1.bf16.msra.mxu0 %v25766_v63 }
 0x934   : > { %15436 = vmatpush1.bf16.msra.mxu1 %v25805_v2  ;;  %10354 = vmatprep.subr.bf16.mxu0 %v25774_v1 }
 0x935   : > { %15437 = vmatprep.subr.bf16.mxu1 %v25813_v3 }
 0x937   : > { %10355 = vmatpush1.bf16.msra.mxu0 %v25772_v0 }
 0x938   : > { %15438 = vmatpush1.bf16.msra.mxu1 %v25811_v7  ;;  %10356 = vmatprep.subr.bf16.mxu0 %v25780_v5  ;;  %v25844_v5 = vld [vmem:[%s28453_s11 + $0x1100] ss:$40 sps:$4 sm:$0xff]  }
 0x939   : > { %15439 = vmatprep.subr.bf16.mxu1 %v25819_v8 }
 0x93b   : > { %10357 = vmatpush1.bf16.msra.mxu0 %v25778_v55  ;;  %v25852_v55 = vld [vmem:[%s28453_s11 + $0x1154] ss:$40 sps:$4 sm:$0xff]  }
 0x93c   : > { %15440 = vmatpush1.bf16.msra.mxu1 %v25817_v12  ;;  %10358 = vmatprep.subr.bf16.mxu0 %v25786_v11 }
 0x93d   : > { %15441 = vmatprep.subr.bf16.mxu1 %v25825_v6 }
 0x93f   : > { %10359 = vmatpush1.bf16.msra.mxu0 %v25784_v58  ;;  %v25847_v58 = vld [vmem:[%s28453_s11 + $0x2800] ss:$40 sps:$4 sm:$0xff]  }
 0x940   : > { %15442 = vmatpush1.bf16.msra.mxu1 %v25823_v53  ;;  %10360 = vmatprep.subr.bf16.mxu0 %v25792_v14  ;;  %v25850_v14 = vld [vmem:[%s28453_s11 + $0x1150] ss:$40 sps:$4 sm:$0xff]  }
 0x941   : > { %15443 = vmatprep.subr.bf16.mxu1 %v25831_v17  ;;  %v25855_v17 = vld [vmem:[%s28453_s11 + $0x2854] ss:$40 sps:$4 sm:$0xff]  }
 0x943   : > { %10361 = vmatpush1.bf16.msra.mxu0 %v25790_v19  ;;  %v25858_v19 = vld [vmem:[%s28453_s11 + $0x11a4] ss:$40 sps:$4 sm:$0xff]  }
 0x944   : > { %15444 = vmatpush1.bf16.msra.mxu1 %v25829_v20  ;;  %10362 = vmatprep.subr.bf16.mxu0 %v25798_v25  ;;  %v25853_v20 = vld [vmem:[%s28453_s11 + $0x2850] ss:$40 sps:$4 sm:$0xff]  }
 0x945   : > { %15445 = vmatprep.subr.bf16.mxu1 %v25837_v59  ;;  %v25856_v59 = vld [vmem:[%s28453_s11 + $0x11a0] ss:$40 sps:$4 sm:$0xff]  }
 0x947   : > { %10363 = vmatpush1.bf16.msra.mxu0 %v25796_v29  ;;  %v25861_v29 = vld [vmem:[%s28453_s11 + $0x28a4] ss:$40 sps:$4 sm:$0xff]  }
 0x948   : > { %15446 = vmatpush1.bf16.msra.mxu1 %v25835_v33  ;;  %10364 = vmatprep.subr.bf16.mxu0 %v25804_v4  ;;  %v25864_v4 = vld [vmem:[%s28453_s11 + $0x11f4] ss:$40 sps:$4 sm:$0xff]   ;;  %v25859_v33 = vld [vmem:[%s28453_s11 + $0x28a0] ss:$40 sps:$4 sm:$0xff]  }
 0x949   : > { %15447 = vmatprep.subr.bf16.mxu1 %v25843_v35  ;;  %v25862_v35 = vld [vmem:[%s28453_s11 + $0x11f0] ss:$40 sps:$4 sm:$0xff]  }
 0x94b   : > { %10365 = vmatpush1.bf16.msra.mxu0 %v25802_v36  ;;  %v25867_v36 = vld [vmem:[%s28453_s11 + $0x28f4] ss:$40 sps:$4 sm:$0xff]  }
 0x94c   : > { %15448 = vmatpush1.bf16.msra.mxu1 %v25841_v15  ;;  %10375 = vmatprep.subr.bf16.mxu0 %v25810_v37  ;;  %v25870_v37 = vld [vmem:[%s28453_s11 + $0x1244] ss:$40 sps:$4 sm:$0xff]   ;;  %v25865_v15 = vld [vmem:[%s28453_s11 + $0x28f0] ss:$40 sps:$4 sm:$0xff]  }
 0x94d   : > { %15458 = vmatprep.subr.bf16.mxu1 %v25849_v38  ;;  %v25868_v38 = vld [vmem:[%s28453_s11 + $0x1240] ss:$40 sps:$4 sm:$0xff]  }
 0x94e   : > { %10367 = vmatmul.mubr.bf16.vlgmr.msra.gmra.mrb[8].mxu0 %v28798_v18  ;;  %v5400_v18 = vsub.s32 4, %v28593_v22 }
 0x94f   : > { %10376 = vmatpush1.bf16.msra.mxu0 %v25808_v41  ;;  %10407 = vmatprep.mubr.bf16.mxu0 %v28804_v23  ;;  %v5412_v23 = vsub.s32 7, %v28593_v22  ;;  %v25873_v41 = vld [vmem:[%s28453_s11 + $0x2944] ss:$40 sps:$4 sm:$0xff]  }
 0x950   : > { %10377 = vmatprep.subr.bf16.mxu0 %v25816_v42  ;;  %v5401_v48 = vrot.slane %v29460_v10, %v5400_v18  ;;  %v25876_v42 = vld [vmem:[%s28453_s11 + $0x1294] ss:$40 sps:$4 sm:$0xff]  }
 0x951   : > { %v5413_v50 = vrot.slane %v29460_v10, %v5412_v23 }
 0x953   : > { %10378 = vmatpush1.bf16.msra.mxu0 %v25814_v43  ;;  %v25871_v43 = vld [vmem:[%s28453_s11 + $0x2940] ss:$40 sps:$4 sm:$0xff]  }
 0x954   : > { %10379 = vmatprep.subr.bf16.mxu0 %v25822_v40  ;;  %v25874_v40 = vld [vmem:[%s28453_s11 + $0x1290] ss:$40 sps:$4 sm:$0xff]  }
 0x957   : > { %10380 = vmatpush1.bf16.msra.mxu0 %v25820_v26  ;;  %v25879_v26 = vld [vmem:[%s28453_s11 + $0x2994] ss:$40 sps:$4 sm:$0xff]  }
 0x958   : > { %10381 = vmatprep.subr.bf16.mxu0 %v25828_v13  ;;  %v25882_v13 = vld [vmem:[%s28453_s11 + $0x12e4] ss:$40 sps:$4 sm:$0xff]  }
 0x95b   : > { %10382 = vmatpush1.bf16.msra.mxu0 %v25826_v45  ;;  %v25877_v45 = vld [vmem:[%s28453_s11 + $0x2990] ss:$40 sps:$4 sm:$0xff]  }
 0x95c   : > { %10383 = vmatprep.subr.bf16.mxu0 %v25834_v27  ;;  %v25880_v27 = vld [vmem:[%s28453_s11 + $0x12e0] ss:$40 sps:$4 sm:$0xff]  }
 0x95f   : > { %10384 = vmatpush1.bf16.msra.mxu0 %v25832_v61  ;;  %v25885_v61 = vld [vmem:[%s28453_s11 + $0x29e4] ss:$40 sps:$4 sm:$0xff]  }
 0x960   : > { %10385 = vmatprep.subr.bf16.mxu0 %v25840_v47  ;;  %v25888_v47 = vld [vmem:[%s28453_s11 + $0x1334] ss:$40 sps:$4 sm:$0xff]  }
 0x961   : > { %v10040_v21 = vpop.f32.mrb[4].mxu0 }
 0x962   : > { %v29570_v54 = vpop.f32.mrb[4].mxu1  ;;  %v23429_v56 = vadd.f32 %v10040_v21, %v5401_v48  ;;  %v10042_v32 = vpop.f32.mrb[5].mxu0  ;;  %v25883_v48 = vld [vmem:[%s28453_s11 + $0x29e0] ss:$40 sps:$4 sm:$0xff]  }
 0x963   : > { %v10247_v63 = vpop.f32.mrb[5].mxu1  ;;  %v23430_v1 = vadd.f32 %v10042_v32, %v5405_v57  ;;  %v10044_v3 = vpop.f32.mrb[6].mxu0  ;;  %10386 = vmatpush1.bf16.msra.mxu0 %v25838_v49  ;;  %v25886_v57 = vld [vmem:[%s28453_s11 + $0x1330] ss:$40 sps:$4 sm:$0xff]   ;;  %v25894_v49 = vld [vmem:[%s28453_s11 + $0x1384] ss:$40 sps:$4 sm:$0xff]  }
 0x964   : > { %v23432_v2 = vadd.f32 %v10247_v63, %v5413_v50  ;;  %v10249_v0 = vpop.f32.mrb[6].mxu1  ;;  %v10461_v10 = vmax.f32 %v23429_v56, 0.0  ;;  %v10045_v7 = vpop.f32.mrb[7].mxu0  ;;  %10387 = vmatprep.subr.bf16.mxu0 %v25846_v51  ;;  %v25891_v50 = vld [vmem:[%s28453_s11 + $0x2a34] ss:$40 sps:$4 sm:$0xff]  }
 0x965   : > { %v10250_v8 = vpop.f32.mrb[7].mxu1  ;;  %v10462_v11 = vmax.f32 %v23430_v1, 0.0  ;;  %v25889_v51 = vld [vmem:[%s28453_s11 + $0x2a30] ss:$40 sps:$4 sm:$0xff]   ;;  %v25892_v21 = vld [vmem:[%s28453_s11 + $0x1380] ss:$40 sps:$4 sm:$0xff]  }
 0x966   : > { %v10464_v12 = vmax.f32 %v23432_v2, 0.0  ;;  %v29578_v53 = vpack.c.bf16 %v10461_v10, %v10461_v10  ;;  %v25897_v56 = vld [vmem:[%s28453_s11 + $0x2a84] ss:$40 sps:$4 sm:$0xff]   ;;  %v25900_v32 = vld [vmem:[%s28453_s11 + $0x13d4] ss:$40 sps:$4 sm:$0xff]  }
 0x967   : > { %v29574_v6 = vpack.c.bf16 %v10462_v11, %v10462_v11  ;;  %10388 = vmatpush1.bf16.msra.mxu0 %v25844_v5  ;;  %v25895_v63 = vld [vmem:[%s28453_s11 + $0x2a80] ss:$40 sps:$4 sm:$0xff]   ;;  %v25898_v1 = vld [vmem:[%s28453_s11 + $0x13d0] ss:$40 sps:$4 sm:$0xff]   ;;  %v25903_v2 = vld [vmem:[%s28453_s11 + $0x2ad4] ss:$40 sps:$4 sm:$0xff]  }
 0x968   : > { %10389 = vmatprep.subr.bf16.mxu0 %v25852_v55  ;;  %v29583_v25 = vpack.c.bf16 %v10464_v12, %v10464_v12  ;;  %v25906_v3 = vld [vmem:[%s28453_s11 + $0x1424] ss:$40 sps:$4 sm:$0xff]   ;;  %v25901_v0 = vld [vmem:[%s28453_s11 + $0x2ad0] ss:$40 sps:$4 sm:$0xff]   ;;  %v25904_v5 = vld [vmem:[%s28453_s11 + $0x1420] ss:$40 sps:$4 sm:$0xff]  }
 0x969   : > { %15449 = vmatprep.mubr.bf16.mxu1 %v29574_v6  ;;  %v25909_v10 = vld [vmem:[%s28453_s11 + $0x2b24] ss:$40 sps:$4 sm:$0xff]   ;;  %v25912_v7 = vld [vmem:[%s28453_s11 + $0x1474] ss:$40 sps:$4 sm:$0xff]   ;;  %v25907_v8 = vld [vmem:[%s28453_s11 + $0x2b20] ss:$40 sps:$4 sm:$0xff]  }
 0x96a   : > { %15450 = vmatmul.mubr.bf16.vlgmr.msra.gmra.mrb[8].mxu1 %v29578_v53  ;;  %v25910_v55 = vld [vmem:[%s28453_s11 + $0x1470] ss:$40 sps:$4 sm:$0xff]   ;;  %v25915_v11 = vld [vmem:[%s28453_s11 + $0x2b74] ss:$40 sps:$4 sm:$0xff]   ;;  %v25918_v12 = vld [vmem:[%s28453_s11 + $0x14c4] ss:$40 sps:$4 sm:$0xff]  }
 0x96b   : > { %15459 = vmatpush1.bf16.msra.mxu1 %v25847_v58  ;;  %10390 = vmatpush1.bf16.msra.mxu0 %v25850_v14  ;;  %v25913_v58 = vld [vmem:[%s28453_s11 + $0x2b70] ss:$40 sps:$4 sm:$0xff]   ;;  %v25921_v14 = vld [vmem:[%s28453_s11 + $0x2bc4] ss:$40 sps:$4 sm:$0xff]  }
 0x96c   : > { %15490 = vmatprep.mubr.bf16.mxu1 %v29583_v25  ;;  %15460 = vmatprep.subr.bf16.mxu1 %v25855_v17  ;;  %v25924_v17 = vld [vmem:[%s28453_s11 + $0x1514] ss:$40 sps:$4 sm:$0xff]  }
 0x96d   : > { %10391 = vmatprep.subr.bf16.mxu0 %v25858_v19  ;;  %v25919_v19 = vld [vmem:[%s28453_s11 + $0x2bc0] ss:$40 sps:$4 sm:$0xff]  }
 0x96f   : > { %15461 = vmatpush1.bf16.msra.mxu1 %v25853_v20  ;;  %10392 = vmatpush1.bf16.msra.mxu0 %v25856_v59  ;;  %v25922_v20 = vld [vmem:[%s28453_s11 + $0x1510] ss:$40 sps:$4 sm:$0xff]   ;;  %v25927_v59 = vld [vmem:[%s28453_s11 + $0x2c14] ss:$40 sps:$4 sm:$0xff]  }
 0x970   : > { %15462 = vmatprep.subr.bf16.mxu1 %v25861_v29  ;;  %10393 = vmatprep.subr.bf16.mxu0 %v25864_v4  ;;  %v25930_v29 = vld [vmem:[%s28453_s11 + $0x1564] ss:$40 sps:$4 sm:$0xff]   ;;  %v25925_v4 = vld [vmem:[%s28453_s11 + $0x2c10] ss:$40 sps:$4 sm:$0xff]  }
 0x973   : > { %15463 = vmatpush1.bf16.msra.mxu1 %v25859_v33  ;;  %10394 = vmatpush1.bf16.msra.mxu0 %v25862_v35  ;;  %v25928_v33 = vld [vmem:[%s28453_s11 + $0x1560] ss:$40 sps:$4 sm:$0xff]   ;;  %v26979_v35 = vld [vmem:[%s29289_s26] sm:$0xff] }
 0x974   : > { %15464 = vmatprep.subr.bf16.mxu1 %v25867_v36  ;;  %10395 = vmatprep.subr.bf16.mxu0 %v25870_v37  ;;  %v25933_v37 = vld [vmem:[%s28453_s11 + $0x2c64] ss:$40 sps:$4 sm:$0xff]  }
 0x977   : > { %15465 = vmatpush1.bf16.msra.mxu1 %v25865_v15  ;;  %10396 = vmatpush1.bf16.msra.mxu0 %v25868_v38  ;;  %v25936_v15 = vld [vmem:[%s28453_s11 + $0x15b4] ss:$40 sps:$4 sm:$0xff]   ;;  %v25931_v38 = vld [vmem:[%s28453_s11 + $0x2c60] ss:$40 sps:$4 sm:$0xff]  }
 0x978   : > { %15466 = vmatprep.subr.bf16.mxu1 %v25873_v41  ;;  %10397 = vmatprep.subr.bf16.mxu0 %v25876_v42  ;;  %v25934_v41 = vld [vmem:[%s28453_s11 + $0x15b0] ss:$40 sps:$4 sm:$0xff]  }
 0x97b   : > { %15467 = vmatpush1.bf16.msra.mxu1 %v25871_v43  ;;  %10398 = vmatpush1.bf16.msra.mxu0 %v25874_v40  ;;  %v25939_v43 = vld [vmem:[%s28453_s11 + $0x2cb4] ss:$40 sps:$4 sm:$0xff]   ;;  %v25942_v40 = vld [vmem:[%s28453_s11 + $0x1604] ss:$40 sps:$4 sm:$0xff]  }
 0x97c   : > { %15468 = vmatprep.subr.bf16.mxu1 %v25879_v26  ;;  %10399 = vmatprep.subr.bf16.mxu0 %v25882_v13  ;;  %v25937_v26 = vld [vmem:[%s28453_s11 + $0x2cb0] ss:$40 sps:$4 sm:$0xff]   ;;  %v25940_v13 = vld [vmem:[%s28453_s11 + $0x1600] ss:$40 sps:$4 sm:$0xff]  }
 0x97f   : > { %15469 = vmatpush1.bf16.msra.mxu1 %v25877_v45  ;;  %10400 = vmatpush1.bf16.msra.mxu0 %v25880_v27  ;;  %v25945_v27 = vld [vmem:[%s28453_s11 + $0x1654] ss:$40 sps:$4 sm:$0xff]  }
 0x980   : > { %15470 = vmatprep.subr.bf16.mxu1 %v25885_v61  ;;  %10401 = vmatprep.subr.bf16.mxu0 %v25888_v47  ;;  %v25948_v47 = vld [vmem:[%s28453_s11 + $0x16a4] ss:$40 sps:$4 sm:$0xff]  }
 0x983   : > { %15471 = vmatpush1.bf16.msra.mxu1 %v25883_v48  ;;  %10402 = vmatpush1.bf16.msra.mxu0 %v25886_v57  ;;  %v25946_v48 = vld [vmem:[%s28453_s11 + $0x16a0] ss:$40 sps:$4 sm:$0xff]   ;;  %v25951_v57 = vld [vmem:[%s28453_s11 + $0x16f4] ss:$40 sps:$4 sm:$0xff]  }
 0x984   : > { %15472 = vmatprep.subr.bf16.mxu1 %v25891_v50  ;;  %10403 = vmatprep.subr.bf16.mxu0 %v25894_v49  ;;  %v25949_v50 = vld [vmem:[%s28453_s11 + $0x16f0] ss:$40 sps:$4 sm:$0xff]   ;;  %v25954_v49 = vld [vmem:[%s28453_s11 + $0x1744] ss:$40 sps:$4 sm:$0xff]  }
 0x987   : > { %15473 = vmatpush1.bf16.msra.mxu1 %v25889_v51  ;;  %10404 = vmatpush1.bf16.msra.mxu0 %v25892_v21  ;;  %v25952_v51 = vld [vmem:[%s28453_s11 + $0x1740] ss:$40 sps:$4 sm:$0xff]   ;;  %v25957_v21 = vld [vmem:[%s28453_s11 + $0x1794] ss:$40 sps:$4 sm:$0xff]  }
 0x988   : > { %15474 = vmatprep.subr.bf16.mxu1 %v25897_v56  ;;  %10405 = vmatprep.subr.bf16.mxu0 %v25900_v32  ;;  %v25955_v56 = vld [vmem:[%s28453_s11 + $0x1790] ss:$40 sps:$4 sm:$0xff]   ;;  %v25960_v32 = vld [vmem:[%s28453_s11 + $0x17e4] ss:$40 sps:$4 sm:$0xff]  }
 0x98b   : > { %15475 = vmatpush1.bf16.msra.mxu1 %v25895_v63  ;;  %10406 = vmatpush1.bf16.msra.mxu0 %v25898_v1  ;;  %v25958_v63 = vld [vmem:[%s28453_s11 + $0x17e0] ss:$40 sps:$4 sm:$0xff]   ;;  %v25963_v1 = vld [vmem:[%s28453_s11 + $0x1834] ss:$40 sps:$4 sm:$0xff]  }
 0x98c   : > { %15476 = vmatprep.subr.bf16.mxu1 %v25903_v2  ;;  %10416 = vmatprep.subr.bf16.mxu0 %v25906_v3  ;;  %v25961_v2 = vld [vmem:[%s28453_s11 + $0x1830] ss:$40 sps:$4 sm:$0xff]   ;;  %v25966_v3 = vld [vmem:[%s28453_s11 + $0x1884] ss:$40 sps:$4 sm:$0xff]  }
 0x98e   : > { %10408 = vmatmul.mubr.bf16.vlgmr.msra.gmra.mrb[8].mxu0 %v28877_v39  ;;  %v25916_v39 = vld [vmem:[%s28453_s11 + $0x14c0] ss:$40 sps:$4 sm:$0xff]  }
 0x98f   : > { %15477 = vmatpush1.bf16.msra.mxu1 %v25901_v0  ;;  %10417 = vmatpush1.bf16.msra.mxu0 %v25904_v5  ;;  %v25964_v0 = vld [vmem:[%s28453_s11 + $0x1880] ss:$40 sps:$4 sm:$0xff]   ;;  %v25969_v5 = vld [vmem:[%s28453_s11 + $0x18d4] ss:$40 sps:$4 sm:$0xff]  }
 0x990   : > { %15478 = vmatprep.subr.bf16.mxu1 %v25909_v10  ;;  %10418 = vmatprep.subr.bf16.mxu0 %v25912_v7  ;;  %v25967_v10 = vld [vmem:[%s28453_s11 + $0x18d0] ss:$40 sps:$4 sm:$0xff]   ;;  %v25972_v7 = vld [vmem:[%s28453_s11 + $0x190c] ss:$40 sps:$4 sm:$0xff]  }
 0x991   : > { %10448 = vmatprep.mubr.bf16.mxu0 %v28882_v24  ;;  %v5408_v24 = vsub.s32 6, %v28593_v22 }
 0x993   : > { %15479 = vmatpush1.bf16.msra.mxu1 %v25907_v8  ;;  %10419 = vmatpush1.bf16.msra.mxu0 %v25910_v55  ;;  %v5409_v36 = vrot.slane %v26979_v35, %v5408_v24  ;;  %v25970_v8 = vld [vmem:[%s28453_s11 + $0x1908] ss:$40 sps:$4 sm:$0xff]   ;;  %v25975_v55 = vld [vmem:[%s28453_s11 + $0x195c] ss:$40 sps:$4 sm:$0xff]  }
 0x994   : > { %15480 = vmatprep.subr.bf16.mxu1 %v25915_v11  ;;  %10420 = vmatprep.subr.bf16.mxu0 %v25918_v12  ;;  %v25973_v11 = vld [vmem:[%s28453_s11 + $0x1958] ss:$40 sps:$4 sm:$0xff]   ;;  %v25978_v12 = vld [vmem:[%s28453_s11 + $0x19ac] ss:$40 sps:$4 sm:$0xff]  }
 0x995   : > { %v23431_v42 = vadd.f32 %v29570_v54, %v5409_v36  ;;  %v25943_v54 = vld [vmem:[%s28453_s11 + $0x1650] ss:$40 sps:$4 sm:$0xff]   ;;  %v26087_v35 = vld [vmem:[%s28453_s11 + $0x2d00] ss:$40 sps:$4 sm:$0xff]   ;;  %v26089_v36 = vld [vmem:[%s28453_s11 + $0x2d04] ss:$40 sps:$4 sm:$0xff]  }
 0x997   : > { %15481 = vmatpush1.bf16.msra.mxu1 %v25913_v58  ;;  %10421 = vmatpush1.bf16.msra.mxu0 %v25916_v39  ;;  %v10463_v45 = vmax.f32 %v23431_v42, 0.0  ;;  %v25976_v58 = vld [vmem:[%s28453_s11 + $0x19a8] ss:$40 sps:$4 sm:$0xff]   ;;  %v25981_v39 = vld [vmem:[%s28453_s11 + $0x19fc] ss:$40 sps:$4 sm:$0xff]  }
 0x998   : > { %15482 = vmatprep.subr.bf16.mxu1 %v25921_v14  ;;  %10422 = vmatprep.subr.bf16.mxu0 %v25924_v17  ;;  %v25979_v14 = vld [vmem:[%s28453_s11 + $0x19f8] ss:$40 sps:$4 sm:$0xff]   ;;  %v25982_v17 = vld [vmem:[%s28453_s11 + $0x1a48] ss:$40 sps:$4 sm:$0xff]   ;;  %v25999_v42 = vld [vmem:[%s28453_s11 + $0x1bdc] ss:$40 sps:$4 sm:$0xff]  }
 0x999   : > { %v29654_v61 = vpack.c.bf16 %v10463_v45, %v10463_v45  ;;  %v26000_v45 = vld [vmem:[%s28453_s11 + $0x1c28] ss:$40 sps:$4 sm:$0xff]  }
 0x99b   : > { %15483 = vmatpush1.bf16.msra.mxu1 %v25919_v19  ;;  %10423 = vmatpush1.bf16.msra.mxu0 %v25922_v20  ;;  %v25987_v19 = vld [vmem:[%s28453_s11 + $0x1a9c] ss:$40 sps:$4 sm:$0xff]   ;;  %v25985_v20 = vld [vmem:[%s28453_s11 + $0x1a98] ss:$40 sps:$4 sm:$0xff]  }
 0x99c   : > { %15484 = vmatprep.subr.bf16.mxu1 %v25927_v59  ;;  %10424 = vmatprep.subr.bf16.mxu0 %v25930_v29  ;;  %v25990_v59 = vld [vmem:[%s28453_s11 + $0x1aec] ss:$40 sps:$4 sm:$0xff]   ;;  %v25988_v29 = vld [vmem:[%s28453_s11 + $0x1ae8] ss:$40 sps:$4 sm:$0xff]  }
 0x99f   : > { %15485 = vmatpush1.bf16.msra.mxu1 %v25925_v4  ;;  %10425 = vmatpush1.bf16.msra.mxu0 %v25928_v33  ;;  %v25993_v4 = vld [vmem:[%s28453_s11 + $0x1b3c] ss:$40 sps:$4 sm:$0xff]   ;;  %v25991_v33 = vld [vmem:[%s28453_s11 + $0x1b38] ss:$40 sps:$4 sm:$0xff]  }
 0x9a0   : > { %15486 = vmatprep.subr.bf16.mxu1 %v25933_v37  ;;  %10426 = vmatprep.subr.bf16.mxu0 %v25936_v15  ;;  %v25996_v37 = vld [vmem:[%s28453_s11 + $0x1b8c] ss:$40 sps:$4 sm:$0xff]   ;;  %v25994_v15 = vld [vmem:[%s28453_s11 + $0x1b88] ss:$40 sps:$4 sm:$0xff]  }
 0x9a3   : > { %15487 = vmatpush1.bf16.msra.mxu1 %v25931_v38  ;;  %10427 = vmatpush1.bf16.msra.mxu0 %v25934_v41  ;;  %v26093_v38 = vld [vmem:[%s28453_s11 + $0x2d50] ss:$40 sps:$4 sm:$0xff]   ;;  %v26095_v41 = vld [vmem:[%s28453_s11 + $0x2d54] ss:$40 sps:$4 sm:$0xff]  }
 0x9a4   : > { %15488 = vmatprep.subr.bf16.mxu1 %v25939_v43  ;;  %10428 = vmatprep.subr.bf16.mxu0 %v25942_v40  ;;  %v25997_v43 = vld [vmem:[%s28453_s11 + $0x1bd8] ss:$40 sps:$4 sm:$0xff]  }
 0x9a5   : > { %v26099_v40 = vld [vmem:[%s28453_s11 + $0x2da0] ss:$40 sps:$4 sm:$0xff]  }
 0x9a7   : > { %15489 = vmatpush1.bf16.msra.mxu1 %v25937_v26  ;;  %10429 = vmatpush1.bf16.msra.mxu0 %v25940_v13  ;;  %v26101_v26 = vld [vmem:[%s28453_s11 + $0x2da4] ss:$40 sps:$4 sm:$0xff]  }
 0x9a8   : > { %10430 = vmatprep.subr.bf16.mxu0 %v25945_v27  ;;  %15499 = vmatprep.subr.bf16.mxu1 %v26089_v36  ;;  %v26002_v13 = vld [vmem:[%s28453_s11 + $0x1c2c] ss:$40 sps:$4 sm:$0xff]   ;;  %v26105_v27 = vld [vmem:[%s28453_s11 + $0x2df0] ss:$40 sps:$4 sm:$0xff]  }
 0x9a9   : > { %v26027_v36 = vld [vmem:[%s28453_s11 + $0x1ef8] ss:$40 sps:$4 sm:$0xff]  }
 0x9aa   : > { %15491 = vmatmul.mubr.bf16.vlgmr.msra.gmra.mrb[8].mxu1 %v29654_v61 }
 0x9ab   : > { %10431 = vmatpush1.bf16.msra.mxu0 %v25943_v54  ;;  %15500 = vmatpush1.bf16.msra.mxu1 %v26087_v35  ;;  %v26107_v54 = vld [vmem:[%s28453_s11 + $0x2df4] ss:$40 sps:$4 sm:$0xff]  }
 0x9ac   : > { %10432 = vmatprep.subr.bf16.mxu0 %v25948_v47  ;;  %15501 = vmatprep.subr.bf16.mxu1 %v26095_v41  ;;  %v26005_v47 = vld [vmem:[%s28453_s11 + $0x1c7c] ss:$40 sps:$4 sm:$0xff]   ;;  %v26030_v41 = vld [vmem:[%s28453_s11 + $0x1f48] ss:$40 sps:$4 sm:$0xff]  }
 0x9ad   : > { %v26029_v35 = vld [vmem:[%s28453_s11 + $0x1efc] ss:$40 sps:$4 sm:$0xff]  }
 0x9af   : > { %10433 = vmatpush1.bf16.msra.mxu0 %v25946_v48  ;;  %15502 = vmatpush1.bf16.msra.mxu1 %v26093_v38  ;;  %v26003_v48 = vld [vmem:[%s28453_s11 + $0x1c78] ss:$40 sps:$4 sm:$0xff]   ;;  %v26032_v38 = vld [vmem:[%s28453_s11 + $0x1f4c] ss:$40 sps:$4 sm:$0xff]  }
 0x9b0   : > { %10434 = vmatprep.subr.bf16.mxu0 %v25951_v57  ;;  %15503 = vmatprep.subr.bf16.mxu1 %v26101_v26  ;;  %v26111_v57 = vld [vmem:[%s28453_s11 + $0x2e40] ss:$40 sps:$4 sm:$0xff]  }
 0x9b1   : > { %v26033_v26 = vld [vmem:[%s28453_s11 + $0x1f98] ss:$40 sps:$4 sm:$0xff]  }
 0x9b3   : > { %10435 = vmatpush1.bf16.msra.mxu0 %v25949_v50  ;;  %15504 = vmatpush1.bf16.msra.mxu1 %v26099_v40  ;;  %v26113_v50 = vld [vmem:[%s28453_s11 + $0x2e44] ss:$40 sps:$4 sm:$0xff]  }
 0x9b4   : > { %10436 = vmatprep.subr.bf16.mxu0 %v25954_v49  ;;  %15505 = vmatprep.subr.bf16.mxu1 %v26107_v54  ;;  %v26008_v49 = vld [vmem:[%s28453_s11 + $0x1ccc] ss:$40 sps:$4 sm:$0xff]   ;;  %v26035_v40 = vld [vmem:[%s28453_s11 + $0x1f9c] ss:$40 sps:$4 sm:$0xff]   ;;  %v26036_v54 = vld [vmem:[%s28453_s11 + $0x1fe8] ss:$40 sps:$4 sm:$0xff]  }
 0x9b7   : > { %10437 = vmatpush1.bf16.msra.mxu0 %v25952_v51  ;;  %15506 = vmatpush1.bf16.msra.mxu1 %v26105_v27  ;;  %v26006_v51 = vld [vmem:[%s28453_s11 + $0x1cc8] ss:$40 sps:$4 sm:$0xff]  }
 0x9b8   : > { %10438 = vmatprep.subr.bf16.mxu0 %v25957_v21  ;;  %15507 = vmatprep.subr.bf16.mxu1 %v26113_v50  ;;  %v26117_v21 = vld [vmem:[%s28453_s11 + $0x2e90] ss:$40 sps:$4 sm:$0xff]   ;;  %v26171_v27 = vld [vmem:[%s28453_s11 + $0x3160] ss:$40 sps:$4 sm:$0xff]  }
 0x9b9   : > { %v26039_v50 = vld [vmem:[%s28453_s11 + $0x2038] ss:$40 sps:$4 sm:$0xff]  }
 0x9bb   : > { %10439 = vmatpush1.bf16.msra.mxu0 %v25955_v56  ;;  %15508 = vmatpush1.bf16.msra.mxu1 %v26111_v57  ;;  %v26119_v56 = vld [vmem:[%s28453_s11 + $0x2e94] ss:$40 sps:$4 sm:$0xff]   ;;  %v26177_v57 = vld [vmem:[%s28453_s11 + $0x31b0] ss:$40 sps:$4 sm:$0xff]  }
 0x9bc   : > { %10440 = vmatprep.subr.bf16.mxu0 %v25960_v32  ;;  %v26011_v32 = vld [vmem:[%s28453_s11 + $0x1d1c] ss:$40 sps:$4 sm:$0xff]   ;;  %15509 = vmatprep.subr.bf16.mxu1 %v26119_v56 }
 0x9bd   : > { %v26047_v56 = vld [vmem:[%s28453_s11 + $0x20dc] ss:$40 sps:$4 sm:$0xff]  }
 0x9bf   : > { %10441 = vmatpush1.bf16.msra.mxu0 %v25958_v63  ;;  %15510 = vmatpush1.bf16.msra.mxu1 %v26117_v21  ;;  %v26009_v63 = vld [vmem:[%s28453_s11 + $0x1d18] ss:$40 sps:$4 sm:$0xff]   ;;  %v26042_v21 = vld [vmem:[%s28453_s11 + $0x2088] ss:$40 sps:$4 sm:$0xff]  }
 0x9c0   : > { %10442 = vmatprep.subr.bf16.mxu0 %v25963_v1  ;;  %v26123_v1 = vld [vmem:[%s28453_s11 + $0x2ee0] ss:$40 sps:$4 sm:$0xff]  }
 0x9c3   : > { %10443 = vmatpush1.bf16.msra.mxu0 %v25961_v2  ;;  %v26125_v2 = vld [vmem:[%s28453_s11 + $0x2ee4] ss:$40 sps:$4 sm:$0xff]  }
 0x9c4   : > { %10444 = vmatprep.subr.bf16.mxu0 %v25966_v3  ;;  %v26014_v3 = vld [vmem:[%s28453_s11 + $0x1d6c] ss:$40 sps:$4 sm:$0xff]   ;;  %15511 = vmatprep.subr.bf16.mxu1 %v26125_v2  ;;  %v26053_v2 = vld [vmem:[%s28453_s11 + $0x217c] ss:$40 sps:$4 sm:$0xff]  }
 0x9c5   : > { %15512 = vmatpush1.bf16.msra.mxu1 %v26123_v1  ;;  %v26048_v1 = vld [vmem:[%s28453_s11 + $0x2128] ss:$40 sps:$4 sm:$0xff]  }
 0x9c7   : > { %10445 = vmatpush1.bf16.msra.mxu0 %v25964_v0  ;;  %v26012_v0 = vld [vmem:[%s28453_s11 + $0x1d68] ss:$40 sps:$4 sm:$0xff]  }
 0x9c8   : > { %10446 = vmatprep.subr.bf16.mxu0 %v25969_v5  ;;  %v26129_v5 = vld [vmem:[%s28453_s11 + $0x2f30] ss:$40 sps:$4 sm:$0xff]  }
 0x9cb   : > { %10447 = vmatpush1.bf16.msra.mxu0 %v25967_v10  ;;  %v26131_v10 = vld [vmem:[%s28453_s11 + $0x2f34] ss:$40 sps:$4 sm:$0xff]  }
 0x9cc   : > { %15540 = vmatprep.subr.bf16.mxu0 %v25972_v7  ;;  %v26017_v7 = vld [vmem:[%s28453_s11 + $0x1dbc] ss:$40 sps:$4 sm:$0xff]   ;;  %15513 = vmatprep.subr.bf16.mxu1 %v26131_v10 }
 0x9cd   : > { %15514 = vmatpush1.bf16.msra.mxu1 %v26129_v5  ;;  %v26054_v5 = vld [vmem:[%s28453_s11 + $0x21c8] ss:$40 sps:$4 sm:$0xff]   ;;  %v26059_v10 = vld [vmem:[%s28453_s11 + $0x221c] ss:$40 sps:$4 sm:$0xff]  }
 0x9ce   : > { %10449 = vmatmul.mubr.bf16.vlgmr.msra.gmra.mrb[8].mxu0 %v28950_v28  ;;  %v25984_v28 = vld [vmem:[%s28453_s11 + $0x1a4c] ss:$40 sps:$4 sm:$0xff]  }
 0x9cf   : > { %15541 = vmatpush1.bf16.msra.mxu0 %v25970_v8  ;;  %15572 = vmatprep.mubr.bf16.mxu0 %v29318_v30  ;;  %v26015_v8 = vld [vmem:[%s28453_s11 + $0x1db8] ss:$40 sps:$4 sm:$0xff]  }
 0x9d0   : > { %15542 = vmatprep.subr.bf16.mxu0 %v25975_v55  ;;  %v26135_v55 = vld [vmem:[%s28453_s11 + $0x2f80] ss:$40 sps:$4 sm:$0xff]  }
 0x9d3   : > { %15543 = vmatpush1.bf16.msra.mxu0 %v25973_v11  ;;  %v26137_v11 = vld [vmem:[%s28453_s11 + $0x2f84] ss:$40 sps:$4 sm:$0xff]  }
 0x9d4   : > { %15544 = vmatprep.subr.bf16.mxu0 %v25978_v12  ;;  %v26020_v12 = vld [vmem:[%s28453_s11 + $0x1e0c] ss:$40 sps:$4 sm:$0xff]   ;;  %15515 = vmatprep.subr.bf16.mxu1 %v26137_v11  ;;  %v26065_v11 = vld [vmem:[%s28453_s11 + $0x22bc] ss:$40 sps:$4 sm:$0xff]  }
 0x9d5   : > { %15516 = vmatpush1.bf16.msra.mxu1 %v26135_v55  ;;  %v26060_v55 = vld [vmem:[%s28453_s11 + $0x2268] ss:$40 sps:$4 sm:$0xff]  }
 0x9d7   : > { %15545 = vmatpush1.bf16.msra.mxu0 %v25976_v58  ;;  %v26018_v58 = vld [vmem:[%s28453_s11 + $0x1e08] ss:$40 sps:$4 sm:$0xff]  }
 0x9d8   : > { %15546 = vmatprep.subr.bf16.mxu0 %v25981_v39  ;;  %v26141_v39 = vld [vmem:[%s28453_s11 + $0x2fd0] ss:$40 sps:$4 sm:$0xff]  }
 0x9db   : > { %15547 = vmatpush1.bf16.msra.mxu0 %v25979_v14  ;;  %v26143_v14 = vld [vmem:[%s28453_s11 + $0x2fd4] ss:$40 sps:$4 sm:$0xff]  }
 0x9dc   : > { %15548 = vmatprep.subr.bf16.mxu0 %v25984_v28  ;;  %v26023_v28 = vld [vmem:[%s28453_s11 + $0x1e5c] ss:$40 sps:$4 sm:$0xff]   ;;  %15517 = vmatprep.subr.bf16.mxu1 %v26143_v14 }
 0x9dd   : > { %15518 = vmatpush1.bf16.msra.mxu1 %v26141_v39  ;;  %v26066_v39 = vld [vmem:[%s28453_s11 + $0x2308] ss:$40 sps:$4 sm:$0xff]   ;;  %v26071_v14 = vld [vmem:[%s28453_s11 + $0x235c] ss:$40 sps:$4 sm:$0xff]  }
 0x9df   : > { %15549 = vmatpush1.bf16.msra.mxu0 %v25982_v17  ;;  %v26021_v17 = vld [vmem:[%s28453_s11 + $0x1e58] ss:$40 sps:$4 sm:$0xff]  }
 0x9e0   : > { %15550 = vmatprep.subr.bf16.mxu0 %v25987_v19  ;;  %v26147_v19 = vld [vmem:[%s28453_s11 + $0x3020] ss:$40 sps:$4 sm:$0xff]  }
 0x9e3   : > { %15551 = vmatpush1.bf16.msra.mxu0 %v25985_v20  ;;  %v26149_v20 = vld [vmem:[%s28453_s11 + $0x3024] ss:$40 sps:$4 sm:$0xff]  }
 0x9e4   : > { %15552 = vmatprep.subr.bf16.mxu0 %v25990_v59  ;;  %v26026_v59 = vld [vmem:[%s28453_s11 + $0x1eac] ss:$40 sps:$4 sm:$0xff]   ;;  %15519 = vmatprep.subr.bf16.mxu1 %v26149_v20  ;;  %v26077_v20 = vld [vmem:[%s28453_s11 + $0x23fc] ss:$40 sps:$4 sm:$0xff]  }
 0x9e5   : > { %15520 = vmatpush1.bf16.msra.mxu1 %v26147_v19  ;;  %v26072_v19 = vld [vmem:[%s28453_s11 + $0x23a8] ss:$40 sps:$4 sm:$0xff]  }
 0x9e7   : > { %15553 = vmatpush1.bf16.msra.mxu0 %v25988_v29  ;;  %v26024_v29 = vld [vmem:[%s28453_s11 + $0x1ea8] ss:$40 sps:$4 sm:$0xff]  }
 0x9e8   : > { %15554 = vmatprep.subr.bf16.mxu0 %v25993_v4  ;;  %v26153_v4 = vld [vmem:[%s28453_s11 + $0x3070] ss:$40 sps:$4 sm:$0xff]  }
 0x9eb   : > { %15555 = vmatpush1.bf16.msra.mxu0 %v25991_v33  ;;  %v26155_v33 = vld [vmem:[%s28453_s11 + $0x3074] ss:$40 sps:$4 sm:$0xff]  }
 0x9ec   : > { %15556 = vmatprep.subr.bf16.mxu0 %v25996_v37  ;;  %15521 = vmatprep.subr.bf16.mxu1 %v26155_v33  ;;  %v26159_v37 = vld [vmem:[%s28453_s11 + $0x30c0] ss:$40 sps:$4 sm:$0xff]   ;;  %v26083_v33 = vld [vmem:[%s28453_s11 + $0x249c] ss:$40 sps:$4 sm:$0xff]  }
 0x9ed   : > { %15522 = vmatpush1.bf16.msra.mxu1 %v26153_v4  ;;  %v26078_v4 = vld [vmem:[%s28453_s11 + $0x2448] ss:$40 sps:$4 sm:$0xff]  }
 0x9ef   : > { %15557 = vmatpush1.bf16.msra.mxu0 %v25994_v15  ;;  %v26161_v15 = vld [vmem:[%s28453_s11 + $0x30c4] ss:$40 sps:$4 sm:$0xff]  }
 0x9f0   : > { %15558 = vmatprep.subr.bf16.mxu0 %v25999_v42  ;;  %15523 = vmatprep.subr.bf16.mxu1 %v26161_v15  ;;  %v26165_v42 = vld [vmem:[%s28453_s11 + $0x3110] ss:$40 sps:$4 sm:$0xff]   ;;  %v26092_v15 = vld [vmem:[%s28453_s11 + $0x253c] ss:$40 sps:$4 sm:$0xff]  }
 0x9f1   : > { %15524 = vmatpush1.bf16.msra.mxu1 %v26159_v37  ;;  %v26084_v37 = vld [vmem:[%s28453_s11 + $0x24e8] ss:$40 sps:$4 sm:$0xff]  }
 0x9f3   : > { %15559 = vmatpush1.bf16.msra.mxu0 %v25997_v43  ;;  %v26167_v43 = vld [vmem:[%s28453_s11 + $0x3114] ss:$40 sps:$4 sm:$0xff]  }
 0x9f4   : > { %15560 = vmatprep.subr.bf16.mxu0 %v26002_v13  ;;  %15525 = vmatprep.subr.bf16.mxu1 %v26167_v43  ;;  %v26038_v13 = vld [vmem:[%s28453_s11 + $0x1fec] ss:$40 sps:$4 sm:$0xff]   ;;  %v26104_v43 = vld [vmem:[%s28453_s11 + $0x25dc] ss:$40 sps:$4 sm:$0xff]  }
 0x9f5   : > { %15526 = vmatpush1.bf16.msra.mxu1 %v26165_v42  ;;  %v26096_v42 = vld [vmem:[%s28453_s11 + $0x2588] ss:$40 sps:$4 sm:$0xff]  }
 0x9f7   : > { %15561 = vmatpush1.bf16.msra.mxu0 %v26000_v45  ;;  %v26173_v45 = vld [vmem:[%s28453_s11 + $0x3164] ss:$40 sps:$4 sm:$0xff]  }
 0x9f8   : > { %15562 = vmatprep.subr.bf16.mxu0 %v26005_v47  ;;  %15527 = vmatprep.subr.bf16.mxu1 %v26173_v45  ;;  %v26041_v47 = vld [vmem:[%s28453_s11 + $0x203c] ss:$40 sps:$4 sm:$0xff]  }
 0x9f9   : > { %15528 = vmatpush1.bf16.msra.mxu1 %v26171_v27  ;;  %v26116_v45 = vld [vmem:[%s28453_s11 + $0x267c] ss:$40 sps:$4 sm:$0xff]   ;;  %v26114_v27 = vld [vmem:[%s28453_s11 + $0x2678] ss:$40 sps:$4 sm:$0xff]  }
 0x9fb   : > { %15563 = vmatpush1.bf16.msra.mxu0 %v26003_v48  ;;  %v26179_v48 = vld [vmem:[%s28453_s11 + $0x31b4] ss:$40 sps:$4 sm:$0xff]  }
 0x9fc   : > { %15564 = vmatprep.subr.bf16.mxu0 %v26008_v49  ;;  %15529 = vmatprep.subr.bf16.mxu1 %v26179_v48  ;;  %v26044_v49 = vld [vmem:[%s28453_s11 + $0x208c] ss:$40 sps:$4 sm:$0xff]   ;;  %v26128_v48 = vld [vmem:[%s28453_s11 + $0x271c] ss:$40 sps:$4 sm:$0xff]  }
 0x9fd   : > { %15530 = vmatpush1.bf16.msra.mxu1 %v26177_v57  ;;  %v26126_v57 = vld [vmem:[%s28453_s11 + $0x2718] ss:$40 sps:$4 sm:$0xff]  }
 0x9ff   : > { %15565 = vmatpush1.bf16.msra.mxu0 %v26006_v51  ;;  %v26185_v51 = vld [vmem:[%s28453_s11 + $0x1914] ss:$40 sps:$4 sm:$0xff]  }
 0xa00   : > { %15566 = vmatprep.subr.bf16.mxu0 %v26011_v32  ;;  %15745 = vmatprep.subr.bf16.mxu1 %v26185_v51  ;;  %v26045_v32 = vld [vmem:[%s28453_s11 + $0x20d8] ss:$40 sps:$4 sm:$0xff]   ;;  %v26140_v51 = vld [vmem:[%s28453_s11 + $0x27bc] ss:$40 sps:$4 sm:$0xff]  }
 0xa03   : > { %15567 = vmatpush1.bf16.msra.mxu0 %v26009_v63  ;;  %v26050_v63 = vld [vmem:[%s28453_s11 + $0x212c] ss:$40 sps:$4 sm:$0xff]  }
 0xa04   : > { %15568 = vmatprep.subr.bf16.mxu0 %v26014_v3  ;;  %v26051_v3 = vld [vmem:[%s28453_s11 + $0x2178] ss:$40 sps:$4 sm:$0xff]  }
 0xa07   : > { %15569 = vmatpush1.bf16.msra.mxu0 %v26012_v0  ;;  %v26056_v0 = vld [vmem:[%s28453_s11 + $0x21cc] ss:$40 sps:$4 sm:$0xff]  }
 0xa08   : > { %15570 = vmatprep.subr.bf16.mxu0 %v26017_v7  ;;  %v26057_v7 = vld [vmem:[%s28453_s11 + $0x2218] ss:$40 sps:$4 sm:$0xff]  }
 0xa0b   : > { %15571 = vmatpush1.bf16.msra.mxu0 %v26015_v8  ;;  %v26062_v8 = vld [vmem:[%s28453_s11 + $0x226c] ss:$40 sps:$4 sm:$0xff]  }
 0xa0c   : > { %15581 = vmatprep.subr.bf16.mxu0 %v26020_v12  ;;  %v26063_v12 = vld [vmem:[%s28453_s11 + $0x22b8] ss:$40 sps:$4 sm:$0xff]  }
 0xa0e   : > { %15573 = vmatmul.mubr.bf16.vlgmr.msra.gmra.mrb[12].mxu0 %v29397_v44 }
 0xa0f   : > { %15582 = vmatpush1.bf16.msra.mxu0 %v26018_v58  ;;  %15613 = vmatprep.mubr.bf16.mxu0 %v29400_v52  ;;  %v26068_v58 = vld [vmem:[%s28453_s11 + $0x230c] ss:$40 sps:$4 sm:$0xff]  }
 0xa10   : > { %15583 = vmatprep.subr.bf16.mxu0 %v26023_v28  ;;  %v26069_v28 = vld [vmem:[%s28453_s11 + $0x2358] ss:$40 sps:$4 sm:$0xff]  }
 0xa13   : > { %15584 = vmatpush1.bf16.msra.mxu0 %v26021_v17  ;;  %v26074_v17 = vld [vmem:[%s28453_s11 + $0x23ac] ss:$40 sps:$4 sm:$0xff]  }
 0xa14   : > { %15585 = vmatprep.subr.bf16.mxu0 %v26026_v59  ;;  %v26075_v59 = vld [vmem:[%s28453_s11 + $0x23f8] ss:$40 sps:$4 sm:$0xff]  }
 0xa17   : > { %15586 = vmatpush1.bf16.msra.mxu0 %v26024_v29  ;;  %v26080_v29 = vld [vmem:[%s28453_s11 + $0x244c] ss:$40 sps:$4 sm:$0xff]  }
 0xa18   : > { %15587 = vmatprep.subr.bf16.mxu0 %v26029_v35  ;;  %v26081_v35 = vld [vmem:[%s28453_s11 + $0x2498] ss:$40 sps:$4 sm:$0xff]  }
 0xa1b   : > { %15588 = vmatpush1.bf16.msra.mxu0 %v26027_v36  ;;  %v26086_v36 = vld [vmem:[%s28453_s11 + $0x24ec] ss:$40 sps:$4 sm:$0xff]  }
 0xa1c   : > { %15589 = vmatprep.subr.bf16.mxu0 %v26032_v38  ;;  %v26090_v38 = vld [vmem:[%s28453_s11 + $0x2538] ss:$40 sps:$4 sm:$0xff]  }
 0xa1f   : > { %15590 = vmatpush1.bf16.msra.mxu0 %v26030_v41  ;;  %v26098_v41 = vld [vmem:[%s28453_s11 + $0x258c] ss:$40 sps:$4 sm:$0xff]  }
 0xa20   : > { %15591 = vmatprep.subr.bf16.mxu0 %v26035_v40  ;;  %v26102_v40 = vld [vmem:[%s28453_s11 + $0x25d8] ss:$40 sps:$4 sm:$0xff]  }
 0xa23   : > { %15592 = vmatpush1.bf16.msra.mxu0 %v26033_v26  ;;  %v26110_v26 = vld [vmem:[%s28453_s11 + $0x262c] ss:$40 sps:$4 sm:$0xff]  }
 0xa24   : > { %15593 = vmatprep.subr.bf16.mxu0 %v26038_v13  ;;  %v26108_v13 = vld [vmem:[%s28453_s11 + $0x2628] ss:$40 sps:$4 sm:$0xff]  }
 0xa27   : > { %15594 = vmatpush1.bf16.msra.mxu0 %v26036_v54  ;;  %v26122_v54 = vld [vmem:[%s28453_s11 + $0x26cc] ss:$40 sps:$4 sm:$0xff]  }
 0xa28   : > { %15595 = vmatprep.subr.bf16.mxu0 %v26041_v47  ;;  %v26120_v47 = vld [vmem:[%s28453_s11 + $0x26c8] ss:$40 sps:$4 sm:$0xff]  }
 0xa2b   : > { %15596 = vmatpush1.bf16.msra.mxu0 %v26039_v50  ;;  %v26134_v50 = vld [vmem:[%s28453_s11 + $0x276c] ss:$40 sps:$4 sm:$0xff]  }
 0xa2c   : > { %15597 = vmatprep.subr.bf16.mxu0 %v26044_v49  ;;  %v26132_v49 = vld [vmem:[%s28453_s11 + $0x2768] ss:$40 sps:$4 sm:$0xff]  }
 0xa2f   : > { %15598 = vmatpush1.bf16.msra.mxu0 %v26042_v21  ;;  %v26138_v21 = vld [vmem:[%s28453_s11 + $0x27b8] ss:$40 sps:$4 sm:$0xff]  }
 0xa30   : > { %15599 = vmatprep.subr.bf16.mxu0 %v26047_v56  ;;  %v26146_v56 = vld [vmem:[%s28453_s11 + $0x280c] ss:$40 sps:$4 sm:$0xff]  }
 0xa33   : > { %15600 = vmatpush1.bf16.msra.mxu0 %v26045_v32  ;;  %v26144_v32 = vld [vmem:[%s28453_s11 + $0x2808] ss:$40 sps:$4 sm:$0xff]  }
 0xa34   : > { %15601 = vmatprep.subr.bf16.mxu0 %v26050_v63  ;;  %v26152_v63 = vld [vmem:[%s28453_s11 + $0x285c] ss:$40 sps:$4 sm:$0xff]  }
 0xa37   : > { %15602 = vmatpush1.bf16.msra.mxu0 %v26048_v1  ;;  %v26150_v1 = vld [vmem:[%s28453_s11 + $0x2858] ss:$40 sps:$4 sm:$0xff]  }
 0xa38   : > { %15603 = vmatprep.subr.bf16.mxu0 %v26053_v2  ;;  %v26158_v2 = vld [vmem:[%s28453_s11 + $0x28ac] ss:$40 sps:$4 sm:$0xff]  }
 0xa3b   : > { %15604 = vmatpush1.bf16.msra.mxu0 %v26051_v3  ;;  %v26156_v3 = vld [vmem:[%s28453_s11 + $0x28a8] ss:$40 sps:$4 sm:$0xff]  }
 0xa3c   : > { %15605 = vmatprep.subr.bf16.mxu0 %v26056_v0  ;;  %v26164_v0 = vld [vmem:[%s28453_s11 + $0x28fc] ss:$40 sps:$4 sm:$0xff]  }
 0xa3f   : > { %15606 = vmatpush1.bf16.msra.mxu0 %v26054_v5  ;;  %v26162_v5 = vld [vmem:[%s28453_s11 + $0x28f8] ss:$40 sps:$4 sm:$0xff]  }
 0xa40   : > { %15607 = vmatprep.subr.bf16.mxu0 %v26059_v10  ;;  %v26170_v10 = vld [vmem:[%s28453_s11 + $0x294c] ss:$40 sps:$4 sm:$0xff]  }
 0xa43   : > { %15608 = vmatpush1.bf16.msra.mxu0 %v26057_v7  ;;  %v26168_v7 = vld [vmem:[%s28453_s11 + $0x2948] ss:$40 sps:$4 sm:$0xff]  }
 0xa44   : > { %15609 = vmatprep.subr.bf16.mxu0 %v26062_v8  ;;  %v5379_v8 = vld [vmem:[%s29289_s26 + $0x8] sm:$0x3] }
 0xa47   : > { %15610 = vmatpush1.bf16.msra.mxu0 %v26060_v55  ;;  %v26176_v55 = vld [vmem:[%s28453_s11 + $0x299c] ss:$40 sps:$4 sm:$0xff]  }
 0xa48   : > { %15611 = vmatprep.subr.bf16.mxu0 %v26065_v11  ;;  %v5417_v11 = vrot.slane %v5379_v8, %v29370_v9 }
 0xa4b   : > { %15612 = vmatpush1.bf16.msra.mxu0 %v26063_v12  ;;  %v5421_v12 = vrot.slane %v5379_v8, %v29295_v62  ;;  %v26225_v8 = vld [vmem:[%s28453_s11 + $0x1b40] ss:$40 sps:$4 sm:$0xff]  }
 0xa4c   : > { %15622 = vmatprep.subr.bf16.mxu0 %v26068_v58  ;;  %v26174_v58 = vld [vmem:[%s28453_s11 + $0x2998] ss:$40 sps:$4 sm:$0xff]  }
 0xa4e   : > { %15614 = vmatmul.mubr.bf16.vlgmr.msra.gmra.mrb[12].mxu0 %v29477_v16 }
 0xa4f   : > { %15623 = vmatpush1.bf16.msra.mxu0 %v26066_v39  ;;  %15654 = vmatprep.mubr.bf16.mxu0 %v29574_v6  ;;  %v26182_v39 = vld [vmem:[%s28453_s11 + $0x29ec] ss:$40 sps:$4 sm:$0xff]  }
 0xa50   : > { %15624 = vmatprep.subr.bf16.mxu0 %v26071_v14 }
 0xa53   : > { %15625 = vmatpush1.bf16.msra.mxu0 %v26069_v28 }
 0xa54   : > { %15626 = vmatprep.subr.bf16.mxu0 %v26074_v17 }
 0xa57   : > { %15627 = vmatpush1.bf16.msra.mxu0 %v26072_v19 }
 0xa58   : > { %15628 = vmatprep.subr.bf16.mxu0 %v26077_v20 }
 0xa5b   : > { %15629 = vmatpush1.bf16.msra.mxu0 %v26075_v59  ;;  %v26180_v59 = vld [vmem:[%s28453_s11 + $0x29e8] ss:$40 sps:$4 sm:$0xff]  }
 0xa5c   : > { %15630 = vmatprep.subr.bf16.mxu0 %v26080_v29 }
 0xa5f   : > { %15631 = vmatpush1.bf16.msra.mxu0 %v26078_v4 }
 0xa60   : > { %15632 = vmatprep.subr.bf16.mxu0 %v26083_v33  ;;  %v26188_v33 = vld [vmem:[%s28453_s11 + $0x2a3c] ss:$40 sps:$4 sm:$0xff]  }
 0xa63   : > { %15633 = vmatpush1.bf16.msra.mxu0 %v26081_v35 }
 0xa64   : > { %15634 = vmatprep.subr.bf16.mxu0 %v26086_v36 }
 0xa67   : > { %15635 = vmatpush1.bf16.msra.mxu0 %v26084_v37  ;;  %v26183_v37 = vld [vmem:[%s28453_s11 + $0x1910] ss:$40 sps:$4 sm:$0xff]  }
 0xa68   : > { %15636 = vmatprep.subr.bf16.mxu0 %v26092_v15  ;;  %v26186_v15 = vld [vmem:[%s28453_s11 + $0x2a38] ss:$40 sps:$4 sm:$0xff]  }
 0xa6b   : > { %15637 = vmatpush1.bf16.msra.mxu0 %v26090_v38 }
 0xa6c   : > { %15638 = vmatprep.subr.bf16.mxu0 %v26098_v41  ;;  %v26191_v41 = vld [vmem:[%s28453_s11 + $0x1964] ss:$40 sps:$4 sm:$0xff]  }
 0xa6f   : > { %15639 = vmatpush1.bf16.msra.mxu0 %v26096_v42  ;;  %v26194_v42 = vld [vmem:[%s28453_s11 + $0x2a8c] ss:$40 sps:$4 sm:$0xff]  }
 0xa70   : > { %15640 = vmatprep.subr.bf16.mxu0 %v26104_v43  ;;  %v26189_v43 = vld [vmem:[%s28453_s11 + $0x1960] ss:$40 sps:$4 sm:$0xff]  }
 0xa73   : > { %15641 = vmatpush1.bf16.msra.mxu0 %v26102_v40  ;;  %v26192_v40 = vld [vmem:[%s28453_s11 + $0x2a88] ss:$40 sps:$4 sm:$0xff]  }
 0xa74   : > { %15642 = vmatprep.subr.bf16.mxu0 %v26110_v26  ;;  %v26197_v26 = vld [vmem:[%s28453_s11 + $0x19b4] ss:$40 sps:$4 sm:$0xff]  }
 0xa77   : > { %15643 = vmatpush1.bf16.msra.mxu0 %v26108_v13  ;;  %v26200_v13 = vld [vmem:[%s28453_s11 + $0x2adc] ss:$40 sps:$4 sm:$0xff]  }
 0xa78   : > { %15644 = vmatprep.subr.bf16.mxu0 %v26116_v45  ;;  %v26195_v45 = vld [vmem:[%s28453_s11 + $0x19b0] ss:$40 sps:$4 sm:$0xff]  }
 0xa7b   : > { %15645 = vmatpush1.bf16.msra.mxu0 %v26114_v27  ;;  %v26198_v27 = vld [vmem:[%s28453_s11 + $0x2ad8] ss:$40 sps:$4 sm:$0xff]  }
 0xa7c   : > { %15646 = vmatprep.subr.bf16.mxu0 %v26122_v54  ;;  %v26203_v54 = vld [vmem:[%s28453_s11 + $0x1a04] ss:$40 sps:$4 sm:$0xff]  }
 0xa7f   : > { %15647 = vmatpush1.bf16.msra.mxu0 %v26120_v47  ;;  %v26206_v47 = vld [vmem:[%s28453_s11 + $0x2b2c] ss:$40 sps:$4 sm:$0xff]  }
 0xa80   : > { %15648 = vmatprep.subr.bf16.mxu0 %v26128_v48  ;;  %v26201_v48 = vld [vmem:[%s28453_s11 + $0x1a00] ss:$40 sps:$4 sm:$0xff]  }
 0xa83   : > { %15649 = vmatpush1.bf16.msra.mxu0 %v26126_v57  ;;  %v26204_v57 = vld [vmem:[%s28453_s11 + $0x2b28] ss:$40 sps:$4 sm:$0xff]  }
 0xa84   : > { %15650 = vmatprep.subr.bf16.mxu0 %v26134_v50  ;;  %v26209_v50 = vld [vmem:[%s28453_s11 + $0x1a54] ss:$40 sps:$4 sm:$0xff]  }
 0xa87   : > { %15651 = vmatpush1.bf16.msra.mxu0 %v26132_v49  ;;  %v26212_v49 = vld [vmem:[%s28453_s11 + $0x2b7c] ss:$40 sps:$4 sm:$0xff]  }
 0xa88   : > { %15652 = vmatprep.subr.bf16.mxu0 %v26140_v51  ;;  %v26207_v51 = vld [vmem:[%s28453_s11 + $0x1a50] ss:$40 sps:$4 sm:$0xff]  }
 0xa8b   : > { %15653 = vmatpush1.bf16.msra.mxu0 %v26138_v21  ;;  %v26210_v21 = vld [vmem:[%s28453_s11 + $0x2b78] ss:$40 sps:$4 sm:$0xff]  }
 0xa8c   : > { %15663 = vmatprep.subr.bf16.mxu0 %v26146_v56  ;;  %v26215_v56 = vld [vmem:[%s28453_s11 + $0x1aa4] ss:$40 sps:$4 sm:$0xff]  }
 0xa8e   : > { %15655 = vmatmul.mubr.bf16.vlgmr.msra.gmra.mrb[12].mxu0 %v29578_v53 }
 0xa8f   : > { %15664 = vmatpush1.bf16.msra.mxu0 %v26144_v32  ;;  %15695 = vmatprep.mubr.bf16.mxu0 %v29583_v25  ;;  %v26218_v32 = vld [vmem:[%s28453_s11 + $0x2bcc] ss:$40 sps:$4 sm:$0xff]  }
 0xa90   : > { %15665 = vmatprep.subr.bf16.mxu0 %v26152_v63  ;;  %v26213_v63 = vld [vmem:[%s28453_s11 + $0x1aa0] ss:$40 sps:$4 sm:$0xff]  }
 0xa93   : > { %15666 = vmatpush1.bf16.msra.mxu0 %v26150_v1  ;;  %v26216_v1 = vld [vmem:[%s28453_s11 + $0x2bc8] ss:$40 sps:$4 sm:$0xff]  }
 0xa94   : > { %15667 = vmatprep.subr.bf16.mxu0 %v26158_v2  ;;  %v26221_v2 = vld [vmem:[%s28453_s11 + $0x1af4] ss:$40 sps:$4 sm:$0xff]  }
 0xa97   : > { %15668 = vmatpush1.bf16.msra.mxu0 %v26156_v3  ;;  %v26224_v3 = vld [vmem:[%s28453_s11 + $0x2c1c] ss:$40 sps:$4 sm:$0xff]  }
 0xa98   : > { %15669 = vmatprep.subr.bf16.mxu0 %v26164_v0  ;;  %v26219_v0 = vld [vmem:[%s28453_s11 + $0x1af0] ss:$40 sps:$4 sm:$0xff]  }
 0xa9b   : > { %15670 = vmatpush1.bf16.msra.mxu0 %v26162_v5  ;;  %v26222_v5 = vld [vmem:[%s28453_s11 + $0x2c18] ss:$40 sps:$4 sm:$0xff]  }
 0xa9c   : > { %15671 = vmatprep.subr.bf16.mxu0 %v26170_v10  ;;  %v26227_v10 = vld [vmem:[%s28453_s11 + $0x1b44] ss:$40 sps:$4 sm:$0xff]  }
 0xa9f   : > { %15672 = vmatpush1.bf16.msra.mxu0 %v26168_v7  ;;  %v26230_v7 = vld [vmem:[%s28453_s11 + $0x2c6c] ss:$40 sps:$4 sm:$0xff]  }
 0xaa0   : > { %15673 = vmatprep.subr.bf16.mxu0 %v26176_v55  ;;  %v26228_v55 = vld [vmem:[%s28453_s11 + $0x2c68] ss:$40 sps:$4 sm:$0xff]  }
 0xaa1   : > { %v10450_v14 = vpop.f32.mrb[8].mxu0 }
 0xaa2   : > { %v23433_v28 = vadd.f32 %v10450_v14, %v5417_v11  ;;  %v10452_v17 = vpop.f32.mrb[9].mxu0  ;;  %v26233_v11 = vld [vmem:[%s28453_s11 + $0x1b94] ss:$40 sps:$4 sm:$0xff]   ;;  %v26239_v14 = vld [vmem:[%s28453_s11 + $0x1be4] ss:$40 sps:$4 sm:$0xff]  }
 0xaa3   : > { %v23434_v19 = vadd.f32 %v10452_v17, %v5421_v12  ;;  %v10454_v20 = vpop.f32.mrb[10].mxu0  ;;  %15674 = vmatpush1.bf16.msra.mxu0 %v26174_v58  ;;  %v26236_v12 = vld [vmem:[%s28453_s11 + $0x2cbc] ss:$40 sps:$4 sm:$0xff]   ;;  %v26231_v58 = vld [vmem:[%s28453_s11 + $0x1b90] ss:$40 sps:$4 sm:$0xff]  }
 0xaa4   : > { %v10465_v29 = vmax.f32 %v23433_v28, 0.0  ;;  %v10455_v4 = vpop.f32.mrb[11].mxu0  ;;  %15675 = vmatprep.subr.bf16.mxu0 %v26182_v39  ;;  %v26234_v39 = vld [vmem:[%s28453_s11 + $0x2cb8] ss:$40 sps:$4 sm:$0xff]   ;;  %v26242_v28 = vld [vmem:[%s28453_s11 + $0x2d0c] ss:$40 sps:$4 sm:$0xff]  }
 0xaa5   : > { %v10466_v35 = vmax.f32 %v23434_v19, 0.0  ;;  %v26237_v17 = vld [vmem:[%s28453_s11 + $0x1be0] ss:$40 sps:$4 sm:$0xff]   ;;  %v26245_v20 = vld [vmem:[%s28453_s11 + $0x1c34] ss:$40 sps:$4 sm:$0xff]  }
 0xaa6   : > { %v29832_v38 = vpack.c.bf16 %v10465_v29, %v10465_v29  ;;  %v26240_v19 = vld [vmem:[%s28453_s11 + $0x2d08] ss:$40 sps:$4 sm:$0xff]   ;;  %v26246_v4 = vld [vmem:[%s28453_s11 + $0x2d58] ss:$40 sps:$4 sm:$0xff]  }
 0xaa7   : > { %v29828_v36 = vpack.c.bf16 %v10466_v35, %v10466_v35  ;;  %15676 = vmatpush1.bf16.msra.mxu0 %v26180_v59  ;;  %v26248_v59 = vld [vmem:[%s28453_s11 + $0x2d5c] ss:$40 sps:$4 sm:$0xff]   ;;  %v26243_v29 = vld [vmem:[%s28453_s11 + $0x1c30] ss:$40 sps:$4 sm:$0xff]   ;;  %v26254_v35 = vld [vmem:[%s28453_s11 + $0x2dac] ss:$40 sps:$4 sm:$0xff]  }
 0xaa8   : > { %15677 = vmatprep.subr.bf16.mxu0 %v26188_v33  ;;  %v26251_v33 = vld [vmem:[%s28453_s11 + $0x1c84] ss:$40 sps:$4 sm:$0xff]  }
 0xaa9   : > { %15531 = vmatprep.mubr.bf16.mxu1 %v29828_v36 }
 0xaaa   : > { %15532 = vmatmul.mubr.bf16.vlgmr.msra.gmra.mrb[8].mxu1 %v29832_v38 }
 0xaab   : > { %15746 = vmatpush1.bf16.msra.mxu1 %v26183_v37  ;;  %15678 = vmatpush1.bf16.msra.mxu0 %v26186_v15  ;;  %v26249_v37 = vld [vmem:[%s28453_s11 + $0x1c80] ss:$40 sps:$4 sm:$0xff]  }
 0xaac   : > { %15777 = vmatprep.mubr.bf16.mxu1 %v29318_v30  ;;  %15747 = vmatprep.subr.bf16.mxu1 %v26191_v41  ;;  %v26252_v15 = vld [vmem:[%s28453_s11 + $0x2da8] ss:$40 sps:$4 sm:$0xff]   ;;  %v26257_v41 = vld [vmem:[%s28453_s11 + $0x1cd4] ss:$40 sps:$4 sm:$0xff]  }
 0xaad   : > { %15679 = vmatprep.subr.bf16.mxu0 %v26194_v42  ;;  %v26260_v42 = vld [vmem:[%s28453_s11 + $0x2dfc] ss:$40 sps:$4 sm:$0xff]  }
 0xaaf   : > { %15748 = vmatpush1.bf16.msra.mxu1 %v26189_v43  ;;  %15680 = vmatpush1.bf16.msra.mxu0 %v26192_v40  ;;  %v26255_v43 = vld [vmem:[%s28453_s11 + $0x1cd0] ss:$40 sps:$4 sm:$0xff]  }
 0xab0   : > { %15749 = vmatprep.subr.bf16.mxu1 %v26197_v26  ;;  %15681 = vmatprep.subr.bf16.mxu0 %v26200_v13  ;;  %v26258_v40 = vld [vmem:[%s28453_s11 + $0x2df8] ss:$40 sps:$4 sm:$0xff]   ;;  %v26263_v26 = vld [vmem:[%s28453_s11 + $0x1d24] ss:$40 sps:$4 sm:$0xff]  }
 0xab1   : > { %v26266_v13 = vld [vmem:[%s28453_s11 + $0x2e4c] ss:$40 sps:$4 sm:$0xff]  }
 0xab3   : > { %15750 = vmatpush1.bf16.msra.mxu1 %v26195_v45  ;;  %15682 = vmatpush1.bf16.msra.mxu0 %v26198_v27  ;;  %v26261_v45 = vld [vmem:[%s28453_s11 + $0x1d20] ss:$40 sps:$4 sm:$0xff]  }
 0xab4   : > { %15751 = vmatprep.subr.bf16.mxu1 %v26203_v54  ;;  %15683 = vmatprep.subr.bf16.mxu0 %v26206_v47  ;;  %v26264_v27 = vld [vmem:[%s28453_s11 + $0x2e48] ss:$40 sps:$4 sm:$0xff]   ;;  %v26269_v54 = vld [vmem:[%s28453_s11 + $0x1d74] ss:$40 sps:$4 sm:$0xff]  }
 0xab5   : > { %v26272_v47 = vld [vmem:[%s28453_s11 + $0x2e9c] ss:$40 sps:$4 sm:$0xff]  }
 0xab7   : > { %15752 = vmatpush1.bf16.msra.mxu1 %v26201_v48  ;;  %15684 = vmatpush1.bf16.msra.mxu0 %v26204_v57  ;;  %v26267_v48 = vld [vmem:[%s28453_s11 + $0x1d70] ss:$40 sps:$4 sm:$0xff]  }
 0xab8   : > { %15753 = vmatprep.subr.bf16.mxu1 %v26209_v50  ;;  %15685 = vmatprep.subr.bf16.mxu0 %v26212_v49  ;;  %v26270_v57 = vld [vmem:[%s28453_s11 + $0x2e98] ss:$40 sps:$4 sm:$0xff]   ;;  %v26275_v50 = vld [vmem:[%s28453_s11 + $0x1dc4] ss:$40 sps:$4 sm:$0xff]  }
 0xab9   : > { %v26278_v49 = vld [vmem:[%s28453_s11 + $0x2eec] ss:$40 sps:$4 sm:$0xff]  }
 0xabb   : > { %15754 = vmatpush1.bf16.msra.mxu1 %v26207_v51  ;;  %15686 = vmatpush1.bf16.msra.mxu0 %v26210_v21  ;;  %v26273_v51 = vld [vmem:[%s28453_s11 + $0x1dc0] ss:$40 sps:$4 sm:$0xff]  }
 0xabc   : > { %15755 = vmatprep.subr.bf16.mxu1 %v26215_v56  ;;  %15687 = vmatprep.subr.bf16.mxu0 %v26218_v32  ;;  %v26276_v21 = vld [vmem:[%s28453_s11 + $0x2ee8] ss:$40 sps:$4 sm:$0xff]   ;;  %v26281_v56 = vld [vmem:[%s28453_s11 + $0x1e14] ss:$40 sps:$4 sm:$0xff]  }
 0xabd   : > { %v26284_v32 = vld [vmem:[%s28453_s11 + $0x2f3c] ss:$40 sps:$4 sm:$0xff]  }
 0xabf   : > { %15756 = vmatpush1.bf16.msra.mxu1 %v26213_v63  ;;  %15688 = vmatpush1.bf16.msra.mxu0 %v26216_v1  ;;  %v26279_v63 = vld [vmem:[%s28453_s11 + $0x1e10] ss:$40 sps:$4 sm:$0xff]  }
 0xac0   : > { %15757 = vmatprep.subr.bf16.mxu1 %v26221_v2  ;;  %15689 = vmatprep.subr.bf16.mxu0 %v26224_v3  ;;  %v26282_v1 = vld [vmem:[%s28453_s11 + $0x2f38] ss:$40 sps:$4 sm:$0xff]   ;;  %v26287_v2 = vld [vmem:[%s28453_s11 + $0x1e64] ss:$40 sps:$4 sm:$0xff]  }
 0xac1   : > { %v26290_v3 = vld [vmem:[%s28453_s11 + $0x2f8c] ss:$40 sps:$4 sm:$0xff]  }
 0xac3   : > { %15758 = vmatpush1.bf16.msra.mxu1 %v26219_v0  ;;  %15690 = vmatpush1.bf16.msra.mxu0 %v26222_v5  ;;  %v26285_v0 = vld [vmem:[%s28453_s11 + $0x1e60] ss:$40 sps:$4 sm:$0xff]  }
 0xac4   : > { %15759 = vmatprep.subr.bf16.mxu1 %v26227_v10  ;;  %15691 = vmatprep.subr.bf16.mxu0 %v26230_v7  ;;  %v26288_v5 = vld [vmem:[%s28453_s11 + $0x2f88] ss:$40 sps:$4 sm:$0xff]   ;;  %v26293_v10 = vld [vmem:[%s28453_s11 + $0x1eb4] ss:$40 sps:$4 sm:$0xff]  }
 0xac5   : > { %v26296_v7 = vld [vmem:[%s28453_s11 + $0x2fdc] ss:$40 sps:$4 sm:$0xff]  }
 0xac7   : > { %15760 = vmatpush1.bf16.msra.mxu1 %v26225_v8  ;;  %15692 = vmatpush1.bf16.msra.mxu0 %v26228_v55  ;;  %v26291_v8 = vld [vmem:[%s28453_s11 + $0x1eb0] ss:$40 sps:$4 sm:$0xff]  }
 0xac8   : > { %15761 = vmatprep.subr.bf16.mxu1 %v26233_v11  ;;  %15693 = vmatprep.subr.bf16.mxu0 %v26236_v12  ;;  %v26294_v55 = vld [vmem:[%s28453_s11 + $0x2fd8] ss:$40 sps:$4 sm:$0xff]   ;;  %v26299_v11 = vld [vmem:[%s28453_s11 + $0x1f04] ss:$40 sps:$4 sm:$0xff]  }
 0xac9   : > { %v26302_v12 = vld [vmem:[%s28453_s11 + $0x302c] ss:$40 sps:$4 sm:$0xff]  }
 0xacb   : > { %15762 = vmatpush1.bf16.msra.mxu1 %v26231_v58  ;;  %15694 = vmatpush1.bf16.msra.mxu0 %v26234_v39  ;;  %v26297_v58 = vld [vmem:[%s28453_s11 + $0x1f00] ss:$40 sps:$4 sm:$0xff]  }
 0xacc   : > { %15763 = vmatprep.subr.bf16.mxu1 %v26239_v14  ;;  %15704 = vmatprep.subr.bf16.mxu0 %v26242_v28  ;;  %v26300_v39 = vld [vmem:[%s28453_s11 + $0x3028] ss:$40 sps:$4 sm:$0xff]   ;;  %v26305_v14 = vld [vmem:[%s28453_s11 + $0x1f54] ss:$40 sps:$4 sm:$0xff]  }
 0xacd   : > { %v26308_v28 = vld [vmem:[%s28453_s11 + $0x307c] ss:$40 sps:$4 sm:$0xff]  }
 0xace   : > { %15696 = vmatmul.mubr.bf16.vlgmr.msra.gmra.mrb[12].mxu0 %v29654_v61 }
 0xacf   : > { %15764 = vmatpush1.bf16.msra.mxu1 %v26237_v17  ;;  %15705 = vmatpush1.bf16.msra.mxu0 %v26240_v19  ;;  %v26303_v17 = vld [vmem:[%s28453_s11 + $0x1f50] ss:$40 sps:$4 sm:$0xff]  }
 0xad0   : > { %15736 = vmatprep.mubr.bf16.mxu0 %v29828_v36  ;;  %15765 = vmatprep.subr.bf16.mxu1 %v26245_v20  ;;  %v26306_v19 = vld [vmem:[%s28453_s11 + $0x3078] ss:$40 sps:$4 sm:$0xff]   ;;  %v26311_v20 = vld [vmem:[%s28453_s11 + $0x1fa4] ss:$40 sps:$4 sm:$0xff]  }
 0xad1   : > { %15706 = vmatprep.subr.bf16.mxu0 %v26248_v59  ;;  %v26314_v59 = vld [vmem:[%s28453_s11 + $0x30cc] ss:$40 sps:$4 sm:$0xff]  }
 0xad3   : > { %15766 = vmatpush1.bf16.msra.mxu1 %v26243_v29  ;;  %15707 = vmatpush1.bf16.msra.mxu0 %v26246_v4  ;;  %v26309_v29 = vld [vmem:[%s28453_s11 + $0x1fa0] ss:$40 sps:$4 sm:$0xff]  }
 0xad4   : > { %15767 = vmatprep.subr.bf16.mxu1 %v26251_v33  ;;  %15708 = vmatprep.subr.bf16.mxu0 %v26254_v35  ;;  %v26312_v4 = vld [vmem:[%s28453_s11 + $0x30c8] ss:$40 sps:$4 sm:$0xff]   ;;  %v26317_v33 = vld [vmem:[%s28453_s11 + $0x1ff4] ss:$40 sps:$4 sm:$0xff]  }
 0xad5   : > { %v26320_v35 = vld [vmem:[%s28453_s11 + $0x311c] ss:$40 sps:$4 sm:$0xff]  }
 0xad7   : > { %15768 = vmatpush1.bf16.msra.mxu1 %v26249_v37  ;;  %15709 = vmatpush1.bf16.msra.mxu0 %v26252_v15  ;;  %v26315_v37 = vld [vmem:[%s28453_s11 + $0x1ff0] ss:$40 sps:$4 sm:$0xff]  }
 0xad8   : > { %15769 = vmatprep.subr.bf16.mxu1 %v26257_v41  ;;  %15710 = vmatprep.subr.bf16.mxu0 %v26260_v42  ;;  %v26318_v15 = vld [vmem:[%s28453_s11 + $0x3118] ss:$40 sps:$4 sm:$0xff]   ;;  %v26323_v41 = vld [vmem:[%s28453_s11 + $0x2044] ss:$40 sps:$4 sm:$0xff]  }
 0xad9   : > { %v26326_v42 = vld [vmem:[%s28453_s11 + $0x316c] ss:$40 sps:$4 sm:$0xff]  }
 0xadb   : > { %15770 = vmatpush1.bf16.msra.mxu1 %v26255_v43  ;;  %15711 = vmatpush1.bf16.msra.mxu0 %v26258_v40  ;;  %v26321_v43 = vld [vmem:[%s28453_s11 + $0x2040] ss:$40 sps:$4 sm:$0xff]  }
 0xadc   : > { %15771 = vmatprep.subr.bf16.mxu1 %v26263_v26  ;;  %15712 = vmatprep.subr.bf16.mxu0 %v26266_v13  ;;  %v26324_v40 = vld [vmem:[%s28453_s11 + $0x3168] ss:$40 sps:$4 sm:$0xff]   ;;  %v26329_v26 = vld [vmem:[%s28453_s11 + $0x2094] ss:$40 sps:$4 sm:$0xff]  }
 0xadd   : > { %v26332_v13 = vld [vmem:[%s28453_s11 + $0x31bc] ss:$40 sps:$4 sm:$0xff]  }
 0xadf   : > { %15772 = vmatpush1.bf16.msra.mxu1 %v26261_v45  ;;  %15713 = vmatpush1.bf16.msra.mxu0 %v26264_v27  ;;  %v26327_v45 = vld [vmem:[%s28453_s11 + $0x2090] ss:$40 sps:$4 sm:$0xff]  }
 0xae0   : > { %15773 = vmatprep.subr.bf16.mxu1 %v26269_v54  ;;  %15714 = vmatprep.subr.bf16.mxu0 %v26272_v47  ;;  %v26330_v27 = vld [vmem:[%s28453_s11 + $0x31b8] ss:$40 sps:$4 sm:$0xff]   ;;  %v26335_v54 = vld [vmem:[%s28453_s11 + $0x20e4] ss:$40 sps:$4 sm:$0xff]  }
 0xae1   : > { %v26338_v47 = vld [vmem:[%s28453_s11 + $0x191c] ss:$40 sps:$4 sm:$0xff]  }
 0xae3   : > { %15774 = vmatpush1.bf16.msra.mxu1 %v26267_v48  ;;  %15715 = vmatpush1.bf16.msra.mxu0 %v26270_v57  ;;  %v26333_v48 = vld [vmem:[%s28453_s11 + $0x20e0] ss:$40 sps:$4 sm:$0xff]  }
 0xae4   : > { %15775 = vmatprep.subr.bf16.mxu1 %v26275_v50  ;;  %15716 = vmatprep.subr.bf16.mxu0 %v26278_v49  ;;  %v26336_v57 = vld [vmem:[%s28453_s11 + $0x1918] ss:$40 sps:$4 sm:$0xff]   ;;  %v26341_v50 = vld [vmem:[%s28453_s11 + $0x2134] ss:$40 sps:$4 sm:$0xff]  }
 0xae5   : > { %v26344_v49 = vld [vmem:[%s28453_s11 + $0x196c] ss:$40 sps:$4 sm:$0xff]  }
 0xae7   : > { %15776 = vmatpush1.bf16.msra.mxu1 %v26273_v51  ;;  %15717 = vmatpush1.bf16.msra.mxu0 %v26276_v21  ;;  %v26339_v51 = vld [vmem:[%s28453_s11 + $0x2130] ss:$40 sps:$4 sm:$0xff]  }
 0xae8   : > { %15786 = vmatprep.subr.bf16.mxu1 %v26281_v56  ;;  %15718 = vmatprep.subr.bf16.mxu0 %v26284_v32  ;;  %v26342_v21 = vld [vmem:[%s28453_s11 + $0x1968] ss:$40 sps:$4 sm:$0xff]   ;;  %v26347_v56 = vld [vmem:[%s28453_s11 + $0x2184] ss:$40 sps:$4 sm:$0xff]  }
 0xae9   : > { %v26350_v32 = vld [vmem:[%s28453_s11 + $0x19bc] ss:$40 sps:$4 sm:$0xff]  }
 0xaea   : > { %15778 = vmatmul.mubr.bf16.vlgmr.msra.gmra.mrb[12].mxu1 %v29397_v44 }
 0xaeb   : > { %15787 = vmatpush1.bf16.msra.mxu1 %v26279_v63  ;;  %15818 = vmatprep.mubr.bf16.mxu1 %v29400_v52  ;;  %v26345_v63 = vld [vmem:[%s28453_s11 + $0x2180] ss:$40 sps:$4 sm:$0xff]  }
 0xaec   : > { %15719 = vmatpush1.bf16.msra.mxu0 %v26282_v1  ;;  %15788 = vmatprep.subr.bf16.mxu1 %v26287_v2  ;;  %v26348_v1 = vld [vmem:[%s28453_s11 + $0x19b8] ss:$40 sps:$4 sm:$0xff]   ;;  %v26353_v2 = vld [vmem:[%s28453_s11 + $0x21d4] ss:$40 sps:$4 sm:$0xff]  }
 0xaed   : > { %15720 = vmatprep.subr.bf16.mxu0 %v26290_v3  ;;  %v26356_v3 = vld [vmem:[%s28453_s11 + $0x1a0c] ss:$40 sps:$4 sm:$0xff]  }
 0xaef   : > { %15789 = vmatpush1.bf16.msra.mxu1 %v26285_v0  ;;  %v26351_v0 = vld [vmem:[%s28453_s11 + $0x21d0] ss:$40 sps:$4 sm:$0xff]  }
 0xaf0   : > { %15721 = vmatpush1.bf16.msra.mxu0 %v26288_v5  ;;  %15790 = vmatprep.subr.bf16.mxu1 %v26293_v10  ;;  %v26354_v5 = vld [vmem:[%s28453_s11 + $0x1a08] ss:$40 sps:$4 sm:$0xff]   ;;  %v26359_v10 = vld [vmem:[%s28453_s11 + $0x2224] ss:$40 sps:$4 sm:$0xff]  }
 0xaf1   : > { %15722 = vmatprep.subr.bf16.mxu0 %v26296_v7  ;;  %v26362_v7 = vld [vmem:[%s28453_s11 + $0x1a5c] ss:$40 sps:$4 sm:$0xff]  }
 0xaf3   : > { %15791 = vmatpush1.bf16.msra.mxu1 %v26291_v8  ;;  %v26357_v8 = vld [vmem:[%s28453_s11 + $0x2220] ss:$40 sps:$4 sm:$0xff]  }
 0xaf4   : > { %15723 = vmatpush1.bf16.msra.mxu0 %v26294_v55  ;;  %15792 = vmatprep.subr.bf16.mxu1 %v26299_v11  ;;  %v26360_v55 = vld [vmem:[%s28453_s11 + $0x1a58] ss:$40 sps:$4 sm:$0xff]   ;;  %v26365_v11 = vld [vmem:[%s28453_s11 + $0x2274] ss:$40 sps:$4 sm:$0xff]  }
 0xaf5   : > { %15724 = vmatprep.subr.bf16.mxu0 %v26302_v12  ;;  %v26368_v12 = vld [vmem:[%s28453_s11 + $0x1aac] ss:$40 sps:$4 sm:$0xff]  }
 0xaf7   : > { %15793 = vmatpush1.bf16.msra.mxu1 %v26297_v58  ;;  %v26363_v58 = vld [vmem:[%s28453_s11 + $0x2270] ss:$40 sps:$4 sm:$0xff]  }
 0xaf8   : > { %15725 = vmatpush1.bf16.msra.mxu0 %v26300_v39  ;;  %15794 = vmatprep.subr.bf16.mxu1 %v26305_v14  ;;  %v26366_v39 = vld [vmem:[%s28453_s11 + $0x1aa8] ss:$40 sps:$4 sm:$0xff]   ;;  %v26371_v14 = vld [vmem:[%s28453_s11 + $0x22c4] ss:$40 sps:$4 sm:$0xff]  }
 0xaf9   : > { %15726 = vmatprep.subr.bf16.mxu0 %v26308_v28  ;;  %v26374_v28 = vld [vmem:[%s28453_s11 + $0x1afc] ss:$40 sps:$4 sm:$0xff]  }
 0xafb   : > { %15795 = vmatpush1.bf16.msra.mxu1 %v26303_v17  ;;  %v26369_v17 = vld [vmem:[%s28453_s11 + $0x22c0] ss:$40 sps:$4 sm:$0xff]  }
 0xafc   : > { %15727 = vmatpush1.bf16.msra.mxu0 %v26306_v19  ;;  %15796 = vmatprep.subr.bf16.mxu1 %v26311_v20  ;;  %v26372_v19 = vld [vmem:[%s28453_s11 + $0x1af8] ss:$40 sps:$4 sm:$0xff]   ;;  %v26377_v20 = vld [vmem:[%s28453_s11 + $0x2314] ss:$40 sps:$4 sm:$0xff]  }
 0xafd   : > { %15728 = vmatprep.subr.bf16.mxu0 %v26314_v59  ;;  %v26380_v59 = vld [vmem:[%s28453_s11 + $0x1b4c] ss:$40 sps:$4 sm:$0xff]  }
 0xaff   : > { %15797 = vmatpush1.bf16.msra.mxu1 %v26309_v29  ;;  %v26375_v29 = vld [vmem:[%s28453_s11 + $0x2310] ss:$40 sps:$4 sm:$0xff]  }
 0xb00   : > { %15729 = vmatpush1.bf16.msra.mxu0 %v26312_v4  ;;  %15798 = vmatprep.subr.bf16.mxu1 %v26317_v33  ;;  %v26378_v4 = vld [vmem:[%s28453_s11 + $0x1b48] ss:$40 sps:$4 sm:$0xff]   ;;  %v26383_v33 = vld [vmem:[%s28453_s11 + $0x2364] ss:$40 sps:$4 sm:$0xff]  }
 0xb01   : > { %15730 = vmatprep.subr.bf16.mxu0 %v26320_v35  ;;  %v26386_v35 = vld [vmem:[%s28453_s11 + $0x1b9c] ss:$40 sps:$4 sm:$0xff]  }
 0xb03   : > { %15799 = vmatpush1.bf16.msra.mxu1 %v26315_v37  ;;  %v26381_v37 = vld [vmem:[%s28453_s11 + $0x2360] ss:$40 sps:$4 sm:$0xff]  }
 0xb04   : > { %15731 = vmatpush1.bf16.msra.mxu0 %v26318_v15  ;;  %15800 = vmatprep.subr.bf16.mxu1 %v26323_v41  ;;  %v26384_v15 = vld [vmem:[%s28453_s11 + $0x1b98] ss:$40 sps:$4 sm:$0xff]   ;;  %v26389_v41 = vld [vmem:[%s28453_s11 + $0x23b4] ss:$40 sps:$4 sm:$0xff]  }
 0xb05   : > { %15732 = vmatprep.subr.bf16.mxu0 %v26326_v42  ;;  %v26392_v42 = vld [vmem:[%s28453_s11 + $0x1bec] ss:$40 sps:$4 sm:$0xff]  }
 0xb07   : > { %15801 = vmatpush1.bf16.msra.mxu1 %v26321_v43  ;;  %v26387_v43 = vld [vmem:[%s28453_s11 + $0x23b0] ss:$40 sps:$4 sm:$0xff]  }
 0xb08   : > { %15733 = vmatpush1.bf16.msra.mxu0 %v26324_v40  ;;  %15802 = vmatprep.subr.bf16.mxu1 %v26329_v26  ;;  %v26390_v40 = vld [vmem:[%s28453_s11 + $0x1be8] ss:$40 sps:$4 sm:$0xff]   ;;  %v26395_v26 = vld [vmem:[%s28453_s11 + $0x2404] ss:$40 sps:$4 sm:$0xff]  }
 0xb09   : > { %15734 = vmatprep.subr.bf16.mxu0 %v26332_v13  ;;  %v26398_v13 = vld [vmem:[%s28453_s11 + $0x1c3c] ss:$40 sps:$4 sm:$0xff]  }
 0xb0b   : > { %15803 = vmatpush1.bf16.msra.mxu1 %v26327_v45  ;;  %v26393_v45 = vld [vmem:[%s28453_s11 + $0x2400] ss:$40 sps:$4 sm:$0xff]  }
 0xb0c   : > { %15735 = vmatpush1.bf16.msra.mxu0 %v26330_v27  ;;  %15804 = vmatprep.subr.bf16.mxu1 %v26335_v54  ;;  %v26396_v27 = vld [vmem:[%s28453_s11 + $0x1c38] ss:$40 sps:$4 sm:$0xff]   ;;  %v26401_v54 = vld [vmem:[%s28453_s11 + $0x2454] ss:$40 sps:$4 sm:$0xff]  }
 0xb0d   : > { %15950 = vmatprep.subr.bf16.mxu0 %v26338_v47  ;;  %v26404_v47 = vld [vmem:[%s28453_s11 + $0x1c8c] ss:$40 sps:$4 sm:$0xff]  }
 0xb0f   : > { %15737 = vmatmul.mubr.bf16.vlgmr.msra.gmra.mrb[12].mxu0 %v29832_v38  ;;  %15805 = vmatpush1.bf16.msra.mxu1 %v26333_v48  ;;  %v26399_v48 = vld [vmem:[%s28453_s11 + $0x2450] ss:$40 sps:$4 sm:$0xff]  }
 0xb10   : > { %15951 = vmatpush1.bf16.msra.mxu0 %v26336_v57  ;;  %15982 = vmatprep.mubr.bf16.mxu0 %v29318_v30  ;;  %v26402_v57 = vld [vmem:[%s28453_s11 + $0x1c88] ss:$40 sps:$4 sm:$0xff]  }
 0xb11   : > { %15806 = vmatprep.subr.bf16.mxu1 %v26341_v50  ;;  %15952 = vmatprep.subr.bf16.mxu0 %v26344_v49  ;;  %v26407_v50 = vld [vmem:[%s28453_s11 + $0x24a4] ss:$40 sps:$4 sm:$0xff]  }
 0xb12   : > { %v26410_v49 = vld [vmem:[%s28453_s11 + $0x1cdc] ss:$40 sps:$4 sm:$0xff]  }
 0xb13   : > { %15807 = vmatpush1.bf16.msra.mxu1 %v26339_v51  ;;  %v26405_v51 = vld [vmem:[%s28453_s11 + $0x24a0] ss:$40 sps:$4 sm:$0xff]  }
 0xb14   : > { %15953 = vmatpush1.bf16.msra.mxu0 %v26342_v21  ;;  %15808 = vmatprep.subr.bf16.mxu1 %v26347_v56  ;;  %v26408_v21 = vld [vmem:[%s28453_s11 + $0x1cd8] ss:$40 sps:$4 sm:$0xff]   ;;  %v26413_v56 = vld [vmem:[%s28453_s11 + $0x24f4] ss:$40 sps:$4 sm:$0xff]  }
 0xb15   : > { %15954 = vmatprep.subr.bf16.mxu0 %v26350_v32  ;;  %v26416_v32 = vld [vmem:[%s28453_s11 + $0x1d2c] ss:$40 sps:$4 sm:$0xff]  }
 0xb17   : > { %15809 = vmatpush1.bf16.msra.mxu1 %v26345_v63  ;;  %v26411_v63 = vld [vmem:[%s28453_s11 + $0x24f0] ss:$40 sps:$4 sm:$0xff]  }
 0xb18   : > { %15955 = vmatpush1.bf16.msra.mxu0 %v26348_v1  ;;  %15810 = vmatprep.subr.bf16.mxu1 %v26353_v2  ;;  %v26414_v1 = vld [vmem:[%s28453_s11 + $0x1d28] ss:$40 sps:$4 sm:$0xff]   ;;  %v26419_v2 = vld [vmem:[%s28453_s11 + $0x2544] ss:$40 sps:$4 sm:$0xff]  }
 0xb19   : > { %15956 = vmatprep.subr.bf16.mxu0 %v26356_v3  ;;  %v26422_v3 = vld [vmem:[%s28453_s11 + $0x1d7c] ss:$40 sps:$4 sm:$0xff]  }
 0xb1b   : > { %15811 = vmatpush1.bf16.msra.mxu1 %v26351_v0  ;;  %v26417_v0 = vld [vmem:[%s28453_s11 + $0x2540] ss:$40 sps:$4 sm:$0xff]  }
 0xb1c   : > { %15957 = vmatpush1.bf16.msra.mxu0 %v26354_v5  ;;  %15812 = vmatprep.subr.bf16.mxu1 %v26359_v10  ;;  %v26420_v5 = vld [vmem:[%s28453_s11 + $0x1d78] ss:$40 sps:$4 sm:$0xff]   ;;  %v26425_v10 = vld [vmem:[%s28453_s11 + $0x2594] ss:$40 sps:$4 sm:$0xff]  }
 0xb1d   : > { %15958 = vmatprep.subr.bf16.mxu0 %v26362_v7  ;;  %v26428_v7 = vld [vmem:[%s28453_s11 + $0x1dcc] ss:$40 sps:$4 sm:$0xff]  }
 0xb1f   : > { %15813 = vmatpush1.bf16.msra.mxu1 %v26357_v8  ;;  %v26423_v8 = vld [vmem:[%s28453_s11 + $0x2590] ss:$40 sps:$4 sm:$0xff]  }
 0xb20   : > { %15959 = vmatpush1.bf16.msra.mxu0 %v26360_v55  ;;  %15814 = vmatprep.subr.bf16.mxu1 %v26365_v11  ;;  %v26426_v55 = vld [vmem:[%s28453_s11 + $0x1dc8] ss:$40 sps:$4 sm:$0xff]   ;;  %v26431_v11 = vld [vmem:[%s28453_s11 + $0x25e4] ss:$40 sps:$4 sm:$0xff]  }
 0xb21   : > { %15960 = vmatprep.subr.bf16.mxu0 %v26368_v12  ;;  %v26434_v12 = vld [vmem:[%s28453_s11 + $0x1e1c] ss:$40 sps:$4 sm:$0xff]  }
 0xb23   : > { %15815 = vmatpush1.bf16.msra.mxu1 %v26363_v58  ;;  %v26429_v58 = vld [vmem:[%s28453_s11 + $0x25e0] ss:$40 sps:$4 sm:$0xff]  }
 0xb24   : > { %15961 = vmatpush1.bf16.msra.mxu0 %v26366_v39  ;;  %15816 = vmatprep.subr.bf16.mxu1 %v26371_v14  ;;  %v26432_v39 = vld [vmem:[%s28453_s11 + $0x1e18] ss:$40 sps:$4 sm:$0xff]   ;;  %v26437_v14 = vld [vmem:[%s28453_s11 + $0x2634] ss:$40 sps:$4 sm:$0xff]  }
 0xb25   : > { %15962 = vmatprep.subr.bf16.mxu0 %v26374_v28  ;;  %v26440_v28 = vld [vmem:[%s28453_s11 + $0x1e6c] ss:$40 sps:$4 sm:$0xff]  }
 0xb27   : > { %15817 = vmatpush1.bf16.msra.mxu1 %v26369_v17  ;;  %v26435_v17 = vld [vmem:[%s28453_s11 + $0x2630] ss:$40 sps:$4 sm:$0xff]  }
 0xb28   : > { %15963 = vmatpush1.bf16.msra.mxu0 %v26372_v19  ;;  %15827 = vmatprep.subr.bf16.mxu1 %v26377_v20  ;;  %v26438_v19 = vld [vmem:[%s28453_s11 + $0x1e68] ss:$40 sps:$4 sm:$0xff]   ;;  %v26443_v20 = vld [vmem:[%s28453_s11 + $0x2684] ss:$40 sps:$4 sm:$0xff]  }
 0xb29   : > { %15964 = vmatprep.subr.bf16.mxu0 %v26380_v59  ;;  %v26446_v59 = vld [vmem:[%s28453_s11 + $0x1ebc] ss:$40 sps:$4 sm:$0xff]  }
 0xb2a   : > { %15819 = vmatmul.mubr.bf16.vlgmr.msra.gmra.mrb[12].mxu1 %v29477_v16 }
 0xb2b   : > { %15828 = vmatpush1.bf16.msra.mxu1 %v26375_v29  ;;  %15859 = vmatprep.mubr.bf16.mxu1 %v29574_v6  ;;  %v26441_v29 = vld [vmem:[%s28453_s11 + $0x2680] ss:$40 sps:$4 sm:$0xff]  }
 0xb2c   : > { %15965 = vmatpush1.bf16.msra.mxu0 %v26378_v4  ;;  %15829 = vmatprep.subr.bf16.mxu1 %v26383_v33  ;;  %v26444_v4 = vld [vmem:[%s28453_s11 + $0x1eb8] ss:$40 sps:$4 sm:$0xff]   ;;  %v26449_v33 = vld [vmem:[%s28453_s11 + $0x26d4] ss:$40 sps:$4 sm:$0xff]  }
 0xb2d   : > { %15966 = vmatprep.subr.bf16.mxu0 %v26386_v35  ;;  %v26452_v35 = vld [vmem:[%s28453_s11 + $0x1f0c] ss:$40 sps:$4 sm:$0xff]  }
 0xb2f   : > { %15830 = vmatpush1.bf16.msra.mxu1 %v26381_v37  ;;  %v26447_v37 = vld [vmem:[%s28453_s11 + $0x26d0] ss:$40 sps:$4 sm:$0xff]  }
 0xb30   : > { %15967 = vmatpush1.bf16.msra.mxu0 %v26384_v15  ;;  %15831 = vmatprep.subr.bf16.mxu1 %v26389_v41  ;;  %v26450_v15 = vld [vmem:[%s28453_s11 + $0x1f08] ss:$40 sps:$4 sm:$0xff]   ;;  %v26455_v41 = vld [vmem:[%s28453_s11 + $0x2724] ss:$40 sps:$4 sm:$0xff]  }
 0xb31   : > { %15968 = vmatprep.subr.bf16.mxu0 %v26392_v42  ;;  %v26458_v42 = vld [vmem:[%s28453_s11 + $0x1f5c] ss:$40 sps:$4 sm:$0xff]  }
 0xb33   : > { %15832 = vmatpush1.bf16.msra.mxu1 %v26387_v43  ;;  %v26453_v43 = vld [vmem:[%s28453_s11 + $0x2720] ss:$40 sps:$4 sm:$0xff]  }
 0xb34   : > { %15969 = vmatpush1.bf16.msra.mxu0 %v26390_v40  ;;  %15833 = vmatprep.subr.bf16.mxu1 %v26395_v26  ;;  %v26456_v40 = vld [vmem:[%s28453_s11 + $0x1f58] ss:$40 sps:$4 sm:$0xff]   ;;  %v26461_v26 = vld [vmem:[%s28453_s11 + $0x2774] ss:$40 sps:$4 sm:$0xff]  }
 0xb35   : > { %15970 = vmatprep.subr.bf16.mxu0 %v26398_v13  ;;  %v26464_v13 = vld [vmem:[%s28453_s11 + $0x1fac] ss:$40 sps:$4 sm:$0xff]  }
 0xb37   : > { %15834 = vmatpush1.bf16.msra.mxu1 %v26393_v45  ;;  %v26459_v45 = vld [vmem:[%s28453_s11 + $0x2770] ss:$40 sps:$4 sm:$0xff]  }
 0xb38   : > { %15971 = vmatpush1.bf16.msra.mxu0 %v26396_v27  ;;  %15835 = vmatprep.subr.bf16.mxu1 %v26401_v54  ;;  %v26462_v27 = vld [vmem:[%s28453_s11 + $0x1fa8] ss:$40 sps:$4 sm:$0xff]   ;;  %v26467_v54 = vld [vmem:[%s28453_s11 + $0x27c4] ss:$40 sps:$4 sm:$0xff]  }
 0xb39   : > { %15972 = vmatprep.subr.bf16.mxu0 %v26404_v47  ;;  %v26470_v47 = vld [vmem:[%s28453_s11 + $0x1ffc] ss:$40 sps:$4 sm:$0xff]  }
 0xb3b   : > { %15836 = vmatpush1.bf16.msra.mxu1 %v26399_v48  ;;  %v26465_v48 = vld [vmem:[%s28453_s11 + $0x27c0] ss:$40 sps:$4 sm:$0xff]  }
 0xb3c   : > { %15973 = vmatpush1.bf16.msra.mxu0 %v26402_v57  ;;  %15837 = vmatprep.subr.bf16.mxu1 %v26407_v50  ;;  %v26468_v57 = vld [vmem:[%s28453_s11 + $0x1ff8] ss:$40 sps:$4 sm:$0xff]   ;;  %v26473_v50 = vld [vmem:[%s28453_s11 + $0x2814] ss:$40 sps:$4 sm:$0xff]  }
 0xb3d   : > { %15974 = vmatprep.subr.bf16.mxu0 %v26410_v49  ;;  %v26476_v49 = vld [vmem:[%s28453_s11 + $0x204c] ss:$40 sps:$4 sm:$0xff]  }
 0xb3f   : > { %15838 = vmatpush1.bf16.msra.mxu1 %v26405_v51  ;;  %v26471_v51 = vld [vmem:[%s28453_s11 + $0x2810] ss:$40 sps:$4 sm:$0xff]  }
 0xb40   : > { %15975 = vmatpush1.bf16.msra.mxu0 %v26408_v21  ;;  %15839 = vmatprep.subr.bf16.mxu1 %v26413_v56  ;;  %v26474_v21 = vld [vmem:[%s28453_s11 + $0x2048] ss:$40 sps:$4 sm:$0xff]   ;;  %v26479_v56 = vld [vmem:[%s28453_s11 + $0x2864] ss:$40 sps:$4 sm:$0xff]  }
 0xb41   : > { %15976 = vmatprep.subr.bf16.mxu0 %v26416_v32  ;;  %v26482_v32 = vld [vmem:[%s28453_s11 + $0x209c] ss:$40 sps:$4 sm:$0xff]  }
 0xb43   : > { %15840 = vmatpush1.bf16.msra.mxu1 %v26411_v63  ;;  %v26477_v63 = vld [vmem:[%s28453_s11 + $0x2860] ss:$40 sps:$4 sm:$0xff]  }
 0xb44   : > { %15977 = vmatpush1.bf16.msra.mxu0 %v26414_v1  ;;  %15841 = vmatprep.subr.bf16.mxu1 %v26419_v2  ;;  %v26480_v1 = vld [vmem:[%s28453_s11 + $0x2098] ss:$40 sps:$4 sm:$0xff]   ;;  %v26485_v2 = vld [vmem:[%s28453_s11 + $0x28b4] ss:$40 sps:$4 sm:$0xff]  }
 0xb45   : > { %15978 = vmatprep.subr.bf16.mxu0 %v26422_v3  ;;  %v26488_v3 = vld [vmem:[%s28453_s11 + $0x20ec] ss:$40 sps:$4 sm:$0xff]  }
 0xb47   : > { %15842 = vmatpush1.bf16.msra.mxu1 %v26417_v0  ;;  %v26483_v0 = vld [vmem:[%s28453_s11 + $0x28b0] ss:$40 sps:$4 sm:$0xff]  }
 0xb48   : > { %15979 = vmatpush1.bf16.msra.mxu0 %v26420_v5  ;;  %15843 = vmatprep.subr.bf16.mxu1 %v26425_v10  ;;  %v26486_v5 = vld [vmem:[%s28453_s11 + $0x20e8] ss:$40 sps:$4 sm:$0xff]   ;;  %v26491_v10 = vld [vmem:[%s28453_s11 + $0x2904] ss:$40 sps:$4 sm:$0xff]  }
 0xb49   : > { %15980 = vmatprep.subr.bf16.mxu0 %v26428_v7  ;;  %v26494_v7 = vld [vmem:[%s28453_s11 + $0x213c] ss:$40 sps:$4 sm:$0xff]  }
 0xb4b   : > { %15844 = vmatpush1.bf16.msra.mxu1 %v26423_v8  ;;  %v26489_v8 = vld [vmem:[%s28453_s11 + $0x2900] ss:$40 sps:$4 sm:$0xff]  }
 0xb4c   : > { %15981 = vmatpush1.bf16.msra.mxu0 %v26426_v55  ;;  %15845 = vmatprep.subr.bf16.mxu1 %v26431_v11  ;;  %v26492_v55 = vld [vmem:[%s28453_s11 + $0x2138] ss:$40 sps:$4 sm:$0xff]   ;;  %v26497_v11 = vld [vmem:[%s28453_s11 + $0x2954] ss:$40 sps:$4 sm:$0xff]  }
 0xb4d   : > { %15991 = vmatprep.subr.bf16.mxu0 %v26434_v12  ;;  %v26500_v12 = vld [vmem:[%s28453_s11 + $0x218c] ss:$40 sps:$4 sm:$0xff]  }
 0xb4f   : > { %15846 = vmatpush1.bf16.msra.mxu1 %v26429_v58  ;;  %15983 = vmatmul.mubr.bf16.vlgmr.msra.gmra.mrb[16].mxu0 %v29397_v44  ;;  %v26495_v58 = vld [vmem:[%s28453_s11 + $0x2950] ss:$40 sps:$4 sm:$0xff]  }
 0xb50   : > { %15992 = vmatpush1.bf16.msra.mxu0 %v26432_v39  ;;  %16023 = vmatprep.mubr.bf16.mxu0 %v29400_v52  ;;  %v30057_v39 = vld [vmem:[%s29289_s26 + $0xa] sm:$0xff] }
 0xb51   : > { %15847 = vmatprep.subr.bf16.mxu1 %v26437_v14  ;;  %15993 = vmatprep.subr.bf16.mxu0 %v26440_v28  ;;  %v26498_v14 = vld [vmem:[%s28453_s11 + $0x2188] ss:$40 sps:$4 sm:$0xff]   ;;  %v26503_v28 = vld [vmem:[%s28453_s11 + $0x29a4] ss:$40 sps:$4 sm:$0xff]  }
 0xb53   : > { %15848 = vmatpush1.bf16.msra.mxu1 %v26435_v17  ;;  %v26506_v17 = vld [vmem:[%s28453_s11 + $0x21dc] ss:$40 sps:$4 sm:$0xff]  }
 0xb54   : > { %15994 = vmatpush1.bf16.msra.mxu0 %v26438_v19  ;;  %15849 = vmatprep.subr.bf16.mxu1 %v26443_v20  ;;  %v11288_v19 = vrot.slane %v30057_v39, %v29370_v9  ;;  %v26501_v20 = vld [vmem:[%s28453_s11 + $0x29a0] ss:$40 sps:$4 sm:$0xff]  }
 0xb55   : > { %15995 = vmatprep.subr.bf16.mxu0 %v26446_v59  ;;  %v11292_v59 = vrot.slane %v30057_v39, %v29295_v62 }
 0xb57   : > { %15850 = vmatpush1.bf16.msra.mxu1 %v26441_v29  ;;  %v26504_v29 = vld [vmem:[%s28453_s11 + $0x21d8] ss:$40 sps:$4 sm:$0xff]  }
 0xb58   : > { %15996 = vmatpush1.bf16.msra.mxu0 %v26444_v4  ;;  %15851 = vmatprep.subr.bf16.mxu1 %v26449_v33  ;;  %v26509_v4 = vld [vmem:[%s28453_s11 + $0x29f4] ss:$40 sps:$4 sm:$0xff]  }
 0xb59   : > { %15997 = vmatprep.subr.bf16.mxu0 %v26452_v35  ;;  %v26512_v35 = vld [vmem:[%s28453_s11 + $0x222c] ss:$40 sps:$4 sm:$0xff]  }
 0xb5b   : > { %15852 = vmatpush1.bf16.msra.mxu1 %v26447_v37 }
 0xb5c   : > { %15998 = vmatpush1.bf16.msra.mxu0 %v26450_v15  ;;  %15853 = vmatprep.subr.bf16.mxu1 %v26455_v41 }
 0xb5d   : > { %15999 = vmatprep.subr.bf16.mxu0 %v26458_v42 }
 0xb5f   : > { %15854 = vmatpush1.bf16.msra.mxu1 %v26453_v43  ;;  %v26507_v43 = vld [vmem:[%s28453_s11 + $0x29f0] ss:$40 sps:$4 sm:$0xff]  }
 0xb60   : > { %16000 = vmatpush1.bf16.msra.mxu0 %v26456_v40  ;;  %15855 = vmatprep.subr.bf16.mxu1 %v26461_v26  ;;  %v26510_v26 = vld [vmem:[%s28453_s11 + $0x2228] ss:$40 sps:$4 sm:$0xff]  }
 0xb61   : > { %16001 = vmatprep.subr.bf16.mxu0 %v26464_v13  ;;  %v26515_v13 = vld [vmem:[%s28453_s11 + $0x2a44] ss:$40 sps:$4 sm:$0xff]  }
 0xb63   : > { %15856 = vmatpush1.bf16.msra.mxu1 %v26459_v45 }
 0xb64   : > { %16002 = vmatpush1.bf16.msra.mxu0 %v26462_v27  ;;  %15857 = vmatprep.subr.bf16.mxu1 %v26467_v54  ;;  %v26518_v27 = vld [vmem:[%s28453_s11 + $0x227c] ss:$40 sps:$4 sm:$0xff]   ;;  %v26513_v54 = vld [vmem:[%s28453_s11 + $0x2a40] ss:$40 sps:$4 sm:$0xff]  }
 0xb65   : > { %16003 = vmatprep.subr.bf16.mxu0 %v26470_v47  ;;  %v26516_v47 = vld [vmem:[%s28453_s11 + $0x2278] ss:$40 sps:$4 sm:$0xff]  }
 0xb67   : > { %15858 = vmatpush1.bf16.msra.mxu1 %v26465_v48  ;;  %v26521_v48 = vld [vmem:[%s28453_s11 + $0x2a94] ss:$40 sps:$4 sm:$0xff]  }
 0xb68   : > { %16004 = vmatpush1.bf16.msra.mxu0 %v26468_v57  ;;  %15868 = vmatprep.subr.bf16.mxu1 %v26473_v50  ;;  %v26524_v57 = vld [vmem:[%s28453_s11 + $0x22cc] ss:$40 sps:$4 sm:$0xff]   ;;  %v26519_v50 = vld [vmem:[%s28453_s11 + $0x2a90] ss:$40 sps:$4 sm:$0xff]  }
 0xb69   : > { %16005 = vmatprep.subr.bf16.mxu0 %v26476_v49  ;;  %v26522_v49 = vld [vmem:[%s28453_s11 + $0x22c8] ss:$40 sps:$4 sm:$0xff]  }
 0xb6a   : > { %15860 = vmatmul.mubr.bf16.vlgmr.msra.gmra.mrb[12].mxu1 %v29578_v53 }
 0xb6b   : > { %15869 = vmatpush1.bf16.msra.mxu1 %v26471_v51  ;;  %15900 = vmatprep.mubr.bf16.mxu1 %v29583_v25  ;;  %v26527_v51 = vld [vmem:[%s28453_s11 + $0x2ae4] ss:$40 sps:$4 sm:$0xff]  }
 0xb6c   : > { %16006 = vmatpush1.bf16.msra.mxu0 %v26474_v21  ;;  %15870 = vmatprep.subr.bf16.mxu1 %v26479_v56  ;;  %v26530_v21 = vld [vmem:[%s28453_s11 + $0x231c] ss:$40 sps:$4 sm:$0xff]   ;;  %v26525_v56 = vld [vmem:[%s28453_s11 + $0x2ae0] ss:$40 sps:$4 sm:$0xff]  }
 0xb6d   : > { %16007 = vmatprep.subr.bf16.mxu0 %v26482_v32  ;;  %v26528_v32 = vld [vmem:[%s28453_s11 + $0x2318] ss:$40 sps:$4 sm:$0xff]  }
 0xb6f   : > { %15871 = vmatpush1.bf16.msra.mxu1 %v26477_v63  ;;  %v26533_v63 = vld [vmem:[%s28453_s11 + $0x2b34] ss:$40 sps:$4 sm:$0xff]  }
 0xb70   : > { %16008 = vmatpush1.bf16.msra.mxu0 %v26480_v1  ;;  %15872 = vmatprep.subr.bf16.mxu1 %v26485_v2  ;;  %v26536_v1 = vld [vmem:[%s28453_s11 + $0x236c] ss:$40 sps:$4 sm:$0xff]   ;;  %v26531_v2 = vld [vmem:[%s28453_s11 + $0x2b30] ss:$40 sps:$4 sm:$0xff]  }
 0xb71   : > { %16009 = vmatprep.subr.bf16.mxu0 %v26488_v3  ;;  %v26534_v3 = vld [vmem:[%s28453_s11 + $0x2368] ss:$40 sps:$4 sm:$0xff]  }
 0xb73   : > { %15873 = vmatpush1.bf16.msra.mxu1 %v26483_v0  ;;  %v26539_v0 = vld [vmem:[%s28453_s11 + $0x2b84] ss:$40 sps:$4 sm:$0xff]  }
 0xb74   : > { %16010 = vmatpush1.bf16.msra.mxu0 %v26486_v5  ;;  %15874 = vmatprep.subr.bf16.mxu1 %v26491_v10  ;;  %v26542_v5 = vld [vmem:[%s28453_s11 + $0x23bc] ss:$40 sps:$4 sm:$0xff]   ;;  %v26537_v10 = vld [vmem:[%s28453_s11 + $0x2b80] ss:$40 sps:$4 sm:$0xff]  }
 0xb75   : > { %16011 = vmatprep.subr.bf16.mxu0 %v26494_v7  ;;  %v26540_v7 = vld [vmem:[%s28453_s11 + $0x23b8] ss:$40 sps:$4 sm:$0xff]  }
 0xb77   : > { %15875 = vmatpush1.bf16.msra.mxu1 %v26489_v8  ;;  %v26545_v8 = vld [vmem:[%s28453_s11 + $0x2bd4] ss:$40 sps:$4 sm:$0xff]  }
 0xb78   : > { %16012 = vmatpush1.bf16.msra.mxu0 %v26492_v55  ;;  %15876 = vmatprep.subr.bf16.mxu1 %v26497_v11  ;;  %v26548_v55 = vld [vmem:[%s28453_s11 + $0x240c] ss:$40 sps:$4 sm:$0xff]   ;;  %v26543_v11 = vld [vmem:[%s28453_s11 + $0x2bd0] ss:$40 sps:$4 sm:$0xff]  }
 0xb79   : > { %16013 = vmatprep.subr.bf16.mxu0 %v26500_v12  ;;  %v26546_v12 = vld [vmem:[%s28453_s11 + $0x2408] ss:$40 sps:$4 sm:$0xff]  }
 0xb7b   : > { %15877 = vmatpush1.bf16.msra.mxu1 %v26495_v58  ;;  %v26551_v58 = vld [vmem:[%s28453_s11 + $0x2c24] ss:$40 sps:$4 sm:$0xff]  }
 0xb7c   : > { %16014 = vmatpush1.bf16.msra.mxu0 %v26498_v14  ;;  %15878 = vmatprep.subr.bf16.mxu1 %v26503_v28  ;;  %v26554_v14 = vld [vmem:[%s28453_s11 + $0x245c] ss:$40 sps:$4 sm:$0xff]   ;;  %v26549_v28 = vld [vmem:[%s28453_s11 + $0x2c20] ss:$40 sps:$4 sm:$0xff]  }
 0xb7d   : > { %v15533_v33 = vpop.f32.mrb[8].mxu1  ;;  %16015 = vmatprep.subr.bf16.mxu0 %v26506_v17  ;;  %v26552_v17 = vld [vmem:[%s28453_s11 + $0x2458] ss:$40 sps:$4 sm:$0xff]  }
 0xb7e   : > { %v30070_v37 = vadd.f32 %v15533_v33, %v11288_v19  ;;  %v15535_v15 = vpop.f32.mrb[9].mxu1  ;;  %v26557_v19 = vld [vmem:[%s28453_s11 + $0x2c74] ss:$40 sps:$4 sm:$0xff]  }
 0xb7f   : > { %v30072_v41 = vadd.f32 %v15535_v15, %v11292_v59  ;;  %15879 = vmatpush1.bf16.msra.mxu1 %v26501_v20  ;;  %v15537_v42 = vpop.f32.mrb[10].mxu1  ;;  %v26560_v20 = vld [vmem:[%s28453_s11 + $0x24ac] ss:$40 sps:$4 sm:$0xff]   ;;  %v26555_v59 = vld [vmem:[%s28453_s11 + $0x2c70] ss:$40 sps:$4 sm:$0xff]  }
 0xb80   : > { %16016 = vmatpush1.bf16.msra.mxu0 %v26504_v29  ;;  %v15538_v40 = vpop.f32.mrb[11].mxu1  ;;  %15880 = vmatprep.subr.bf16.mxu1 %v26509_v4  ;;  %v26558_v29 = vld [vmem:[%s28453_s11 + $0x24a8] ss:$40 sps:$4 sm:$0xff]   ;;  %v26563_v4 = vld [vmem:[%s28453_s11 + $0x2cc4] ss:$40 sps:$4 sm:$0xff]  }
 0xb81   : > { %v16370_v45 = vcombine.low %v30070_v37, %v30072_v41  ;;  %16017 = vmatprep.subr.bf16.mxu0 %v26512_v35  ;;  %v26566_v33 = vld [vmem:[%s28453_s11 + $0x24fc] ss:$40 sps:$4 sm:$0xff]   ;;  %v26561_v35 = vld [vmem:[%s28453_s11 + $0x2cc0] ss:$40 sps:$4 sm:$0xff]   ;;  %v26567_v40 = vld [vmem:[%s28453_s11 + $0x2d10] ss:$40 sps:$4 sm:$0xff]  }
 0xb82   : > { %v26564_v15 = vld [vmem:[%s28453_s11 + $0x24f8] ss:$40 sps:$4 sm:$0xff]   ;;  %v26569_v42 = vld [vmem:[%s28453_s11 + $0x2d14] ss:$40 sps:$4 sm:$0xff]  }
 0xb83   : > { %15881 = vmatpush1.bf16.msra.mxu1 %v26507_v43  ;;  %v26572_v43 = vld [vmem:[%s28453_s11 + $0x254c] ss:$40 sps:$4 sm:$0xff]   ;;  %v26669_v37 = vld [vmem:[%s28453_s11 + $0x1970] ss:$40 sps:$4 sm:$0xff]   ;;  %v26980_v41 = vld [vmem:[#allocation3] sm:$0xff] }
 0xb84   : > { %16018 = vmatpush1.bf16.msra.mxu0 %v26510_v26  ;;  %15882 = vmatprep.subr.bf16.mxu1 %v26515_v13  ;;  %v26570_v26 = vld [vmem:[%s28453_s11 + $0x2548] ss:$40 sps:$4 sm:$0xff]   ;;  %v26575_v13 = vld [vmem:[%s28453_s11 + $0x2d64] ss:$40 sps:$4 sm:$0xff]  }
 0xb85   : > { %16019 = vmatprep.subr.bf16.mxu0 %v26518_v27  ;;  %v26578_v27 = vld [vmem:[%s28453_s11 + $0x259c] ss:$40 sps:$4 sm:$0xff]  }
 0xb87   : > { %15883 = vmatpush1.bf16.msra.mxu1 %v26513_v54  ;;  %v26573_v54 = vld [vmem:[%s28453_s11 + $0x2d60] ss:$40 sps:$4 sm:$0xff]  }
 0xb88   : > { %16020 = vmatpush1.bf16.msra.mxu0 %v26516_v47  ;;  %15884 = vmatprep.subr.bf16.mxu1 %v26521_v48  ;;  %v26576_v47 = vld [vmem:[%s28453_s11 + $0x2598] ss:$40 sps:$4 sm:$0xff]   ;;  %v26581_v48 = vld [vmem:[%s28453_s11 + $0x2db4] ss:$40 sps:$4 sm:$0xff]  }
 0xb89   : > { %16021 = vmatprep.subr.bf16.mxu0 %v26524_v57  ;;  %v26584_v57 = vld [vmem:[%s28453_s11 + $0x25ec] ss:$40 sps:$4 sm:$0xff]  }
 0xb8b   : > { %15885 = vmatpush1.bf16.msra.mxu1 %v26519_v50  ;;  %v26579_v50 = vld [vmem:[%s28453_s11 + $0x2db0] ss:$40 sps:$4 sm:$0xff]  }
 0xb8c   : > { %16022 = vmatpush1.bf16.msra.mxu0 %v26522_v49  ;;  %15886 = vmatprep.subr.bf16.mxu1 %v26527_v51  ;;  %v26582_v49 = vld [vmem:[%s28453_s11 + $0x25e8] ss:$40 sps:$4 sm:$0xff]   ;;  %v26587_v51 = vld [vmem:[%s28453_s11 + $0x2e04] ss:$40 sps:$4 sm:$0xff]  }
 0xb8d   : > { %16032 = vmatprep.subr.bf16.mxu0 %v26530_v21  ;;  %v26590_v21 = vld [vmem:[%s28453_s11 + $0x263c] ss:$40 sps:$4 sm:$0xff]  }
 0xb8f   : > { %15887 = vmatpush1.bf16.msra.mxu1 %v26525_v56  ;;  %16024 = vmatmul.mubr.bf16.vlgmr.msra.gmra.mrb[16].mxu0 %v29477_v16  ;;  %v26585_v56 = vld [vmem:[%s28453_s11 + $0x2e00] ss:$40 sps:$4 sm:$0xff]  }
 0xb90   : > { %16033 = vmatpush1.bf16.msra.mxu0 %v26528_v32  ;;  %16064 = vmatprep.mubr.bf16.mxu0 %v29574_v6  ;;  %v26588_v32 = vld [vmem:[%s28453_s11 + $0x2638] ss:$40 sps:$4 sm:$0xff]  }
 0xb91   : > { %15888 = vmatprep.subr.bf16.mxu1 %v26533_v63  ;;  %16034 = vmatprep.subr.bf16.mxu0 %v26536_v1  ;;  %v26593_v63 = vld [vmem:[%s28453_s11 + $0x2e54] ss:$40 sps:$4 sm:$0xff]  }
 0xb92   : > { %v26596_v1 = vld [vmem:[%s28453_s11 + $0x268c] ss:$40 sps:$4 sm:$0xff]  }
 0xb93   : > { %15889 = vmatpush1.bf16.msra.mxu1 %v26531_v2  ;;  %v26591_v2 = vld [vmem:[%s28453_s11 + $0x2e50] ss:$40 sps:$4 sm:$0xff]  }
 0xb94   : > { %16035 = vmatpush1.bf16.msra.mxu0 %v26534_v3  ;;  %15890 = vmatprep.subr.bf16.mxu1 %v26539_v0  ;;  %v26594_v3 = vld [vmem:[%s28453_s11 + $0x2688] ss:$40 sps:$4 sm:$0xff]   ;;  %v26599_v0 = vld [vmem:[%s28453_s11 + $0x2ea4] ss:$40 sps:$4 sm:$0xff]  }
 0xb95   : > { %16036 = vmatprep.subr.bf16.mxu0 %v26542_v5  ;;  %v26602_v5 = vld [vmem:[%s28453_s11 + $0x26dc] ss:$40 sps:$4 sm:$0xff]  }
 0xb97   : > { %15891 = vmatpush1.bf16.msra.mxu1 %v26537_v10  ;;  %v26597_v10 = vld [vmem:[%s28453_s11 + $0x2ea0] ss:$40 sps:$4 sm:$0xff]  }
 0xb98   : > { %16037 = vmatpush1.bf16.msra.mxu0 %v26540_v7  ;;  %15892 = vmatprep.subr.bf16.mxu1 %v26545_v8  ;;  %v26600_v7 = vld [vmem:[%s28453_s11 + $0x26d8] ss:$40 sps:$4 sm:$0xff]   ;;  %v26605_v8 = vld [vmem:[%s28453_s11 + $0x2ef4] ss:$40 sps:$4 sm:$0xff]  }
 0xb99   : > { %16038 = vmatprep.subr.bf16.mxu0 %v26548_v55  ;;  %v26608_v55 = vld [vmem:[%s28453_s11 + $0x272c] ss:$40 sps:$4 sm:$0xff]  }
 0xb9b   : > { %15893 = vmatpush1.bf16.msra.mxu1 %v26543_v11  ;;  %v26603_v11 = vld [vmem:[%s28453_s11 + $0x2ef0] ss:$40 sps:$4 sm:$0xff]  }
 0xb9c   : > { %16039 = vmatpush1.bf16.msra.mxu0 %v26546_v12  ;;  %15894 = vmatprep.subr.bf16.mxu1 %v26551_v58  ;;  %v26606_v12 = vld [vmem:[%s28453_s11 + $0x2728] ss:$40 sps:$4 sm:$0xff]   ;;  %v26611_v58 = vld [vmem:[%s28453_s11 + $0x2f44] ss:$40 sps:$4 sm:$0xff]  }
 0xb9d   : > { %16040 = vmatprep.subr.bf16.mxu0 %v26554_v14  ;;  %v26614_v14 = vld [vmem:[%s28453_s11 + $0x277c] ss:$40 sps:$4 sm:$0xff]  }
 0xb9f   : > { %15895 = vmatpush1.bf16.msra.mxu1 %v26549_v28  ;;  %v26609_v28 = vld [vmem:[%s28453_s11 + $0x2f40] ss:$40 sps:$4 sm:$0xff]  }
 0xba0   : > { %16041 = vmatpush1.bf16.msra.mxu0 %v26552_v17  ;;  %15896 = vmatprep.subr.bf16.mxu1 %v26557_v19  ;;  %v26612_v17 = vld [vmem:[%s28453_s11 + $0x2778] ss:$40 sps:$4 sm:$0xff]   ;;  %v26617_v19 = vld [vmem:[%s28453_s11 + $0x2f94] ss:$40 sps:$4 sm:$0xff]  }
 0xba1   : > { %16042 = vmatprep.subr.bf16.mxu0 %v26560_v20  ;;  %v26620_v20 = vld [vmem:[%s28453_s11 + $0x27cc] ss:$40 sps:$4 sm:$0xff]  }
 0xba3   : > { %15897 = vmatpush1.bf16.msra.mxu1 %v26555_v59  ;;  %v26615_v59 = vld [vmem:[%s28453_s11 + $0x2f90] ss:$40 sps:$4 sm:$0xff]  }
 0xba4   : > { %16043 = vmatpush1.bf16.msra.mxu0 %v26558_v29  ;;  %15898 = vmatprep.subr.bf16.mxu1 %v26563_v4  ;;  %v26618_v29 = vld [vmem:[%s28453_s11 + $0x27c8] ss:$40 sps:$4 sm:$0xff]   ;;  %v26623_v4 = vld [vmem:[%s28453_s11 + $0x2fe4] ss:$40 sps:$4 sm:$0xff]  }
 0xba5   : > { %16044 = vmatprep.subr.bf16.mxu0 %v26566_v33  ;;  %v26626_v33 = vld [vmem:[%s28453_s11 + $0x281c] ss:$40 sps:$4 sm:$0xff]  }
 0xba7   : > { %15899 = vmatpush1.bf16.msra.mxu1 %v26561_v35  ;;  %v26621_v35 = vld [vmem:[%s28453_s11 + $0x2fe0] ss:$40 sps:$4 sm:$0xff]  }
 0xba8   : > { %16045 = vmatpush1.bf16.msra.mxu0 %v26564_v15  ;;  %15909 = vmatprep.subr.bf16.mxu1 %v26569_v42  ;;  %v26624_v15 = vld [vmem:[%s28453_s11 + $0x2818] ss:$40 sps:$4 sm:$0xff]   ;;  %v26629_v42 = vld [vmem:[%s28453_s11 + $0x3034] ss:$40 sps:$4 sm:$0xff]  }
 0xba9   : > { %16046 = vmatprep.subr.bf16.mxu0 %v26572_v43  ;;  %v26632_v43 = vld [vmem:[%s28453_s11 + $0x286c] ss:$40 sps:$4 sm:$0xff]  }
 0xbaa   : > { %15901 = vmatmul.mubr.bf16.vlgmr.msra.gmra.mrb[12].mxu1 %v29654_v61 }
 0xbab   : > { %15910 = vmatpush1.bf16.msra.mxu1 %v26567_v40  ;;  %15941 = vmatprep.mubr.bf16.mxu1 %v29828_v36  ;;  %v26627_v40 = vld [vmem:[%s28453_s11 + $0x3030] ss:$40 sps:$4 sm:$0xff]  }
 0xbac   : > { %16047 = vmatpush1.bf16.msra.mxu0 %v26570_v26  ;;  %15911 = vmatprep.subr.bf16.mxu1 %v26575_v13  ;;  %v26630_v26 = vld [vmem:[%s28453_s11 + $0x2868] ss:$40 sps:$4 sm:$0xff]   ;;  %v26635_v13 = vld [vmem:[%s28453_s11 + $0x3084] ss:$40 sps:$4 sm:$0xff]  }
 0xbad   : > { %16048 = vmatprep.subr.bf16.mxu0 %v26578_v27  ;;  %v26638_v27 = vld [vmem:[%s28453_s11 + $0x28bc] ss:$40 sps:$4 sm:$0xff]  }
 0xbaf   : > { %15912 = vmatpush1.bf16.msra.mxu1 %v26573_v54  ;;  %v26633_v54 = vld [vmem:[%s28453_s11 + $0x3080] ss:$40 sps:$4 sm:$0xff]  }
 0xbb0   : > { %16049 = vmatpush1.bf16.msra.mxu0 %v26576_v47  ;;  %15913 = vmatprep.subr.bf16.mxu1 %v26581_v48  ;;  %v26636_v47 = vld [vmem:[%s28453_s11 + $0x28b8] ss:$40 sps:$4 sm:$0xff]   ;;  %v26641_v48 = vld [vmem:[%s28453_s11 + $0x30d4] ss:$40 sps:$4 sm:$0xff]  }
 0xbb1   : > { %16050 = vmatprep.subr.bf16.mxu0 %v26584_v57  ;;  %v26644_v57 = vld [vmem:[%s28453_s11 + $0x290c] ss:$40 sps:$4 sm:$0xff]  }
 0xbb3   : > { %15914 = vmatpush1.bf16.msra.mxu1 %v26579_v50  ;;  %v26639_v50 = vld [vmem:[%s28453_s11 + $0x30d0] ss:$40 sps:$4 sm:$0xff]  }
 0xbb4   : > { %16051 = vmatpush1.bf16.msra.mxu0 %v26582_v49  ;;  %15915 = vmatprep.subr.bf16.mxu1 %v26587_v51  ;;  %v26642_v49 = vld [vmem:[%s28453_s11 + $0x2908] ss:$40 sps:$4 sm:$0xff]   ;;  %v26647_v51 = vld [vmem:[%s28453_s11 + $0x3124] ss:$40 sps:$4 sm:$0xff]  }
 0xbb5   : > { %16052 = vmatprep.subr.bf16.mxu0 %v26590_v21  ;;  %v26650_v21 = vld [vmem:[%s28453_s11 + $0x295c] ss:$40 sps:$4 sm:$0xff]  }
 0xbb7   : > { %15916 = vmatpush1.bf16.msra.mxu1 %v26585_v56  ;;  %v26645_v56 = vld [vmem:[%s28453_s11 + $0x3120] ss:$40 sps:$4 sm:$0xff]  }
 0xbb8   : > { %16053 = vmatpush1.bf16.msra.mxu0 %v26588_v32  ;;  %15917 = vmatprep.subr.bf16.mxu1 %v26593_v63  ;;  %v26648_v32 = vld [vmem:[%s28453_s11 + $0x2958] ss:$40 sps:$4 sm:$0xff]   ;;  %v26653_v63 = vld [vmem:[%s28453_s11 + $0x3174] ss:$40 sps:$4 sm:$0xff]  }
 0xbb9   : > { %16054 = vmatprep.subr.bf16.mxu0 %v26596_v1  ;;  %v26656_v1 = vld [vmem:[%s28453_s11 + $0x29ac] ss:$40 sps:$4 sm:$0xff]  }
 0xbbb   : > { %15918 = vmatpush1.bf16.msra.mxu1 %v26591_v2  ;;  %v11296_v2 = vrot.slane %v30057_v39, %v29453_v60 }
 0xbbc   : > { %16055 = vmatpush1.bf16.msra.mxu0 %v26594_v3  ;;  %15919 = vmatprep.subr.bf16.mxu1 %v26599_v0  ;;  %v26651_v3 = vld [vmem:[%s28453_s11 + $0x3170] ss:$40 sps:$4 sm:$0xff]   ;;  %v11300_v0 = vrot.slane %v30057_v39, %v29374_v31  ;;  %v26665_v39 = vld [vmem:[%s28453_s11 + $0x1924] ss:$40 sps:$4 sm:$0xff]  }
 0xbbd   : > { %16056 = vmatprep.subr.bf16.mxu0 %v26602_v5  ;;  %v26654_v5 = vld [vmem:[%s28453_s11 + $0x29a8] ss:$40 sps:$4 sm:$0xff]  }
 0xbbf   : > { %15920 = vmatpush1.bf16.msra.mxu1 %v26597_v10  ;;  %v26659_v10 = vld [vmem:[%s28453_s11 + $0x31c4] ss:$40 sps:$4 sm:$0xff]  }
 0xbc0   : > { %16057 = vmatpush1.bf16.msra.mxu0 %v26600_v7  ;;  %15921 = vmatprep.subr.bf16.mxu1 %v26605_v8  ;;  %v26662_v7 = vld [vmem:[%s28453_s11 + $0x29fc] ss:$40 sps:$4 sm:$0xff]  }
 0xbc1   : > { %16058 = vmatprep.subr.bf16.mxu0 %v26608_v55 }
 0xbc3   : > { %15922 = vmatpush1.bf16.msra.mxu1 %v26603_v11 }
 0xbc4   : > { %16059 = vmatpush1.bf16.msra.mxu0 %v26606_v12  ;;  %15923 = vmatprep.subr.bf16.mxu1 %v26611_v58  ;;  %v26657_v12 = vld [vmem:[%s28453_s11 + $0x31c0] ss:$40 sps:$4 sm:$0xff]  }
 0xbc5   : > { %16060 = vmatprep.subr.bf16.mxu0 %v26614_v14 }
 0xbc7   : > { %15924 = vmatpush1.bf16.msra.mxu1 %v26609_v28  ;;  %v26660_v28 = vld [vmem:[%s28453_s11 + $0x29f8] ss:$40 sps:$4 sm:$0xff]  }
 0xbc8   : > { %16061 = vmatpush1.bf16.msra.mxu0 %v26612_v17  ;;  %15925 = vmatprep.subr.bf16.mxu1 %v26617_v19  ;;  %v26668_v19 = vld [vmem:[%s28453_s11 + $0x2a4c] ss:$40 sps:$4 sm:$0xff]  }
 0xbc9   : > { %16062 = vmatprep.subr.bf16.mxu0 %v26620_v20 }
 0xbcb   : > { %15926 = vmatpush1.bf16.msra.mxu1 %v26615_v59  ;;  %v26663_v59 = vld [vmem:[%s28453_s11 + $0x1920] ss:$40 sps:$4 sm:$0xff]  }
 0xbcc   : > { %16063 = vmatpush1.bf16.msra.mxu0 %v26618_v29  ;;  %15927 = vmatprep.subr.bf16.mxu1 %v26623_v4  ;;  %v16378_v29 = vrot.slane %v16370_v45, %v28601_v34 }
 0xbcd   : > { %16073 = vmatprep.subr.bf16.mxu0 %v26626_v33  ;;  %v26666_v33 = vld [vmem:[%s28453_s11 + $0x2a48] ss:$40 sps:$4 sm:$0xff]  }
 0xbcf   : > { %15928 = vmatpush1.bf16.msra.mxu1 %v26621_v35  ;;  %16065 = vmatmul.mubr.bf16.vlgmr.msra.gmra.mrb[16].mxu0 %v29578_v53  ;;  %v26671_v35 = vld [vmem:[%s28453_s11 + $0x1974] ss:$40 sps:$4 sm:$0xff]  }
 0xbd0   : > { %16074 = vmatpush1.bf16.msra.mxu0 %v26624_v15  ;;  %16105 = vmatprep.mubr.bf16.mxu0 %v29583_v25  ;;  %v26674_v15 = vld [vmem:[%s28453_s11 + $0x2a9c] ss:$40 sps:$4 sm:$0xff]  }
 0xbd1   : > { %15929 = vmatprep.subr.bf16.mxu1 %v26629_v42  ;;  %16075 = vmatprep.subr.bf16.mxu0 %v26632_v43  ;;  %v26672_v43 = vld [vmem:[%s28453_s11 + $0x2a98] ss:$40 sps:$4 sm:$0xff]  }
 0xbd3   : > { %15930 = vmatpush1.bf16.msra.mxu1 %v26627_v40  ;;  %v26677_v40 = vld [vmem:[%s28453_s11 + $0x19c4] ss:$40 sps:$4 sm:$0xff]  }
 0xbd4   : > { %16076 = vmatpush1.bf16.msra.mxu0 %v26630_v26  ;;  %15931 = vmatprep.subr.bf16.mxu1 %v26635_v13  ;;  %v26680_v26 = vld [vmem:[%s28453_s11 + $0x2aec] ss:$40 sps:$4 sm:$0xff]  }
 0xbd5   : > { %16077 = vmatprep.subr.bf16.mxu0 %v26638_v27  ;;  %v26678_v27 = vld [vmem:[%s28453_s11 + $0x2ae8] ss:$40 sps:$4 sm:$0xff]  }
 0xbd7   : > { %15932 = vmatpush1.bf16.msra.mxu1 %v26633_v54  ;;  %v26683_v54 = vld [vmem:[%s28453_s11 + $0x1a14] ss:$40 sps:$4 sm:$0xff]  }
 0xbd8   : > { %16078 = vmatpush1.bf16.msra.mxu0 %v26636_v47  ;;  %15933 = vmatprep.subr.bf16.mxu1 %v26641_v48  ;;  %v26686_v47 = vld [vmem:[%s28453_s11 + $0x2b3c] ss:$40 sps:$4 sm:$0xff]   ;;  %v26681_v48 = vld [vmem:[%s28453_s11 + $0x1a10] ss:$40 sps:$4 sm:$0xff]  }
 0xbd9   : > { %16079 = vmatprep.subr.bf16.mxu0 %v26644_v57  ;;  %v26684_v57 = vld [vmem:[%s28453_s11 + $0x2b38] ss:$40 sps:$4 sm:$0xff]  }
 0xbdb   : > { %15934 = vmatpush1.bf16.msra.mxu1 %v26639_v50  ;;  %v26689_v50 = vld [vmem:[%s28453_s11 + $0x1a64] ss:$40 sps:$4 sm:$0xff]  }
 0xbdc   : > { %16080 = vmatpush1.bf16.msra.mxu0 %v26642_v49  ;;  %15935 = vmatprep.subr.bf16.mxu1 %v26647_v51  ;;  %v26692_v49 = vld [vmem:[%s28453_s11 + $0x2b8c] ss:$40 sps:$4 sm:$0xff]   ;;  %v26687_v51 = vld [vmem:[%s28453_s11 + $0x1a60] ss:$40 sps:$4 sm:$0xff]  }
 0xbdd   : > { %16081 = vmatprep.subr.bf16.mxu0 %v26650_v21  ;;  %v26690_v21 = vld [vmem:[%s28453_s11 + $0x2b88] ss:$40 sps:$4 sm:$0xff]  }
 0xbdf   : > { %15936 = vmatpush1.bf16.msra.mxu1 %v26645_v56  ;;  %v26695_v56 = vld [vmem:[%s28453_s11 + $0x1ab4] ss:$40 sps:$4 sm:$0xff]  }
 0xbe0   : > { %16082 = vmatpush1.bf16.msra.mxu0 %v26648_v32  ;;  %15937 = vmatprep.subr.bf16.mxu1 %v26653_v63  ;;  %v26698_v32 = vld [vmem:[%s28453_s11 + $0x2bdc] ss:$40 sps:$4 sm:$0xff]   ;;  %v26693_v63 = vld [vmem:[%s28453_s11 + $0x1ab0] ss:$40 sps:$4 sm:$0xff]  }
 0xbe1   : > { %16083 = vmatprep.subr.bf16.mxu0 %v26656_v1  ;;  %v26696_v1 = vld [vmem:[%s28453_s11 + $0x2bd8] ss:$40 sps:$4 sm:$0xff]  }
 0xbe2   : > { %v15738_v8 = vpop.f32.mrb[12].mxu0 }
 0xbe3   : > { %v23437_v55 = vadd.f32 %v15738_v8, %v11296_v2  ;;  %v15740_v11 = vpop.f32.mrb[13].mxu0  ;;  %15938 = vmatpush1.bf16.msra.mxu1 %v26651_v3  ;;  %v26701_v2 = vld [vmem:[%s28453_s11 + $0x1b04] ss:$40 sps:$4 sm:$0xff]   ;;  %v26705_v8 = vld [vmem:[%s28453_s11 + $0x1b50] ss:$40 sps:$4 sm:$0xff]  }
 0xbe4   : > { %v23438_v58 = vadd.f32 %v15740_v11, %v11300_v0  ;;  %v15742_v14 = vpop.f32.mrb[14].mxu0  ;;  %16084 = vmatpush1.bf16.msra.mxu0 %v26654_v5  ;;  %15939 = vmatprep.subr.bf16.mxu1 %v26659_v10  ;;  %v26704_v3 = vld [vmem:[%s28453_s11 + $0x2c2c] ss:$40 sps:$4 sm:$0xff]   ;;  %v26699_v0 = vld [vmem:[%s28453_s11 + $0x1b00] ss:$40 sps:$4 sm:$0xff]  }
 0xbe5   : > { %v15743_v17 = vpop.f32.mrb[15].mxu0  ;;  %16085 = vmatprep.subr.bf16.mxu0 %v26662_v7  ;;  %v26702_v5 = vld [vmem:[%s28453_s11 + $0x2c28] ss:$40 sps:$4 sm:$0xff]   ;;  %v26707_v10 = vld [vmem:[%s28453_s11 + $0x1b54] ss:$40 sps:$4 sm:$0xff]  }
 0xbe6   : > { %v16371_v20 = vcombine.low %v23437_v55, %v23438_v58  ;;  %v26710_v7 = vld [vmem:[%s28453_s11 + $0x2c7c] ss:$40 sps:$4 sm:$0xff]   ;;  %v26708_v55 = vld [vmem:[%s28453_s11 + $0x2c78] ss:$40 sps:$4 sm:$0xff]   ;;  %v26714_v14 = vld [vmem:[%s28453_s11 + $0x2cc8] ss:$40 sps:$4 sm:$0xff]  }
 0xbe7   : > { %15940 = vmatpush1.bf16.msra.mxu1 %v26657_v12  ;;  %v26713_v11 = vld [vmem:[%s28453_s11 + $0x1ba4] ss:$40 sps:$4 sm:$0xff]   ;;  %v26711_v58 = vld [vmem:[%s28453_s11 + $0x1ba0] ss:$40 sps:$4 sm:$0xff]   ;;  %v26717_v17 = vld [vmem:[%s28453_s11 + $0x1bf0] ss:$40 sps:$4 sm:$0xff]  }
 0xbe8   : > { %v16385_v4 = vrot.slane %v16371_v20, %v28601_v34  ;;  %16086 = vmatpush1.bf16.msra.mxu0 %v26660_v28  ;;  %16155 = vmatprep.subr.bf16.mxu1 %v26665_v39  ;;  %v26716_v12 = vld [vmem:[%s28453_s11 + $0x2ccc] ss:$40 sps:$4 sm:$0xff]   ;;  %v26722_v39 = vld [vmem:[%s28453_s11 + $0x2d1c] ss:$40 sps:$4 sm:$0xff]  }
 0xbe9   : > { %16087 = vmatprep.subr.bf16.mxu0 %v26668_v19  ;;  %v26719_v28 = vld [vmem:[%s28453_s11 + $0x1bf4] ss:$40 sps:$4 sm:$0xff]   ;;  %v26720_v19 = vld [vmem:[%s28453_s11 + $0x2d18] ss:$40 sps:$4 sm:$0xff]   ;;  %v26725_v20 = vld [vmem:[%s28453_s11 + $0x1c44] ss:$40 sps:$4 sm:$0xff]  }
 0xbea   : > { %v16386_v42 = vcombine.low %v16378_v29, %v16385_v4  ;;  %15942 = vmatmul.mubr.bf16.vlgmr.msra.gmra.mrb[12].mxu1 %v29832_v38  ;;  %v26723_v29 = vld [vmem:[%s28453_s11 + $0x1c40] ss:$40 sps:$4 sm:$0xff]  }
 0xbeb   : > { %16156 = vmatpush1.bf16.msra.mxu1 %v26663_v59  ;;  %16187 = vmatprep.mubr.bf16.mxu1 %v29318_v30  ;;  %v26675_v30 = vld [vmem:[%s28453_s11 + $0x19c0] ss:$40 sps:$4 sm:$0xff]   ;;  %v26728_v59 = vld [vmem:[%s28453_s11 + $0x2d6c] ss:$40 sps:$4 sm:$0xff]  }
 0xbec   : > { %v16415_v45 = vadd.f32 %v26980_v41, %v16386_v42  ;;  %16088 = vmatpush1.bf16.msra.mxu0 %v26666_v33  ;;  %16157 = vmatprep.subr.bf16.mxu1 %v26671_v35  ;;  %v26726_v4 = vld [vmem:[%s28453_s11 + $0x2d68] ss:$40 sps:$4 sm:$0xff]   ;;  %v26731_v33 = vld [vmem:[%s28453_s11 + $0x1c94] ss:$40 sps:$4 sm:$0xff]   ;;  %v26732_v42 = vld [vmem:[%s28453_s11 + $0x2db8] ss:$40 sps:$4 sm:$0xff]  }
 0xbed   : > { %16089 = vmatprep.subr.bf16.mxu0 %v26674_v15  ;;  %v26734_v35 = vld [vmem:[%s28453_s11 + $0x2dbc] ss:$40 sps:$4 sm:$0xff]   ;;  %v26729_v15 = vld [vmem:[%s28453_s11 + $0x1c90] ss:$40 sps:$4 sm:$0xff]   ;;  %v26740_v41 = vld [vmem:[%s28453_s11 + $0x2e0c] ss:$40 sps:$4 sm:$0xff]  }
 0xbee   : > { %v30205_v13 = vmax.f32 %v16415_v45, 0.0  ;;  %v26735_v45 = vld [vmem:[%s28453_s11 + $0x1ce0] ss:$40 sps:$4 sm:$0xff]  }
 0xbef   : > { %16158 = vmatpush1.bf16.msra.mxu1 %v26669_v37  ;;  %v26737_v37 = vld [vmem:[%s28453_s11 + $0x1ce4] ss:$40 sps:$4 sm:$0xff]  }
 0xbf0   : > { %16421 = vst [vmem:[#allocation3] sm:$0xff] %v30205_v13  ;;  %16090 = vmatpush1.bf16.msra.mxu0 %v26672_v43  ;;  %16159 = vmatprep.subr.bf16.mxu1 %v26677_v40  ;;  %v26738_v43 = vld [vmem:[%s28453_s11 + $0x2e08] ss:$40 sps:$4 sm:$0xff]   ;;  %v26743_v40 = vld [vmem:[%s28453_s11 + $0x1d34] ss:$40 sps:$4 sm:$0xff]  }
 0xbf1   : > { %16091 = vmatprep.subr.bf16.mxu0 %v26680_v26  ;;  %v26746_v26 = vld [vmem:[%s28453_s11 + $0x2e5c] ss:$40 sps:$4 sm:$0xff]  }
 0xbf3   : > { %16160 = vmatpush1.bf16.msra.mxu1 %v26675_v30  ;;  %v26741_v30 = vld [vmem:[%s28453_s11 + $0x1d30] ss:$40 sps:$4 sm:$0xff]  }
 0xbf4   : > { %16092 = vmatpush1.bf16.msra.mxu0 %v26678_v27  ;;  %16161 = vmatprep.subr.bf16.mxu1 %v26683_v54  ;;  %v26744_v27 = vld [vmem:[%s28453_s11 + $0x2e58] ss:$40 sps:$4 sm:$0xff]   ;;  %v26749_v54 = vld [vmem:[%s28453_s11 + $0x1d84] ss:$40 sps:$4 sm:$0xff]  }
 0xbf5   : > { %16093 = vmatprep.subr.bf16.mxu0 %v26686_v47  ;;  %v26752_v47 = vld [vmem:[%s28453_s11 + $0x2eac] ss:$40 sps:$4 sm:$0xff]  }
 0xbf7   : > { %16162 = vmatpush1.bf16.msra.mxu1 %v26681_v48  ;;  %v26747_v48 = vld [vmem:[%s28453_s11 + $0x1d80] ss:$40 sps:$4 sm:$0xff]  }
 0xbf8   : > { %16094 = vmatpush1.bf16.msra.mxu0 %v26684_v57  ;;  %16163 = vmatprep.subr.bf16.mxu1 %v26689_v50  ;;  %v26750_v57 = vld [vmem:[%s28453_s11 + $0x2ea8] ss:$40 sps:$4 sm:$0xff]   ;;  %v26755_v50 = vld [vmem:[%s28453_s11 + $0x1dd4] ss:$40 sps:$4 sm:$0xff]  }
 0xbf9   : > { %16095 = vmatprep.subr.bf16.mxu0 %v26692_v49  ;;  %v26758_v49 = vld [vmem:[%s28453_s11 + $0x2efc] ss:$40 sps:$4 sm:$0xff]  }
 0xbfb   : > { %16164 = vmatpush1.bf16.msra.mxu1 %v26687_v51  ;;  %v26753_v51 = vld [vmem:[%s28453_s11 + $0x1dd0] ss:$40 sps:$4 sm:$0xff]  }
 0xbfc   : > { %16096 = vmatpush1.bf16.msra.mxu0 %v26690_v21  ;;  %16165 = vmatprep.subr.bf16.mxu1 %v26695_v56  ;;  %v26756_v21 = vld [vmem:[%s28453_s11 + $0x2ef8] ss:$40 sps:$4 sm:$0xff]   ;;  %v26761_v56 = vld [vmem:[%s28453_s11 + $0x1e24] ss:$40 sps:$4 sm:$0xff]  }
 0xbfd   : > { %16097 = vmatprep.subr.bf16.mxu0 %v26698_v32  ;;  %v26764_v32 = vld [vmem:[%s28453_s11 + $0x2f4c] ss:$40 sps:$4 sm:$0xff]  }
 0xbff   : > { %16166 = vmatpush1.bf16.msra.mxu1 %v26693_v63  ;;  %v26759_v63 = vld [vmem:[%s28453_s11 + $0x1e20] ss:$40 sps:$4 sm:$0xff]  }
 0xc00   : > { %16098 = vmatpush1.bf16.msra.mxu0 %v26696_v1  ;;  %16167 = vmatprep.subr.bf16.mxu1 %v26701_v2  ;;  %v26762_v1 = vld [vmem:[%s28453_s11 + $0x2f48] ss:$40 sps:$4 sm:$0xff]   ;;  %v26767_v2 = vld [vmem:[%s28453_s11 + $0x1e74] ss:$40 sps:$4 sm:$0xff]  }
 0xc01   : > { %16099 = vmatprep.subr.bf16.mxu0 %v26704_v3  ;;  %v26770_v3 = vld [vmem:[%s28453_s11 + $0x2f9c] ss:$40 sps:$4 sm:$0xff]  }
 0xc03   : > { %16168 = vmatpush1.bf16.msra.mxu1 %v26699_v0  ;;  %v26765_v0 = vld [vmem:[%s28453_s11 + $0x1e70] ss:$40 sps:$4 sm:$0xff]  }
 0xc04   : > { %16100 = vmatpush1.bf16.msra.mxu0 %v26702_v5  ;;  %16169 = vmatprep.subr.bf16.mxu1 %v26707_v10  ;;  %v26768_v5 = vld [vmem:[%s28453_s11 + $0x2f98] ss:$40 sps:$4 sm:$0xff]   ;;  %v26773_v10 = vld [vmem:[%s28453_s11 + $0x1ec4] ss:$40 sps:$4 sm:$0xff]  }
 0xc05   : > { %16101 = vmatprep.subr.bf16.mxu0 %v26710_v7  ;;  %v26776_v7 = vld [vmem:[%s28453_s11 + $0x2fec] ss:$40 sps:$4 sm:$0xff]  }
 0xc07   : > { %16170 = vmatpush1.bf16.msra.mxu1 %v26705_v8  ;;  %v26771_v8 = vld [vmem:[%s28453_s11 + $0x1ec0] ss:$40 sps:$4 sm:$0xff]  }
 0xc08   : > { %16102 = vmatpush1.bf16.msra.mxu0 %v26708_v55  ;;  %16171 = vmatprep.subr.bf16.mxu1 %v26713_v11  ;;  %v26779_v55 = vld [vmem:[%s28453_s11 + $0x1f14] ss:$40 sps:$4 sm:$0xff]   ;;  %v26777_v11 = vld [vmem:[%s28453_s11 + $0x1f10] ss:$40 sps:$4 sm:$0xff]  }
 0xc09   : > { %16103 = vmatprep.subr.bf16.mxu0 %v26716_v12  ;;  %v26780_v12 = vld [vmem:[%s28453_s11 + $0x3038] ss:$40 sps:$4 sm:$0xff]  }
 0xc0b   : > { %16172 = vmatpush1.bf16.msra.mxu1 %v26711_v58  ;;  %v26785_v58 = vld [vmem:[%s28453_s11 + $0x1f64] ss:$40 sps:$4 sm:$0xff]  }
 0xc0c   : > { %16104 = vmatpush1.bf16.msra.mxu0 %v26714_v14  ;;  %16173 = vmatprep.subr.bf16.mxu1 %v26719_v28  ;;  %v26788_v14 = vld [vmem:[%s28453_s11 + $0x308c] ss:$40 sps:$4 sm:$0xff]   ;;  %v26783_v28 = vld [vmem:[%s28453_s11 + $0x1f60] ss:$40 sps:$4 sm:$0xff]  }
 0xc0d   : > { %16114 = vmatprep.subr.bf16.mxu0 %v26722_v39  ;;  %v26786_v39 = vld [vmem:[%s28453_s11 + $0x3088] ss:$40 sps:$4 sm:$0xff]  }
 0xc0f   : > { %16106 = vmatmul.mubr.bf16.vlgmr.msra.gmra.mrb[16].mxu0 %v29654_v61  ;;  %16174 = vmatpush1.bf16.msra.mxu1 %v26717_v17  ;;  %v26791_v17 = vld [vmem:[%s28453_s11 + $0x1fb4] ss:$40 sps:$4 sm:$0xff]  }
 0xc10   : > { %16115 = vmatpush1.bf16.msra.mxu0 %v26720_v19  ;;  %16146 = vmatprep.mubr.bf16.mxu0 %v29828_v36  ;;  %v26794_v19 = vld [vmem:[%s28453_s11 + $0x30dc] ss:$40 sps:$4 sm:$0xff]  }
 0xc11   : > { %16175 = vmatprep.subr.bf16.mxu1 %v26725_v20  ;;  %16116 = vmatprep.subr.bf16.mxu0 %v26728_v59  ;;  %v26789_v20 = vld [vmem:[%s28453_s11 + $0x1fb0] ss:$40 sps:$4 sm:$0xff]  }
 0xc12   : > { %v26792_v59 = vld [vmem:[%s28453_s11 + $0x30d8] ss:$40 sps:$4 sm:$0xff]  }
 0xc13   : > { %16176 = vmatpush1.bf16.msra.mxu1 %v26723_v29  ;;  %v26797_v29 = vld [vmem:[%s28453_s11 + $0x2004] ss:$40 sps:$4 sm:$0xff]  }
 0xc14   : > { %16117 = vmatpush1.bf16.msra.mxu0 %v26726_v4  ;;  %16177 = vmatprep.subr.bf16.mxu1 %v26731_v33  ;;  %v26800_v4 = vld [vmem:[%s28453_s11 + $0x312c] ss:$40 sps:$4 sm:$0xff]   ;;  %v26795_v33 = vld [vmem:[%s28453_s11 + $0x2000] ss:$40 sps:$4 sm:$0xff]  }
 0xc15   : > { %16118 = vmatprep.subr.bf16.mxu0 %v26734_v35  ;;  %v26798_v35 = vld [vmem:[%s28453_s11 + $0x3128] ss:$40 sps:$4 sm:$0xff]  }
 0xc17   : > { %16178 = vmatpush1.bf16.msra.mxu1 %v26729_v15  ;;  %v26803_v15 = vld [vmem:[%s28453_s11 + $0x2054] ss:$40 sps:$4 sm:$0xff]  }
 0xc18   : > { %16119 = vmatpush1.bf16.msra.mxu0 %v26732_v42  ;;  %16179 = vmatprep.subr.bf16.mxu1 %v26737_v37  ;;  %v26806_v42 = vld [vmem:[%s28453_s11 + $0x317c] ss:$40 sps:$4 sm:$0xff]   ;;  %v26801_v37 = vld [vmem:[%s28453_s11 + $0x2050] ss:$40 sps:$4 sm:$0xff]  }
 0xc19   : > { %16120 = vmatprep.subr.bf16.mxu0 %v26740_v41  ;;  %v26804_v41 = vld [vmem:[%s28453_s11 + $0x3178] ss:$40 sps:$4 sm:$0xff]  }
 0xc1b   : > { %16180 = vmatpush1.bf16.msra.mxu1 %v26735_v45  ;;  %v26809_v45 = vld [vmem:[%s28453_s11 + $0x20a4] ss:$40 sps:$4 sm:$0xff]  }
 0xc1c   : > { %16121 = vmatpush1.bf16.msra.mxu0 %v26738_v43  ;;  %16181 = vmatprep.subr.bf16.mxu1 %v26743_v40  ;;  %v26812_v43 = vld [vmem:[%s28453_s11 + $0x31cc] ss:$40 sps:$4 sm:$0xff]   ;;  %v26807_v40 = vld [vmem:[%s28453_s11 + $0x20a0] ss:$40 sps:$4 sm:$0xff]  }
 0xc1d   : > { %16122 = vmatprep.subr.bf16.mxu0 %v26746_v26  ;;  %v26810_v26 = vld [vmem:[%s28453_s11 + $0x31c8] ss:$40 sps:$4 sm:$0xff]  }
 0xc1f   : > { %16182 = vmatpush1.bf16.msra.mxu1 %v26741_v30  ;;  %v26815_v30 = vld [vmem:[%s28453_s11 + $0x20f4] ss:$40 sps:$4 sm:$0xff]  }
 0xc20   : > { %16123 = vmatpush1.bf16.msra.mxu0 %v26744_v27  ;;  %16183 = vmatprep.subr.bf16.mxu1 %v26749_v54  ;;  %v26813_v27 = vld [vmem:[%s28453_s11 + $0x20f0] ss:$40 sps:$4 sm:$0xff]   ;;  %v26818_v54 = vld [vmem:[%s28453_s11 + $0x2144] ss:$40 sps:$4 sm:$0xff]  }
 0xc21   : > { %16124 = vmatprep.subr.bf16.mxu0 %v26752_v47  ;;  %v26816_v47 = vld [vmem:[%s28453_s11 + $0x2140] ss:$40 sps:$4 sm:$0xff]  }
 0xc23   : > { %16184 = vmatpush1.bf16.msra.mxu1 %v26747_v48  ;;  %v26821_v48 = vld [vmem:[%s28453_s11 + $0x2194] ss:$40 sps:$4 sm:$0xff]  }
 0xc24   : > { %16125 = vmatpush1.bf16.msra.mxu0 %v26750_v57  ;;  %16185 = vmatprep.subr.bf16.mxu1 %v26755_v50  ;;  %v26819_v57 = vld [vmem:[%s28453_s11 + $0x2190] ss:$40 sps:$4 sm:$0xff]   ;;  %v26824_v50 = vld [vmem:[%s28453_s11 + $0x21e4] ss:$40 sps:$4 sm:$0xff]  }
 0xc25   : > { %16126 = vmatprep.subr.bf16.mxu0 %v26758_v49  ;;  %v26822_v49 = vld [vmem:[%s28453_s11 + $0x21e0] ss:$40 sps:$4 sm:$0xff]  }
 0xc27   : > { %16186 = vmatpush1.bf16.msra.mxu1 %v26753_v51  ;;  %v26827_v51 = vld [vmem:[%s28453_s11 + $0x2234] ss:$40 sps:$4 sm:$0xff]  }
 0xc28   : > { %16127 = vmatpush1.bf16.msra.mxu0 %v26756_v21  ;;  %16196 = vmatprep.subr.bf16.mxu1 %v26761_v56  ;;  %v26825_v21 = vld [vmem:[%s28453_s11 + $0x2230] ss:$40 sps:$4 sm:$0xff]   ;;  %v26830_v56 = vld [vmem:[%s28453_s11 + $0x2284] ss:$40 sps:$4 sm:$0xff]  }
 0xc29   : > { %16128 = vmatprep.subr.bf16.mxu0 %v26764_v32  ;;  %v26828_v32 = vld [vmem:[%s28453_s11 + $0x2280] ss:$40 sps:$4 sm:$0xff]  }
 0xc2a   : > { %16188 = vmatmul.mubr.bf16.vlgmr.msra.gmra.mrb[16].mxu1 %v29397_v44  ;;  %v26774_v44 = vld [vmem:[%s28453_s11 + $0x2fe8] ss:$40 sps:$4 sm:$0xff]  }
 0xc2b   : > { %16197 = vmatpush1.bf16.msra.mxu1 %v26759_v63  ;;  %16228 = vmatprep.mubr.bf16.mxu1 %v29400_v52  ;;  %v26782_v52 = vld [vmem:[%s28453_s11 + $0x303c] ss:$40 sps:$4 sm:$0xff]  }
 0xc2c   : > { %16129 = vmatpush1.bf16.msra.mxu0 %v26762_v1  ;;  %16198 = vmatprep.subr.bf16.mxu1 %v26767_v2  ;;  %v26833_v63 = vld [vmem:[%s28453_s11 + $0x22d4] ss:$40 sps:$4 sm:$0xff]   ;;  %v26831_v1 = vld [vmem:[%s28453_s11 + $0x22d0] ss:$40 sps:$4 sm:$0xff]   ;;  %v26836_v2 = vld [vmem:[%s28453_s11 + $0x2324] ss:$40 sps:$4 sm:$0xff]  }
 0xc2d   : > { %16130 = vmatprep.subr.bf16.mxu0 %v26770_v3  ;;  %v26834_v3 = vld [vmem:[%s28453_s11 + $0x2320] ss:$40 sps:$4 sm:$0xff]  }
 0xc2f   : > { %16199 = vmatpush1.bf16.msra.mxu1 %v26765_v0  ;;  %v26839_v0 = vld [vmem:[%s28453_s11 + $0x2374] ss:$40 sps:$4 sm:$0xff]  }
 0xc30   : > { %16131 = vmatpush1.bf16.msra.mxu0 %v26768_v5  ;;  %16200 = vmatprep.subr.bf16.mxu1 %v26773_v10  ;;  %v26837_v5 = vld [vmem:[%s28453_s11 + $0x2370] ss:$40 sps:$4 sm:$0xff]   ;;  %v26842_v10 = vld [vmem:[%s28453_s11 + $0x23c4] ss:$40 sps:$4 sm:$0xff]  }
 0xc31   : > { %16132 = vmatprep.subr.bf16.mxu0 %v26776_v7  ;;  %v26840_v7 = vld [vmem:[%s28453_s11 + $0x23c0] ss:$40 sps:$4 sm:$0xff]  }
 0xc33   : > { %16201 = vmatpush1.bf16.msra.mxu1 %v26771_v8  ;;  %v26845_v8 = vld [vmem:[%s28453_s11 + $0x2414] ss:$40 sps:$4 sm:$0xff]  }
 0xc34   : > { %16133 = vmatpush1.bf16.msra.mxu0 %v26774_v44  ;;  %16202 = vmatprep.subr.bf16.mxu1 %v26779_v55  ;;  %v26843_v44 = vld [vmem:[%s28453_s11 + $0x2410] ss:$40 sps:$4 sm:$0xff]   ;;  %v26846_v55 = vld [vmem:[%s28453_s11 + $0x2460] ss:$40 sps:$4 sm:$0xff]  }
 0xc35   : > { %16134 = vmatprep.subr.bf16.mxu0 %v26782_v52  ;;  %v26849_v52 = vld [vmem:[%s28453_s11 + $0x24b0] ss:$40 sps:$4 sm:$0xff]  }
 0xc37   : > { %16203 = vmatpush1.bf16.msra.mxu1 %v26777_v11  ;;  %v26854_v11 = vld [vmem:[%s28453_s11 + $0x2504] ss:$40 sps:$4 sm:$0xff]  }
 0xc38   : > { %16135 = vmatpush1.bf16.msra.mxu0 %v26780_v12  ;;  %16204 = vmatprep.subr.bf16.mxu1 %v26785_v58  ;;  %v26852_v12 = vld [vmem:[%s28453_s11 + $0x2500] ss:$40 sps:$4 sm:$0xff]   ;;  %v26857_v58 = vld [vmem:[%s28453_s11 + $0x2554] ss:$40 sps:$4 sm:$0xff]  }
 0xc39   : > { %16136 = vmatprep.subr.bf16.mxu0 %v26788_v14  ;;  %v26855_v14 = vld [vmem:[%s28453_s11 + $0x2550] ss:$40 sps:$4 sm:$0xff]  }
 0xc3b   : > { %16205 = vmatpush1.bf16.msra.mxu1 %v26783_v28  ;;  %v26860_v28 = vld [vmem:[%s28453_s11 + $0x25a4] ss:$40 sps:$4 sm:$0xff]  }
 0xc3c   : > { %16137 = vmatpush1.bf16.msra.mxu0 %v26786_v39  ;;  %16206 = vmatprep.subr.bf16.mxu1 %v26791_v17  ;;  %v26858_v39 = vld [vmem:[%s28453_s11 + $0x25a0] ss:$40 sps:$4 sm:$0xff]   ;;  %v26863_v17 = vld [vmem:[%s28453_s11 + $0x25f4] ss:$40 sps:$4 sm:$0xff]  }
 0xc3d   : > { %16138 = vmatprep.subr.bf16.mxu0 %v26794_v19  ;;  %v26861_v19 = vld [vmem:[%s28453_s11 + $0x25f0] ss:$40 sps:$4 sm:$0xff]  }
 0xc3f   : > { %16207 = vmatpush1.bf16.msra.mxu1 %v26789_v20  ;;  %v26866_v20 = vld [vmem:[%s28453_s11 + $0x2644] ss:$40 sps:$4 sm:$0xff]  }
 0xc40   : > { %16139 = vmatpush1.bf16.msra.mxu0 %v26792_v59  ;;  %16208 = vmatprep.subr.bf16.mxu1 %v26797_v29  ;;  %v26864_v59 = vld [vmem:[%s28453_s11 + $0x2640] ss:$40 sps:$4 sm:$0xff]   ;;  %v26869_v29 = vld [vmem:[%s28453_s11 + $0x2694] ss:$40 sps:$4 sm:$0xff]  }
 0xc41   : > { %16140 = vmatprep.subr.bf16.mxu0 %v26800_v4  ;;  %v26867_v4 = vld [vmem:[%s28453_s11 + $0x2690] ss:$40 sps:$4 sm:$0xff]  }
 0xc43   : > { %16209 = vmatpush1.bf16.msra.mxu1 %v26795_v33  ;;  %v26872_v33 = vld [vmem:[%s28453_s11 + $0x26e4] ss:$40 sps:$4 sm:$0xff]  }
 0xc44   : > { %16141 = vmatpush1.bf16.msra.mxu0 %v26798_v35  ;;  %16210 = vmatprep.subr.bf16.mxu1 %v26803_v15  ;;  %v26870_v35 = vld [vmem:[%s28453_s11 + $0x26e0] ss:$40 sps:$4 sm:$0xff]   ;;  %v26875_v15 = vld [vmem:[%s28453_s11 + $0x2734] ss:$40 sps:$4 sm:$0xff]  }
 0xc45   : > { %16142 = vmatprep.subr.bf16.mxu0 %v26806_v42  ;;  %v26873_v42 = vld [vmem:[%s28453_s11 + $0x2730] ss:$40 sps:$4 sm:$0xff]  }
 0xc47   : > { %16211 = vmatpush1.bf16.msra.mxu1 %v26801_v37  ;;  %v26878_v37 = vld [vmem:[%s28453_s11 + $0x2784] ss:$40 sps:$4 sm:$0xff]  }
 0xc48   : > { %16143 = vmatpush1.bf16.msra.mxu0 %v26804_v41  ;;  %16212 = vmatprep.subr.bf16.mxu1 %v26809_v45  ;;  %v26876_v41 = vld [vmem:[%s28453_s11 + $0x2780] ss:$40 sps:$4 sm:$0xff]   ;;  %v26881_v45 = vld [vmem:[%s28453_s11 + $0x27d4] ss:$40 sps:$4 sm:$0xff]  }
 0xc49   : > { %16144 = vmatprep.subr.bf16.mxu0 %v26812_v43  ;;  %v26879_v43 = vld [vmem:[%s28453_s11 + $0x27d0] ss:$40 sps:$4 sm:$0xff]  }
 0xc4b   : > { %16213 = vmatpush1.bf16.msra.mxu1 %v26807_v40  ;;  %v26884_v40 = vld [vmem:[%s28453_s11 + $0x2824] ss:$40 sps:$4 sm:$0xff]  }
 0xc4c   : > { %16145 = vmatpush1.bf16.msra.mxu0 %v26810_v26  ;;  %16214 = vmatprep.subr.bf16.mxu1 %v26815_v30  ;;  %v26882_v26 = vld [vmem:[%s28453_s11 + $0x2820] ss:$40 sps:$4 sm:$0xff]   ;;  %v26887_v30 = vld [vmem:[%s28453_s11 + $0x2874] ss:$40 sps:$4 sm:$0xff]  }
 0xc4f   : > { %16147 = vmatmul.mubr.bf16.vlgmr.msra.gmra.mrb[16].mxu0 %v29832_v38  ;;  %16215 = vmatpush1.bf16.msra.mxu1 %v26813_v27  ;;  %v26885_v27 = vld [vmem:[%s28453_s11 + $0x2870] ss:$40 sps:$4 sm:$0xff]  }
 0xc50   : > { %16216 = vmatprep.subr.bf16.mxu1 %v26818_v54  ;;  %v26890_v54 = vld [vmem:[%s28453_s11 + $0x28c4] ss:$40 sps:$4 sm:$0xff]  }
 0xc53   : > { %16217 = vmatpush1.bf16.msra.mxu1 %v26816_v47  ;;  %v26888_v47 = vld [vmem:[%s28453_s11 + $0x28c0] ss:$40 sps:$4 sm:$0xff]  }
 0xc54   : > { %16218 = vmatprep.subr.bf16.mxu1 %v26821_v48  ;;  %v26893_v48 = vld [vmem:[%s28453_s11 + $0x2914] ss:$40 sps:$4 sm:$0xff]  }
 0xc57   : > { %16219 = vmatpush1.bf16.msra.mxu1 %v26819_v57  ;;  %v26891_v57 = vld [vmem:[%s28453_s11 + $0x2910] ss:$40 sps:$4 sm:$0xff]  }
 0xc58   : > { %16220 = vmatprep.subr.bf16.mxu1 %v26824_v50  ;;  %v26896_v50 = vld [vmem:[%s28453_s11 + $0x2964] ss:$40 sps:$4 sm:$0xff]  }
 0xc5b   : > { %16221 = vmatpush1.bf16.msra.mxu1 %v26822_v49  ;;  %v26899_v49 = vld [vmem:[%s28453_s11 + $0x29b4] ss:$40 sps:$4 sm:$0xff]  }
 0xc5c   : > { %16222 = vmatprep.subr.bf16.mxu1 %v26827_v51 }
 0xc5f   : > { %16223 = vmatpush1.bf16.msra.mxu1 %v26825_v21 }
 0xc60   : > { %16224 = vmatprep.subr.bf16.mxu1 %v26830_v56  ;;  %v26897_v56 = vld [vmem:[%s28453_s11 + $0x29b0] ss:$40 sps:$4 sm:$0xff]  }
 0xc63   : > { %16225 = vmatpush1.bf16.msra.mxu1 %v26828_v32  ;;  %v26902_v32 = vld [vmem:[%s28453_s11 + $0x2a04] ss:$40 sps:$4 sm:$0xff]  }
 0xc64   : > { %16226 = vmatprep.subr.bf16.mxu1 %v26833_v63 }
 0xc67   : > { %16227 = vmatpush1.bf16.msra.mxu1 %v26831_v1 }
 0xc68   : > { %16237 = vmatprep.subr.bf16.mxu1 %v26836_v2 }
 0xc6a   : > { %16229 = vmatmul.mubr.bf16.vlgmr.msra.gmra.mrb[16].mxu1 %v29477_v16  ;;  %v26848_v16 = vld [vmem:[%s28453_s11 + $0x2464] ss:$40 sps:$4 sm:$0xff]  }
 0xc6b   : > { %16238 = vmatpush1.bf16.msra.mxu1 %v26834_v3  ;;  %16269 = vmatprep.mubr.bf16.mxu1 %v29574_v6  ;;  %v26851_v6 = vld [vmem:[%s28453_s11 + $0x24b4] ss:$40 sps:$4 sm:$0xff]  }
 0xc6c   : > { %16239 = vmatprep.subr.bf16.mxu1 %v26839_v0 }
 0xc6f   : > { %16240 = vmatpush1.bf16.msra.mxu1 %v26837_v5 }
 0xc70   : > { %16241 = vmatprep.subr.bf16.mxu1 %v26842_v10 }
 0xc73   : > { %16242 = vmatpush1.bf16.msra.mxu1 %v26840_v7  ;;  %v26903_v7 = vld [vmem:[%s28453_s11 + $0x2a50] ss:$40 sps:$4 sm:$0xff]  }
 0xc74   : > { %16243 = vmatprep.subr.bf16.mxu1 %v26845_v8  ;;  %v26908_v8 = vld [vmem:[%s28453_s11 + $0x2aa4] ss:$40 sps:$4 sm:$0xff]  }
 0xc77   : > { %16244 = vmatpush1.bf16.msra.mxu1 %v26843_v44  ;;  %v26906_v44 = vld [vmem:[%s28453_s11 + $0x2aa0] ss:$40 sps:$4 sm:$0xff]  }
 0xc78   : > { %16245 = vmatprep.subr.bf16.mxu1 %v26848_v16  ;;  %v26911_v16 = vld [vmem:[%s28453_s11 + $0x2af4] ss:$40 sps:$4 sm:$0xff]  }
 0xc7b   : > { %16246 = vmatpush1.bf16.msra.mxu1 %v26846_v55  ;;  %v26909_v55 = vld [vmem:[%s28453_s11 + $0x2af0] ss:$40 sps:$4 sm:$0xff]  }
 0xc7c   : > { %16247 = vmatprep.subr.bf16.mxu1 %v26851_v6  ;;  %v26914_v6 = vld [vmem:[%s28453_s11 + $0x2b44] ss:$40 sps:$4 sm:$0xff]  }
 0xc7f   : > { %16248 = vmatpush1.bf16.msra.mxu1 %v26849_v52  ;;  %v26912_v52 = vld [vmem:[%s28453_s11 + $0x2b40] ss:$40 sps:$4 sm:$0xff]  }
 0xc80   : > { %16249 = vmatprep.subr.bf16.mxu1 %v26854_v11  ;;  %v26917_v11 = vld [vmem:[%s28453_s11 + $0x2b94] ss:$40 sps:$4 sm:$0xff]  }
 0xc83   : > { %16250 = vmatpush1.bf16.msra.mxu1 %v26852_v12  ;;  %v26915_v12 = vld [vmem:[%s28453_s11 + $0x2b90] ss:$40 sps:$4 sm:$0xff]  }
 0xc84   : > { %16251 = vmatprep.subr.bf16.mxu1 %v26857_v58  ;;  %v26920_v58 = vld [vmem:[%s28453_s11 + $0x2be4] ss:$40 sps:$4 sm:$0xff]  }
 0xc87   : > { %16252 = vmatpush1.bf16.msra.mxu1 %v26855_v14  ;;  %v26918_v14 = vld [vmem:[%s28453_s11 + $0x2be0] ss:$40 sps:$4 sm:$0xff]  }
 0xc88   : > { %16253 = vmatprep.subr.bf16.mxu1 %v26860_v28  ;;  %v26923_v28 = vld [vmem:[%s28453_s11 + $0x2c34] ss:$40 sps:$4 sm:$0xff]  }
 0xc8b   : > { %16254 = vmatpush1.bf16.msra.mxu1 %v26858_v39  ;;  %v26921_v39 = vld [vmem:[%s28453_s11 + $0x2c30] ss:$40 sps:$4 sm:$0xff]  }
 0xc8c   : > { %16255 = vmatprep.subr.bf16.mxu1 %v26863_v17  ;;  %v26926_v17 = vld [vmem:[%s28453_s11 + $0x2c84] ss:$40 sps:$4 sm:$0xff]  }
 0xc8f   : > { %16256 = vmatpush1.bf16.msra.mxu1 %v26861_v19  ;;  %v26924_v19 = vld [vmem:[%s28453_s11 + $0x2c80] ss:$40 sps:$4 sm:$0xff]  }
 0xc90   : > { %16257 = vmatprep.subr.bf16.mxu1 %v26866_v20  ;;  %v26929_v20 = vld [vmem:[%s28453_s11 + $0x2cd4] ss:$40 sps:$4 sm:$0xff]  }
 0xc93   : > { %16258 = vmatpush1.bf16.msra.mxu1 %v26864_v59  ;;  %v26927_v59 = vld [vmem:[%s28453_s11 + $0x2cd0] ss:$40 sps:$4 sm:$0xff]  }
 0xc94   : > { %16259 = vmatprep.subr.bf16.mxu1 %v26869_v29  ;;  %v26932_v29 = vld [vmem:[%s28453_s11 + $0x2d24] ss:$40 sps:$4 sm:$0xff]  }
 0xc97   : > { %16260 = vmatpush1.bf16.msra.mxu1 %v26867_v4  ;;  %v26930_v4 = vld [vmem:[%s28453_s11 + $0x2d20] ss:$40 sps:$4 sm:$0xff]  }
 0xc98   : > { %16261 = vmatprep.subr.bf16.mxu1 %v26872_v33  ;;  %v26935_v33 = vld [vmem:[%s28453_s11 + $0x2d74] ss:$40 sps:$4 sm:$0xff]  }
 0xc9b   : > { %16262 = vmatpush1.bf16.msra.mxu1 %v26870_v35  ;;  %v26933_v35 = vld [vmem:[%s28453_s11 + $0x2d70] ss:$40 sps:$4 sm:$0xff]  }
 0xc9c   : > { %16263 = vmatprep.subr.bf16.mxu1 %v26875_v15  ;;  %v26938_v15 = vld [vmem:[%s28453_s11 + $0x2dc4] ss:$40 sps:$4 sm:$0xff]  }
 0xc9f   : > { %16264 = vmatpush1.bf16.msra.mxu1 %v26873_v42  ;;  %v26936_v42 = vld [vmem:[%s28453_s11 + $0x2dc0] ss:$40 sps:$4 sm:$0xff]  }
 0xca0   : > { %16265 = vmatprep.subr.bf16.mxu1 %v26878_v37  ;;  %v26941_v37 = vld [vmem:[%s28453_s11 + $0x2e14] ss:$40 sps:$4 sm:$0xff]  }
 0xca3   : > { %16266 = vmatpush1.bf16.msra.mxu1 %v26876_v41  ;;  %v26939_v41 = vld [vmem:[%s28453_s11 + $0x2e10] ss:$40 sps:$4 sm:$0xff]  }
 0xca4   : > { %16267 = vmatprep.subr.bf16.mxu1 %v26881_v45  ;;  %v26942_v45 = vld [vmem:[%s28453_s11 + $0x2e60] ss:$40 sps:$4 sm:$0xff]  }
 0xca7   : > { %16268 = vmatpush1.bf16.msra.mxu1 %v26879_v43  ;;  %v26945_v43 = vld [vmem:[%s28453_s11 + $0x2eb0] ss:$40 sps:$4 sm:$0xff]  }
 0xca8   : > { %16278 = vmatprep.subr.bf16.mxu1 %v26884_v40  ;;  %v26950_v40 = vld [vmem:[%s28453_s11 + $0x2f04] ss:$40 sps:$4 sm:$0xff]  }
 0xcaa   : > { %16270 = vmatmul.mubr.bf16.vlgmr.msra.gmra.mrb[16].mxu1 %v29578_v53  ;;  %v26894_v53 = vld [vmem:[%s28453_s11 + $0x2960] ss:$40 sps:$4 sm:$0xff]  }
 0xcab   : > { %16279 = vmatpush1.bf16.msra.mxu1 %v26882_v26  ;;  %16310 = vmatprep.mubr.bf16.mxu1 %v29583_v25  ;;  %v30365_v25 = vld [vmem:[%s29289_s26 + $0xa] sm:$0xff] }
 0xcac   : > { %16280 = vmatprep.subr.bf16.mxu1 %v26887_v30  ;;  %v11304_v51 = vrot.slane %v30365_v25, %v5400_v18  ;;  %v11308_v21 = vrot.slane %v30365_v25, %v5404_v46  ;;  %v26900_v18 = vld [vmem:[%s28453_s11 + $0x2a00] ss:$40 sps:$4 sm:$0xff]   ;;  %v26905_v46 = vld [vmem:[%s28453_s11 + $0x2a54] ss:$40 sps:$4 sm:$0xff]  }
 0xcad   : > { %v26948_v26 = vld [vmem:[%s28453_s11 + $0x2f00] ss:$40 sps:$4 sm:$0xff]   ;;  %v26953_v30 = vld [vmem:[%s28453_s11 + $0x2f54] ss:$40 sps:$4 sm:$0xff]  }
 0xcaf   : > { %16281 = vmatpush1.bf16.msra.mxu1 %v26885_v27  ;;  %v26951_v27 = vld [vmem:[%s28453_s11 + $0x2f50] ss:$40 sps:$4 sm:$0xff]  }
 0xcb0   : > { %16282 = vmatprep.subr.bf16.mxu1 %v26890_v54  ;;  %v26956_v54 = vld [vmem:[%s28453_s11 + $0x2fa4] ss:$40 sps:$4 sm:$0xff]  }
 0xcb3   : > { %16283 = vmatpush1.bf16.msra.mxu1 %v26888_v47  ;;  %v26954_v47 = vld [vmem:[%s28453_s11 + $0x2fa0] ss:$40 sps:$4 sm:$0xff]  }
 0xcb4   : > { %16284 = vmatprep.subr.bf16.mxu1 %v26893_v48  ;;  %v26959_v48 = vld [vmem:[%s28453_s11 + $0x2ff4] ss:$40 sps:$4 sm:$0xff]  }
 0xcb7   : > { %16285 = vmatpush1.bf16.msra.mxu1 %v26891_v57  ;;  %v26957_v57 = vld [vmem:[%s28453_s11 + $0x2ff0] ss:$40 sps:$4 sm:$0xff]  }
 0xcb8   : > { %16286 = vmatprep.subr.bf16.mxu1 %v26896_v50  ;;  %v26962_v50 = vld [vmem:[%s28453_s11 + $0x3044] ss:$40 sps:$4 sm:$0xff]  }
 0xcbb   : > { %16287 = vmatpush1.bf16.msra.mxu1 %v26894_v53  ;;  %v26960_v53 = vld [vmem:[%s28453_s11 + $0x3040] ss:$40 sps:$4 sm:$0xff]  }
 0xcbc   : > { %16288 = vmatprep.subr.bf16.mxu1 %v26899_v49  ;;  %v26965_v49 = vld [vmem:[%s28453_s11 + $0x3094] ss:$40 sps:$4 sm:$0xff]  }
 0xcbd   : > { %v15943_v63 = vpop.f32.mrb[12].mxu1 }
 0xcbe   : > { %v30375_v1 = vadd.f32 %v15943_v63, %v11304_v51  ;;  %v15945_v2 = vpop.f32.mrb[13].mxu1  ;;  %v26963_v51 = vld [vmem:[%s28453_s11 + $0x3090] ss:$40 sps:$4 sm:$0xff]  }
 0xcbf   : > { %v30377_v3 = vadd.f32 %v15945_v2, %v11308_v21  ;;  %v15947_v0 = vpop.f32.mrb[14].mxu1  ;;  %16289 = vmatpush1.bf16.msra.mxu1 %v26897_v56  ;;  %v26968_v21 = vld [vmem:[%s28453_s11 + $0x30e4] ss:$40 sps:$4 sm:$0xff]   ;;  %v26966_v56 = vld [vmem:[%s28453_s11 + $0x30e0] ss:$40 sps:$4 sm:$0xff]  }
 0xcc0   : > { %v15948_v5 = vpop.f32.mrb[15].mxu1  ;;  %16290 = vmatprep.subr.bf16.mxu1 %v26902_v32  ;;  %v26971_v32 = vld [vmem:[%s28453_s11 + $0x3134] ss:$40 sps:$4 sm:$0xff]   ;;  %v26969_v63 = vld [vmem:[%s28453_s11 + $0x3130] ss:$40 sps:$4 sm:$0xff]   ;;  %v11312_v0 = vrot.slane %v30365_v25, %v5408_v24 }
 0xcc1   : > { %v16387_v10 = vcombine.low %v30375_v1, %v30377_v3  ;;  %v26974_v2 = vld [vmem:[%s28453_s11 + $0x3184] ss:$40 sps:$4 sm:$0xff]   ;;  %v11316_v5 = vrot.slane %v30365_v25, %v5412_v23 }
 0xcc2   : > { %v26982_v25 = vld [vmem:[#allocation3 + $0x8] sm:$0xff] }
 0xcc3   : > { %16291 = vmatpush1.bf16.msra.mxu1 %v26900_v18  ;;  %v26972_v18 = vld [vmem:[%s28453_s11 + $0x3180] ss:$40 sps:$4 sm:$0xff]   ;;  %v16395_v22 = vrot.slane %v16387_v10, %v28601_v34 }
 0xcc4   : > { %16292 = vmatprep.subr.bf16.mxu1 %v26905_v46  ;;  %v26977_v46 = vld [vmem:[%s28453_s11 + $0x31d4] ss:$40 sps:$4 sm:$0xff]  }
 0xcc7   : > { %16293 = vmatpush1.bf16.msra.mxu1 %v26903_v7 }
 0xcc8   : > { %16294 = vmatprep.subr.bf16.mxu1 %v26908_v8 }
 0xccb   : > { %16295 = vmatpush1.bf16.msra.mxu1 %v26906_v44 }
 0xccc   : > { %16296 = vmatprep.subr.bf16.mxu1 %v26911_v16  ;;  %v26975_v16 = vld [vmem:[%s28453_s11 + $0x31d0] ss:$40 sps:$4 sm:$0xff]  }
 0xccf   : > { %16297 = vmatpush1.bf16.msra.mxu1 %v26909_v55 }
 0xcd0   : > { %16298 = vmatprep.subr.bf16.mxu1 %v26914_v6 }
 0xcd3   : > { %16299 = vmatpush1.bf16.msra.mxu1 %v26912_v52 }
 0xcd4   : > { %16300 = vmatprep.subr.bf16.mxu1 %v26917_v11 }
 0xcd7   : > { %16301 = vmatpush1.bf16.msra.mxu1 %v26915_v12 }
 0xcd8   : > { %16302 = vmatprep.subr.bf16.mxu1 %v26920_v58 }
 0xcdb   : > { %16303 = vmatpush1.bf16.msra.mxu1 %v26918_v14  ;;  %v22124_v14 = vld [vmem:[%s29289_s26 + $0x12] sm:$0x3] }
 0xcdc   : > { %16304 = vmatprep.subr.bf16.mxu1 %v26923_v28  ;;  %v11320_v28 = vrot.slane %v22124_v14, %v29370_v9 }
 0xcdf   : > { %16305 = vmatpush1.bf16.msra.mxu1 %v26921_v39  ;;  %v11324_v39 = vrot.slane %v22124_v14, %v29295_v62  ;;  %v27040_v14 = vld [vmem:[#allocation14 + $0x524] ss:$16 sps:$4 sm:$0xff] (!%p22925_p9)  }
 0xce0   : > { %16306 = vmatprep.subr.bf16.mxu1 %v26926_v17 }
 0xce3   : > { %16307 = vmatpush1.bf16.msra.mxu1 %v26924_v19 }
 0xce4   : > { %16308 = vmatprep.subr.bf16.mxu1 %v26929_v20 }
 0xce7   : > { %16309 = vmatpush1.bf16.msra.mxu1 %v26927_v59 }
 0xce8   : > { %16319 = vmatprep.subr.bf16.mxu1 %v26932_v29  ;;  %v26983_v29 = vld [vmem:[#allocation3 + $0x10] sm:$0xf] }
 0xcea   : > { %16311 = vmatmul.mubr.bf16.vlgmr.msra.gmra.mrb[16].mxu1 %v29654_v61  ;;  %v26944_v61 = vld [vmem:[%s28453_s11 + $0x2e64] ss:$40 sps:$4 sm:$0xff]  }
 0xceb   : > { %16320 = vmatpush1.bf16.msra.mxu1 %v26930_v4  ;;  %16351 = vmatprep.mubr.bf16.mxu1 %v29828_v36  ;;  %v26947_v36 = vld [vmem:[%s28453_s11 + $0x2eb4] ss:$40 sps:$4 sm:$0xff]  }
 0xcec   : > { %16321 = vmatprep.subr.bf16.mxu1 %v26935_v33 }
 0xcef   : > { %16322 = vmatpush1.bf16.msra.mxu1 %v26933_v35  ;;  %v26984_v35 = vld [vmem:[#allocation14 + $0x4] ss:$16 sps:$4 sm:$0xff] (!%p22925_p9)  }
 0xcf0   : > { %16323 = vmatprep.subr.bf16.mxu1 %v26938_v15  ;;  %v30461_v15 = vrot.slane (!%p22925_p9), %v30205_v13, %v28601_v34 }
 0xcf3   : > { %16324 = vmatpush1.bf16.msra.mxu1 %v26936_v42 }
 0xcf4   : > { %16325 = vmatprep.subr.bf16.mxu1 %v26941_v37  ;;  %v26986_v37 = vld [vmem:[#allocation14 + $0x404] ss:$16 sps:$4 sm:$0xff] (!%p22925_p9)  }
 0xcf5   : > { %18517 = vmatprep.subr.bf16.mxu0 (!%p22925_p9), %v26986_v37  ;;  %v27060_v37 = vld [vmem:[#allocation14 + $0x180] ss:$16 sps:$4 sm:$0xff] (!%p22925_p9)  }
 0xcf7   : > { %16326 = vmatpush1.bf16.msra.mxu1 %v26939_v41  ;;  %v26988_v41 = vld [vmem:[#allocation14] ss:$16 sps:$4 sm:$0xff] (!%p22925_p9)  }
 0xcf8   : > { %16327 = vmatprep.subr.bf16.mxu1 %v26944_v61  ;;  %v26989_v61 = vld [vmem:[#allocation14 + $0x400] ss:$16 sps:$4 sm:$0xff] (!%p22925_p9)  }
 0xcf9   : > { %18518 = vmatpush1.bf16.msra.mxu0 (!%p22925_p9), %v26989_v61  ;;  %v27062_v61 = vld [vmem:[#allocation14 + $0x1a4] ss:$16 sps:$4 sm:$0xff] (!%p22925_p9)  }
 0xcfb   : > { %16328 = vmatpush1.bf16.msra.mxu1 %v26942_v45  ;;  %v16446_v45 = vcombine.high (!%p22925_p9), %v30461_v15, %v30461_v15 }
 0xcfc   : > { %16329 = vmatprep.subr.bf16.mxu1 %v26947_v36 }
 0xcff   : > { %16330 = vmatpush1.bf16.msra.mxu1 %v26945_v43  ;;  %v26990_v43 = vld [vmem:[#allocation14 + $0x24] ss:$16 sps:$4 sm:$0xff] (!%p22925_p9)  }
 0xd00   : > { %16331 = vmatprep.subr.bf16.mxu1 %v26950_v40  ;;  %v26992_v40 = vld [vmem:[#allocation14 + $0x424] ss:$16 sps:$4 sm:$0xff] (!%p22925_p9)  }
 0xd01   : > { %18519 = vmatprep.subr.bf16.mxu0 (!%p22925_p9), %v26992_v40  ;;  %v27068_v40 = vld [vmem:[#allocation14 + $0x1c4] ss:$16 sps:$4 sm:$0xff] (!%p22925_p9)  }
 0xd03   : > { %16332 = vmatpush1.bf16.msra.mxu1 %v26948_v26  ;;  %v26994_v26 = vld [vmem:[#allocation14 + $0x20] ss:$16 sps:$4 sm:$0xff] (!%p22925_p9)  }
 0xd04   : > { %16333 = vmatprep.subr.bf16.mxu1 %v26953_v30  ;;  %v30471_v30 = vpack.c.bf16 (!%p22925_p9), %v16446_v45, %v16446_v45  ;;  %v27064_v45 = vld [vmem:[#allocation14 + $0x5a4] ss:$16 sps:$4 sm:$0xff] (!%p22925_p9)  }
 0xd07   : > { %16334 = vmatpush1.bf16.msra.mxu1 %v26951_v27 }
 0xd08   : > { %16335 = vmatprep.subr.bf16.mxu1 %v26956_v54  ;;  %v26995_v54 = vld [vmem:[#allocation14 + $0x420] ss:$16 sps:$4 sm:$0xff] (!%p22925_p9)  }
 0xd09   : > { %18520 = vmatpush1.bf16.msra.mxu0 (!%p22925_p9), %v26995_v54  ;;  %v16431_v54 = vcombine.high (!%p22925_p9), %v30205_v13, %v30205_v13  ;;  %v27082_v13 = vld [vmem:[#allocation14 + $0x204] ss:$16 sps:$4 sm:$0xff] (!%p22925_p9)  }
 0xd0b   : > { %16336 = vmatpush1.bf16.msra.mxu1 %v26954_v47  ;;  %v26996_v47 = vld [vmem:[#allocation14 + $0x44] ss:$16 sps:$4 sm:$0xff] (!%p22925_p9)  }
 0xd0c   : > { %16337 = vmatprep.subr.bf16.mxu1 %v26959_v48  ;;  %v26998_v48 = vld [vmem:[#allocation14 + $0x444] ss:$16 sps:$4 sm:$0xff] (!%p22925_p9)  }
 0xd0d   : > { %18521 = vmatprep.subr.bf16.mxu0 (!%p22925_p9), %v26998_v48  ;;  %v27072_v48 = vld [vmem:[#allocation14 + $0x1c0] ss:$16 sps:$4 sm:$0xff] (!%p22925_p9)  }
 0xd0f   : > { %16338 = vmatpush1.bf16.msra.mxu1 %v26957_v57  ;;  %v27000_v57 = vld [vmem:[#allocation14 + $0x40] ss:$16 sps:$4 sm:$0xff] (!%p22925_p9)  }
 0xd10   : > { %16339 = vmatprep.subr.bf16.mxu1 %v26962_v50  ;;  %v27001_v50 = vld [vmem:[#allocation14 + $0x440] ss:$16 sps:$4 sm:$0xff] (!%p22925_p9)  }
 0xd11   : > { %18522 = vmatpush1.bf16.msra.mxu0 (!%p22925_p9), %v27001_v50  ;;  %v27074_v50 = vld [vmem:[#allocation14 + $0x1e4] ss:$16 sps:$4 sm:$0xff] (!%p22925_p9)  }
 0xd13   : > { %16340 = vmatpush1.bf16.msra.mxu1 %v26960_v53  ;;  %v27002_v53 = vld [vmem:[#allocation14 + $0x64] ss:$16 sps:$4 sm:$0xff] (!%p22925_p9)  }
 0xd14   : > { %16341 = vmatprep.subr.bf16.mxu1 %v26965_v49  ;;  %v27004_v49 = vld [vmem:[#allocation14 + $0x464] ss:$16 sps:$4 sm:$0xff] (!%p22925_p9)  }
 0xd15   : > { %18523 = vmatprep.subr.bf16.mxu0 (!%p22925_p9), %v27004_v49  ;;  %v30482_v49 = vrot.slane (!%p22925_p9), %v16431_v54, %v28601_v34  ;;  %v27137_v54 = vld [vmem:[#allocation14 + $0x720] ss:$16 sps:$4 sm:$0xff] (!%p22925_p9)  }
 0xd17   : > { %16342 = vmatpush1.bf16.msra.mxu1 %v26963_v51  ;;  %v27006_v51 = vld [vmem:[#allocation14 + $0x60] ss:$16 sps:$4 sm:$0xff] (!%p22925_p9)  }
 0xd18   : > { %16343 = vmatprep.subr.bf16.mxu1 %v26968_v21  ;;  %v27007_v21 = vld [vmem:[#allocation14 + $0x460] ss:$16 sps:$4 sm:$0xff] (!%p22925_p9)  }
 0xd19   : > { %18524 = vmatpush1.bf16.msra.mxu0 (!%p22925_p9), %v27007_v21  ;;  %v27078_v21 = vld [vmem:[#allocation14 + $0x1e0] ss:$16 sps:$4 sm:$0xff] (!%p22925_p9)  }
 0xd1b   : > { %16344 = vmatpush1.bf16.msra.mxu1 %v26966_v56  ;;  %v27008_v56 = vld [vmem:[#allocation14 + $0x84] ss:$16 sps:$4 sm:$0xff] (!%p22925_p9)  }
 0xd1c   : > { %16345 = vmatprep.subr.bf16.mxu1 %v26971_v32  ;;  %v27010_v32 = vld [vmem:[#allocation14 + $0x484] ss:$16 sps:$4 sm:$0xff] (!%p22925_p9)  }
 0xd1d   : > { %18525 = vmatprep.subr.bf16.mxu0 (!%p22925_p9), %v27010_v32  ;;  %v16447_v32 = vcombine.high (!%p22925_p9), %v30482_v49, %v30482_v49 }
 0xd1f   : > { %16346 = vmatpush1.bf16.msra.mxu1 %v26969_v63  ;;  %v27012_v63 = vld [vmem:[#allocation14 + $0x80] ss:$16 sps:$4 sm:$0xff] (!%p22925_p9)  }
 0xd20   : > { %16347 = vmatprep.subr.bf16.mxu1 %v26974_v2  ;;  %v27013_v2 = vld [vmem:[#allocation14 + $0x480] ss:$16 sps:$4 sm:$0xff] (!%p22925_p9)  }
 0xd21   : > { %18526 = vmatpush1.bf16.msra.mxu0 (!%p22925_p9), %v27013_v2  ;;  %v27080_v2 = vld [vmem:[#allocation14 + $0x200] ss:$16 sps:$4 sm:$0xff] (!%p22925_p9)  }
 0xd22   : > { %v16148_v7 = vpop.f32.mrb[16].mxu0 }
 0xd23   : > { %v23441_v8 = vadd.f32 %v16148_v7, %v11312_v0  ;;  %v16150_v44 = vpop.f32.mrb[17].mxu0  ;;  %16348 = vmatpush1.bf16.msra.mxu1 %v26972_v18  ;;  %v27014_v0 = vld [vmem:[#allocation14 + $0xa4] ss:$16 sps:$4 sm:$0xff] (!%p22925_p9)  }
 0xd24   : > { %v23442_v55 = vadd.f32 %v16150_v44, %v11316_v5  ;;  %v16152_v6 = vpop.f32.mrb[18].mxu0  ;;  %16349 = vmatprep.subr.bf16.mxu1 %v26977_v46  ;;  %v27016_v18 = vld [vmem:[#allocation14 + $0x4a4] ss:$16 sps:$4 sm:$0xff] (!%p22925_p9)   ;;  %v27018_v5 = vld [vmem:[#allocation14 + $0xa0] ss:$16 sps:$4 sm:$0xff] (!%p22925_p9)  }
 0xd25   : > { %v16153_v52 = vpop.f32.mrb[19].mxu0  ;;  %v27019_v46 = vld [vmem:[#allocation14 + $0x4a0] ss:$16 sps:$4 sm:$0xff] (!%p22925_p9)   ;;  %v27020_v7 = vld [vmem:[#allocation14 + $0xc4] ss:$16 sps:$4 sm:$0xff] (!%p22925_p9)   ;;  %18527 = vmatprep.subr.bf16.mxu0 (!%p22925_p9), %v27016_v18  ;;  %v30493_v18 = vpack.c.bf16 (!%p22925_p9), %v30461_v15, %v30461_v15 }
 0xd26   : > { %v16388_v11 = vcombine.low %v23441_v8, %v23442_v55  ;;  %v27022_v8 = vld [vmem:[#allocation14 + $0x4c4] ss:$16 sps:$4 sm:$0xff] (!%p22925_p9)   ;;  %v27024_v44 = vld [vmem:[#allocation14 + $0xc0] ss:$16 sps:$4 sm:$0xff] (!%p22925_p9)   ;;  %18528 = vmatpush1.bf16.msra.mxu0 (!%p22925_p9), %v27019_v46 }
 0xd27   : > { %16350 = vmatpush1.bf16.msra.mxu1 %v26975_v16  ;;  %v27025_v16 = vld [vmem:[#allocation14 + $0x4c0] ss:$16 sps:$4 sm:$0xff] (!%p22925_p9)   ;;  %v27026_v55 = vld [vmem:[#allocation14 + $0xe4] ss:$16 sps:$4 sm:$0xff] (!%p22925_p9)   ;;  %18529 = vmatprep.subr.bf16.mxu0 (!%p22925_p9), %v27022_v8  ;;  %v30499_v8 = vpack.c.bf16 (!%p22925_p9), %v16447_v32, %v16447_v32 }
 0xd28   : > { %v16402_v23 = vrot.slane %v16388_v11, %v28601_v34  ;;  %18435 = vmatprep.subr.bf16.mxu1 (!%p22925_p9), %v26984_v35  ;;  %v27028_v6 = vld [vmem:[#allocation14 + $0x4e4] ss:$16 sps:$4 sm:$0xff] (!%p22925_p9)   ;;  %v27030_v52 = vld [vmem:[#allocation14 + $0xe0] ss:$16 sps:$4 sm:$0xff] (!%p22925_p9)  }
 0xd29   : > { %v27031_v11 = vld [vmem:[#allocation14 + $0x4e0] ss:$16 sps:$4 sm:$0xff] (!%p22925_p9)   ;;  %v27058_v35 = vld [vmem:[#allocation14 + $0x584] ss:$16 sps:$4 sm:$0xff] (!%p22925_p9)  }
 0xd2a   : > { %v16403_v24 = vcombine.low %v16395_v22, %v16402_v23  ;;  %16352 = vmatmul.mubr.bf16.vlgmr.msra.gmra.mrb[16].mxu1 %v29832_v38  ;;  %18530 = vmatpush1.bf16.msra.mxu0 (!%p22925_p9), %v27025_v16  ;;  %v27032_v22 = vld [vmem:[#allocation14 + $0x104] ss:$16 sps:$4 sm:$0xff] (!%p22925_p9)   ;;  %v27086_v15 = vld [vmem:[#allocation14 + $0x220] ss:$16 sps:$4 sm:$0xff] (!%p22925_p9)  }
 0xd2b   : > { %18436 = vmatpush1.bf16.msra.mxu1 (!%p22925_p9), %v26988_v41  ;;  %18467 = vmatprep.mubr.bf16.mxu1 (!%p22925_p9), %v30471_v30  ;;  %v27034_v23 = vld [vmem:[#allocation14 + $0x504] ss:$16 sps:$4 sm:$0xff] (!%p22925_p9)   ;;  %v27061_v41 = vld [vmem:[#allocation14 + $0x580] ss:$16 sps:$4 sm:$0xff] (!%p22925_p9)  }
 0xd2c   : > { %v16416_v12 = vadd.f32 %v26982_v25, %v16403_v24  ;;  %18437 = vmatprep.subr.bf16.mxu1 (!%p22925_p9), %v26990_v43  ;;  %18531 = vmatprep.subr.bf16.mxu0 (!%p22925_p9), %v27028_v6  ;;  %v27036_v24 = vld [vmem:[#allocation14 + $0x100] ss:$16 sps:$4 sm:$0xff] (!%p22925_p9)   ;;  %v27088_v46 = vld [vmem:[#allocation14 + $0x224] ss:$16 sps:$4 sm:$0xff] (!%p22925_p9)  }
 0xd2d   : > { %v27037_v25 = vld [vmem:[#allocation14 + $0x500] ss:$16 sps:$4 sm:$0xff] (!%p22925_p9)   ;;  %v27157_v32 = vld [vmem:[#allocation14 + $0x784] ss:$16 sps:$4 sm:$0xff] (!%p22925_p9)  }
 0xd2e   : > { %v30446_v58 = vmax.f32 %v16416_v12, 0.0  ;;  %18532 = vmatpush1.bf16.msra.mxu0 (!%p22925_p9), %v27031_v11  ;;  %v27038_v12 = vld [vmem:[#allocation14 + $0x124] ss:$16 sps:$4 sm:$0xff] (!%p22925_p9)   ;;  %v27067_v43 = vld [vmem:[#allocation14 + $0x5a0] ss:$16 sps:$4 sm:$0xff] (!%p22925_p9)  }
 0xd2f   : > { %18438 = vmatpush1.bf16.msra.mxu1 (!%p22925_p9), %v26994_v26  ;;  %18533 = vmatprep.subr.bf16.mxu0 (!%p22925_p9), %v27034_v23  ;;  %v27070_v26 = vld [vmem:[#allocation14 + $0x5c4] ss:$16 sps:$4 sm:$0xff] (!%p22925_p9)   ;;  %v27089_v16 = vld [vmem:[#allocation14 + $0x620] ss:$16 sps:$4 sm:$0xff] (!%p22925_p9)  }
 0xd30   : > { %16422 = vst [vmem:[#allocation3 + $0x8] sm:$0xff] %v30446_v58  ;;  %v30465_v42 = vrot.slane (!%p22925_p9), %v30446_v58, %v28601_v34  ;;  %18439 = vmatprep.subr.bf16.mxu1 (!%p22925_p9), %v26996_v47  ;;  %v16448_v47 = vcombine.high (!%p22925_p9), %v30446_v58, %v30446_v58  ;;  %v27085_v58 = vld [vmem:[#allocation14 + $0x604] ss:$16 sps:$4 sm:$0xff] (!%p22925_p9)   ;;  %v27092_v6 = vld [vmem:[#allocation14 + $0x240] ss:$16 sps:$4 sm:$0xff] (!%p22925_p9)  }
 0xd31   : > { %v27100_v11 = vld [vmem:[#allocation14 + $0x264] ss:$16 sps:$4 sm:$0xff] (!%p22925_p9)   ;;  %v27098_v23 = vld [vmem:[#allocation14 + $0x260] ss:$16 sps:$4 sm:$0xff] (!%p22925_p9)  }
 0xd32   : > { %v16463_v36 = vcombine.high (!%p22925_p9), %v30465_v42, %v30465_v42  ;;  %18534 = vmatpush1.bf16.msra.mxu0 (!%p22925_p9), %v27037_v25  ;;  %v27106_v25 = vld [vmem:[#allocation14 + $0x284] ss:$16 sps:$4 sm:$0xff] (!%p22925_p9)  }
 0xd33   : > { %18440 = vmatpush1.bf16.msra.mxu1 (!%p22925_p9), %v27000_v57  ;;  %18535 = vmatprep.subr.bf16.mxu0 (!%p22925_p9), %v27040_v14  ;;  %v27073_v57 = vld [vmem:[#allocation14 + $0x5c0] ss:$16 sps:$4 sm:$0xff] (!%p22925_p9)  }
 0xd34   : > { %v30473_v27 = vpack.c.bf16 (!%p22925_p9), %v16463_v36, %v16463_v36  ;;  %18441 = vmatprep.subr.bf16.mxu1 (!%p22925_p9), %v27002_v53  ;;  %v27066_v36 = vld [vmem:[#allocation14 + $0x1a0] ss:$16 sps:$4 sm:$0xff] (!%p22925_p9)   ;;  %v27076_v53 = vld [vmem:[#allocation14 + $0x5e4] ss:$16 sps:$4 sm:$0xff] (!%p22925_p9)  }
 0xd35   : > { %v27104_v14 = vld [vmem:[#allocation14 + $0x280] ss:$16 sps:$4 sm:$0xff] (!%p22925_p9)  }
 0xd36   : > { %18549 = vmatprep.mubr.bf16.mxu0 (!%p22925_p9), %v30473_v27 }
 0xd37   : > { %18442 = vmatpush1.bf16.msra.mxu1 (!%p22925_p9), %v27006_v51  ;;  %v30485_v51 = vrot.slane (!%p22925_p9), %v16448_v47, %v28601_v34  ;;  %v27142_v47 = vld [vmem:[#allocation14 + $0x344] ss:$16 sps:$4 sm:$0xff] (!%p22925_p9)  }
 0xd38   : > { %18443 = vmatprep.subr.bf16.mxu1 (!%p22925_p9), %v27008_v56  ;;  %v27079_v56 = vld [vmem:[#allocation14 + $0x5e0] ss:$16 sps:$4 sm:$0xff] (!%p22925_p9)  }
 0xd3b   : > { %18444 = vmatpush1.bf16.msra.mxu1 (!%p22925_p9), %v27012_v63  ;;  %v16464_v63 = vcombine.high (!%p22925_p9), %v30485_v51, %v30485_v51 }
 0xd3c   : > { %18445 = vmatprep.subr.bf16.mxu1 (!%p22925_p9), %v27014_v0  ;;  %v27083_v0 = vld [vmem:[#allocation14 + $0x600] ss:$16 sps:$4 sm:$0xff] (!%p22925_p9)  }
 0xd3f   : > { %18446 = vmatpush1.bf16.msra.mxu1 (!%p22925_p9), %v27018_v5  ;;  %v30497_v5 = vpack.c.bf16 (!%p22925_p9), %v30465_v42, %v30465_v42  ;;  %v27094_v42 = vld [vmem:[#allocation14 + $0x244] ss:$16 sps:$4 sm:$0xff] (!%p22925_p9)  }
 0xd40   : > { %18447 = vmatprep.subr.bf16.mxu1 (!%p22925_p9), %v27020_v7  ;;  %v27091_v7 = vld [vmem:[#allocation14 + $0x624] ss:$16 sps:$4 sm:$0xff] (!%p22925_p9)  }
 0xd43   : > { %18448 = vmatpush1.bf16.msra.mxu1 (!%p22925_p9), %v27024_v44  ;;  %v30501_v44 = vpack.c.bf16 (!%p22925_p9), %v16464_v63, %v16464_v63  ;;  %v27152_v63 = vld [vmem:[#allocation14 + $0x380] ss:$16 sps:$4 sm:$0xff] (!%p22925_p9)  }
 0xd44   : > { %18449 = vmatprep.subr.bf16.mxu1 (!%p22925_p9), %v27026_v55  ;;  %v27097_v55 = vld [vmem:[#allocation14 + $0x644] ss:$16 sps:$4 sm:$0xff] (!%p22925_p9)  }
 0xd47   : > { %18450 = vmatpush1.bf16.msra.mxu1 (!%p22925_p9), %v27030_v52  ;;  %v27095_v52 = vld [vmem:[#allocation14 + $0x640] ss:$16 sps:$4 sm:$0xff] (!%p22925_p9)  }
 0xd48   : > { %18451 = vmatprep.subr.bf16.mxu1 (!%p22925_p9), %v27032_v22  ;;  %v27103_v22 = vld [vmem:[#allocation14 + $0x664] ss:$16 sps:$4 sm:$0xff] (!%p22925_p9)  }
 0xd4b   : > { %18452 = vmatpush1.bf16.msra.mxu1 (!%p22925_p9), %v27036_v24  ;;  %v27101_v24 = vld [vmem:[#allocation14 + $0x660] ss:$16 sps:$4 sm:$0xff] (!%p22925_p9)  }
 0xd4c   : > { %18453 = vmatprep.subr.bf16.mxu1 (!%p22925_p9), %v27038_v12  ;;  %v27109_v12 = vld [vmem:[#allocation14 + $0x684] ss:$16 sps:$4 sm:$0xff] (!%p22925_p9)  }
 0xdfd   : > { %v16353_v17 = vpop.f32.mrb[16].mxu1 }
 0xdfe   : > { %v23443_v19 = vadd.f32 %v16353_v17, %v11320_v28  ;;  %v16355_v1 = vpop.f32.mrb[17].mxu1  ;;  %v27042_v28 = vld [vmem:[#allocation14 + $0x120] ss:$16 sps:$4 sm:$0xff] (!%p22925_p9)   ;;  %v27044_v17 = vld [vmem:[#allocation14 + $0x144] ss:$16 sps:$4 sm:$0xff] (!%p22925_p9)  }
 0xdff   : > { %v23444_v3 = vadd.f32 %v16355_v1, %v11324_v39  ;;  %v16357_v10 = vpop.f32.mrb[18].mxu1  ;;  %v27043_v39 = vld [vmem:[#allocation14 + $0x520] ss:$16 sps:$4 sm:$0xff] (!%p22925_p9)   ;;  %18454 = vmatpush1.bf16.msra.mxu1 (!%p22925_p9), %v27042_v28 }
 0xe00   : > { %v16358_v20 = vpop.f32.mrb[19].mxu1  ;;  %v27048_v1 = vld [vmem:[#allocation14 + $0x140] ss:$16 sps:$4 sm:$0xff] (!%p22925_p9)   ;;  %18536 = vmatpush1.bf16.msra.mxu0 (!%p22925_p9), %v27043_v39  ;;  %v27050_v10 = vld [vmem:[#allocation14 + $0x164] ss:$16 sps:$4 sm:$0xff] (!%p22925_p9)   ;;  %18455 = vmatprep.subr.bf16.mxu1 (!%p22925_p9), %v27044_v17 }
 0xe01   : > { %v16404_v59 = vcombine.low %v23443_v19, %v23444_v3  ;;  %v27046_v19 = vld [vmem:[#allocation14 + $0x544] ss:$16 sps:$4 sm:$0xff] (!%p22925_p9)   ;;  %v27049_v3 = vld [vmem:[#allocation14 + $0x540] ss:$16 sps:$4 sm:$0xff] (!%p22925_p9)  }
 0xe02   : > { %18537 = vmatprep.subr.bf16.mxu0 (!%p22925_p9), %v27046_v19  ;;  %v27052_v20 = vld [vmem:[#allocation14 + $0x564] ss:$16 sps:$4 sm:$0xff] (!%p22925_p9)   ;;  %v27107_v28 = vld [vmem:[#allocation14 + $0x680] ss:$16 sps:$4 sm:$0xff] (!%p22925_p9)  }
 0xe03   : > { %v16411_v38 = vrot.slane %v16404_v59, %v28601_v34  ;;  %16427 = sbr.rel (%p22925_p9) target bundleno = 4705 (0x1261), region = 120  ;;  %v27054_v59 = vld [vmem:[#allocation14 + $0x160] ss:$16 sps:$4 sm:$0xff] (!%p22925_p9)   ;;  %18456 = vmatpush1.bf16.msra.mxu1 (!%p22925_p9), %v27048_v1  ;;  %v27112_v39 = vld [vmem:[#allocation14 + $0x2a4] ss:$16 sps:$4 sm:$0xff] (!%p22925_p9)  }
 0xe04   : > { %18538 = vmatpush1.bf16.msra.mxu0 (!%p22925_p9), %v27049_v3  ;;  %18457 = vmatprep.subr.bf16.mxu1 (!%p22925_p9), %v27050_v10  ;;  %v27115_v17 = vld [vmem:[#allocation14 + $0x6a4] ss:$16 sps:$4 sm:$0xff] (!%p22925_p9)   ;;  %v27110_v19 = vld [vmem:[#allocation14 + $0x2a0] ss:$16 sps:$4 sm:$0xff] (!%p22925_p9)  }
 0xe05   : > { %v30453_v4 = vadd.f32 %v26983_v29, %v16411_v38  ;;  %v27055_v38 = vld [vmem:[#allocation14 + $0x560] ss:$16 sps:$4 sm:$0xff] (!%p22925_p9)   ;;  %v27056_v29 = vld [vmem:[#allocation14 + $0x184] ss:$16 sps:$4 sm:$0xff] (!%p22925_p9)   ;;  %18539 = vmatprep.subr.bf16.mxu0 (!%p22925_p9), %v27052_v20 }
 0xe06   : > { %v27113_v1 = vld [vmem:[#allocation14 + $0x6a0] ss:$16 sps:$4 sm:$0xff] (!%p22925_p9)   ;;  %v27118_v3 = vld [vmem:[#allocation14 + $0x2c4] ss:$16 sps:$4 sm:$0xff] (!%p22925_p9)  }
 0xe07   : > { %v16420_v33 = vmax.f32 %v30453_v4, 0.0  ;;  %18458 = vmatpush1.bf16.msra.mxu1 (!%p22925_p9), %v27054_v59  ;;  %v27121_v10 = vld [vmem:[#allocation14 + $0x6c4] ss:$16 sps:$4 sm:$0xff] (!%p22925_p9)   ;;  %v27116_v20 = vld [vmem:[#allocation14 + $0x2c0] ss:$16 sps:$4 sm:$0xff] (!%p22925_p9)   ;;  %v30520_v4 = vpack.c.bf16 (!%p22925_p9), %v30485_v51, %v30485_v51 }
 0xe08   : > { %18540 = vmatpush1.bf16.msra.mxu0 (!%p22925_p9), %v27055_v38  ;;  %18459 = vmatprep.subr.bf16.mxu1 (!%p22925_p9), %v27056_v29  ;;  %v27119_v59 = vld [vmem:[#allocation14 + $0x6c0] ss:$16 sps:$4 sm:$0xff] (!%p22925_p9)   ;;  %v27124_v38 = vld [vmem:[#allocation14 + $0x2e4] ss:$16 sps:$4 sm:$0xff] (!%p22925_p9)   ;;  %v27193_v51 = vld [vmem:[#allocation14 + $0x4c] ss:$16 sps:$4 sm:$0xff] (!%p22925_p9)  }
 0xe09   : > { %16423 = vst [vmem:[#allocation3 + $0x10] sm:$0xf] %v16420_v33  ;;  %18541 = vmatprep.subr.bf16.mxu0 (!%p22925_p9), %v27058_v35  ;;  %v27127_v29 = vld [vmem:[#allocation14 + $0x6e4] ss:$16 sps:$4 sm:$0xff] (!%p22925_p9)   ;;  %v27122_v35 = vld [vmem:[#allocation14 + $0x2e0] ss:$16 sps:$4 sm:$0xff] (!%p22925_p9)  }
 0xe0b   : > { %18460 = vmatpush1.bf16.msra.mxu1 %v27060_v37  ;;  %v27125_v37 = vld [vmem:[#allocation14 + $0x6e0] ss:$16 sps:$4 sm:$0xff]  }
 0xe0c   : > { %18542 = vmatpush1.bf16.msra.mxu0 %v27061_v41  ;;  %18461 = vmatprep.subr.bf16.mxu1 %v27062_v61  ;;  %v27130_v41 = vld [vmem:[#allocation14 + $0x304] ss:$16 sps:$4 sm:$0xff]  }
 0xe0d   : > { %18543 = vmatprep.subr.bf16.mxu0 %v27064_v45  ;;  %v27133_v61 = vld [vmem:[#allocation14 + $0x704] ss:$16 sps:$4 sm:$0xff]   ;;  %v27128_v45 = vld [vmem:[#allocation14 + $0x300] ss:$16 sps:$4 sm:$0xff]  }
 0xe0f   : > { %18462 = vmatpush1.bf16.msra.mxu1 %v27066_v36  ;;  %v27131_v36 = vld [vmem:[#allocation14 + $0x700] ss:$16 sps:$4 sm:$0xff]  }
 0xe10   : > { %18544 = vmatpush1.bf16.msra.mxu0 %v27067_v43  ;;  %18463 = vmatprep.subr.bf16.mxu1 %v27068_v40  ;;  %v27136_v43 = vld [vmem:[#allocation14 + $0x324] ss:$16 sps:$4 sm:$0xff]  }
 0xe11   : > { %18545 = vmatprep.subr.bf16.mxu0 %v27070_v26  ;;  %v27139_v40 = vld [vmem:[#allocation14 + $0x724] ss:$16 sps:$4 sm:$0xff]   ;;  %v27134_v26 = vld [vmem:[#allocation14 + $0x320] ss:$16 sps:$4 sm:$0xff]  }
 0xe13   : > { %18464 = vmatpush1.bf16.msra.mxu1 %v27072_v48  ;;  %v27145_v48 = vld [vmem:[#allocation14 + $0x744] ss:$16 sps:$4 sm:$0xff]  }
 0xe14   : > { %18546 = vmatpush1.bf16.msra.mxu0 %v27073_v57  ;;  %18465 = vmatprep.subr.bf16.mxu1 %v27074_v50  ;;  %v27140_v57 = vld [vmem:[#allocation14 + $0x340] ss:$16 sps:$4 sm:$0xff]  }
 0xe15   : > { %18547 = vmatprep.subr.bf16.mxu0 %v27076_v53  ;;  %v27143_v50 = vld [vmem:[#allocation14 + $0x740] ss:$16 sps:$4 sm:$0xff]   ;;  %v27148_v53 = vld [vmem:[#allocation14 + $0x364] ss:$16 sps:$4 sm:$0xff]  }
 0xe17   : > { %18466 = vmatpush1.bf16.msra.mxu1 %v27078_v21  ;;  %v27151_v21 = vld [vmem:[#allocation14 + $0x764] ss:$16 sps:$4 sm:$0xff]  }
 0xe18   : > { %18548 = vmatpush1.bf16.msra.mxu0 %v27079_v56  ;;  %18476 = vmatprep.subr.bf16.mxu1 %v27082_v13  ;;  %v27146_v56 = vld [vmem:[#allocation14 + $0x360] ss:$16 sps:$4 sm:$0xff]  }
 0xe19   : > { %18558 = vmatprep.subr.bf16.mxu0 %v27085_v58  ;;  %v27149_v13 = vld [vmem:[#allocation14 + $0x760] ss:$16 sps:$4 sm:$0xff]   ;;  %v27154_v58 = vld [vmem:[#allocation14 + $0x384] ss:$16 sps:$4 sm:$0xff]  }
 0xe1a   : > { %18468 = vmatmul.mubr.bf16.vlgmr.msra.gmra.mrb[0].mxu1 %v30493_v18 }
 0xe1b   : > { %18550 = vmatmul.mubr.bf16.vlgmr.msra.gmra.mrb[0].mxu0 %v30497_v5  ;;  %18477 = vmatpush1.bf16.msra.mxu1 %v27080_v2  ;;  %v27155_v2 = vld [vmem:[#allocation14 + $0x780] ss:$16 sps:$4 sm:$0xff]  }
 0xe1c   : > { %18559 = vmatpush1.bf16.msra.mxu0 %v27083_v0  ;;  %18478 = vmatprep.subr.bf16.mxu1 %v27088_v46  ;;  %v27160_v0 = vld [vmem:[#allocation14 + $0x3a4] ss:$16 sps:$4 sm:$0xff]  }
 0xe1d   : > { %18560 = vmatprep.subr.bf16.mxu0 %v27091_v7  ;;  %18508 = vmatprep.mubr.bf16.mxu1 %v30499_v8  ;;  %v27163_v46 = vld [vmem:[#allocation14 + $0x7a4] ss:$16 sps:$4 sm:$0xff]   ;;  %v27158_v7 = vld [vmem:[#allocation14 + $0x3a0] ss:$16 sps:$4 sm:$0xff]  }
 0xe1e   : > { %18590 = vmatprep.mubr.bf16.mxu0 %v30501_v44 }
 0xe1f   : > { %18479 = vmatpush1.bf16.msra.mxu1 %v27086_v15  ;;  %v27161_v15 = vld [vmem:[#allocation14 + $0x7a0] ss:$16 sps:$4 sm:$0xff]  }
 0xe20   : > { %18561 = vmatpush1.bf16.msra.mxu0 %v27089_v16  ;;  %18480 = vmatprep.subr.bf16.mxu1 %v27094_v42  ;;  %v27166_v16 = vld [vmem:[#allocation14 + $0x3c4] ss:$16 sps:$4 sm:$0xff]  }
 0xe21   : > { %18562 = vmatprep.subr.bf16.mxu0 %v27097_v55  ;;  %v27169_v42 = vld [vmem:[#allocation14 + $0x7c4] ss:$16 sps:$4 sm:$0xff]   ;;  %v27164_v55 = vld [vmem:[#allocation14 + $0x3c0] ss:$16 sps:$4 sm:$0xff]  }
 0xe23   : > { %18481 = vmatpush1.bf16.msra.mxu1 %v27092_v6  ;;  %v27167_v6 = vld [vmem:[#allocation14 + $0x7c0] ss:$16 sps:$4 sm:$0xff]  }
 0xe24   : > { %18563 = vmatpush1.bf16.msra.mxu0 %v27095_v52  ;;  %18482 = vmatprep.subr.bf16.mxu1 %v27100_v11  ;;  %v27172_v52 = vld [vmem:[#allocation14 + $0x3e4] ss:$16 sps:$4 sm:$0xff]  }
 0xe25   : > { %18564 = vmatprep.subr.bf16.mxu0 %v27103_v22  ;;  %v27175_v11 = vld [vmem:[#allocation14 + $0x7e4] ss:$16 sps:$4 sm:$0xff]   ;;  %v30510_v22 = vrot.slane %v16420_v33, %v28601_v34 }
 0xe26   : > { %v27184_v33 = vld [vmem:[#allocation14 + $0x824] ss:$16 sps:$4 sm:$0xff]  }
 0xe27   : > { %18483 = vmatpush1.bf16.msra.mxu1 %v27098_v23  ;;  %v27170_v23 = vld [vmem:[#allocation14 + $0x3e0] ss:$16 sps:$4 sm:$0xff]  }
 0xe28   : > { %18565 = vmatpush1.bf16.msra.mxu0 %v27101_v24  ;;  %18484 = vmatprep.subr.bf16.mxu1 %v27106_v25  ;;  %v27173_v24 = vld [vmem:[#allocation14 + $0x7e0] ss:$16 sps:$4 sm:$0xff]   ;;  %v27178_v25 = vld [vmem:[#allocation14 + $0x804] ss:$16 sps:$4 sm:$0xff]  }
 0xe29   : > { %18566 = vmatprep.subr.bf16.mxu0 %v27109_v12  ;;  %v27181_v12 = vld [vmem:[#allocation14 + $0xc] ss:$16 sps:$4 sm:$0xff]  }
 0xe2b   : > { %18485 = vmatpush1.bf16.msra.mxu1 %v27104_v14  ;;  %v16472_v14 = vcombine.high %v30510_v22, %v30510_v22 }
 0xe2c   : > { %18567 = vmatpush1.bf16.msra.mxu0 %v27107_v28  ;;  %18486 = vmatprep.subr.bf16.mxu1 %v27112_v39  ;;  %v30516_v28 = vpack.c.bf16 %v30482_v49, %v30482_v49  ;;  %v27176_v39 = vld [vmem:[#allocation14 + $0x800] ss:$16 sps:$4 sm:$0xff]  }
 0xe2d   : > { %18568 = vmatprep.subr.bf16.mxu0 %v27115_v17  ;;  %v27179_v17 = vld [vmem:[#allocation14 + $0x8] ss:$16 sps:$4 sm:$0xff]   ;;  %v27182_v49 = vld [vmem:[#allocation14 + $0x820] ss:$16 sps:$4 sm:$0xff]  }
 0xe2f   : > { %18487 = vmatpush1.bf16.msra.mxu1 %v27110_v19  ;;  %v27187_v19 = vld [vmem:[#allocation14 + $0x2c] ss:$16 sps:$4 sm:$0xff]  }
 0xe30   : > { %18569 = vmatpush1.bf16.msra.mxu0 %v27113_v1  ;;  %18488 = vmatprep.subr.bf16.mxu1 %v27118_v3  ;;  %v30522_v1 = vpack.c.bf16 %v16472_v14, %v16472_v14  ;;  %v27185_v3 = vld [vmem:[#allocation14 + $0x28] ss:$16 sps:$4 sm:$0xff]  }
 0xe31   : > { %18570 = vmatprep.subr.bf16.mxu0 %v27121_v10  ;;  %v27190_v10 = vld [vmem:[#allocation14 + $0x844] ss:$16 sps:$4 sm:$0xff]   ;;  %v27251_v14 = vld [vmem:[#allocation14 + $0x188] ss:$16 sps:$4 sm:$0xff]  }
 0xe33   : > { %18489 = vmatpush1.bf16.msra.mxu1 %v27116_v20  ;;  %v27188_v20 = vld [vmem:[#allocation14 + $0x840] ss:$16 sps:$4 sm:$0xff]  }
 0xe34   : > { %18571 = vmatpush1.bf16.msra.mxu0 %v27119_v59  ;;  %18490 = vmatprep.subr.bf16.mxu1 %v27124_v38  ;;  %v27191_v59 = vld [vmem:[#allocation14 + $0x48] ss:$16 sps:$4 sm:$0xff]   ;;  %v27196_v38 = vld [vmem:[#allocation14 + $0x864] ss:$16 sps:$4 sm:$0xff]  }
 0xe35   : > { %18572 = vmatprep.subr.bf16.mxu0 %v27127_v29  ;;  %v27199_v29 = vld [vmem:[#allocation14 + $0x6c] ss:$16 sps:$4 sm:$0xff]  }
 0xe37   : > { %18491 = vmatpush1.bf16.msra.mxu1 %v27122_v35  ;;  %v27194_v35 = vld [vmem:[#allocation14 + $0x860] ss:$16 sps:$4 sm:$0xff]  }
 0xe38   : > { %18573 = vmatpush1.bf16.msra.mxu0 %v27125_v37  ;;  %18492 = vmatprep.subr.bf16.mxu1 %v27130_v41  ;;  %v27197_v37 = vld [vmem:[#allocation14 + $0x68] ss:$16 sps:$4 sm:$0xff]   ;;  %v27202_v41 = vld [vmem:[#allocation14 + $0x884] ss:$16 sps:$4 sm:$0xff]  }
 0xe39   : > { %18574 = vmatprep.subr.bf16.mxu0 %v27133_v61  ;;  %v27205_v61 = vld [vmem:[#allocation14 + $0x8c] ss:$16 sps:$4 sm:$0xff]  }
 0xe3b   : > { %18493 = vmatpush1.bf16.msra.mxu1 %v27128_v45  ;;  %v27200_v45 = vld [vmem:[#allocation14 + $0x880] ss:$16 sps:$4 sm:$0xff]  }
 0xe3c   : > { %18575 = vmatpush1.bf16.msra.mxu0 %v27131_v36  ;;  %18494 = vmatprep.subr.bf16.mxu1 %v27136_v43  ;;  %v27203_v36 = vld [vmem:[#allocation14 + $0x88] ss:$16 sps:$4 sm:$0xff]   ;;  %v27211_v43 = vld [vmem:[#allocation14 + $0xac] ss:$16 sps:$4 sm:$0xff]  }
 0xe3d   : > { %18576 = vmatprep.subr.bf16.mxu0 %v27139_v40  ;;  %v27206_v40 = vld [vmem:[#allocation14 + $0x8a0] ss:$16 sps:$4 sm:$0xff]  }
 0xe3f   : > { %18495 = vmatpush1.bf16.msra.mxu1 %v27134_v26  ;;  %v27209_v26 = vld [vmem:[#allocation14 + $0xa8] ss:$16 sps:$4 sm:$0xff]  }
 0xe40   : > { %18577 = vmatpush1.bf16.msra.mxu0 %v27137_v54  ;;  %18496 = vmatprep.subr.bf16.mxu1 %v27142_v47  ;;  %v27214_v54 = vld [vmem:[#allocation14 + $0x8c4] ss:$16 sps:$4 sm:$0xff]   ;;  %v27217_v47 = vld [vmem:[#allocation14 + $0xcc] ss:$16 sps:$4 sm:$0xff]  }
 0xe41   : > { %18578 = vmatprep.subr.bf16.mxu0 %v27145_v48  ;;  %v27212_v48 = vld [vmem:[#allocation14 + $0x8c0] ss:$16 sps:$4 sm:$0xff]  }
 0xe43   : > { %18497 = vmatpush1.bf16.msra.mxu1 %v27140_v57  ;;  %v27215_v57 = vld [vmem:[#allocation14 + $0xc8] ss:$16 sps:$4 sm:$0xff]  }
 0xe44   : > { %18579 = vmatpush1.bf16.msra.mxu0 %v27143_v50  ;;  %18498 = vmatprep.subr.bf16.mxu1 %v27148_v53  ;;  %v27220_v50 = vld [vmem:[#allocation14 + $0x8e4] ss:$16 sps:$4 sm:$0xff]   ;;  %v27223_v53 = vld [vmem:[#allocation14 + $0xec] ss:$16 sps:$4 sm:$0xff]  }
 0xe45   : > { %18580 = vmatprep.subr.bf16.mxu0 %v27151_v21  ;;  %v27218_v21 = vld [vmem:[#allocation14 + $0x8e0] ss:$16 sps:$4 sm:$0xff]  }
 0xe47   : > { %18499 = vmatpush1.bf16.msra.mxu1 %v27146_v56  ;;  %v27221_v56 = vld [vmem:[#allocation14 + $0xe8] ss:$16 sps:$4 sm:$0xff]  }
 0xe48   : > { %18581 = vmatpush1.bf16.msra.mxu0 %v27149_v13  ;;  %18500 = vmatprep.subr.bf16.mxu1 %v27154_v58  ;;  %v27226_v13 = vld [vmem:[#allocation14 + $0x904] ss:$16 sps:$4 sm:$0xff]   ;;  %v27229_v58 = vld [vmem:[#allocation14 + $0x10c] ss:$16 sps:$4 sm:$0xff]  }
 0xe49   : > { %18582 = vmatprep.subr.bf16.mxu0 %v27157_v32  ;;  %v27224_v32 = vld [vmem:[#allocation14 + $0x900] ss:$16 sps:$4 sm:$0xff]  }
 0xe4b   : > { %18501 = vmatpush1.bf16.msra.mxu1 %v27152_v63  ;;  %v27227_v63 = vld [vmem:[#allocation14 + $0x108] ss:$16 sps:$4 sm:$0xff]  }
 0xe4c   : > { %18583 = vmatpush1.bf16.msra.mxu0 %v27155_v2  ;;  %18502 = vmatprep.subr.bf16.mxu1 %v27160_v0  ;;  %v27232_v2 = vld [vmem:[#allocation14 + $0x924] ss:$16 sps:$4 sm:$0xff]   ;;  %v27235_v0 = vld [vmem:[#allocation14 + $0x12c] ss:$16 sps:$4 sm:$0xff]  }
 0xe4d   : > { %18584 = vmatprep.subr.bf16.mxu0 %v27163_v46  ;;  %v27230_v46 = vld [vmem:[#allocation14 + $0x920] ss:$16 sps:$4 sm:$0xff]  }
 0xe4f   : > { %18503 = vmatpush1.bf16.msra.mxu1 %v27158_v7  ;;  %v27233_v7 = vld [vmem:[#allocation14 + $0x128] ss:$16 sps:$4 sm:$0xff]  }
 0xe50   : > { %18585 = vmatpush1.bf16.msra.mxu0 %v27161_v15  ;;  %18504 = vmatprep.subr.bf16.mxu1 %v27166_v16  ;;  %v27238_v15 = vld [vmem:[#allocation14 + $0x944] ss:$16 sps:$4 sm:$0xff]   ;;  %v27241_v16 = vld [vmem:[#allocation14 + $0x14c] ss:$16 sps:$4 sm:$0xff]  }
 0xe51   : > { %18586 = vmatprep.subr.bf16.mxu0 %v27169_v42  ;;  %v27236_v42 = vld [vmem:[#allocation14 + $0x940] ss:$16 sps:$4 sm:$0xff]  }
 0xe53   : > { %18505 = vmatpush1.bf16.msra.mxu1 %v27164_v55  ;;  %v27239_v55 = vld [vmem:[#allocation14 + $0x148] ss:$16 sps:$4 sm:$0xff]  }
 0xe54   : > { %18587 = vmatpush1.bf16.msra.mxu0 %v27167_v6  ;;  %18506 = vmatprep.subr.bf16.mxu1 %v27172_v52  ;;  %v27244_v6 = vld [vmem:[#allocation14 + $0x964] ss:$16 sps:$4 sm:$0xff]   ;;  %v27247_v52 = vld [vmem:[#allocation14 + $0x16c] ss:$16 sps:$4 sm:$0xff]  }
 0xe55   : > { %18588 = vmatprep.subr.bf16.mxu0 %v27175_v11  ;;  %v27242_v11 = vld [vmem:[#allocation14 + $0x960] ss:$16 sps:$4 sm:$0xff]  }
 0xe57   : > { %18507 = vmatpush1.bf16.msra.mxu1 %v27170_v23  ;;  %v27245_v23 = vld [vmem:[#allocation14 + $0x168] ss:$16 sps:$4 sm:$0xff]  }
 0xe58   : > { %18589 = vmatpush1.bf16.msra.mxu0 %v27173_v24  ;;  %18640 = vmatprep.subr.bf16.mxu1 %v27181_v12  ;;  %v27250_v24 = vld [vmem:[#allocation14 + $0x984] ss:$16 sps:$4 sm:$0xff]   ;;  %v27248_v12 = vld [vmem:[#allocation14 + $0x980] ss:$16 sps:$4 sm:$0xff]  }
 0xe59   : > { %18599 = vmatprep.subr.bf16.mxu0 %v27178_v25  ;;  %v27253_v25 = vld [vmem:[#allocation14 + $0x18c] ss:$16 sps:$4 sm:$0xff]  }
 0xe5a   : > { %18509 = vmatmul.mubr.bf16.vlgmr.msra.gmra.mrb[0].mxu1 %v30516_v28 }
 0xe5b   : > { %18591 = vmatmul.mubr.bf16.vlgmr.msra.gmra.mrb[0].mxu0 %v30520_v4  ;;  %18641 = vmatpush1.bf16.msra.mxu1 %v27179_v17  ;;  %v27259_v17 = vld [vmem:[#allocation14 + $0x1ac] ss:$16 sps:$4 sm:$0xff]  }
 0xe5c   : > { %18600 = vmatpush1.bf16.msra.mxu0 %v27176_v39  ;;  %18642 = vmatprep.subr.bf16.mxu1 %v27187_v19  ;;  %v27256_v39 = vld [vmem:[#allocation14 + $0x9a4] ss:$16 sps:$4 sm:$0xff]   ;;  %v27257_v19 = vld [vmem:[#allocation14 + $0x1a8] ss:$16 sps:$4 sm:$0xff]  }
 0xe5d   : > { %18601 = vmatprep.subr.bf16.mxu0 %v27184_v33  ;;  %18631 = vmatprep.mubr.bf16.mxu0 %v30522_v1  ;;  %v27254_v33 = vld [vmem:[#allocation14 + $0x9a0] ss:$16 sps:$4 sm:$0xff]  }
 0xe5e   : > { %18672 = vmatprep.mubr.bf16.mxu1 %v30471_v30  ;;  %v27208_v30 = vld [vmem:[#allocation14 + $0x8a4] ss:$16 sps:$4 sm:$0xff]  }
 0xe5f   : > { %18643 = vmatpush1.bf16.msra.mxu1 %v27185_v3  ;;  %v27265_v3 = vld [vmem:[#allocation14 + $0x1cc] ss:$16 sps:$4 sm:$0xff]  }
 0xe60   : > { %18602 = vmatpush1.bf16.msra.mxu0 %v27182_v49  ;;  %18644 = vmatprep.subr.bf16.mxu1 %v27193_v51  ;;  %v27262_v49 = vld [vmem:[#allocation14 + $0x9c4] ss:$16 sps:$4 sm:$0xff]   ;;  %v27263_v51 = vld [vmem:[#allocation14 + $0x1c8] ss:$16 sps:$4 sm:$0xff]  }
 0xe61   : > { %18603 = vmatprep.subr.bf16.mxu0 %v27190_v10  ;;  %v27260_v10 = vld [vmem:[#allocation14 + $0x9c0] ss:$16 sps:$4 sm:$0xff]  }
 0xe63   : > { %18645 = vmatpush1.bf16.msra.mxu1 %v27191_v59  ;;  %v27271_v59 = vld [vmem:[#allocation14 + $0x1ec] ss:$16 sps:$4 sm:$0xff]  }
 0xe64   : > { %18604 = vmatpush1.bf16.msra.mxu0 %v27188_v20  ;;  %18646 = vmatprep.subr.bf16.mxu1 %v27199_v29  ;;  %v27268_v20 = vld [vmem:[#allocation14 + $0x9e4] ss:$16 sps:$4 sm:$0xff]   ;;  %v27269_v29 = vld [vmem:[#allocation14 + $0x1e8] ss:$16 sps:$4 sm:$0xff]  }
 0xe65   : > { %18605 = vmatprep.subr.bf16.mxu0 %v27196_v38  ;;  %v27266_v38 = vld [vmem:[#allocation14 + $0x9e0] ss:$16 sps:$4 sm:$0xff]  }
 0xe67   : > { %18647 = vmatpush1.bf16.msra.mxu1 %v27197_v37  ;;  %v30530_v37 = vpack.c.bf16 %v30510_v22, %v30510_v22  ;;  %v27281_v22 = vld [vmem:[#allocation14 + $0x268] ss:$16 sps:$4 sm:$0xff]  }
 0xe68   : > { %18606 = vmatpush1.bf16.msra.mxu0 %v27194_v35  ;;  %18648 = vmatprep.subr.bf16.mxu1 %v27205_v61  ;;  %v27274_v35 = vld [vmem:[#allocation14 + $0x20c] ss:$16 sps:$4 sm:$0xff]  }
 0xe69   : > { %18607 = vmatprep.subr.bf16.mxu0 %v27202_v41  ;;  %v27272_v41 = vld [vmem:[#allocation14 + $0x208] ss:$16 sps:$4 sm:$0xff]   ;;  %v27277_v61 = vld [vmem:[#allocation14 + $0x22c] ss:$16 sps:$4 sm:$0xff]  }
 0xe6b   : > { %18649 = vmatpush1.bf16.msra.mxu1 %v27203_v36  ;;  %v27280_v36 = vld [vmem:[#allocation14 + $0x24c] ss:$16 sps:$4 sm:$0xff]  }
 0xe6c   : > { %18608 = vmatpush1.bf16.msra.mxu0 %v27200_v45  ;;  %18650 = vmatprep.subr.bf16.mxu1 %v27211_v43  ;;  %v27275_v45 = vld [vmem:[#allocation14 + $0x228] ss:$16 sps:$4 sm:$0xff]   ;;  %v27283_v43 = vld [vmem:[#allocation14 + $0x26c] ss:$16 sps:$4 sm:$0xff]  }
 0xe6d   : > { %18609 = vmatprep.subr.bf16.mxu0 %v27208_v30  ;;  %v27278_v30 = vld [vmem:[#allocation14 + $0x248] ss:$16 sps:$4 sm:$0xff]  }
 0xe6f   : > { %18651 = vmatpush1.bf16.msra.mxu1 %v27209_v26  ;;  %v27284_v26 = vld [vmem:[#allocation14 + $0x288] ss:$16 sps:$4 sm:$0xff]  }
 0xe70   : > { %18610 = vmatpush1.bf16.msra.mxu0 %v27206_v40  ;;  %18652 = vmatprep.subr.bf16.mxu1 %v27217_v47  ;;  %v27286_v40 = vld [vmem:[#allocation14 + $0x28c] ss:$16 sps:$4 sm:$0xff]  }
 0xe71   : > { %18611 = vmatprep.subr.bf16.mxu0 %v27214_v54  ;;  %v27289_v54 = vld [vmem:[#allocation14 + $0x2ac] ss:$16 sps:$4 sm:$0xff]  }
 0xe72   : > { %v27292_v47 = vld [vmem:[#allocation14 + $0x2cc] ss:$16 sps:$4 sm:$0xff]  }
 0xe73   : > { %18653 = vmatpush1.bf16.msra.mxu1 %v27215_v57  ;;  %v27391_v57 = vld [vmem:[#allocation18 + $0x4] ss:$8 sps:$4 sm:$0xff]  }
 0xe74   : > { %18612 = vmatpush1.bf16.msra.mxu0 %v27212_v48  ;;  %18654 = vmatprep.subr.bf16.mxu1 %v27223_v53  ;;  %v27290_v48 = vld [vmem:[#allocation14 + $0x2c8] ss:$16 sps:$4 sm:$0xff]   ;;  %v27298_v53 = vld [vmem:[#allocation14 + $0x30c] ss:$16 sps:$4 sm:$0xff]  }
 0xe75   : > { %18613 = vmatprep.subr.bf16.mxu0 %v27220_v50  ;;  %v27293_v50 = vld [vmem:[#allocation14 + $0x2e8] ss:$16 sps:$4 sm:$0xff]  }
 0xe77   : > { %18655 = vmatpush1.bf16.msra.mxu1 %v27221_v56  ;;  %v27397_v56 = vld [vmem:[#allocation18 + $0x14] ss:$8 sps:$4 sm:$0xff]  }
 0xe78   : > { %18614 = vmatpush1.bf16.msra.mxu0 %v27218_v21  ;;  %18656 = vmatprep.subr.bf16.mxu1 %v27229_v58  ;;  %v27389_v21 = vld [vmem:[#allocation18] ss:$8 sps:$4 sm:$0xff]  }
 0xe79   : > { %18615 = vmatprep.subr.bf16.mxu0 %v27226_v13  ;;  %v27296_v13 = vld [vmem:[#allocation14 + $0x308] ss:$16 sps:$4 sm:$0xff]   ;;  %v27301_v58 = vld [vmem:[#allocation14 + $0x32c] ss:$16 sps:$4 sm:$0xff]  }
 0xe7b   : > { %18657 = vmatpush1.bf16.msra.mxu1 %v27227_v63  ;;  %v27403_v63 = vld [vmem:[#allocation18 + $0x24] ss:$8 sps:$4 sm:$0xff]  }
 0xe7c   : > { %18616 = vmatpush1.bf16.msra.mxu0 %v27224_v32  ;;  %18658 = vmatprep.subr.bf16.mxu1 %v27235_v0  ;;  %v27395_v32 = vld [vmem:[#allocation18 + $0x10] ss:$8 sps:$4 sm:$0xff]  }
 0xe7d   : > { %18617 = vmatprep.subr.bf16.mxu0 %v27232_v2  ;;  %v27299_v2 = vld [vmem:[#allocation14 + $0x328] ss:$16 sps:$4 sm:$0xff]   ;;  %v27304_v0 = vld [vmem:[#allocation14 + $0x34c] ss:$16 sps:$4 sm:$0xff]  }
 0xe7f   : > { %18659 = vmatpush1.bf16.msra.mxu1 %v27233_v7  ;;  %v27409_v7 = vld [vmem:[#allocation18 + $0x34] ss:$8 sps:$4 sm:$0xff]  }
 0xe80   : > { %18618 = vmatpush1.bf16.msra.mxu0 %v27230_v46  ;;  %18660 = vmatprep.subr.bf16.mxu1 %v27241_v16  ;;  %v27401_v46 = vld [vmem:[#allocation18 + $0x20] ss:$8 sps:$4 sm:$0xff]  }
 0xe81   : > { %18619 = vmatprep.subr.bf16.mxu0 %v27238_v15  ;;  %v27302_v15 = vld [vmem:[#allocation14 + $0x348] ss:$16 sps:$4 sm:$0xff]   ;;  %v27307_v16 = vld [vmem:[#allocation14 + $0x36c] ss:$16 sps:$4 sm:$0xff]  }
 0xe83   : > { %18661 = vmatpush1.bf16.msra.mxu1 %v27239_v55  ;;  %v27415_v55 = vld [vmem:[#allocation18 + $0x44] ss:$8 sps:$4 sm:$0xff]  }
 0xe84   : > { %18620 = vmatpush1.bf16.msra.mxu0 %v27236_v42  ;;  %18662 = vmatprep.subr.bf16.mxu1 %v27247_v52  ;;  %v27407_v42 = vld [vmem:[#allocation18 + $0x30] ss:$8 sps:$4 sm:$0xff]  }
 0xe85   : > { %18621 = vmatprep.subr.bf16.mxu0 %v27244_v6  ;;  %v27305_v6 = vld [vmem:[#allocation14 + $0x368] ss:$16 sps:$4 sm:$0xff]   ;;  %v27310_v52 = vld [vmem:[#allocation14 + $0x38c] ss:$16 sps:$4 sm:$0xff]  }
 0xe87   : > { %18663 = vmatpush1.bf16.msra.mxu1 %v27245_v23  ;;  %v27421_v23 = vld [vmem:[#allocation18 + $0x54] ss:$8 sps:$4 sm:$0xff]  }
 0xe88   : > { %18622 = vmatpush1.bf16.msra.mxu0 %v27242_v11  ;;  %18664 = vmatprep.subr.bf16.mxu1 %v27253_v25  ;;  %v27413_v11 = vld [vmem:[#allocation18 + $0x40] ss:$8 sps:$4 sm:$0xff]  }
 0xe89   : > { %18623 = vmatprep.subr.bf16.mxu0 %v27250_v24  ;;  %v27308_v24 = vld [vmem:[#allocation14 + $0x388] ss:$16 sps:$4 sm:$0xff]   ;;  %v27313_v25 = vld [vmem:[#allocation14 + $0x3ac] ss:$16 sps:$4 sm:$0xff]  }
 0xe8b   : > { %18665 = vmatpush1.bf16.msra.mxu1 %v27251_v14  ;;  %v27427_v14 = vld [vmem:[#allocation18 + $0x64] ss:$8 sps:$4 sm:$0xff]  }
 0xe8c   : > { %18624 = vmatpush1.bf16.msra.mxu0 %v27248_v12  ;;  %18666 = vmatprep.subr.bf16.mxu1 %v27259_v17  ;;  %v27419_v12 = vld [vmem:[#allocation18 + $0x50] ss:$8 sps:$4 sm:$0xff]  }
 0xe8d   : > { %18625 = vmatprep.subr.bf16.mxu0 %v27256_v39  ;;  %v27311_v39 = vld [vmem:[#allocation14 + $0x3a8] ss:$16 sps:$4 sm:$0xff]   ;;  %v27316_v17 = vld [vmem:[#allocation14 + $0x3cc] ss:$16 sps:$4 sm:$0xff]  }
 0xe8f   : > { %18667 = vmatpush1.bf16.msra.mxu1 %v27257_v19  ;;  %v27433_v19 = vld [vmem:[#allocation18 + $0x74] ss:$8 sps:$4 sm:$0xff]  }
 0xe90   : > { %18626 = vmatpush1.bf16.msra.mxu0 %v27254_v33  ;;  %18668 = vmatprep.subr.bf16.mxu1 %v27265_v3  ;;  %v27425_v33 = vld [vmem:[#allocation18 + $0x60] ss:$8 sps:$4 sm:$0xff]  }
 0xe91   : > { %18627 = vmatprep.subr.bf16.mxu0 %v27262_v49  ;;  %v27314_v49 = vld [vmem:[#allocation14 + $0x3c8] ss:$16 sps:$4 sm:$0xff]   ;;  %v27319_v3 = vld [vmem:[#allocation14 + $0x3ec] ss:$16 sps:$4 sm:$0xff]  }
 0xe93   : > { %18669 = vmatpush1.bf16.msra.mxu1 %v27263_v51  ;;  %v27439_v51 = vld [vmem:[#allocation18 + $0x84] ss:$8 sps:$4 sm:$0xff]  }
 0xe94   : > { %18628 = vmatpush1.bf16.msra.mxu0 %v27260_v10  ;;  %18670 = vmatprep.subr.bf16.mxu1 %v27271_v59  ;;  %v27431_v10 = vld [vmem:[#allocation18 + $0x70] ss:$8 sps:$4 sm:$0xff]   ;;  %v27437_v59 = vld [vmem:[#allocation18 + $0x80] ss:$8 sps:$4 sm:$0xff]  }
 0xe95   : > { %18629 = vmatprep.subr.bf16.mxu0 %v27268_v20  ;;  %v27317_v20 = vld [vmem:[#allocation14 + $0x3e8] ss:$16 sps:$4 sm:$0xff]  }
 0xe97   : > { %18671 = vmatpush1.bf16.msra.mxu1 %v27269_v29  ;;  %v27445_v29 = vld [vmem:[#allocation18 + $0x94] ss:$8 sps:$4 sm:$0xff]  }
 0xe98   : > { %18630 = vmatpush1.bf16.msra.mxu0 %v27266_v38  ;;  %18681 = vmatprep.subr.bf16.mxu1 %v27274_v35  ;;  %v27322_v38 = vld [vmem:[#allocation14 + $0x40c] ss:$16 sps:$4 sm:$0xff]   ;;  %v27320_v35 = vld [vmem:[#allocation14 + $0x408] ss:$16 sps:$4 sm:$0xff]  }
 0xe99   : > { %19324 = vmatprep.subr.bf16.mxu0 %v27391_v57  ;;  %v27467_v57 = vld [vmem:[#allocation18 + $0xd0] ss:$8 sps:$4 sm:$0xff]  }
 0xe9a   : > { %18673 = vmatmul.mubr.bf16.vlgmr.msra.gmra.mrb[4].mxu1 %v30493_v18  ;;  %v27287_v18 = vld [vmem:[#allocation14 + $0x2a8] ss:$16 sps:$4 sm:$0xff]  }
 0xe9b   : > { %18632 = vmatmul.mubr.bf16.vlgmr.msra.gmra.mrb[0].mxu0 %v30530_v37  ;;  %18682 = vmatpush1.bf16.msra.mxu1 %v27272_v41  ;;  %v27443_v41 = vld [vmem:[#allocation18 + $0x90] ss:$8 sps:$4 sm:$0xff]  }
 0xe9c   : > { %18713 = vmatprep.mubr.bf16.mxu1 %v30499_v8  ;;  %18683 = vmatprep.subr.bf16.mxu1 %v27277_v61  ;;  %v27295_v8 = vld [vmem:[#allocation14 + $0x2ec] ss:$16 sps:$4 sm:$0xff]  }
 0xe9d   : > { %19325 = vmatpush1.bf16.msra.mxu0 %v27389_v21  ;;  %v27325_v61 = vld [vmem:[#allocation14 + $0x42c] ss:$16 sps:$4 sm:$0xff]   ;;  %v27335_v21 = vld [vmem:[#allocation14 + $0x4a8] ss:$16 sps:$4 sm:$0xff]  }
 0xe9e   : > { %19326 = vmatprep.subr.bf16.mxu0 %v27397_v56  ;;  %v27473_v56 = vld [vmem:[#allocation18 + $0xe0] ss:$8 sps:$4 sm:$0xff]  }
 0xe9f   : > { %18684 = vmatpush1.bf16.msra.mxu1 %v27275_v45  ;;  %v27451_v45 = vld [vmem:[#allocation18 + $0xa4] ss:$8 sps:$4 sm:$0xff]  }
 0xea0   : > { %18685 = vmatprep.subr.bf16.mxu1 %v27280_v36  ;;  %v27323_v36 = vld [vmem:[#allocation14 + $0x428] ss:$16 sps:$4 sm:$0xff]  }
 0xea1   : > { %19327 = vmatpush1.bf16.msra.mxu0 %v27395_v32  ;;  %v27338_v32 = vld [vmem:[#allocation14 + $0x4c8] ss:$16 sps:$4 sm:$0xff]  }
 0xea2   : > { %19328 = vmatprep.subr.bf16.mxu0 %v27403_v63  ;;  %v27479_v63 = vld [vmem:[#allocation18 + $0xf0] ss:$8 sps:$4 sm:$0xff]  }
 0xea3   : > { %18686 = vmatpush1.bf16.msra.mxu1 %v27278_v30  ;;  %v27449_v30 = vld [vmem:[#allocation18 + $0xa0] ss:$8 sps:$4 sm:$0xff]  }
 0xea4   : > { %18687 = vmatprep.subr.bf16.mxu1 %v27283_v43  ;;  %v27328_v43 = vld [vmem:[#allocation14 + $0x44c] ss:$16 sps:$4 sm:$0xff]  }
 0xea5   : > { %19329 = vmatpush1.bf16.msra.mxu0 %v27401_v46  ;;  %v27346_v46 = vld [vmem:[#allocation14 + $0x50c] ss:$16 sps:$4 sm:$0xff]  }
 0xea6   : > { %19330 = vmatprep.subr.bf16.mxu0 %v27409_v7  ;;  %v27344_v7 = vld [vmem:[#allocation14 + $0x508] ss:$16 sps:$4 sm:$0xff]  }
 0xea7   : > { %18688 = vmatpush1.bf16.msra.mxu1 %v27281_v22  ;;  %v27457_v22 = vld [vmem:[#allocation18 + $0xb4] ss:$8 sps:$4 sm:$0xff]  }
 0xea8   : > { %18689 = vmatprep.subr.bf16.mxu1 %v27286_v40  ;;  %v27326_v40 = vld [vmem:[#allocation14 + $0x448] ss:$16 sps:$4 sm:$0xff]  }
 0xea9   : > { %19331 = vmatpush1.bf16.msra.mxu0 %v27407_v42  ;;  %v27352_v42 = vld [vmem:[#allocation14 + $0x54c] ss:$16 sps:$4 sm:$0xff]  }
 0xeaa   : > { %19332 = vmatprep.subr.bf16.mxu0 %v27415_v55  ;;  %v27350_v55 = vld [vmem:[#allocation14 + $0x548] ss:$16 sps:$4 sm:$0xff]  }
 0xeab   : > { %18690 = vmatpush1.bf16.msra.mxu1 %v27284_v26  ;;  %v27455_v26 = vld [vmem:[#allocation18 + $0xb0] ss:$8 sps:$4 sm:$0xff]  }
 0xeac   : > { %18691 = vmatprep.subr.bf16.mxu1 %v27289_v54  ;;  %v27331_v54 = vld [vmem:[#allocation14 + $0x46c] ss:$16 sps:$4 sm:$0xff]  }
 0xead   : > { %19333 = vmatpush1.bf16.msra.mxu0 %v27413_v11  ;;  %v27358_v11 = vld [vmem:[#allocation14 + $0x58c] ss:$16 sps:$4 sm:$0xff]  }
 0xeae   : > { %19334 = vmatprep.subr.bf16.mxu0 %v27421_v23  ;;  %v27356_v23 = vld [vmem:[#allocation14 + $0x588] ss:$16 sps:$4 sm:$0xff]  }
 0xeaf   : > { %18692 = vmatpush1.bf16.msra.mxu1 %v27287_v18  ;;  %v27463_v18 = vld [vmem:[#allocation18 + $0xc4] ss:$8 sps:$4 sm:$0xff]  }
 0xeb0   : > { %18693 = vmatprep.subr.bf16.mxu1 %v27292_v47  ;;  %v27461_v47 = vld [vmem:[#allocation18 + $0xc0] ss:$8 sps:$4 sm:$0xff]  }
 0xeb1   : > { %19335 = vmatpush1.bf16.msra.mxu0 %v27419_v12  ;;  %v27364_v12 = vld [vmem:[#allocation14 + $0x5cc] ss:$16 sps:$4 sm:$0xff]  }
 0xeb2   : > { %19336 = vmatprep.subr.bf16.mxu0 %v27427_v14  ;;  %v27362_v14 = vld [vmem:[#allocation14 + $0x5c8] ss:$16 sps:$4 sm:$0xff]  }
 0xeb3   : > { %18694 = vmatpush1.bf16.msra.mxu1 %v27290_v48  ;;  %v27334_v48 = vld [vmem:[#allocation14 + $0x48c] ss:$16 sps:$4 sm:$0xff]  }
 0xeb4   : > { %18695 = vmatprep.subr.bf16.mxu1 %v27295_v8  ;;  %v27332_v8 = vld [vmem:[#allocation14 + $0x488] ss:$16 sps:$4 sm:$0xff]  }
 0xeb5   : > { %19337 = vmatpush1.bf16.msra.mxu0 %v27425_v33  ;;  %v27370_v33 = vld [vmem:[#allocation14 + $0x60c] ss:$16 sps:$4 sm:$0xff]  }
 0xeb6   : > { %19338 = vmatprep.subr.bf16.mxu0 %v27433_v19  ;;  %v27368_v19 = vld [vmem:[#allocation14 + $0x608] ss:$16 sps:$4 sm:$0xff]  }
 0xeb7   : > { %18696 = vmatpush1.bf16.msra.mxu1 %v27293_v50  ;;  %v27337_v50 = vld [vmem:[#allocation14 + $0x4ac] ss:$16 sps:$4 sm:$0xff]  }
 0xeb8   : > { %18697 = vmatprep.subr.bf16.mxu1 %v27298_v53  ;;  %v27475_v53 = vld [vmem:[#allocation18 + $0xe4] ss:$8 sps:$4 sm:$0xff]  }
 0xeb9   : > { %19339 = vmatpush1.bf16.msra.mxu0 %v27431_v10  ;;  %v27371_v10 = vld [vmem:[#allocation14 + $0x628] ss:$16 sps:$4 sm:$0xff]  }
 0xeba   : > { %19340 = vmatprep.subr.bf16.mxu0 %v27439_v51  ;;  %v27376_v51 = vld [vmem:[#allocation14 + $0x64c] ss:$16 sps:$4 sm:$0xff]  }
 0xebb   : > { %18698 = vmatpush1.bf16.msra.mxu1 %v27296_v13  ;;  %v27340_v13 = vld [vmem:[#allocation14 + $0x4cc] ss:$16 sps:$4 sm:$0xff]  }
 0xebc   : > { %18699 = vmatprep.subr.bf16.mxu1 %v27301_v58  ;;  %v27481_v58 = vld [vmem:[#allocation18 + $0xf4] ss:$8 sps:$4 sm:$0xff]  }
 0xebd   : > { %19341 = vmatpush1.bf16.msra.mxu0 %v27437_v59  ;;  %v27379_v59 = vld [vmem:[#allocation14 + $0x66c] ss:$16 sps:$4 sm:$0xff]  }
 0xebe   : > { %19342 = vmatprep.subr.bf16.mxu0 %v27445_v29  ;;  %v27382_v29 = vld [vmem:[#allocation14 + $0x68c] ss:$16 sps:$4 sm:$0xff]  }
 0xebf   : > { %18700 = vmatpush1.bf16.msra.mxu1 %v27299_v2  ;;  %v27343_v2 = vld [vmem:[#allocation14 + $0x4ec] ss:$16 sps:$4 sm:$0xff]  }
 0xec0   : > { %18701 = vmatprep.subr.bf16.mxu1 %v27304_v0  ;;  %v27341_v0 = vld [vmem:[#allocation14 + $0x4e8] ss:$16 sps:$4 sm:$0xff]  }
 0xec1   : > { %19343 = vmatpush1.bf16.msra.mxu0 %v27443_v41  ;;  %v27383_v41 = vld [vmem:[#allocation14 + $0x6a8] ss:$16 sps:$4 sm:$0xff]  }
 0xec2   : > { %19344 = vmatprep.subr.bf16.mxu0 %v27451_v45 }
 0xec3   : > { %18702 = vmatpush1.bf16.msra.mxu1 %v27302_v15  ;;  %v27349_v15 = vld [vmem:[#allocation14 + $0x52c] ss:$16 sps:$4 sm:$0xff]  }
 0xec4   : > { %18703 = vmatprep.subr.bf16.mxu1 %v27307_v16  ;;  %v27347_v16 = vld [vmem:[#allocation14 + $0x528] ss:$16 sps:$4 sm:$0xff]  }
 0xec5   : > { %19345 = vmatpush1.bf16.msra.mxu0 %v27449_v30  ;;  %v27386_v30 = vld [vmem:[#allocation14 + $0x6c8] ss:$16 sps:$4 sm:$0xff]  }
 0xec6   : > { %19346 = vmatprep.subr.bf16.mxu0 %v27457_v22  ;;  %v27394_v22 = vld [vmem:[#allocation14 + $0x6ec] ss:$16 sps:$4 sm:$0xff]  }
 0xec7   : > { %18704 = vmatpush1.bf16.msra.mxu1 %v27305_v6  ;;  %v27355_v6 = vld [vmem:[#allocation14 + $0x56c] ss:$16 sps:$4 sm:$0xff]  }
 0xec8   : > { %18705 = vmatprep.subr.bf16.mxu1 %v27310_v52  ;;  %v27353_v52 = vld [vmem:[#allocation14 + $0x568] ss:$16 sps:$4 sm:$0xff]  }
 0xec9   : > { %19347 = vmatpush1.bf16.msra.mxu0 %v27455_v26  ;;  %v27400_v26 = vld [vmem:[#allocation14 + $0x70c] ss:$16 sps:$4 sm:$0xff]  }
 0xeca   : > { %19348 = vmatprep.subr.bf16.mxu0 %v27463_v18  ;;  %v27406_v18 = vld [vmem:[#allocation14 + $0x72c] ss:$16 sps:$4 sm:$0xff]  }
 0xecb   : > { %18706 = vmatpush1.bf16.msra.mxu1 %v27308_v24  ;;  %v27361_v24 = vld [vmem:[#allocation14 + $0x5ac] ss:$16 sps:$4 sm:$0xff]  }
 0xecc   : > { %18707 = vmatprep.subr.bf16.mxu1 %v27313_v25  ;;  %v27359_v25 = vld [vmem:[#allocation14 + $0x5a8] ss:$16 sps:$4 sm:$0xff]  }
 0xecd   : > { %19349 = vmatpush1.bf16.msra.mxu0 %v27461_v47  ;;  %v27412_v47 = vld [vmem:[#allocation14 + $0x74c] ss:$16 sps:$4 sm:$0xff]  }
 0xecf   : > { %18708 = vmatpush1.bf16.msra.mxu1 %v27311_v39  ;;  %v27367_v39 = vld [vmem:[#allocation14 + $0x5ec] ss:$16 sps:$4 sm:$0xff]  }
 0xed0   : > { %18709 = vmatprep.subr.bf16.mxu1 %v27316_v17  ;;  %v27365_v17 = vld [vmem:[#allocation14 + $0x5e8] ss:$16 sps:$4 sm:$0xff]  }
 0xed3   : > { %18710 = vmatpush1.bf16.msra.mxu1 %v27314_v49  ;;  %v27373_v49 = vld [vmem:[#allocation14 + $0x62c] ss:$16 sps:$4 sm:$0xff]  }
 0xed4   : > { %18711 = vmatprep.subr.bf16.mxu1 %v27319_v3  ;;  %v27514_v3 = vld [vmem:[#allocation18 + $0x104] ss:$8 sps:$4 sm:$0xff]  }
 0xed7   : > { %18712 = vmatpush1.bf16.msra.mxu1 %v27317_v20  ;;  %v27374_v20 = vld [vmem:[#allocation14 + $0x648] ss:$16 sps:$4 sm:$0xff]  }
 0xed8   : > { %18722 = vmatprep.subr.bf16.mxu1 %v27322_v38  ;;  %v27377_v38 = vld [vmem:[#allocation14 + $0x668] ss:$16 sps:$4 sm:$0xff]  }
 0xeda   : > { %18714 = vmatmul.mubr.bf16.vlgmr.msra.gmra.mrb[4].mxu1 %v30516_v28  ;;  %v27329_v28 = vld [vmem:[#allocation14 + $0x468] ss:$16 sps:$4 sm:$0xff]  }
 0xedb   : > { %18723 = vmatpush1.bf16.msra.mxu1 %v27320_v35  ;;  %18754 = vmatprep.mubr.bf16.mxu1 %v30473_v27  ;;  %v27469_v27 = vld [vmem:[#allocation18 + $0xd4] ss:$8 sps:$4 sm:$0xff]  }
 0xedc   : > { %18724 = vmatprep.subr.bf16.mxu1 %v27325_v61  ;;  %19350 = vmatprep.subr.bf16.mxu0 %v27469_v27  ;;  %v27380_v35 = vld [vmem:[#allocation14 + $0x688] ss:$16 sps:$4 sm:$0xff]   ;;  %v27388_v61 = vld [vmem:[#allocation14 + $0x6cc] ss:$16 sps:$4 sm:$0xff]  }
 0xedd   : > { %19351 = vmatpush1.bf16.msra.mxu0 %v27467_v57  ;;  %v27418_v27 = vld [vmem:[#allocation14 + $0x76c] ss:$16 sps:$4 sm:$0xff]  }
 0xede   : > { %19352 = vmatprep.subr.bf16.mxu0 %v27475_v53  ;;  %v27424_v57 = vld [vmem:[#allocation14 + $0x78c] ss:$16 sps:$4 sm:$0xff]  }
 0xedf   : > { %18725 = vmatpush1.bf16.msra.mxu1 %v27323_v36  ;;  %v27430_v53 = vld [vmem:[#allocation14 + $0x7ac] ss:$16 sps:$4 sm:$0xff]  }
 0xee0   : > { %18726 = vmatprep.subr.bf16.mxu1 %v27328_v43 }
 0xee1   : > { %19353 = vmatpush1.bf16.msra.mxu0 %v27473_v56  ;;  %v27436_v56 = vld [vmem:[#allocation14 + $0x7cc] ss:$16 sps:$4 sm:$0xff]  }
 0xee2   : > { %19354 = vmatprep.subr.bf16.mxu0 %v27481_v58  ;;  %v27442_v58 = vld [vmem:[#allocation14 + $0x7ec] ss:$16 sps:$4 sm:$0xff]  }
 0xee3   : > { %18727 = vmatpush1.bf16.msra.mxu1 %v27326_v40  ;;  %v27392_v40 = vld [vmem:[#allocation14 + $0x6e8] ss:$16 sps:$4 sm:$0xff]  }
 0xee4   : > { %18728 = vmatprep.subr.bf16.mxu1 %v27331_v54  ;;  %v27398_v54 = vld [vmem:[#allocation14 + $0x708] ss:$16 sps:$4 sm:$0xff]  }
 0xee5   : > { %19355 = vmatpush1.bf16.msra.mxu0 %v27479_v63  ;;  %v27448_v63 = vld [vmem:[#allocation14 + $0x80c] ss:$16 sps:$4 sm:$0xff]  }
 0xee6   : > { %19365 = vmatprep.subr.bf16.mxu0 %v27514_v3  ;;  %v27487_v3 = vld [vmem:[#allocation14 + $0x8ec] ss:$16 sps:$4 sm:$0xff]  }
 0xee7   : > { %18729 = vmatpush1.bf16.msra.mxu1 %v27329_v28  ;;  %v27404_v28 = vld [vmem:[#allocation14 + $0x728] ss:$16 sps:$4 sm:$0xff]  }
 0xee8   : > { %18730 = vmatprep.subr.bf16.mxu1 %v27334_v48  ;;  %v27410_v48 = vld [vmem:[#allocation14 + $0x748] ss:$16 sps:$4 sm:$0xff]  }
 0xeeb   : > { %18731 = vmatpush1.bf16.msra.mxu1 %v27332_v8  ;;  %v27416_v8 = vld [vmem:[#allocation14 + $0x768] ss:$16 sps:$4 sm:$0xff]  }
 0xeec   : > { %18732 = vmatprep.subr.bf16.mxu1 %v27337_v50  ;;  %v27422_v50 = vld [vmem:[#allocation14 + $0x788] ss:$16 sps:$4 sm:$0xff]  }
 0xeef   : > { %18733 = vmatpush1.bf16.msra.mxu1 %v27335_v21  ;;  %v27428_v21 = vld [vmem:[#allocation14 + $0x7a8] ss:$16 sps:$4 sm:$0xff]  }
 0xef0   : > { %18734 = vmatprep.subr.bf16.mxu1 %v27340_v13  ;;  %v27434_v13 = vld [vmem:[#allocation14 + $0x7c8] ss:$16 sps:$4 sm:$0xff]  }
 0xef3   : > { %18735 = vmatpush1.bf16.msra.mxu1 %v27338_v32  ;;  %v27440_v32 = vld [vmem:[#allocation14 + $0x7e8] ss:$16 sps:$4 sm:$0xff]  }
 0xef4   : > { %18736 = vmatprep.subr.bf16.mxu1 %v27343_v2  ;;  %v27446_v2 = vld [vmem:[#allocation14 + $0x808] ss:$16 sps:$4 sm:$0xff]  }
 0xef7   : > { %18737 = vmatpush1.bf16.msra.mxu1 %v27341_v0  ;;  %v27454_v0 = vld [vmem:[#allocation14 + $0x82c] ss:$16 sps:$4 sm:$0xff]  }
 0xef8   : > { %18738 = vmatprep.subr.bf16.mxu1 %v27346_v46  ;;  %v27452_v46 = vld [vmem:[#allocation14 + $0x828] ss:$16 sps:$4 sm:$0xff]  }
 0xefb   : > { %18739 = vmatpush1.bf16.msra.mxu1 %v27344_v7  ;;  %v27460_v7 = vld [vmem:[#allocation14 + $0x84c] ss:$16 sps:$4 sm:$0xff]  }
 0xefc   : > { %18740 = vmatprep.subr.bf16.mxu1 %v27349_v15  ;;  %v27458_v15 = vld [vmem:[#allocation14 + $0x848] ss:$16 sps:$4 sm:$0xff]  }
 0xeff   : > { %18741 = vmatpush1.bf16.msra.mxu1 %v27347_v16  ;;  %v27466_v16 = vld [vmem:[#allocation14 + $0x86c] ss:$16 sps:$4 sm:$0xff]  }
 0xf00   : > { %18742 = vmatprep.subr.bf16.mxu1 %v27352_v42  ;;  %v27464_v42 = vld [vmem:[#allocation14 + $0x868] ss:$16 sps:$4 sm:$0xff]  }
 0xf03   : > { %18743 = vmatpush1.bf16.msra.mxu1 %v27350_v55  ;;  %v27472_v55 = vld [vmem:[#allocation14 + $0x88c] ss:$16 sps:$4 sm:$0xff]  }
 0xf04   : > { %18744 = vmatprep.subr.bf16.mxu1 %v27355_v6  ;;  %v30545_v6 = vld [vmem:[#allocation15] sm:$0xf] }
 0xf07   : > { %18745 = vmatpush1.bf16.msra.mxu1 %v27353_v52  ;;  %v27470_v52 = vld [vmem:[#allocation14 + $0x888] ss:$16 sps:$4 sm:$0xff]  }
 0xf08   : > { %18746 = vmatprep.subr.bf16.mxu1 %v27358_v11  ;;  %v27478_v11 = vld [vmem:[#allocation14 + $0x8ac] ss:$16 sps:$4 sm:$0xff]  }
 0xf0b   : > { %18747 = vmatpush1.bf16.msra.mxu1 %v27356_v23  ;;  %v27476_v23 = vld [vmem:[#allocation14 + $0x8a8] ss:$16 sps:$4 sm:$0xff]  }
 0xf0c   : > { %18748 = vmatprep.subr.bf16.mxu1 %v27361_v24 }
 0xf0f   : > { %18749 = vmatpush1.bf16.msra.mxu1 %v27359_v25  ;;  %v27484_v25 = vld [vmem:[#allocation14 + $0x8cc] ss:$16 sps:$4 sm:$0xff]  }
 0xf10   : > { %18750 = vmatprep.subr.bf16.mxu1 %v27364_v12 }
 0xf13   : > { %18751 = vmatpush1.bf16.msra.mxu1 %v27362_v14 }
 0xf14   : > { %18752 = vmatprep.subr.bf16.mxu1 %v27367_v39 }
 0xf17   : > { %18753 = vmatpush1.bf16.msra.mxu1 %v27365_v17 }
 0xf18   : > { %18763 = vmatprep.subr.bf16.mxu1 %v27370_v33 }
 0xf1a   : > { %18755 = vmatmul.mubr.bf16.vlgmr.msra.gmra.mrb[4].mxu1 %v30497_v5  ;;  %v27385_v5 = vld [vmem:[#allocation14 + $0x6ac] ss:$16 sps:$4 sm:$0xff]  }
 0xf1b   : > { %18764 = vmatpush1.bf16.msra.mxu1 %v27368_v19  ;;  %18795 = vmatprep.mubr.bf16.mxu1 %v30501_v44  ;;  %v27482_v19 = vld [vmem:[#allocation14 + $0x8c8] ss:$16 sps:$4 sm:$0xff]  }
 0xf1c   : > { %18765 = vmatprep.subr.bf16.mxu1 %v27373_v49 }
 0xf1f   : > { %18766 = vmatpush1.bf16.msra.mxu1 %v27371_v10 }
 0xf20   : > { %18767 = vmatprep.subr.bf16.mxu1 %v27376_v51 }
 0xf23   : > { %18768 = vmatpush1.bf16.msra.mxu1 %v27374_v20  ;;  %v27512_v20 = vld [vmem:[#allocation18 + $0x100] ss:$8 sps:$4 sm:$0xff]  }
 0xf24   : > { %18769 = vmatprep.subr.bf16.mxu1 %v27379_v59 }
 0xf27   : > { %18770 = vmatpush1.bf16.msra.mxu1 %v27377_v38  ;;  %v27517_v38 = vld [vmem:[#allocation18 + $0x114] ss:$8 sps:$4 sm:$0xff]  }
 0xf28   : > { %18771 = vmatprep.subr.bf16.mxu1 %v27382_v29  ;;  %v27485_v29 = vld [vmem:[#allocation14 + $0x8e8] ss:$16 sps:$4 sm:$0xff]  }
 0xf2b   : > { %18772 = vmatpush1.bf16.msra.mxu1 %v27380_v35  ;;  %v27490_v35 = vld [vmem:[#allocation14 + $0x90c] ss:$16 sps:$4 sm:$0xff]  }
 0xf2c   : > { %18773 = vmatprep.subr.bf16.mxu1 %v27385_v5  ;;  %v27515_v5 = vld [vmem:[#allocation18 + $0x110] ss:$8 sps:$4 sm:$0xff]  }
 0xf2d   : > { %v30539_v44 = vpop.f32.mrb[0].mxu1 }
 0xf2e   : > { %v30541_v45 = vpop.f32.mrb[1].mxu1 }
 0xf2f   : > { %v18514_v36 = vpop.f32.mrb[2].mxu1  ;;  %18774 = vmatpush1.bf16.msra.mxu1 %v27383_v41  ;;  %v27520_v41 = vld [vmem:[#allocation18 + $0x124] ss:$8 sps:$4 sm:$0xff]  }
 0xf30   : > { %v18515_v43 = vpop.f32.mrb[3].mxu1  ;;  %18775 = vmatprep.subr.bf16.mxu1 %v27388_v61  ;;  %v27488_v61 = vld [vmem:[#allocation14 + $0x908] ss:$16 sps:$4 sm:$0xff]  }
 0xf31   : > { %v27523_v36 = vld [vmem:[#allocation18 + $0x134] ss:$8 sps:$4 sm:$0xff]   ;;  %v27496_v43 = vld [vmem:[#allocation14 + $0x94c] ss:$16 sps:$4 sm:$0xff]  }
 0xf33   : > { %18776 = vmatpush1.bf16.msra.mxu1 %v27386_v30  ;;  %v27491_v30 = vld [vmem:[#allocation14 + $0x928] ss:$16 sps:$4 sm:$0xff]  }
 0xf34   : > { %18777 = vmatprep.subr.bf16.mxu1 %v27394_v22  ;;  %v27521_v22 = vld [vmem:[#allocation18 + $0x130] ss:$8 sps:$4 sm:$0xff]  }
 0xf37   : > { %18778 = vmatpush1.bf16.msra.mxu1 %v27392_v40  ;;  %v27526_v40 = vld [vmem:[#allocation18 + $0x144] ss:$8 sps:$4 sm:$0xff]  }
 0xf38   : > { %18779 = vmatprep.subr.bf16.mxu1 %v27400_v26  ;;  %v27494_v26 = vld [vmem:[#allocation14 + $0x948] ss:$16 sps:$4 sm:$0xff]  }
 0xf3b   : > { %18780 = vmatpush1.bf16.msra.mxu1 %v27398_v54  ;;  %v27499_v54 = vld [vmem:[#allocation14 + $0x96c] ss:$16 sps:$4 sm:$0xff]  }
 0xf3c   : > { %18781 = vmatprep.subr.bf16.mxu1 %v27406_v18  ;;  %v27524_v18 = vld [vmem:[#allocation18 + $0x140] ss:$8 sps:$4 sm:$0xff]  }
 0xf3f   : > { %18782 = vmatpush1.bf16.msra.mxu1 %v27404_v28  ;;  %v27529_v28 = vld [vmem:[#allocation18 + $0x154] ss:$8 sps:$4 sm:$0xff]  }
 0xf40   : > { %18783 = vmatprep.subr.bf16.mxu1 %v27412_v47  ;;  %v27497_v47 = vld [vmem:[#allocation14 + $0x968] ss:$16 sps:$4 sm:$0xff]  }
 0xf43   : > { %18784 = vmatpush1.bf16.msra.mxu1 %v27410_v48  ;;  %v27502_v48 = vld [vmem:[#allocation14 + $0x98c] ss:$16 sps:$4 sm:$0xff]  }
 0xf44   : > { %18785 = vmatprep.subr.bf16.mxu1 %v27418_v27  ;;  %v27527_v27 = vld [vmem:[#allocation18 + $0x150] ss:$8 sps:$4 sm:$0xff]  }
 0xf47   : > { %18786 = vmatpush1.bf16.msra.mxu1 %v27416_v8  ;;  %v27532_v8 = vld [vmem:[#allocation18 + $0x164] ss:$8 sps:$4 sm:$0xff]  }
 0xf48   : > { %18787 = vmatprep.subr.bf16.mxu1 %v27424_v57  ;;  %v27500_v57 = vld [vmem:[#allocation14 + $0x988] ss:$16 sps:$4 sm:$0xff]  }
 0xf4b   : > { %18788 = vmatpush1.bf16.msra.mxu1 %v27422_v50  ;;  %v27505_v50 = vld [vmem:[#allocation14 + $0x9ac] ss:$16 sps:$4 sm:$0xff]  }
 0xf4c   : > { %18789 = vmatprep.subr.bf16.mxu1 %v27430_v53  ;;  %v27530_v53 = vld [vmem:[#allocation18 + $0x160] ss:$8 sps:$4 sm:$0xff]  }
 0xf4f   : > { %18790 = vmatpush1.bf16.msra.mxu1 %v27428_v21  ;;  %v27535_v21 = vld [vmem:[#allocation18 + $0x174] ss:$8 sps:$4 sm:$0xff]  }
 0xf50   : > { %18791 = vmatprep.subr.bf16.mxu1 %v27436_v56  ;;  %v27503_v56 = vld [vmem:[#allocation14 + $0x9a8] ss:$16 sps:$4 sm:$0xff]  }
 0xf53   : > { %18792 = vmatpush1.bf16.msra.mxu1 %v27434_v13  ;;  %v27508_v13 = vld [vmem:[#allocation14 + $0x9cc] ss:$16 sps:$4 sm:$0xff]  }
 0xf54   : > { %18793 = vmatprep.subr.bf16.mxu1 %v27442_v58  ;;  %v27533_v58 = vld [vmem:[#allocation18 + $0x170] ss:$8 sps:$4 sm:$0xff]  }
 0xf57   : > { %18794 = vmatpush1.bf16.msra.mxu1 %v27440_v32  ;;  %v27538_v32 = vld [vmem:[#allocation18 + $0x184] ss:$8 sps:$4 sm:$0xff]  }
 0xf58   : > { %18804 = vmatprep.subr.bf16.mxu1 %v27448_v63  ;;  %v27506_v63 = vld [vmem:[#allocation14 + $0x9c8] ss:$16 sps:$4 sm:$0xff]  }
 0xf5a   : > { %18796 = vmatmul.mubr.bf16.vlgmr.msra.gmra.mrb[4].mxu1 %v30520_v4  ;;  %v16818_v4 = vrot.slane %v30545_v6, %v29370_v9 }
 0xf5b   : > { %18805 = vmatpush1.bf16.msra.mxu1 %v27446_v2  ;;  %18836 = vmatprep.mubr.bf16.mxu1 %v30522_v1  ;;  %v16822_v1 = vrot.slane %v30545_v6, %v29295_v62  ;;  %v27511_v2 = vld [vmem:[#allocation14 + $0x9ec] ss:$16 sps:$4 sm:$0xff]  }
 0xf5c   : > { %18806 = vmatprep.subr.bf16.mxu1 %v27454_v0  ;;  %v23605_v24 = vadd.f32 %v30539_v44, %v16818_v4  ;;  %v27493_v44 = vld [vmem:[#allocation14 + $0x92c] ss:$16 sps:$4 sm:$0xff]   ;;  %v27550_v4 = vld [vmem:[#allocation18 + $0x1c4] ss:$8 sps:$4 sm:$0xff]  }
 0xf5d   : > { %v23607_v12 = vadd.f32 %v30541_v45, %v16822_v1  ;;  %v27518_v45 = vld [vmem:[#allocation18 + $0x120] ss:$8 sps:$4 sm:$0xff]   ;;  %v27553_v1 = vld [vmem:[#allocation18 + $0x1d4] ss:$8 sps:$4 sm:$0xff]  }
 0xf5e   : > { %v27536_v0 = vld [vmem:[#allocation18 + $0x180] ss:$8 sps:$4 sm:$0xff]  }
 0xf5f   : > { %18807 = vmatpush1.bf16.msra.mxu1 %v27452_v46  ;;  %v27541_v46 = vld [vmem:[#allocation18 + $0x194] ss:$8 sps:$4 sm:$0xff]  }
 0xf60   : > { %18808 = vmatprep.subr.bf16.mxu1 %v27460_v7  ;;  %v27509_v7 = vld [vmem:[#allocation14 + $0x9e8] ss:$16 sps:$4 sm:$0xff]  }
 0xf63   : > { %18809 = vmatpush1.bf16.msra.mxu1 %v27458_v15  ;;  %v27539_v15 = vld [vmem:[#allocation18 + $0x190] ss:$8 sps:$4 sm:$0xff]  }
 0xf64   : > { %18810 = vmatprep.subr.bf16.mxu1 %v27466_v16  ;;  %v27544_v16 = vld [vmem:[#allocation18 + $0x1a4] ss:$8 sps:$4 sm:$0xff]  }
 0xf67   : > { %18811 = vmatpush1.bf16.msra.mxu1 %v27464_v42  ;;  %v27542_v42 = vld [vmem:[#allocation18 + $0x1a0] ss:$8 sps:$4 sm:$0xff]  }
 0xf68   : > { %18812 = vmatprep.subr.bf16.mxu1 %v27472_v55  ;;  %v27547_v55 = vld [vmem:[#allocation18 + $0x1b4] ss:$8 sps:$4 sm:$0xff]  }
 0xf6b   : > { %18813 = vmatpush1.bf16.msra.mxu1 %v27470_v52  ;;  %v27545_v52 = vld [vmem:[#allocation18 + $0x1b0] ss:$8 sps:$4 sm:$0xff]  }
 0xf6c   : > { %18814 = vmatprep.subr.bf16.mxu1 %v27478_v11  ;;  %v27548_v11 = vld [vmem:[#allocation18 + $0x1c0] ss:$8 sps:$4 sm:$0xff]  }
 0xf6e   : > { %v18633_v14 = vpop.f32.mrb[0].mxu0 }
 0xf6f   : > { %v23606_v39 = vadd.f32 %v23605_v24, %v18633_v14  ;;  %v18635_v17 = vpop.f32.mrb[1].mxu0  ;;  %18815 = vmatpush1.bf16.msra.mxu1 %v27476_v23  ;;  %v27551_v23 = vld [vmem:[#allocation18 + $0x1d0] ss:$8 sps:$4 sm:$0xff]   ;;  %v27556_v24 = vld [vmem:[#allocation18 + $0x1e4] ss:$8 sps:$4 sm:$0xff]  }
 0xf70   : > { %v23608_v33 = vadd.f32 %v23607_v12, %v18635_v17  ;;  %v18637_v49 = vpop.f32.mrb[2].mxu0  ;;  %18816 = vmatprep.subr.bf16.mxu1 %v27484_v25  ;;  %v27554_v25 = vld [vmem:[#allocation18 + $0x1e0] ss:$8 sps:$4 sm:$0xff]   ;;  %v27559_v12 = vld [vmem:[#allocation18 + $0x1f4] ss:$8 sps:$4 sm:$0xff]  }
 0xf71   : > { %v18638_v10 = vpop.f32.mrb[3].mxu0  ;;  %v18936_v59 = vpack.c.bf16 %v23606_v39, %v23606_v39  ;;  %v27562_v14 = vld [vmem:[#allocation17 + $0x4] ss:$8 sps:$4 sm:$0xff]  }
 0xf72   : > { %v18937_v51 = vpack.c.bf16 %v23608_v33, %v23608_v33  ;;  %v30554_v39 = vld [vmem:[#allocation2] sm:$0xff]  ;;  %v16826_v33 = vrot.slane %v30545_v6, %v29453_v60 }
 0xf73   : > { %18817 = vmatpush1.bf16.msra.mxu1 %v27482_v19  ;;  %v30558_v17 = vrot.slane %v30554_v39, %v28601_v34  ;;  %v16830_v19 = vrot.slane %v30545_v6, %v29374_v31  ;;  %v27563_v60 = vld [vmem:[#allocation17 + $0x10] ss:$8 sps:$4 sm:$0xff]   ;;  %v27568_v31 = vld [vmem:[#allocation17 + $0x24] ss:$8 sps:$4 sm:$0xff]   ;;  %v27566_v6 = vld [vmem:[#allocation17 + $0x20] ss:$8 sps:$4 sm:$0xff]  }
 0xf74   : > { %19356 = vmatprep.mubr.bf16.mxu0 %v18937_v51  ;;  %18818 = vmatprep.subr.bf16.mxu1 %v27487_v3 }
 0xf75   : > { %19357 = vmatmul.mubr.bf16.vlgmr.msra.gmra.mrb[4].mxu0 %v18936_v59  ;;  %v18862_v3 = vcombine.high %v30558_v17, %v30558_v17 }
 0xf76   : > { %19366 = vmatpush1.bf16.msra.mxu0 %v27512_v20 }
 0xf77   : > { %19367 = vmatprep.subr.bf16.mxu0 %v27517_v38  ;;  %18819 = vmatpush1.bf16.msra.mxu1 %v27485_v29 }
 0xf78   : > { %18820 = vmatprep.subr.bf16.mxu1 %v27490_v35  ;;  %v27560_v35 = vld [vmem:[#allocation17] ss:$8 sps:$4 sm:$0xff]  }
 0xf7a   : > { %19368 = vmatpush1.bf16.msra.mxu0 %v27515_v5  ;;  %v18869_v5 = vpack.c.bf16 %v18862_v3, %v18862_v3  ;;  %v27632_v3 = vld [vmem:[#allocation17 + $0x180] ss:$8 sps:$4 sm:$0xff]  }
 0xf7b   : > { %19369 = vmatprep.subr.bf16.mxu0 %v27520_v41  ;;  %18821 = vmatpush1.bf16.msra.mxu1 %v27488_v61  ;;  %v27565_v61 = vld [vmem:[#allocation17 + $0x14] ss:$8 sps:$4 sm:$0xff]  }
 0xf7c   : > { %18822 = vmatprep.subr.bf16.mxu1 %v27493_v44  ;;  %v27571_v44 = vld [vmem:[#allocation17 + $0x34] ss:$8 sps:$4 sm:$0xff]  }
 0xf7e   : > { %19370 = vmatpush1.bf16.msra.mxu0 %v27518_v45  ;;  %v27569_v45 = vld [vmem:[#allocation17 + $0x30] ss:$8 sps:$4 sm:$0xff]  }
 0xf7f   : > { %19371 = vmatprep.subr.bf16.mxu0 %v27523_v36  ;;  %18823 = vmatpush1.bf16.msra.mxu1 %v27491_v30  ;;  %v27574_v36 = vld [vmem:[#allocation17 + $0x44] ss:$8 sps:$4 sm:$0xff]   ;;  %v27572_v30 = vld [vmem:[#allocation17 + $0x40] ss:$8 sps:$4 sm:$0xff]  }
 0xf80   : > { %18824 = vmatprep.subr.bf16.mxu1 %v27496_v43  ;;  %v27577_v43 = vld [vmem:[#allocation17 + $0x54] ss:$8 sps:$4 sm:$0xff]  }
 0xf82   : > { %19372 = vmatpush1.bf16.msra.mxu0 %v27521_v22  ;;  %v27575_v22 = vld [vmem:[#allocation17 + $0x50] ss:$8 sps:$4 sm:$0xff]  }
 0xf83   : > { %19373 = vmatprep.subr.bf16.mxu0 %v27526_v40  ;;  %18825 = vmatpush1.bf16.msra.mxu1 %v27494_v26  ;;  %v27580_v40 = vld [vmem:[#allocation17 + $0x64] ss:$8 sps:$4 sm:$0xff]   ;;  %v27578_v26 = vld [vmem:[#allocation17 + $0x60] ss:$8 sps:$4 sm:$0xff]  }
 0xf84   : > { %18826 = vmatprep.subr.bf16.mxu1 %v27499_v54  ;;  %v27583_v54 = vld [vmem:[#allocation17 + $0x74] ss:$8 sps:$4 sm:$0xff]  }
 0xf86   : > { %19374 = vmatpush1.bf16.msra.mxu0 %v27524_v18  ;;  %v27581_v18 = vld [vmem:[#allocation17 + $0x70] ss:$8 sps:$4 sm:$0xff]  }
 0xf87   : > { %19375 = vmatprep.subr.bf16.mxu0 %v27529_v28  ;;  %18827 = vmatpush1.bf16.msra.mxu1 %v27497_v47  ;;  %v27586_v28 = vld [vmem:[#allocation17 + $0x84] ss:$8 sps:$4 sm:$0xff]   ;;  %v27584_v47 = vld [vmem:[#allocation17 + $0x80] ss:$8 sps:$4 sm:$0xff]  }
 0xf88   : > { %18828 = vmatprep.subr.bf16.mxu1 %v27502_v48  ;;  %v27589_v48 = vld [vmem:[#allocation17 + $0x94] ss:$8 sps:$4 sm:$0xff]  }
 0xf8a   : > { %19376 = vmatpush1.bf16.msra.mxu0 %v27527_v27  ;;  %v27587_v27 = vld [vmem:[#allocation17 + $0x90] ss:$8 sps:$4 sm:$0xff]  }
 0xf8b   : > { %19377 = vmatprep.subr.bf16.mxu0 %v27532_v8  ;;  %18829 = vmatpush1.bf16.msra.mxu1 %v27500_v57  ;;  %v27592_v8 = vld [vmem:[#allocation17 + $0xa4] ss:$8 sps:$4 sm:$0xff]   ;;  %v27590_v57 = vld [vmem:[#allocation17 + $0xa0] ss:$8 sps:$4 sm:$0xff]  }
 0xf8c   : > { %18830 = vmatprep.subr.bf16.mxu1 %v27505_v50  ;;  %v27595_v50 = vld [vmem:[#allocation17 + $0xb4] ss:$8 sps:$4 sm:$0xff]  }
 0xf8e   : > { %19378 = vmatpush1.bf16.msra.mxu0 %v27530_v53  ;;  %v27593_v53 = vld [vmem:[#allocation17 + $0xb0] ss:$8 sps:$4 sm:$0xff]  }
 0xf8f   : > { %19379 = vmatprep.subr.bf16.mxu0 %v27535_v21  ;;  %18831 = vmatpush1.bf16.msra.mxu1 %v27503_v56  ;;  %v27598_v21 = vld [vmem:[#allocation17 + $0xc4] ss:$8 sps:$4 sm:$0xff]   ;;  %v27596_v56 = vld [vmem:[#allocation17 + $0xc0] ss:$8 sps:$4 sm:$0xff]  }
 0xf90   : > { %18832 = vmatprep.subr.bf16.mxu1 %v27508_v13  ;;  %v27601_v13 = vld [vmem:[#allocation17 + $0xd4] ss:$8 sps:$4 sm:$0xff]  }
 0xf92   : > { %19380 = vmatpush1.bf16.msra.mxu0 %v27533_v58  ;;  %v27599_v58 = vld [vmem:[#allocation17 + $0xd0] ss:$8 sps:$4 sm:$0xff]  }
 0xf93   : > { %19381 = vmatprep.subr.bf16.mxu0 %v27538_v32  ;;  %18833 = vmatpush1.bf16.msra.mxu1 %v27506_v63  ;;  %v18847_v32 = vcombine.high %v30554_v39, %v30554_v39  ;;  %v27604_v63 = vld [vmem:[#allocation17 + $0xe4] ss:$8 sps:$4 sm:$0xff]  }
 0xf94   : > { %18834 = vmatprep.subr.bf16.mxu1 %v27511_v2  ;;  %v27602_v2 = vld [vmem:[#allocation17 + $0xe0] ss:$8 sps:$4 sm:$0xff]   ;;  %v27628_v39 = vld [vmem:[#allocation17 + $0x164] ss:$8 sps:$4 sm:$0xff]  }
 0xf96   : > { %19382 = vmatpush1.bf16.msra.mxu0 %v27536_v0  ;;  %v30569_v0 = vrot.slane %v18847_v32, %v28601_v34  ;;  %v27611_v34 = vld [vmem:[#allocation17 + $0x110] ss:$8 sps:$4 sm:$0xff]  }
 0xf97   : > { %19383 = vmatprep.subr.bf16.mxu0 %v27541_v46  ;;  %18835 = vmatpush1.bf16.msra.mxu1 %v27509_v7  ;;  %v27607_v46 = vld [vmem:[#allocation17 + $0xf4] ss:$8 sps:$4 sm:$0xff]   ;;  %v27605_v7 = vld [vmem:[#allocation17 + $0xf0] ss:$8 sps:$4 sm:$0xff]  }
 0xf9a   : > { %19384 = vmatpush1.bf16.msra.mxu0 %v27539_v15  ;;  %18837 = vmatmul.mubr.bf16.vlgmr.msra.gmra.mrb[4].mxu1 %v30530_v37  ;;  %v27557_v37 = vld [vmem:[#allocation18 + $0x1f0] ss:$8 sps:$4 sm:$0xff]   ;;  %v18863_v15 = vcombine.high %v30569_v0, %v30569_v0 }
 0xf9b   : > { %19385 = vmatprep.subr.bf16.mxu0 %v27544_v16  ;;  %v27610_v16 = vld [vmem:[#allocation17 + $0x104] ss:$8 sps:$4 sm:$0xff]  }
 0xf9e   : > { %19386 = vmatpush1.bf16.msra.mxu0 %v27542_v42  ;;  %v18868_v42 = vpack.c.bf16 %v30558_v17, %v30558_v17  ;;  %v27626_v17 = vld [vmem:[#allocation17 + $0x160] ss:$8 sps:$4 sm:$0xff]  }
 0xf9f   : > { %19387 = vmatprep.subr.bf16.mxu0 %v27547_v55  ;;  %v27608_v55 = vld [vmem:[#allocation17 + $0x100] ss:$8 sps:$4 sm:$0xff]  }
 0xfa2   : > { %19388 = vmatpush1.bf16.msra.mxu0 %v27545_v52  ;;  %v18871_v52 = vpack.c.bf16 %v18863_v15, %v18863_v15 }
 0xfa3   : > { %19389 = vmatprep.subr.bf16.mxu0 %v27550_v4  ;;  %v27613_v4 = vld [vmem:[#allocation17 + $0x114] ss:$8 sps:$4 sm:$0xff]  }
 0xfa6   : > { %19390 = vmatpush1.bf16.msra.mxu0 %v27548_v11  ;;  %v27616_v11 = vld [vmem:[#allocation17 + $0x124] ss:$8 sps:$4 sm:$0xff]  }
 0xfa7   : > { %19391 = vmatprep.subr.bf16.mxu0 %v27553_v1  ;;  %v27614_v1 = vld [vmem:[#allocation17 + $0x120] ss:$8 sps:$4 sm:$0xff]  }
 0xfaa   : > { %19392 = vmatpush1.bf16.msra.mxu0 %v27551_v23  ;;  %v27619_v23 = vld [vmem:[#allocation17 + $0x134] ss:$8 sps:$4 sm:$0xff]  }
 0xfab   : > { %19393 = vmatprep.subr.bf16.mxu0 %v27556_v24  ;;  %v27617_v24 = vld [vmem:[#allocation17 + $0x130] ss:$8 sps:$4 sm:$0xff]  }
 0xfae   : > { %19394 = vmatpush1.bf16.msra.mxu0 %v27554_v25  ;;  %v27622_v25 = vld [vmem:[#allocation17 + $0x144] ss:$8 sps:$4 sm:$0xff]  }
 0xfaf   : > { %19395 = vmatprep.subr.bf16.mxu0 %v27559_v12  ;;  %v27620_v12 = vld [vmem:[#allocation17 + $0x140] ss:$8 sps:$4 sm:$0xff]  }
 0xfb2   : > { %19396 = vmatpush1.bf16.msra.mxu0 %v27557_v37  ;;  %v27625_v37 = vld [vmem:[#allocation17 + $0x154] ss:$8 sps:$4 sm:$0xff]  }
 0xfb3   : > { %19726 = vmatprep.subr.bf16.mxu0 %v27562_v14  ;;  %v27623_v14 = vld [vmem:[#allocation17 + $0x150] ss:$8 sps:$4 sm:$0xff]  }
0x106d   : > { %v18838_v49 = vpop.f32.mrb[4].mxu1 }
0x106e   : > { %v23609_v10 = vadd.f32 %v18838_v49, %v16826_v33  ;;  %v18840_v51 = vpop.f32.mrb[5].mxu1  ;;  %v27631_v33 = vld [vmem:[#allocation17 + $0x174] ss:$8 sps:$4 sm:$0xff]   ;;  %v27634_v49 = vld [vmem:[#allocation17 + $0x184] ss:$8 sps:$4 sm:$0xff]  }
0x106f   : > { %v23610_v20 = vadd.f32 %v18840_v51, %v16830_v19  ;;  %v18842_v59 = vpop.f32.mrb[6].mxu1  ;;  %v27629_v19 = vld [vmem:[#allocation17 + $0x170] ss:$8 sps:$4 sm:$0xff]  }
0x1070   : > { %v18843_v38 = vpop.f32.mrb[7].mxu1  ;;  %v18938_v41 = vpack.c.bf16 %v23609_v10, %v23609_v10  ;;  %v27637_v10 = vld [vmem:[#allocation17 + $0x194] ss:$8 sps:$4 sm:$0xff]   ;;  %v27635_v51 = vld [vmem:[#allocation17 + $0x190] ss:$8 sps:$4 sm:$0xff]  }
0x1071   : > { %v18939_v29 = vpack.c.bf16 %v23610_v20, %v23610_v20  ;;  %v27640_v20 = vld [vmem:[#allocation17 + $0x1a4] ss:$8 sps:$4 sm:$0xff]   ;;  %v27638_v59 = vld [vmem:[#allocation17 + $0x1a0] ss:$8 sps:$4 sm:$0xff]   ;;  %v27643_v38 = vld [vmem:[#allocation17 + $0x1b4] ss:$8 sps:$4 sm:$0xff]  }
0x1073   : > { %19397 = vmatprep.mubr.bf16.mxu0 %v18939_v29  ;;  %v27641_v29 = vld [vmem:[#allocation17 + $0x1b0] ss:$8 sps:$4 sm:$0xff]  }
0x1074   : > { %19398 = vmatmul.mubr.bf16.vlgmr.msra.gmra.mrb[4].mxu0 %v18938_v41  ;;  %v27649_v41 = vld [vmem:[#allocation17 + $0x1d4] ss:$8 sps:$4 sm:$0xff]  }
0x1075   : > { %19727 = vmatpush1.bf16.msra.mxu0 %v27560_v35  ;;  %19758 = vmatprep.mubr.bf16.mxu0 %v18869_v5  ;;  %v27646_v35 = vld [vmem:[#allocation17 + $0x1c4] ss:$8 sps:$4 sm:$0xff]   ;;  %v27644_v5 = vld [vmem:[#allocation17 + $0x1c0] ss:$8 sps:$4 sm:$0xff]  }
0x1076   : > { %19728 = vmatprep.subr.bf16.mxu0 %v27565_v61  ;;  %v27647_v61 = vld [vmem:[#allocation17 + $0x1d0] ss:$8 sps:$4 sm:$0xff]  }
0x1079   : > { %19729 = vmatpush1.bf16.msra.mxu0 %v27563_v60  ;;  %v27652_v60 = vld [vmem:[#allocation17 + $0x1e4] ss:$8 sps:$4 sm:$0xff]  }
0x107a   : > { %19730 = vmatprep.subr.bf16.mxu0 %v27568_v31  ;;  %v27650_v31 = vld [vmem:[#allocation17 + $0x1e0] ss:$8 sps:$4 sm:$0xff]  }
0x107d   : > { %19731 = vmatpush1.bf16.msra.mxu0 %v27566_v6  ;;  %v27655_v6 = vld [vmem:[#allocation17 + $0x1f4] ss:$8 sps:$4 sm:$0xff]  }
0x107e   : > { %19732 = vmatprep.subr.bf16.mxu0 %v27571_v44  ;;  %v27653_v44 = vld [vmem:[#allocation17 + $0x1f0] ss:$8 sps:$4 sm:$0xff]  }
0x1081   : > { %19733 = vmatpush1.bf16.msra.mxu0 %v27569_v45  ;;  %v18870_v45 = vpack.c.bf16 %v30569_v0, %v30569_v0 }
0x1082   : > { %19734 = vmatprep.subr.bf16.mxu0 %v27574_v36  ;;  %v19810_v36 = vld [vmem:[#allocation20] sm:$0x3] }
0x1085   : > { %19735 = vmatpush1.bf16.msra.mxu0 %v27572_v30  ;;  %v19815_v30 = vrot.slane %v19810_v36, %v29370_v9 }
0x1086   : > { %19736 = vmatprep.subr.bf16.mxu0 %v27577_v43 }
0x1089   : > { %19737 = vmatpush1.bf16.msra.mxu0 %v27575_v22  ;;  %v19819_v22 = vrot.slane %v19810_v36, %v29295_v62 }
0x108a   : > { %19738 = vmatprep.subr.bf16.mxu0 %v27580_v40 }
0x108d   : > { %19739 = vmatpush1.bf16.msra.mxu0 %v27578_v26 }
0x108e   : > { %19740 = vmatprep.subr.bf16.mxu0 %v27583_v54 }
0x1091   : > { %19741 = vmatpush1.bf16.msra.mxu0 %v27581_v18 }
0x1092   : > { %19742 = vmatprep.subr.bf16.mxu0 %v27586_v28 }
0x1095   : > { %19743 = vmatpush1.bf16.msra.mxu0 %v27584_v47 }
0x1096   : > { %19744 = vmatprep.subr.bf16.mxu0 %v27589_v48 }
0x1099   : > { %19745 = vmatpush1.bf16.msra.mxu0 %v27587_v27 }
0x109a   : > { %19746 = vmatprep.subr.bf16.mxu0 %v27592_v8 }
0x109d   : > { %19747 = vmatpush1.bf16.msra.mxu0 %v27590_v57 }
0x109e   : > { %19748 = vmatprep.subr.bf16.mxu0 %v27595_v50  ;;  %v23374_v50 = vld [vmem:[#allocation4] ss:$0 sm:$0xff] }
0x10a1   : > { %19749 = vmatpush1.bf16.msra.mxu0 %v27593_v53 }
0x10a2   : > { %19750 = vmatprep.subr.bf16.mxu0 %v27598_v21 }
0x10a5   : > { %19751 = vmatpush1.bf16.msra.mxu0 %v27596_v56 }
0x10a6   : > { %19752 = vmatprep.subr.bf16.mxu0 %v27601_v13 }
0x10a9   : > { %19753 = vmatpush1.bf16.msra.mxu0 %v27599_v58 }
0x10aa   : > { %19754 = vmatprep.subr.bf16.mxu0 %v27604_v63 }
0x10ad   : > { %19755 = vmatpush1.bf16.msra.mxu0 %v27602_v2 }
0x10ae   : > { %19756 = vmatprep.subr.bf16.mxu0 %v27607_v46 }
0x10b1   : > { %19757 = vmatpush1.bf16.msra.mxu0 %v27605_v7 }
0x10b2   : > { %19767 = vmatprep.subr.bf16.mxu0 %v27610_v16 }
0x10b4   : > { %19759 = vmatmul.mubr.bf16.vlgmr.msra.gmra.mrb[4].mxu0 %v18868_v42 }
0x10b5   : > { %19768 = vmatpush1.bf16.msra.mxu0 %v27608_v55  ;;  %19799 = vmatprep.mubr.bf16.mxu0 %v18871_v52 }
0x10b6   : > { %19769 = vmatprep.subr.bf16.mxu0 %v27613_v4 }
0x10b9   : > { %19770 = vmatpush1.bf16.msra.mxu0 %v27611_v34 }
0x10ba   : > { %19771 = vmatprep.subr.bf16.mxu0 %v27616_v11 }
0x10bd   : > { %19772 = vmatpush1.bf16.msra.mxu0 %v27614_v1 }
0x10be   : > { %19773 = vmatprep.subr.bf16.mxu0 %v27619_v23 }
0x10c1   : > { %19774 = vmatpush1.bf16.msra.mxu0 %v27617_v24 }
0x10c2   : > { %19775 = vmatprep.subr.bf16.mxu0 %v27622_v25 }
0x10c5   : > { %19776 = vmatpush1.bf16.msra.mxu0 %v27620_v12 }
0x10c6   : > { %19777 = vmatprep.subr.bf16.mxu0 %v27625_v37 }
0x10c9   : > { %19778 = vmatpush1.bf16.msra.mxu0 %v27623_v14 }
0x10ca   : > { %19779 = vmatprep.subr.bf16.mxu0 %v27628_v39 }
0x10cd   : > { %19780 = vmatpush1.bf16.msra.mxu0 %v27626_v17 }
0x10ce   : > { %19781 = vmatprep.subr.bf16.mxu0 %v27631_v33 }
0x10d1   : > { %19782 = vmatpush1.bf16.msra.mxu0 %v27629_v19 }
0x10d2   : > { %19783 = vmatprep.subr.bf16.mxu0 %v27634_v49 }
0x10d5   : > { %19784 = vmatpush1.bf16.msra.mxu0 %v27632_v3 }
0x10d6   : > { %19785 = vmatprep.subr.bf16.mxu0 %v27637_v10 }
0x10d9   : > { %19786 = vmatpush1.bf16.msra.mxu0 %v27635_v51 }
0x10da   : > { %19787 = vmatprep.subr.bf16.mxu0 %v27640_v20 }
0x10dd   : > { %19788 = vmatpush1.bf16.msra.mxu0 %v27638_v59 }
0x10de   : > { %19789 = vmatprep.subr.bf16.mxu0 %v27643_v38 }
0x10e1   : > { %19790 = vmatpush1.bf16.msra.mxu0 %v27641_v29 }
0x10e2   : > { %19791 = vmatprep.subr.bf16.mxu0 %v27646_v35 }
0x10e5   : > { %19792 = vmatpush1.bf16.msra.mxu0 %v27644_v5 }
0x10e6   : > { %19793 = vmatprep.subr.bf16.mxu0 %v27649_v41 }
0x10e9   : > { %19794 = vmatpush1.bf16.msra.mxu0 %v27647_v61 }
0x10ea   : > { %19795 = vmatprep.subr.bf16.mxu0 %v27652_v60 }
0x10ed   : > { %19796 = vmatpush1.bf16.msra.mxu0 %v27650_v31 }
0x10ee   : > { %19797 = vmatprep.subr.bf16.mxu0 %v27655_v6 }
0x10f1   : > { %19798 = vmatpush1.bf16.msra.mxu0 %v27653_v44 }
0x10f4   : > { %19800 = vmatmul.mubr.bf16.vlgmr.msra.gmra.mrb[4].mxu0 %v18870_v45 }
0x11c7   : > { %v19801_v43 = vpop.f32.mrb[4].mxu0 }
0x11c8   : > { %v19808_v40 = vmax.f32 %v19801_v43, 0.0  ;;  %v19803_v26 = vpop.f32.mrb[5].mxu0 }
0x11c9   : > { %v19809_v54 = vmax.f32 %v19803_v26, 0.0  ;;  %v19805_v18 = vpop.f32.mrb[6].mxu0 }
0x11ca   : > { %v19822_v28 = vmul.f32 %v19815_v30, %v19808_v40  ;;  %v19806_v47 = vpop.f32.mrb[7].mxu0 }
0x11cb   : > { %v19823_v48 = vmul.f32 %v19819_v22, %v19809_v54 }
0x11cc   : > { %v19825_v27 = vsel %vm19824_vm0, %v19822_v28, 0.0 }
0x11cd   : > { %v19826_v8 = vsel %vm19824_vm0, %v19823_v48, 0.0 }
0x11ce   : > { %v19827_v57 = vadd.f32 %v19826_v8, %v19825_v27 }
0x11d0   : > { %19828 = vadd.xlane.f32.xlu0 %v19827_v57 }
0x125d   : > { %v19829_v53 = vpop.xlane.xlu0 %19828 }
0x125e   : > { %v19837_v21 = vadd.f32 %v23374_v50, %v19829_v53 }
0x1260   : > { %19839 = vst.msk [vmem:[%s30649_s13] sm:$0x3] %vm19838_vm1, %v19837_v21 }
0x1261 PF: > { %p26_p3 = scmp.ge.s32.totalorder %s28375_s22, 4   ;;  %s30650_s23 = smov %s28022_s24 }
0x1262   : > { %s30651_s24 = smov %s28026_s25  ;;  %s30652_s25 = smov %s28387_s21 }
0x1263   : > { %s30653_s26 = smov %s28375_s22  ;;  %28 = sbr.rel (!%p26_p3) target bundleno = 12 (0xc), region = 160 }
0x126a   :  { %19851 = vsyncpa [#allocation6], 1 }
0x126b   :  { %19853 = vsyncpa [#allocation6 + $0x1], 1 }
0x126c   :  { %19854 = vsyncpa [#allocation8], 1 }
0x126d   :  { %19855 = vsyncpa [#allocation11], 1 }
0x126e   :  { %19856 = vsyncpa [#allocation16], 1 }
0x126f   :  { %19857 = vsyncpa [#allocation19], 1 }

</bundles_post_ra>
